<compile_context>
chip_gen: v7x
topology: tpu7x:2x2x1
jax: 0.10.0
libtpu: 0.0.40
codegen_flags: <defaults>
</compile_context>

<pallas_src>
import functools
import math

import jax
import jax.numpy as jnp
from jax.experimental import pallas as pl
from jax.experimental.pallas import tpu as pltpu


def _ru(x, m):
    return (x + m - 1) // m * m


def _vmem_limit(block_bytes):
    # Whole-sample blocks: size the scoped VMEM limit from the real footprint
    # (double-buffered) instead of the 16/32 MiB defaults; cap at v7x physical.
    return int(min(64 << 20, max(32 << 20, 2 * block_bytes + (2 << 20))))


def _gelu_exact(x):
    # matches torch.nn.GELU(approximate='none') / F.gelu
    return 0.5 * x * (1.0 + jax.lax.erf(x * (1.0 / math.sqrt(2.0))))


# ----------------------------------------------------------------------------
# Pallas kernel: 3x3 conv (padding=1, bias=False) as 9 shifted matmuls.
# Input and output both live in the zero-padded (H+3)*Wp x C_pad flat layout
# (valid pixels at rows 1..H, cols 1..W).
# ----------------------------------------------------------------------------
def _conv3x3_kernel(x_ref, w_ref, o_ref, xf_ref, *, offsets, l_out, shift):
    """x_ref: (1, l_pad, Cin_p) bf16 zero-padded slab; w_ref: (9, Cin_p, Cout_p)
    bf16 taps; o_ref: (1, l_pad, Cout_p) f32 (same padded layout);
    xf_ref: (l_pad, Cin_p) f32 scratch."""
    # One aligned upcast pass; HBM<->VMEM stays bf16, odd-offset slices stay on
    # the 32-bit path.
    xf_ref[...] = x_ref[0].astype(jnp.float32)
    # Zero the whole output block once: pad rows/cols and the halo become valid
    # zero padding for the next layer; the accumulate below starts from 0.
    o_ref[...] = jnp.zeros(o_ref.shape, o_ref.dtype)
    for t in range(9):
        lhs = xf_ref[pl.ds(offsets[t], l_out), :].astype(jnp.bfloat16)
        o_ref[0, pl.ds(shift, l_out), :] += jnp.dot(
            lhs, w_ref[t], preferred_element_type=jnp.float32)


def conv3x3(x_slab, w, *, H, W, Wp, cout_p):
    """x_slab: (B, l_pad, Cin_p) bf16 padded slab; w: (Cout, Cin, 3, 3) f32.
    Returns (B, l_pad, cout_p) f32 in the same padded layout (valid pixels at
    rows 1..H / cols 1..W; pad rows/cols zero; wrap cols hold garbage that the
    following GroupNorm masks out)."""
    B, l_pad, Cin_p = x_slab.shape
    Cout, Cin = w.shape[0], w.shape[1]
    assert l_pad == (H + 3) * Wp
    l_out = H * Wp
    shift = Wp + 1                       # multiple of 8 by construction of Wp

    w_taps = jnp.transpose(w, (2, 3, 1, 0))                    # (3,3,Cin,Cout)
    w_taps = jnp.pad(w_taps, ((0, 0), (0, 0),
                              (0, Cin_p - Cin), (0, cout_p - Cout)))
    w_taps = w_taps.reshape(9, Cin_p, cout_p).astype(jnp.bfloat16)

    offsets = tuple(di * Wp + dj for di in range(3) for dj in range(3))

    blk = (l_pad * Cin_p * 2 + 9 * Cin_p * cout_p * 2
           + l_pad * cout_p * 4 + l_pad * Cin_p * 4)
    return pl.pallas_call(
        functools.partial(_conv3x3_kernel, offsets=offsets, l_out=l_out,
                          shift=shift),
        out_shape=jax.ShapeDtypeStruct((B, l_pad, cout_p), jnp.float32),
        grid=(B,),
        in_specs=[
            pl.BlockSpec((1, l_pad, Cin_p), lambda b: (b, 0, 0)),
            pl.BlockSpec((9, Cin_p, cout_p), lambda b: (0, 0, 0)),
        ],
        out_specs=pl.BlockSpec((1, l_pad, cout_p), lambda b: (b, 0, 0)),
        scratch_shapes=[pltpu.VMEM((l_pad, Cin_p), jnp.float32)],
        compiler_params=pltpu.CompilerParams(
            dimension_semantics=("parallel",),
            vmem_limit_bytes=_vmem_limit(blk)),
    )(x_slab, w_taps)


# ----------------------------------------------------------------------------
# Pallas kernel: GroupNorm(num_groups=1) on the padded layout, with masked
# statistics and fused GELU / skip-add + GELU.  Output has all pad/wrap
# positions zeroed, so it is directly the next conv's input slab.
# ----------------------------------------------------------------------------
def _gn_kernel(x_ref, g_ref, b_ref, *rest, H, W, c_real, n_valid, eps,
               act_gelu, has_skip):
    o_ref = rest[-1]
    x = x_ref[0]                                     # (H+3, Wp, Cp) f32
    Hp, Wp, Cp = x.shape
    row = jax.lax.broadcasted_iota(jnp.int32, (Hp, 1, 1), 0)
    col = jax.lax.broadcasted_iota(jnp.int32, (1, Wp, 1), 1)
    chan = jax.lax.broadcasted_iota(jnp.int32, (1, 1, Cp), 2)
    valid = ((row >= 1) & (row <= H) & (col >= 1) & (col <= W)
             & (chan < c_real))                      # (Hp, Wp, Cp)

    inv_n = 1.0 / n_valid
    mean = jnp.sum(jnp.where(valid, x, 0.0)) * inv_n
    var = jnp.sum(jnp.where(valid, jnp.square(x - mean), 0.0)) * inv_n
    y = (x - mean) * jax.lax.rsqrt(var + eps)
    y = y * g_ref[...] + b_ref[...]                  # per-channel affine
    if has_skip:
        y = _gelu_exact(rest[0][0] + y)              # fused residual + GELU
    elif act_gelu:
        y = _gelu_exact(y)
    # Zero all pad / wrap / padded-channel positions -> valid zero padding for
    # the next conv's slab.
    o_ref[0] = jnp.where(valid, y, 0.0).astype(o_ref.dtype)


def groupnorm1(x4, gamma, beta, *, H, W, c_real, act_gelu=False, skip=None,
               out_dtype=jnp.float32, eps=1e-5):
    """x4: (B, H+3, Wp, Cp) f32 padded layout.  Stats over the H*W*c_real valid
    elements per sample; optional fused GELU or skip-add + GELU."""
    B, Hp, Wp, Cp = x4.shape
    g = jnp.pad(gamma.astype(jnp.float32), (0, Cp - gamma.shape[0])).reshape(1, Cp)
    b = jnp.pad(beta.astype(jnp.float32), (0, Cp - beta.shape[0])).reshape(1, Cp)
    has_skip = skip is not None

    in_specs = [
        pl.BlockSpec((1, Hp, Wp, Cp), lambda i: (i, 0, 0, 0)),
        pl.BlockSpec((1, Cp), lambda i: (0, 0)),
        pl.BlockSpec((1, Cp), lambda i: (0, 0)),
    ]
    args = [x4, g, b]
    if has_skip:
        in_specs.append(pl.BlockSpec((1, Hp, Wp, Cp), lambda i: (i, 0, 0, 0)))
        args.append(skip)

    blk = Hp * Wp * Cp * (4 * (2 if has_skip else 1)
                          + jnp.dtype(out_dtype).itemsize)
    return pl.pallas_call(
        functools.partial(_gn_kernel, H=H, W=W, c_real=c_real,
                          n_valid=float(H * W * c_real), eps=eps,
                          act_gelu=act_gelu, has_skip=has_skip),
        out_shape=jax.ShapeDtypeStruct((B, Hp, Wp, Cp), out_dtype),
        grid=(B,),
        in_specs=in_specs,
        out_specs=pl.BlockSpec((1, Hp, Wp, Cp), lambda i: (i, 0, 0, 0)),
        compiler_params=pltpu.CompilerParams(
            dimension_semantics=("parallel",),
            vmem_limit_bytes=_vmem_limit(blk)),
    )(*args)


# ----------------------------------------------------------------------------
# DoubleConv forward (matches the PyTorch module)
# ----------------------------------------------------------------------------
def double_conv(x, p, skip_con=False):
    """x: (B, Cin, H, W) NCHW.  Conv3x3 -> GN(1) -> GELU -> Conv3x3 -> GN(1),
    optionally F.gelu(x + out) when skip_con."""
    B, Cin, H, W = x.shape
    mid = p['w1'].shape[0]
    out_ch = p['w2'].shape[0]

    Wp = _ru(W + 3, 8) - 1          # >= W+2 and (Wp+1) % 8 == 0 (aligned shift)
    Hp = H + 3                      # 1 top pad row + 2 bottom (halo) rows
    Cin_p = _ru(Cin, 16)            # bf16 contraction packing
    Cmid_p = _ru(mid, 128)          # lane-dense stores / MXU N dim
    Cout_p = _ru(out_ch, 128)
    l_pad = Hp * Wp

    x_nhwc = jnp.transpose(x, (0, 2, 3, 1))
    pad_sp = ((0, 0), (1, 2), (1, Wp - 1 - W))

    # conv1 input slab: padded layout, bf16 (halved HBM traffic)
    x_slab = jnp.pad(x_nhwc, pad_sp + ((0, Cin_p - Cin),)).astype(jnp.bfloat16)

    h = conv3x3(x_slab.reshape(B, l_pad, Cin_p), p['w1'],
                H=H, W=W, Wp=Wp, cout_p=Cmid_p)                # (B,l_pad,Cmid_p)
    h = groupnorm1(h.reshape(B, Hp, Wp, Cmid_p), p['g1'], p['b1'],
                   H=H, W=W, c_real=mid, act_gelu=True,
                   out_dtype=jnp.bfloat16)                     # conv2 slab

    h2 = conv3x3(h.reshape(B, l_pad, Cmid_p), p['w2'],
                 H=H, W=W, Wp=Wp, cout_p=Cout_p)               # (B,l_pad,Cout_p)

    skip4 = None
    if skip_con:
        assert Cin == out_ch, "skip_con requires in_ch == out_ch"
        skip4 = jnp.pad(x_nhwc, pad_sp + ((0, Cout_p - Cin),))  # f32, same layout
    y = groupnorm1(h2.reshape(B, Hp, Wp, Cout_p), p['g2'], p['b2'],
                   H=H, W=W, c_real=out_ch, act_gelu=False, skip=skip4,
                   out_dtype=jnp.float32)

    # single strip of spatial/channel padding at module exit
    y = y[:, 1:H + 1, 1:W + 1, :out_ch]
    return jnp.transpose(y, (0, 3, 1, 2))


def init_double_conv(key, in_ch, out_ch, mid_chs=None):
    # TODO(synk): the PyTorch source tests `if mid_chs == False`, which never
    # fires for the default None (construction bug); using the intended
    # mid_chs = out_ch.
    mid = out_ch if mid_chs is None else mid_chs
    k1, k2 = jax.random.split(key)
    s1 = 1.0 / math.sqrt(in_ch * 9)
    s2 = 1.0 / math.sqrt(mid * 9)
    return dict(
        w1=jax.random.uniform(k1, (mid, in_ch, 3, 3), jnp.float32, -s1, s1),
        g1=jnp.ones((mid,), jnp.float32),
        b1=jnp.zeros((mid,), jnp.float32),
        w2=jax.random.uniform(k2, (out_ch, mid, 3, 3), jnp.float32, -s2, s2),
        g2=jnp.ones((out_ch,), jnp.float32),
        b2=jnp.zeros((out_ch,), jnp.float32),
    )


# ----------------------------------------------------------------------------
# pure-JAX reference (numerical sanity check)
# ----------------------------------------------------------------------------
def _ref_double_conv(x, p, skip_con=False):
    def conv(z, w):
        return jax.lax.conv_general_dilated(
            z, w, window_strides=(1, 1), padding=((1, 1), (1, 1)),
            dimension_numbers=("NCHW", "OIHW", "NCHW"),
            precision=jax.lax.Precision.HIGHEST)

    def gn(z, g, b):
        mean = z.mean(axis=(1, 2, 3), keepdims=True)
        var = jnp.square(z - mean).mean(axis=(1, 2, 3), keepdims=True)
        zn = (z - mean) * jax.lax.rsqrt(var + 1e-5)
        return zn * g[None, :, None, None] + b[None, :, None, None]

    h = _gelu_exact(gn(conv(x, p['w1']), p['g1'], p['b1']))
    h = gn(conv(h, p['w2']), p['g2'], p['b2'])
    return _gelu_exact(x + h) if skip_con else h


# ----------------------------------------------------------------------------
if __name__ == "__main__":
    key = jax.random.PRNGKey(0)
    kp1, kp2, kx = jax.random.split(key, 3)

    B, Cin, H, W = 2, 4, 16, 16
    Cout = 8
    x = jax.random.normal(kx, (B, Cin, H, W), jnp.float32)
    p_plain = init_double_conv(kp1, Cin, Cout)        # DoubleConv(4, 8)
    p_skip = init_double_conv(kp2, Cout, Cout)        # DoubleConv(8, 8, skip_con=True)

    @jax.jit
    def fwd(x, p_plain, p_skip):
        y = double_conv(x, p_plain, skip_con=False)
        return double_conv(y, p_skip, skip_con=True)

    out = jax.block_until_ready(fwd(x, p_plain, p_skip))
    assert out.shape == (B, Cout, H, W), out.shape
    assert bool(jnp.isfinite(out).all())

    # sanity check vs reference (bf16 MXU operands / activations -> loose tol)
    ref = _ref_double_conv(_ref_double_conv(x, p_plain, False), p_skip, True)
    max_err = float(jnp.max(jnp.abs(out - ref)))
    assert max_err < 2e-1, max_err

    print("KERNEL_OK")
</pallas_src>

<mosaic_0001>
module attributes {stable_mosaic.version = 11 : i64} {
  func.func @_conv3x3_kernel(%arg0: i32, %arg1: memref<1x437x16xbf16, #tpu.memory_space<vmem>>, %arg2: memref<9x16x128xbf16, #tpu.memory_space<vmem>>, %arg3: memref<1x437x128xf32, #tpu.memory_space<vmem>>, %arg4: memref<437x16xf32, #tpu.memory_space<vmem>>) attributes {dimension_semantics = [#tpu.dimension_semantics<parallel>], iteration_bounds = array<i64: 2>, scalar_prefetch = 0 : i64, scratch_operands = 1 : i64, tpu.core_type = #tpu.core_type<tc>, window_params = [{transform_indices = @transform_0, window_bounds = array<i64: 1, 437, 16>}, {pipeline_mode = #tpu.pipeline_mode<synchronous>, transform_indices = @transform_1, window_bounds = array<i64: 9, 16, 128>}, {transform_indices = @transform_2, window_bounds = array<i64: 1, 437, 128>}]} {
    %c0 = arith.constant 0 : index
    %c0_0 = arith.constant 0 : index
    %c0_1 = arith.constant 0 : index
    %0 = vector.load %arg1[%c0, %c0_0, %c0_1] : memref<1x437x16xbf16, #tpu.memory_space<vmem>>, vector<1x437x16xbf16>
    %1 = vector.shape_cast %0 : vector<1x437x16xbf16> to vector<437x16xbf16>
    %2 = arith.extf %1 : vector<437x16xbf16> to vector<437x16xf32>
    %c0_2 = arith.constant 0 : index
    %c0_3 = arith.constant 0 : index
    %3 = vector.load %arg4[%c0_2, %c0_3] : memref<437x16xf32, #tpu.memory_space<vmem>>, vector<437x16xf32>
    tpu.vector_store %arg4[%c0_2, %c0_3], %2 {strides = array<i32>} : memref<437x16xf32, #tpu.memory_space<vmem>>, vector<437x16xf32>,
    %cst = arith.constant 0.000000e+00 : f32
    %4 = vector.broadcast %cst : f32 to vector<1x437x128xf32>
    %c0_4 = arith.constant 0 : index
    %c0_5 = arith.constant 0 : index
    %c0_6 = arith.constant 0 : index
    %5 = vector.load %arg3[%c0_4, %c0_5, %c0_6] : memref<1x437x128xf32, #tpu.memory_space<vmem>>, vector<1x437x128xf32>
    tpu.vector_store %arg3[%c0_4, %c0_5, %c0_6], %4 {strides = array<i32>} : memref<1x437x128xf32, #tpu.memory_space<vmem>>, vector<1x437x128xf32>,
    %c0_7 = arith.constant 0 : index
    %c0_8 = arith.constant 0 : index
    %6 = vector.load %arg4[%c0_7, %c0_8] : memref<437x16xf32, #tpu.memory_space<vmem>>, vector<368x16xf32>
    %7 = arith.truncf %6 : vector<368x16xf32> to vector<368x16xbf16>
    %c0_9 = arith.constant 0 : index
    %c24 = arith.constant 24 : index
    %c0_10 = arith.constant 0 : index
    %8 = vector.load %arg3[%c0_9, %c24, %c0_10] : memref<1x437x128xf32, #tpu.memory_space<vmem>>, vector<1x368x128xf32>
    %9 = vector.shape_cast %8 : vector<1x368x128xf32> to vector<368x128xf32>
    %c0_11 = arith.constant 0 : index
    %c0_12 = arith.constant 0 : index
    %c0_13 = arith.constant 0 : index
    %10 = vector.load %arg2[%c0_11, %c0_12, %c0_13] : memref<9x16x128xbf16, #tpu.memory_space<vmem>>, vector<1x16x128xbf16>
    %11 = vector.shape_cast %10 : vector<1x16x128xbf16> to vector<16x128xbf16>
    %cst_14 = arith.constant dense<0.000000e+00> : vector<368x128xf32>
    %12 = tpu.matmul %7, %11, %cst_14 {dimension_numbers = #tpu.dot_dimension_numbers<[1], [0], [0], [1], [0, 0, 1, 1], [], []>} : vector<368x16xbf16>, vector<16x128xbf16>, vector<368x128xf32> -> vector<368x128xf32>
    %13 = arith.addf %9, %12 : vector<368x128xf32>
    %c0_15 = arith.constant 0 : index
    %c24_16 = arith.constant 24 : index
    %c0_17 = arith.constant 0 : index
    %14 = vector.load %arg3[%c0_15, %c24_16, %c0_17] : memref<1x437x128xf32, #tpu.memory_space<vmem>>, vector<1x368x128xf32>
    %15 = vector.shape_cast %14 : vector<1x368x128xf32> to vector<368x128xf32>
    %16 = vector.shape_cast %13 : vector<368x128xf32> to vector<1x368x128xf32>
    tpu.vector_store %arg3[%c0_15, %c24_16, %c0_17], %16 {strides = array<i32>} : memref<1x437x128xf32, #tpu.memory_space<vmem>>, vector<1x368x128xf32>,
    %c1 = arith.constant 1 : index
    %c0_18 = arith.constant 0 : index
    %17 = vector.load %arg4[%c1, %c0_18] : memref<437x16xf32, #tpu.memory_space<vmem>>, vector<368x16xf32>
    %18 = arith.truncf %17 : vector<368x16xf32> to vector<368x16xbf16>
    %c0_19 = arith.constant 0 : index
    %c24_20 = arith.constant 24 : index
    %c0_21 = arith.constant 0 : index
    %19 = vector.load %arg3[%c0_19, %c24_20, %c0_21] : memref<1x437x128xf32, #tpu.memory_space<vmem>>, vector<1x368x128xf32>
    %20 = vector.shape_cast %19 : vector<1x368x128xf32> to vector<368x128xf32>
    %c1_22 = arith.constant 1 : index
    %c0_23 = arith.constant 0 : index
    %c0_24 = arith.constant 0 : index
    %21 = vector.load %arg2[%c1_22, %c0_23, %c0_24] : memref<9x16x128xbf16, #tpu.memory_space<vmem>>, vector<1x16x128xbf16>
    %22 = vector.shape_cast %21 : vector<1x16x128xbf16> to vector<16x128xbf16>
    %cst_25 = arith.constant dense<0.000000e+00> : vector<368x128xf32>
    %23 = tpu.matmul %18, %22, %cst_25 {dimension_numbers = #tpu.dot_dimension_numbers<[1], [0], [0], [1], [0, 0, 1, 1], [], []>} : vector<368x16xbf16>, vector<16x128xbf16>, vector<368x128xf32> -> vector<368x128xf32>
    %24 = arith.addf %20, %23 : vector<368x128xf32>
    %c0_26 = arith.constant 0 : index
    %c24_27 = arith.constant 24 : index
    %c0_28 = arith.constant 0 : index
    %25 = vector.load %arg3[%c0_26, %c24_27, %c0_28] : memref<1x437x128xf32, #tpu.memory_space<vmem>>, vector<1x368x128xf32>
    %26 = vector.shape_cast %25 : vector<1x368x128xf32> to vector<368x128xf32>
    %27 = vector.shape_cast %24 : vector<368x128xf32> to vector<1x368x128xf32>
    tpu.vector_store %arg3[%c0_26, %c24_27, %c0_28], %27 {strides = array<i32>} : memref<1x437x128xf32, #tpu.memory_space<vmem>>, vector<1x368x128xf32>,
    %c2 = arith.constant 2 : index
    %c0_29 = arith.constant 0 : index
    %28 = vector.load %arg4[%c2, %c0_29] : memref<437x16xf32, #tpu.memory_space<vmem>>, vector<368x16xf32>
    %29 = arith.truncf %28 : vector<368x16xf32> to vector<368x16xbf16>
    %c0_30 = arith.constant 0 : index
    %c24_31 = arith.constant 24 : index
    %c0_32 = arith.constant 0 : index
    %30 = vector.load %arg3[%c0_30, %c24_31, %c0_32] : memref<1x437x128xf32, #tpu.memory_space<vmem>>, vector<1x368x128xf32>
    %31 = vector.shape_cast %30 : vector<1x368x128xf32> to vector<368x128xf32>
    %c2_33 = arith.constant 2 : index
    %c0_34 = arith.constant 0 : index
    %c0_35 = arith.constant 0 : index
    %32 = vector.load %arg2[%c2_33, %c0_34, %c0_35] : memref<9x16x128xbf16, #tpu.memory_space<vmem>>, vector<1x16x128xbf16>
    %33 = vector.shape_cast %32 : vector<1x16x128xbf16> to vector<16x128xbf16>
    %cst_36 = arith.constant dense<0.000000e+00> : vector<368x128xf32>
    %34 = tpu.matmul %29, %33, %cst_36 {dimension_numbers = #tpu.dot_dimension_numbers<[1], [0], [0], [1], [0, 0, 1, 1], [], []>} : vector<368x16xbf16>, vector<16x128xbf16>, vector<368x128xf32> -> vector<368x128xf32>
    %35 = arith.addf %31, %34 : vector<368x128xf32>
    %c0_37 = arith.constant 0 : index
    %c24_38 = arith.constant 24 : index
    %c0_39 = arith.constant 0 : index
    %36 = vector.load %arg3[%c0_37, %c24_38, %c0_39] : memref<1x437x128xf32, #tpu.memory_space<vmem>>, vector<1x368x128xf32>
    %37 = vector.shape_cast %36 : vector<1x368x128xf32> to vector<368x128xf32>
    %38 = vector.shape_cast %35 : vector<368x128xf32> to vector<1x368x128xf32>
    tpu.vector_store %arg3[%c0_37, %c24_38, %c0_39], %38 {strides = array<i32>} : memref<1x437x128xf32, #tpu.memory_space<vmem>>, vector<1x368x128xf32>,
    %c23 = arith.constant 23 : index
    %c0_40 = arith.constant 0 : index
    %39 = vector.load %arg4[%c23, %c0_40] : memref<437x16xf32, #tpu.memory_space<vmem>>, vector<368x16xf32>
    %40 = arith.truncf %39 : vector<368x16xf32> to vector<368x16xbf16>
    %c0_41 = arith.constant 0 : index
    %c24_42 = arith.constant 24 : index
    %c0_43 = arith.constant 0 : index
    %41 = vector.load %arg3[%c0_41, %c24_42, %c0_43] : memref<1x437x128xf32, #tpu.memory_space<vmem>>, vector<1x368x128xf32>
    %42 = vector.shape_cast %41 : vector<1x368x128xf32> to vector<368x128xf32>
    %c3 = arith.constant 3 : index
    %c0_44 = arith.constant 0 : index
    %c0_45 = arith.constant 0 : index
    %43 = vector.load %arg2[%c3, %c0_44, %c0_45] : memref<9x16x128xbf16, #tpu.memory_space<vmem>>, vector<1x16x128xbf16>
    %44 = vector.shape_cast %43 : vector<1x16x128xbf16> to vector<16x128xbf16>
    %cst_46 = arith.constant dense<0.000000e+00> : vector<368x128xf32>
    %45 = tpu.matmul %40, %44, %cst_46 {dimension_numbers = #tpu.dot_dimension_numbers<[1], [0], [0], [1], [0, 0, 1, 1], [], []>} : vector<368x16xbf16>, vector<16x128xbf16>, vector<368x128xf32> -> vector<368x128xf32>
    %46 = arith.addf %42, %45 : vector<368x128xf32>
    %c0_47 = arith.constant 0 : index
    %c24_48 = arith.constant 24 : index
    %c0_49 = arith.constant 0 : index
    %47 = vector.load %arg3[%c0_47, %c24_48, %c0_49] : memref<1x437x128xf32, #tpu.memory_space<vmem>>, vector<1x368x128xf32>
    %48 = vector.shape_cast %47 : vector<1x368x128xf32> to vector<368x128xf32>
    %49 = vector.shape_cast %46 : vector<368x128xf32> to vector<1x368x128xf32>
    tpu.vector_store %arg3[%c0_47, %c24_48, %c0_49], %49 {strides = array<i32>} : memref<1x437x128xf32, #tpu.memory_space<vmem>>, vector<1x368x128xf32>,
    %c24_50 = arith.constant 24 : index
    %c0_51 = arith.constant 0 : index
    %50 = vector.load %arg4[%c24_50, %c0_51] : memref<437x16xf32, #tpu.memory_space<vmem>>, vector<368x16xf32>
    %51 = arith.truncf %50 : vector<368x16xf32> to vector<368x16xbf16>
    %c0_52 = arith.constant 0 : index
    %c24_53 = arith.constant 24 : index
    %c0_54 = arith.constant 0 : index
    %52 = vector.load %arg3[%c0_52, %c24_53, %c0_54] : memref<1x437x128xf32, #tpu.memory_space<vmem>>, vector<1x368x128xf32>
    %53 = vector.shape_cast %52 : vector<1x368x128xf32> to vector<368x128xf32>
    %c4 = arith.constant 4 : index
    %c0_55 = arith.constant 0 : index
    %c0_56 = arith.constant 0 : index
    %54 = vector.load %arg2[%c4, %c0_55, %c0_56] : memref<9x16x128xbf16, #tpu.memory_space<vmem>>, vector<1x16x128xbf16>
    %55 = vector.shape_cast %54 : vector<1x16x128xbf16> to vector<16x128xbf16>
    %cst_57 = arith.constant dense<0.000000e+00> : vector<368x128xf32>
    %56 = tpu.matmul %51, %55, %cst_57 {dimension_numbers = #tpu.dot_dimension_numbers<[1], [0], [0], [1], [0, 0, 1, 1], [], []>} : vector<368x16xbf16>, vector<16x128xbf16>, vector<368x128xf32> -> vector<368x128xf32>
    %57 = arith.addf %53, %56 : vector<368x128xf32>
    %c0_58 = arith.constant 0 : index
    %c24_59 = arith.constant 24 : index
    %c0_60 = arith.constant 0 : index
    %58 = vector.load %arg3[%c0_58, %c24_59, %c0_60] : memref<1x437x128xf32, #tpu.memory_space<vmem>>, vector<1x368x128xf32>
    %59 = vector.shape_cast %58 : vector<1x368x128xf32> to vector<368x128xf32>
    %60 = vector.shape_cast %57 : vector<368x128xf32> to vector<1x368x128xf32>
    tpu.vector_store %arg3[%c0_58, %c24_59, %c0_60], %60 {strides = array<i32>} : memref<1x437x128xf32, #tpu.memory_space<vmem>>, vector<1x368x128xf32>,
    %c25 = arith.constant 25 : index
    %c0_61 = arith.constant 0 : index
    %61 = vector.load %arg4[%c25, %c0_61] : memref<437x16xf32, #tpu.memory_space<vmem>>, vector<368x16xf32>
    %62 = arith.truncf %61 : vector<368x16xf32> to vector<368x16xbf16>
    %c0_62 = arith.constant 0 : index
    %c24_63 = arith.constant 24 : index
    %c0_64 = arith.constant 0 : index
    %63 = vector.load %arg3[%c0_62, %c24_63, %c0_64] : memref<1x437x128xf32, #tpu.memory_space<vmem>>, vector<1x368x128xf32>
    %64 = vector.shape_cast %63 : vector<1x368x128xf32> to vector<368x128xf32>
    %c5 = arith.constant 5 : index
    %c0_65 = arith.constant 0 : index
    %c0_66 = arith.constant 0 : index
    %65 = vector.load %arg2[%c5, %c0_65, %c0_66] : memref<9x16x128xbf16, #tpu.memory_space<vmem>>, vector<1x16x128xbf16>
    %66 = vector.shape_cast %65 : vector<1x16x128xbf16> to vector<16x128xbf16>
    %cst_67 = arith.constant dense<0.000000e+00> : vector<368x128xf32>
    %67 = tpu.matmul %62, %66, %cst_67 {dimension_numbers = #tpu.dot_dimension_numbers<[1], [0], [0], [1], [0, 0, 1, 1], [], []>} : vector<368x16xbf16>, vector<16x128xbf16>, vector<368x128xf32> -> vector<368x128xf32>
    %68 = arith.addf %64, %67 : vector<368x128xf32>
    %c0_68 = arith.constant 0 : index
    %c24_69 = arith.constant 24 : index
    %c0_70 = arith.constant 0 : index
    %69 = vector.load %arg3[%c0_68, %c24_69, %c0_70] : memref<1x437x128xf32, #tpu.memory_space<vmem>>, vector<1x368x128xf32>
    %70 = vector.shape_cast %69 : vector<1x368x128xf32> to vector<368x128xf32>
    %71 = vector.shape_cast %68 : vector<368x128xf32> to vector<1x368x128xf32>
    tpu.vector_store %arg3[%c0_68, %c24_69, %c0_70], %71 {strides = array<i32>} : memref<1x437x128xf32, #tpu.memory_space<vmem>>, vector<1x368x128xf32>,
    %c46 = arith.constant 46 : index
    %c0_71 = arith.constant 0 : index
    %72 = vector.load %arg4[%c46, %c0_71] : memref<437x16xf32, #tpu.memory_space<vmem>>, vector<368x16xf32>
    %73 = arith.truncf %72 : vector<368x16xf32> to vector<368x16xbf16>
    %c0_72 = arith.constant 0 : index
    %c24_73 = arith.constant 24 : index
    %c0_74 = arith.constant 0 : index
    %74 = vector.load %arg3[%c0_72, %c24_73, %c0_74] : memref<1x437x128xf32, #tpu.memory_space<vmem>>, vector<1x368x128xf32>
    %75 = vector.shape_cast %74 : vector<1x368x128xf32> to vector<368x128xf32>
    %c6 = arith.constant 6 : index
    %c0_75 = arith.constant 0 : index
    %c0_76 = arith.constant 0 : index
    %76 = vector.load %arg2[%c6, %c0_75, %c0_76] : memref<9x16x128xbf16, #tpu.memory_space<vmem>>, vector<1x16x128xbf16>
    %77 = vector.shape_cast %76 : vector<1x16x128xbf16> to vector<16x128xbf16>
    %cst_77 = arith.constant dense<0.000000e+00> : vector<368x128xf32>
    %78 = tpu.matmul %73, %77, %cst_77 {dimension_numbers = #tpu.dot_dimension_numbers<[1], [0], [0], [1], [0, 0, 1, 1], [], []>} : vector<368x16xbf16>, vector<16x128xbf16>, vector<368x128xf32> -> vector<368x128xf32>
    %79 = arith.addf %75, %78 : vector<368x128xf32>
    %c0_78 = arith.constant 0 : index
    %c24_79 = arith.constant 24 : index
    %c0_80 = arith.constant 0 : index
    %80 = vector.load %arg3[%c0_78, %c24_79, %c0_80] : memref<1x437x128xf32, #tpu.memory_space<vmem>>, vector<1x368x128xf32>
    %81 = vector.shape_cast %80 : vector<1x368x128xf32> to vector<368x128xf32>
    %82 = vector.shape_cast %79 : vector<368x128xf32> to vector<1x368x128xf32>
    tpu.vector_store %arg3[%c0_78, %c24_79, %c0_80], %82 {strides = array<i32>} : memref<1x437x128xf32, #tpu.memory_space<vmem>>, vector<1x368x128xf32>,
    %c47 = arith.constant 47 : index
    %c0_81 = arith.constant 0 : index
    %83 = vector.load %arg4[%c47, %c0_81] : memref<437x16xf32, #tpu.memory_space<vmem>>, vector<368x16xf32>
    %84 = arith.truncf %83 : vector<368x16xf32> to vector<368x16xbf16>
    %c0_82 = arith.constant 0 : index
    %c24_83 = arith.constant 24 : index
    %c0_84 = arith.constant 0 : index
    %85 = vector.load %arg3[%c0_82, %c24_83, %c0_84] : memref<1x437x128xf32, #tpu.memory_space<vmem>>, vector<1x368x128xf32>
    %86 = vector.shape_cast %85 : vector<1x368x128xf32> to vector<368x128xf32>
    %c7 = arith.constant 7 : index
    %c0_85 = arith.constant 0 : index
    %c0_86 = arith.constant 0 : index
    %87 = vector.load %arg2[%c7, %c0_85, %c0_86] : memref<9x16x128xbf16, #tpu.memory_space<vmem>>, vector<1x16x128xbf16>
    %88 = vector.shape_cast %87 : vector<1x16x128xbf16> to vector<16x128xbf16>
    %cst_87 = arith.constant dense<0.000000e+00> : vector<368x128xf32>
    %89 = tpu.matmul %84, %88, %cst_87 {dimension_numbers = #tpu.dot_dimension_numbers<[1], [0], [0], [1], [0, 0, 1, 1], [], []>} : vector<368x16xbf16>, vector<16x128xbf16>, vector<368x128xf32> -> vector<368x128xf32>
    %90 = arith.addf %86, %89 : vector<368x128xf32>
    %c0_88 = arith.constant 0 : index
    %c24_89 = arith.constant 24 : index
    %c0_90 = arith.constant 0 : index
    %91 = vector.load %arg3[%c0_88, %c24_89, %c0_90] : memref<1x437x128xf32, #tpu.memory_space<vmem>>, vector<1x368x128xf32>
    %92 = vector.shape_cast %91 : vector<1x368x128xf32> to vector<368x128xf32>
    %93 = vector.shape_cast %90 : vector<368x128xf32> to vector<1x368x128xf32>
    tpu.vector_store %arg3[%c0_88, %c24_89, %c0_90], %93 {strides = array<i32>} : memref<1x437x128xf32, #tpu.memory_space<vmem>>, vector<1x368x128xf32>,
    %c48 = arith.constant 48 : index
    %c0_91 = arith.constant 0 : index
    %94 = vector.load %arg4[%c48, %c0_91] : memref<437x16xf32, #tpu.memory_space<vmem>>, vector<368x16xf32>
    %95 = arith.truncf %94 : vector<368x16xf32> to vector<368x16xbf16>
    %c0_92 = arith.constant 0 : index
    %c24_93 = arith.constant 24 : index
    %c0_94 = arith.constant 0 : index
    %96 = vector.load %arg3[%c0_92, %c24_93, %c0_94] : memref<1x437x128xf32, #tpu.memory_space<vmem>>, vector<1x368x128xf32>
    %97 = vector.shape_cast %96 : vector<1x368x128xf32> to vector<368x128xf32>
    %c8 = arith.constant 8 : index
    %c0_95 = arith.constant 0 : index
    %c0_96 = arith.constant 0 : index
    %98 = vector.load %arg2[%c8, %c0_95, %c0_96] : memref<9x16x128xbf16, #tpu.memory_space<vmem>>, vector<1x16x128xbf16>
    %99 = vector.shape_cast %98 : vector<1x16x128xbf16> to vector<16x128xbf16>
    %cst_97 = arith.constant dense<0.000000e+00> : vector<368x128xf32>
    %100 = tpu.matmul %95, %99, %cst_97 {dimension_numbers = #tpu.dot_dimension_numbers<[1], [0], [0], [1], [0, 0, 1, 1], [], []>} : vector<368x16xbf16>, vector<16x128xbf16>, vector<368x128xf32> -> vector<368x128xf32>
    %101 = arith.addf %97, %100 : vector<368x128xf32>
    %c0_98 = arith.constant 0 : index
    %c24_99 = arith.constant 24 : index
    %c0_100 = arith.constant 0 : index
    %102 = vector.load %arg3[%c0_98, %c24_99, %c0_100] : memref<1x437x128xf32, #tpu.memory_space<vmem>>, vector<1x368x128xf32>
    %103 = vector.shape_cast %102 : vector<1x368x128xf32> to vector<368x128xf32>
    %104 = vector.shape_cast %101 : vector<368x128xf32> to vector<1x368x128xf32>
    tpu.vector_store %arg3[%c0_98, %c24_99, %c0_100], %104 {strides = array<i32>} : memref<1x437x128xf32, #tpu.memory_space<vmem>>, vector<1x368x128xf32>,
    return
  }
  func.func @transform_0(%arg0: i32) -> (i32, i32, i32) {
    %c0_i32 = arith.constant 0 : i32
    %c0_i32_0 = arith.constant 0 : i32
    %c0_i32_1 = arith.constant 0 : i32
    return %arg0, %c0_i32, %c0_i32_0 : i32, i32, i32
  }
  func.func @transform_1(%arg0: i32) -> (i32, i32, i32) {
    %c0_i32 = arith.constant 0 : i32
    %c0_i32_0 = arith.constant 0 : i32
    %c0_i32_1 = arith.constant 0 : i32
    %c0_i32_2 = arith.constant 0 : i32
    return %c0_i32, %c0_i32_0, %c0_i32_1 : i32, i32, i32
  }
  func.func @transform_2(%arg0: i32) -> (i32, i32, i32) {
    %c0_i32 = arith.constant 0 : i32
    %c0_i32_0 = arith.constant 0 : i32
    %c0_i32_1 = arith.constant 0 : i32
    return %arg0, %c0_i32, %c0_i32_0 : i32, i32, i32
  }
}

module attributes {stable_mosaic.version = 11 : i64} {
  func.func @_gn_kernel(%arg0: i32, %arg1: memref<1x19x23x128xf32, #tpu.memory_space<vmem>>, %arg2: memref<1x128xf32, #tpu.memory_space<vmem>>, %arg3: memref<1x128xf32, #tpu.memory_space<vmem>>, %arg4: memref<1x19x23x128xbf16, #tpu.memory_space<vmem>>) attributes {dimension_semantics = [#tpu.dimension_semantics<parallel>], iteration_bounds = array<i64: 2>, scalar_prefetch = 0 : i64, scratch_operands = 0 : i64, tpu.core_type = #tpu.core_type<tc>, window_params = [{transform_indices = @transform_0, window_bounds = array<i64: 1, 19, 23, 128>}, {pipeline_mode = #tpu.pipeline_mode<synchronous>, transform_indices = @transform_1, window_bounds = array<i64: 1, 128>}, {pipeline_mode = #tpu.pipeline_mode<synchronous>, transform_indices = @transform_2, window_bounds = array<i64: 1, 128>}, {transform_indices = @transform_3, window_bounds = array<i64: 1, 19, 23, 128>}]} {
    %c0 = arith.constant 0 : index
    %c0_0 = arith.constant 0 : index
    %c0_1 = arith.constant 0 : index
    %c0_2 = arith.constant 0 : index
    %0 = vector.load %arg1[%c0, %c0_0, %c0_1, %c0_2] : memref<1x19x23x128xf32, #tpu.memory_space<vmem>>, vector<1x19x23x128xf32>
    %1 = vector.shape_cast %0 : vector<1x19x23x128xf32> to vector<19x23x128xf32>
    %2 = tpu.iota {dimensions = array<i32: 0>} : vector<19x1x1xi32>
    %3 = tpu.iota {dimensions = array<i32: 1>} : vector<1x23x1xi32>
    %4 = tpu.iota {dimensions = array<i32: 2>} : vector<1x1x128xi32>
    %c1_i32 = arith.constant 1 : i32
    %5 = vector.broadcast %c1_i32 : i32 to vector<19x1x1xi32>
    %6 = arith.cmpi sge, %2, %5 : vector<19x1x1xi32>
    %c16_i32 = arith.constant 16 : i32
    %7 = vector.broadcast %c16_i32 : i32 to vector<19x1x1xi32>
    %8 = arith.cmpi sle, %2, %7 : vector<19x1x1xi32>
    %9 = arith.andi %6, %8 : vector<19x1x1xi1>
    %c1_i32_3 = arith.constant 1 : i32
    %10 = vector.broadcast %c1_i32_3 : i32 to vector<1x23x1xi32>
    %11 = arith.cmpi sge, %3, %10 : vector<1x23x1xi32>
    %12 = vector.broadcast %9 : vector<19x1x1xi1> to vector<19x23x1xi1>
    %13 = vector.broadcast %11 : vector<1x23x1xi1> to vector<19x23x1xi1>
    %14 = arith.andi %12, %13 : vector<19x23x1xi1>
    %c16_i32_4 = arith.constant 16 : i32
    %15 = vector.broadcast %c16_i32_4 : i32 to vector<1x23x1xi32>
    %16 = arith.cmpi sle, %3, %15 : vector<1x23x1xi32>
    %17 = vector.broadcast %16 : vector<1x23x1xi1> to vector<19x23x1xi1>
    %18 = arith.andi %14, %17 : vector<19x23x1xi1>
    %c8_i32 = arith.constant 8 : i32
    %19 = vector.broadcast %c8_i32 : i32 to vector<1x1x128xi32>
    %20 = arith.cmpi slt, %4, %19 : vector<1x1x128xi32>
    %21 = vector.broadcast %18 : vector<19x23x1xi1> to vector<19x23x128xi1>
    %22 = vector.broadcast %20 : vector<1x1x128xi1> to vector<19x23x128xi1>
    %23 = arith.andi %21, %22 : vector<19x23x128xi1>
    %cst = arith.constant 0.000000e+00 : f32
    %24 = vector.broadcast %cst : f32 to vector<19x23x128xf32>
    %25 = arith.select %23, %1, %24 : vector<19x23x128xi1>, vector<19x23x128xf32>
    %26 = vector.shape_cast %25 : vector<19x23x128xf32> to vector<1x19x23x128xf32>
    %cst_5 = arith.constant dense<0.000000e+00> : vector<1xf32>
    %27 = vector.multi_reduction <add>, %26, %cst_5 [1, 2, 3] : vector<1x19x23x128xf32> to vector<1xf32>
    %28 = vector.shape_cast %27 : vector<1xf32> to vector<1x1x1x1xf32>
    %29 = vector.extract %28[0, 0, 0, 0] : f32 from vector<1x1x1x1xf32>
    %cst_6 = arith.constant 4.8828125E-4 : f32
    %30 = arith.mulf %29, %cst_6 : f32
    %31 = vector.broadcast %30 : f32 to vector<19x23x128xf32>
    %32 = arith.subf %1, %31 : vector<19x23x128xf32>
    %33 = arith.mulf %32, %32 : vector<19x23x128xf32>
    %cst_7 = arith.constant 0.000000e+00 : f32
    %34 = vector.broadcast %cst_7 : f32 to vector<19x23x128xf32>
    %35 = arith.select %23, %33, %34 : vector<19x23x128xi1>, vector<19x23x128xf32>
    %36 = vector.shape_cast %35 : vector<19x23x128xf32> to vector<1x19x23x128xf32>
    %cst_8 = arith.constant dense<0.000000e+00> : vector<1xf32>
    %37 = vector.multi_reduction <add>, %36, %cst_8 [1, 2, 3] : vector<1x19x23x128xf32> to vector<1xf32>
    %38 = vector.shape_cast %37 : vector<1xf32> to vector<1x1x1x1xf32>
    %39 = vector.extract %38[0, 0, 0, 0] : f32 from vector<1x1x1x1xf32>
    %cst_9 = arith.constant 4.8828125E-4 : f32
    %40 = arith.mulf %39, %cst_9 : f32
    %41 = vector.broadcast %30 : f32 to vector<19x23x128xf32>
    %42 = arith.subf %1, %41 : vector<19x23x128xf32>
    %cst_10 = arith.constant 9.99999974E-6 : f32
    %43 = arith.addf %40, %cst_10 : f32
    %44 = math.rsqrt %43 : f32
    %45 = vector.broadcast %44 : f32 to vector<19x23x128xf32>
    %46 = arith.mulf %42, %45 : vector<19x23x128xf32>
    %c0_11 = arith.constant 0 : index
    %c0_12 = arith.constant 0 : index
    %47 = vector.load %arg2[%c0_11, %c0_12] : memref<1x128xf32, #tpu.memory_space<vmem>>, vector<1x128xf32>
    %48 = vector.shape_cast %47 : vector<1x128xf32> to vector<1x1x128xf32>
    %49 = vector.broadcast %48 : vector<1x1x128xf32> to vector<19x23x128xf32>
    %50 = arith.mulf %46, %49 : vector<19x23x128xf32>
    %c0_13 = arith.constant 0 : index
    %c0_14 = arith.constant 0 : index
    %51 = vector.load %arg3[%c0_13, %c0_14] : memref<1x128xf32, #tpu.memory_space<vmem>>, vector<1x128xf32>
    %52 = vector.shape_cast %51 : vector<1x128xf32> to vector<1x1x128xf32>
    %53 = vector.broadcast %52 : vector<1x1x128xf32> to vector<19x23x128xf32>
    %54 = arith.addf %50, %53 : vector<19x23x128xf32>
    %cst_15 = arith.constant 5.000000e-01 : f32
    %55 = vector.broadcast %cst_15 : f32 to vector<19x23x128xf32>
    %56 = arith.mulf %55, %54 : vector<19x23x128xf32>
    %cst_16 = arith.constant 0.707106769 : f32
    %57 = vector.broadcast %cst_16 : f32 to vector<19x23x128xf32>
    %58 = arith.mulf %54, %57 : vector<19x23x128xf32>
    %59 = math.erf %58 : vector<19x23x128xf32>
    %cst_17 = arith.constant 1.000000e+00 : f32
    %60 = vector.broadcast %cst_17 : f32 to vector<19x23x128xf32>
    %61 = arith.addf %60, %59 : vector<19x23x128xf32>
    %62 = arith.mulf %56, %61 : vector<19x23x128xf32>
    %cst_18 = arith.constant 0.000000e+00 : f32
    %63 = vector.broadcast %cst_18 : f32 to vector<19x23x128xf32>
    %64 = arith.select %23, %62, %63 : vector<19x23x128xi1>, vector<19x23x128xf32>
    %65 = arith.truncf %64 : vector<19x23x128xf32> to vector<19x23x128xbf16>
    %c0_19 = arith.constant 0 : index
    %c0_20 = arith.constant 0 : index
    %c0_21 = arith.constant 0 : index
    %c0_22 = arith.constant 0 : index
    %66 = vector.load %arg4[%c0_19, %c0_20, %c0_21, %c0_22] : memref<1x19x23x128xbf16, #tpu.memory_space<vmem>>, vector<1x19x23x128xbf16>
    %67 = vector.shape_cast %66 : vector<1x19x23x128xbf16> to vector<19x23x128xbf16>
    %68 = vector.shape_cast %65 : vector<19x23x128xbf16> to vector<1x19x23x128xbf16>
    tpu.vector_store %arg4[%c0_19, %c0_20, %c0_21, %c0_22], %68 {strides = array<i32>} : memref<1x19x23x128xbf16, #tpu.memory_space<vmem>>, vector<1x19x23x128xbf16>,
    return
  }
  func.func @transform_0(%arg0: i32) -> (i32, i32, i32, i32) {
    %c0_i32 = arith.constant 0 : i32
    %c0_i32_0 = arith.constant 0 : i32
    %c0_i32_1 = arith.constant 0 : i32
    %c0_i32_2 = arith.constant 0 : i32
    return %arg0, %c0_i32, %c0_i32_0, %c0_i32_1 : i32, i32, i32, i32
  }
  func.func @transform_1(%arg0: i32) -> (i32, i32) {
    %c0_i32 = arith.constant 0 : i32
    %c0_i32_0 = arith.constant 0 : i32
    %c0_i32_1 = arith.constant 0 : i32
    return %c0_i32, %c0_i32_0 : i32, i32
  }
  func.func @transform_2(%arg0: i32) -> (i32, i32) {
    %c0_i32 = arith.constant 0 : i32
    %c0_i32_0 = arith.constant 0 : i32
    %c0_i32_1 = arith.constant 0 : i32
    return %c0_i32, %c0_i32_0 : i32, i32
  }
  func.func @transform_3(%arg0: i32) -> (i32, i32, i32, i32) {
    %c0_i32 = arith.constant 0 : i32
    %c0_i32_0 = arith.constant 0 : i32
    %c0_i32_1 = arith.constant 0 : i32
    %c0_i32_2 = arith.constant 0 : i32
    return %arg0, %c0_i32, %c0_i32_0, %c0_i32_1 : i32, i32, i32, i32
  }
}

module attributes {stable_mosaic.version = 11 : i64} {
  func.func @_conv3x3_kernel(%arg0: i32, %arg1: memref<1x437x128xbf16, #tpu.memory_space<vmem>>, %arg2: memref<9x128x128xbf16, #tpu.memory_space<vmem>>, %arg3: memref<1x437x128xf32, #tpu.memory_space<vmem>>, %arg4: memref<437x128xf32, #tpu.memory_space<vmem>>) attributes {dimension_semantics = [#tpu.dimension_semantics<parallel>], iteration_bounds = array<i64: 2>, scalar_prefetch = 0 : i64, scratch_operands = 1 : i64, tpu.core_type = #tpu.core_type<tc>, window_params = [{transform_indices = @transform_0, window_bounds = array<i64: 1, 437, 128>}, {pipeline_mode = #tpu.pipeline_mode<synchronous>, transform_indices = @transform_1, window_bounds = array<i64: 9, 128, 128>}, {transform_indices = @transform_2, window_bounds = array<i64: 1, 437, 128>}]} {
    %c0 = arith.constant 0 : index
    %c0_0 = arith.constant 0 : index
    %c0_1 = arith.constant 0 : index
    %0 = vector.load %arg1[%c0, %c0_0, %c0_1] : memref<1x437x128xbf16, #tpu.memory_space<vmem>>, vector<1x437x128xbf16>
    %1 = vector.shape_cast %0 : vector<1x437x128xbf16> to vector<437x128xbf16>
    %2 = arith.extf %1 : vector<437x128xbf16> to vector<437x128xf32>
    %c0_2 = arith.constant 0 : index
    %c0_3 = arith.constant 0 : index
    %3 = vector.load %arg4[%c0_2, %c0_3] : memref<437x128xf32, #tpu.memory_space<vmem>>, vector<437x128xf32>
    tpu.vector_store %arg4[%c0_2, %c0_3], %2 {strides = array<i32>} : memref<437x128xf32, #tpu.memory_space<vmem>>, vector<437x128xf32>,
    %cst = arith.constant 0.000000e+00 : f32
    %4 = vector.broadcast %cst : f32 to vector<1x437x128xf32>
    %c0_4 = arith.constant 0 : index
    %c0_5 = arith.constant 0 : index
    %c0_6 = arith.constant 0 : index
    %5 = vector.load %arg3[%c0_4, %c0_5, %c0_6] : memref<1x437x128xf32, #tpu.memory_space<vmem>>, vector<1x437x128xf32>
    tpu.vector_store %arg3[%c0_4, %c0_5, %c0_6], %4 {strides = array<i32>} : memref<1x437x128xf32, #tpu.memory_space<vmem>>, vector<1x437x128xf32>,
    %c0_7 = arith.constant 0 : index
    %c0_8 = arith.constant 0 : index
    %6 = vector.load %arg4[%c0_7, %c0_8] : memref<437x128xf32, #tpu.memory_space<vmem>>, vector<368x128xf32>
    %7 = arith.truncf %6 : vector<368x128xf32> to vector<368x128xbf16>
    %c0_9 = arith.constant 0 : index
    %c24 = arith.constant 24 : index
    %c0_10 = arith.constant 0 : index
    %8 = vector.load %arg3[%c0_9, %c24, %c0_10] : memref<1x437x128xf32, #tpu.memory_space<vmem>>, vector<1x368x128xf32>
    %9 = vector.shape_cast %8 : vector<1x368x128xf32> to vector<368x128xf32>
    %c0_11 = arith.constant 0 : index
    %c0_12 = arith.constant 0 : index
    %c0_13 = arith.constant 0 : index
    %10 = vector.load %arg2[%c0_11, %c0_12, %c0_13] : memref<9x128x128xbf16, #tpu.memory_space<vmem>>, vector<1x128x128xbf16>
    %11 = vector.shape_cast %10 : vector<1x128x128xbf16> to vector<128x128xbf16>
    %cst_14 = arith.constant dense<0.000000e+00> : vector<368x128xf32>
    %12 = tpu.matmul %7, %11, %cst_14 {dimension_numbers = #tpu.dot_dimension_numbers<[1], [0], [0], [1], [0, 0, 1, 1], [], []>} : vector<368x128xbf16>, vector<128x128xbf16>, vector<368x128xf32> -> vector<368x128xf32>
    %13 = arith.addf %9, %12 : vector<368x128xf32>
    %c0_15 = arith.constant 0 : index
    %c24_16 = arith.constant 24 : index
    %c0_17 = arith.constant 0 : index
    %14 = vector.load %arg3[%c0_15, %c24_16, %c0_17] : memref<1x437x128xf32, #tpu.memory_space<vmem>>, vector<1x368x128xf32>
    %15 = vector.shape_cast %14 : vector<1x368x128xf32> to vector<368x128xf32>
    %16 = vector.shape_cast %13 : vector<368x128xf32> to vector<1x368x128xf32>
    tpu.vector_store %arg3[%c0_15, %c24_16, %c0_17], %16 {strides = array<i32>} : memref<1x437x128xf32, #tpu.memory_space<vmem>>, vector<1x368x128xf32>,
    %c1 = arith.constant 1 : index
    %c0_18 = arith.constant 0 : index
    %17 = vector.load %arg4[%c1, %c0_18] : memref<437x128xf32, #tpu.memory_space<vmem>>, vector<368x128xf32>
    %18 = arith.truncf %17 : vector<368x128xf32> to vector<368x128xbf16>
    %c0_19 = arith.constant 0 : index
    %c24_20 = arith.constant 24 : index
    %c0_21 = arith.constant 0 : index
    %19 = vector.load %arg3[%c0_19, %c24_20, %c0_21] : memref<1x437x128xf32, #tpu.memory_space<vmem>>, vector<1x368x128xf32>
    %20 = vector.shape_cast %19 : vector<1x368x128xf32> to vector<368x128xf32>
    %c1_22 = arith.constant 1 : index
    %c0_23 = arith.constant 0 : index
    %c0_24 = arith.constant 0 : index
    %21 = vector.load %arg2[%c1_22, %c0_23, %c0_24] : memref<9x128x128xbf16, #tpu.memory_space<vmem>>, vector<1x128x128xbf16>
    %22 = vector.shape_cast %21 : vector<1x128x128xbf16> to vector<128x128xbf16>
    %cst_25 = arith.constant dense<0.000000e+00> : vector<368x128xf32>
    %23 = tpu.matmul %18, %22, %cst_25 {dimension_numbers = #tpu.dot_dimension_numbers<[1], [0], [0], [1], [0, 0, 1, 1], [], []>} : vector<368x128xbf16>, vector<128x128xbf16>, vector<368x128xf32> -> vector<368x128xf32>
    %24 = arith.addf %20, %23 : vector<368x128xf32>
    %c0_26 = arith.constant 0 : index
    %c24_27 = arith.constant 24 : index
    %c0_28 = arith.constant 0 : index
    %25 = vector.load %arg3[%c0_26, %c24_27, %c0_28] : memref<1x437x128xf32, #tpu.memory_space<vmem>>, vector<1x368x128xf32>
    %26 = vector.shape_cast %25 : vector<1x368x128xf32> to vector<368x128xf32>
    %27 = vector.shape_cast %24 : vector<368x128xf32> to vector<1x368x128xf32>
    tpu.vector_store %arg3[%c0_26, %c24_27, %c0_28], %27 {strides = array<i32>} : memref<1x437x128xf32, #tpu.memory_space<vmem>>, vector<1x368x128xf32>,
    %c2 = arith.constant 2 : index
    %c0_29 = arith.constant 0 : index
    %28 = vector.load %arg4[%c2, %c0_29] : memref<437x128xf32, #tpu.memory_space<vmem>>, vector<368x128xf32>
    %29 = arith.truncf %28 : vector<368x128xf32> to vector<368x128xbf16>
    %c0_30 = arith.constant 0 : index
    %c24_31 = arith.constant 24 : index
    %c0_32 = arith.constant 0 : index
    %30 = vector.load %arg3[%c0_30, %c24_31, %c0_32] : memref<1x437x128xf32, #tpu.memory_space<vmem>>, vector<1x368x128xf32>
    %31 = vector.shape_cast %30 : vector<1x368x128xf32> to vector<368x128xf32>
    %c2_33 = arith.constant 2 : index
    %c0_34 = arith.constant 0 : index
    %c0_35 = arith.constant 0 : index
    %32 = vector.load %arg2[%c2_33, %c0_34, %c0_35] : memref<9x128x128xbf16, #tpu.memory_space<vmem>>, vector<1x128x128xbf16>
    %33 = vector.shape_cast %32 : vector<1x128x128xbf16> to vector<128x128xbf16>
    %cst_36 = arith.constant dense<0.000000e+00> : vector<368x128xf32>
    %34 = tpu.matmul %29, %33, %cst_36 {dimension_numbers = #tpu.dot_dimension_numbers<[1], [0], [0], [1], [0, 0, 1, 1], [], []>} : vector<368x128xbf16>, vector<128x128xbf16>, vector<368x128xf32> -> vector<368x128xf32>
    %35 = arith.addf %31, %34 : vector<368x128xf32>
    %c0_37 = arith.constant 0 : index
    %c24_38 = arith.constant 24 : index
    %c0_39 = arith.constant 0 : index
    %36 = vector.load %arg3[%c0_37, %c24_38, %c0_39] : memref<1x437x128xf32, #tpu.memory_space<vmem>>, vector<1x368x128xf32>
    %37 = vector.shape_cast %36 : vector<1x368x128xf32> to vector<368x128xf32>
    %38 = vector.shape_cast %35 : vector<368x128xf32> to vector<1x368x128xf32>
    tpu.vector_store %arg3[%c0_37, %c24_38, %c0_39], %38 {strides = array<i32>} : memref<1x437x128xf32, #tpu.memory_space<vmem>>, vector<1x368x128xf32>,
    %c23 = arith.constant 23 : index
    %c0_40 = arith.constant 0 : index
    %39 = vector.load %arg4[%c23, %c0_40] : memref<437x128xf32, #tpu.memory_space<vmem>>, vector<368x128xf32>
    %40 = arith.truncf %39 : vector<368x128xf32> to vector<368x128xbf16>
    %c0_41 = arith.constant 0 : index
    %c24_42 = arith.constant 24 : index
    %c0_43 = arith.constant 0 : index
    %41 = vector.load %arg3[%c0_41, %c24_42, %c0_43] : memref<1x437x128xf32, #tpu.memory_space<vmem>>, vector<1x368x128xf32>
    %42 = vector.shape_cast %41 : vector<1x368x128xf32> to vector<368x128xf32>
    %c3 = arith.constant 3 : index
    %c0_44 = arith.constant 0 : index
    %c0_45 = arith.constant 0 : index
    %43 = vector.load %arg2[%c3, %c0_44, %c0_45] : memref<9x128x128xbf16, #tpu.memory_space<vmem>>, vector<1x128x128xbf16>
    %44 = vector.shape_cast %43 : vector<1x128x128xbf16> to vector<128x128xbf16>
    %cst_46 = arith.constant dense<0.000000e+00> : vector<368x128xf32>
    %45 = tpu.matmul %40, %44, %cst_46 {dimension_numbers = #tpu.dot_dimension_numbers<[1], [0], [0], [1], [0, 0, 1, 1], [], []>} : vector<368x128xbf16>, vector<128x128xbf16>, vector<368x128xf32> -> vector<368x128xf32>
    %46 = arith.addf %42, %45 : vector<368x128xf32>
    %c0_47 = arith.constant 0 : index
    %c24_48 = arith.constant 24 : index
    %c0_49 = arith.constant 0 : index
    %47 = vector.load %arg3[%c0_47, %c24_48, %c0_49] : memref<1x437x128xf32, #tpu.memory_space<vmem>>, vector<1x368x128xf32>
    %48 = vector.shape_cast %47 : vector<1x368x128xf32> to vector<368x128xf32>
    %49 = vector.shape_cast %46 : vector<368x128xf32> to vector<1x368x128xf32>
    tpu.vector_store %arg3[%c0_47, %c24_48, %c0_49], %49 {strides = array<i32>} : memref<1x437x128xf32, #tpu.memory_space<vmem>>, vector<1x368x128xf32>,
    %c24_50 = arith.constant 24 : index
    %c0_51 = arith.constant 0 : index
    %50 = vector.load %arg4[%c24_50, %c0_51] : memref<437x128xf32, #tpu.memory_space<vmem>>, vector<368x128xf32>
    %51 = arith.truncf %50 : vector<368x128xf32> to vector<368x128xbf16>
    %c0_52 = arith.constant 0 : index
    %c24_53 = arith.constant 24 : index
    %c0_54 = arith.constant 0 : index
    %52 = vector.load %arg3[%c0_52, %c24_53, %c0_54] : memref<1x437x128xf32, #tpu.memory_space<vmem>>, vector<1x368x128xf32>
    %53 = vector.shape_cast %52 : vector<1x368x128xf32> to vector<368x128xf32>
    %c4 = arith.constant 4 : index
    %c0_55 = arith.constant 0 : index
    %c0_56 = arith.constant 0 : index
    %54 = vector.load %arg2[%c4, %c0_55, %c0_56] : memref<9x128x128xbf16, #tpu.memory_space<vmem>>, vector<1x128x128xbf16>
    %55 = vector.shape_cast %54 : vector<1x128x128xbf16> to vector<128x128xbf16>
    %cst_57 = arith.constant dense<0.000000e+00> : vector<368x128xf32>
    %56 = tpu.matmul %51, %55, %cst_57 {dimension_numbers = #tpu.dot_dimension_numbers<[1], [0], [0], [1], [0, 0, 1, 1], [], []>} : vector<368x128xbf16>, vector<128x128xbf16>, vector<368x128xf32> -> vector<368x128xf32>
    %57 = arith.addf %53, %56 : vector<368x128xf32>
    %c0_58 = arith.constant 0 : index
    %c24_59 = arith.constant 24 : index
    %c0_60 = arith.constant 0 : index
    %58 = vector.load %arg3[%c0_58, %c24_59, %c0_60] : memref<1x437x128xf32, #tpu.memory_space<vmem>>, vector<1x368x128xf32>
    %59 = vector.shape_cast %58 : vector<1x368x128xf32> to vector<368x128xf32>
    %60 = vector.shape_cast %57 : vector<368x128xf32> to vector<1x368x128xf32>
    tpu.vector_store %arg3[%c0_58, %c24_59, %c0_60], %60 {strides = array<i32>} : memref<1x437x128xf32, #tpu.memory_space<vmem>>, vector<1x368x128xf32>,
    %c25 = arith.constant 25 : index
    %c0_61 = arith.constant 0 : index
    %61 = vector.load %arg4[%c25, %c0_61] : memref<437x128xf32, #tpu.memory_space<vmem>>, vector<368x128xf32>
    %62 = arith.truncf %61 : vector<368x128xf32> to vector<368x128xbf16>
    %c0_62 = arith.constant 0 : index
    %c24_63 = arith.constant 24 : index
    %c0_64 = arith.constant 0 : index
    %63 = vector.load %arg3[%c0_62, %c24_63, %c0_64] : memref<1x437x128xf32, #tpu.memory_space<vmem>>, vector<1x368x128xf32>
    %64 = vector.shape_cast %63 : vector<1x368x128xf32> to vector<368x128xf32>
    %c5 = arith.constant 5 : index
    %c0_65 = arith.constant 0 : index
    %c0_66 = arith.constant 0 : index
    %65 = vector.load %arg2[%c5, %c0_65, %c0_66] : memref<9x128x128xbf16, #tpu.memory_space<vmem>>, vector<1x128x128xbf16>
    %66 = vector.shape_cast %65 : vector<1x128x128xbf16> to vector<128x128xbf16>
    %cst_67 = arith.constant dense<0.000000e+00> : vector<368x128xf32>
    %67 = tpu.matmul %62, %66, %cst_67 {dimension_numbers = #tpu.dot_dimension_numbers<[1], [0], [0], [1], [0, 0, 1, 1], [], []>} : vector<368x128xbf16>, vector<128x128xbf16>, vector<368x128xf32> -> vector<368x128xf32>
    %68 = arith.addf %64, %67 : vector<368x128xf32>
    %c0_68 = arith.constant 0 : index
    %c24_69 = arith.constant 24 : index
    %c0_70 = arith.constant 0 : index
    %69 = vector.load %arg3[%c0_68, %c24_69, %c0_70] : memref<1x437x128xf32, #tpu.memory_space<vmem>>, vector<1x368x128xf32>
    %70 = vector.shape_cast %69 : vector<1x368x128xf32> to vector<368x128xf32>
    %71 = vector.shape_cast %68 : vector<368x128xf32> to vector<1x368x128xf32>
    tpu.vector_store %arg3[%c0_68, %c24_69, %c0_70], %71 {strides = array<i32>} : memref<1x437x128xf32, #tpu.memory_space<vmem>>, vector<1x368x128xf32>,
    %c46 = arith.constant 46 : index
    %c0_71 = arith.constant 0 : index
    %72 = vector.load %arg4[%c46, %c0_71] : memref<437x128xf32, #tpu.memory_space<vmem>>, vector<368x128xf32>
    %73 = arith.truncf %72 : vector<368x128xf32> to vector<368x128xbf16>
    %c0_72 = arith.constant 0 : index
    %c24_73 = arith.constant 24 : index
    %c0_74 = arith.constant 0 : index
    %74 = vector.load %arg3[%c0_72, %c24_73, %c0_74] : memref<1x437x128xf32, #tpu.memory_space<vmem>>, vector<1x368x128xf32>
    %75 = vector.shape_cast %74 : vector<1x368x128xf32> to vector<368x128xf32>
    %c6 = arith.constant 6 : index
    %c0_75 = arith.constant 0 : index
    %c0_76 = arith.constant 0 : index
    %76 = vector.load %arg2[%c6, %c0_75, %c0_76] : memref<9x128x128xbf16, #tpu.memory_space<vmem>>, vector<1x128x128xbf16>
    %77 = vector.shape_cast %76 : vector<1x128x128xbf16> to vector<128x128xbf16>
    %cst_77 = arith.constant dense<0.000000e+00> : vector<368x128xf32>
    %78 = tpu.matmul %73, %77, %cst_77 {dimension_numbers = #tpu.dot_dimension_numbers<[1], [0], [0], [1], [0, 0, 1, 1], [], []>} : vector<368x128xbf16>, vector<128x128xbf16>, vector<368x128xf32> -> vector<368x128xf32>
    %79 = arith.addf %75, %78 : vector<368x128xf32>
    %c0_78 = arith.constant 0 : index
    %c24_79 = arith.constant 24 : index
    %c0_80 = arith.constant 0 : index
    %80 = vector.load %arg3[%c0_78, %c24_79, %c0_80] : memref<1x437x128xf32, #tpu.memory_space<vmem>>, vector<1x368x128xf32>
    %81 = vector.shape_cast %80 : vector<1x368x128xf32> to vector<368x128xf32>
    %82 = vector.shape_cast %79 : vector<368x128xf32> to vector<1x368x128xf32>
    tpu.vector_store %arg3[%c0_78, %c24_79, %c0_80], %82 {strides = array<i32>} : memref<1x437x128xf32, #tpu.memory_space<vmem>>, vector<1x368x128xf32>,
    %c47 = arith.constant 47 : index
    %c0_81 = arith.constant 0 : index
    %83 = vector.load %arg4[%c47, %c0_81] : memref<437x128xf32, #tpu.memory_space<vmem>>, vector<368x128xf32>
    %84 = arith.truncf %83 : vector<368x128xf32> to vector<368x128xbf16>
    %c0_82 = arith.constant 0 : index
    %c24_83 = arith.constant 24 : index
    %c0_84 = arith.constant 0 : index
    %85 = vector.load %arg3[%c0_82, %c24_83, %c0_84] : memref<1x437x128xf32, #tpu.memory_space<vmem>>, vector<1x368x128xf32>
    %86 = vector.shape_cast %85 : vector<1x368x128xf32> to vector<368x128xf32>
    %c7 = arith.constant 7 : index
    %c0_85 = arith.constant 0 : index
    %c0_86 = arith.constant 0 : index
    %87 = vector.load %arg2[%c7, %c0_85, %c0_86] : memref<9x128x128xbf16, #tpu.memory_space<vmem>>, vector<1x128x128xbf16>
    %88 = vector.shape_cast %87 : vector<1x128x128xbf16> to vector<128x128xbf16>
    %cst_87 = arith.constant dense<0.000000e+00> : vector<368x128xf32>
    %89 = tpu.matmul %84, %88, %cst_87 {dimension_numbers = #tpu.dot_dimension_numbers<[1], [0], [0], [1], [0, 0, 1, 1], [], []>} : vector<368x128xbf16>, vector<128x128xbf16>, vector<368x128xf32> -> vector<368x128xf32>
    %90 = arith.addf %86, %89 : vector<368x128xf32>
    %c0_88 = arith.constant 0 : index
    %c24_89 = arith.constant 24 : index
    %c0_90 = arith.constant 0 : index
    %91 = vector.load %arg3[%c0_88, %c24_89, %c0_90] : memref<1x437x128xf32, #tpu.memory_space<vmem>>, vector<1x368x128xf32>
    %92 = vector.shape_cast %91 : vector<1x368x128xf32> to vector<368x128xf32>
    %93 = vector.shape_cast %90 : vector<368x128xf32> to vector<1x368x128xf32>
    tpu.vector_store %arg3[%c0_88, %c24_89, %c0_90], %93 {strides = array<i32>} : memref<1x437x128xf32, #tpu.memory_space<vmem>>, vector<1x368x128xf32>,
    %c48 = arith.constant 48 : index
    %c0_91 = arith.constant 0 : index
    %94 = vector.load %arg4[%c48, %c0_91] : memref<437x128xf32, #tpu.memory_space<vmem>>, vector<368x128xf32>
    %95 = arith.truncf %94 : vector<368x128xf32> to vector<368x128xbf16>
    %c0_92 = arith.constant 0 : index
    %c24_93 = arith.constant 24 : index
    %c0_94 = arith.constant 0 : index
    %96 = vector.load %arg3[%c0_92, %c24_93, %c0_94] : memref<1x437x128xf32, #tpu.memory_space<vmem>>, vector<1x368x128xf32>
    %97 = vector.shape_cast %96 : vector<1x368x128xf32> to vector<368x128xf32>
    %c8 = arith.constant 8 : index
    %c0_95 = arith.constant 0 : index
    %c0_96 = arith.constant 0 : index
    %98 = vector.load %arg2[%c8, %c0_95, %c0_96] : memref<9x128x128xbf16, #tpu.memory_space<vmem>>, vector<1x128x128xbf16>
    %99 = vector.shape_cast %98 : vector<1x128x128xbf16> to vector<128x128xbf16>
    %cst_97 = arith.constant dense<0.000000e+00> : vector<368x128xf32>
    %100 = tpu.matmul %95, %99, %cst_97 {dimension_numbers = #tpu.dot_dimension_numbers<[1], [0], [0], [1], [0, 0, 1, 1], [], []>} : vector<368x128xbf16>, vector<128x128xbf16>, vector<368x128xf32> -> vector<368x128xf32>
    %101 = arith.addf %97, %100 : vector<368x128xf32>
    %c0_98 = arith.constant 0 : index
    %c24_99 = arith.constant 24 : index
    %c0_100 = arith.constant 0 : index
    %102 = vector.load %arg3[%c0_98, %c24_99, %c0_100] : memref<1x437x128xf32, #tpu.memory_space<vmem>>, vector<1x368x128xf32>
    %103 = vector.shape_cast %102 : vector<1x368x128xf32> to vector<368x128xf32>
    %104 = vector.shape_cast %101 : vector<368x128xf32> to vector<1x368x128xf32>
    tpu.vector_store %arg3[%c0_98, %c24_99, %c0_100], %104 {strides = array<i32>} : memref<1x437x128xf32, #tpu.memory_space<vmem>>, vector<1x368x128xf32>,
    return
  }
  func.func @transform_0(%arg0: i32) -> (i32, i32, i32) {
    %c0_i32 = arith.constant 0 : i32
    %c0_i32_0 = arith.constant 0 : i32
    %c0_i32_1 = arith.constant 0 : i32
    return %arg0, %c0_i32, %c0_i32_0 : i32, i32, i32
  }
  func.func @transform_1(%arg0: i32) -> (i32, i32, i32) {
    %c0_i32 = arith.constant 0 : i32
    %c0_i32_0 = arith.constant 0 : i32
    %c0_i32_1 = arith.constant 0 : i32
    %c0_i32_2 = arith.constant 0 : i32
    return %c0_i32, %c0_i32_0, %c0_i32_1 : i32, i32, i32
  }
  func.func @transform_2(%arg0: i32) -> (i32, i32, i32) {
    %c0_i32 = arith.constant 0 : i32
    %c0_i32_0 = arith.constant 0 : i32
    %c0_i32_1 = arith.constant 0 : i32
    return %arg0, %c0_i32, %c0_i32_0 : i32, i32, i32
  }
}

module attributes {stable_mosaic.version = 11 : i64} {
  func.func @_gn_kernel(%arg0: i32, %arg1: memref<1x19x23x128xf32, #tpu.memory_space<vmem>>, %arg2: memref<1x128xf32, #tpu.memory_space<vmem>>, %arg3: memref<1x128xf32, #tpu.memory_space<vmem>>, %arg4: memref<1x19x23x128xf32, #tpu.memory_space<vmem>>) attributes {dimension_semantics = [#tpu.dimension_semantics<parallel>], iteration_bounds = array<i64: 2>, scalar_prefetch = 0 : i64, scratch_operands = 0 : i64, tpu.core_type = #tpu.core_type<tc>, window_params = [{transform_indices = @transform_0, window_bounds = array<i64: 1, 19, 23, 128>}, {pipeline_mode = #tpu.pipeline_mode<synchronous>, transform_indices = @transform_1, window_bounds = array<i64: 1, 128>}, {pipeline_mode = #tpu.pipeline_mode<synchronous>, transform_indices = @transform_2, window_bounds = array<i64: 1, 128>}, {transform_indices = @transform_3, window_bounds = array<i64: 1, 19, 23, 128>}]} {
    %c0 = arith.constant 0 : index
    %c0_0 = arith.constant 0 : index
    %c0_1 = arith.constant 0 : index
    %c0_2 = arith.constant 0 : index
    %0 = vector.load %arg1[%c0, %c0_0, %c0_1, %c0_2] : memref<1x19x23x128xf32, #tpu.memory_space<vmem>>, vector<1x19x23x128xf32>
    %1 = vector.shape_cast %0 : vector<1x19x23x128xf32> to vector<19x23x128xf32>
    %2 = tpu.iota {dimensions = array<i32: 0>} : vector<19x1x1xi32>
    %3 = tpu.iota {dimensions = array<i32: 1>} : vector<1x23x1xi32>
    %4 = tpu.iota {dimensions = array<i32: 2>} : vector<1x1x128xi32>
    %c1_i32 = arith.constant 1 : i32
    %5 = vector.broadcast %c1_i32 : i32 to vector<19x1x1xi32>
    %6 = arith.cmpi sge, %2, %5 : vector<19x1x1xi32>
    %c16_i32 = arith.constant 16 : i32
    %7 = vector.broadcast %c16_i32 : i32 to vector<19x1x1xi32>
    %8 = arith.cmpi sle, %2, %7 : vector<19x1x1xi32>
    %9 = arith.andi %6, %8 : vector<19x1x1xi1>
    %c1_i32_3 = arith.constant 1 : i32
    %10 = vector.broadcast %c1_i32_3 : i32 to vector<1x23x1xi32>
    %11 = arith.cmpi sge, %3, %10 : vector<1x23x1xi32>
    %12 = vector.broadcast %9 : vector<19x1x1xi1> to vector<19x23x1xi1>
    %13 = vector.broadcast %11 : vector<1x23x1xi1> to vector<19x23x1xi1>
    %14 = arith.andi %12, %13 : vector<19x23x1xi1>
    %c16_i32_4 = arith.constant 16 : i32
    %15 = vector.broadcast %c16_i32_4 : i32 to vector<1x23x1xi32>
    %16 = arith.cmpi sle, %3, %15 : vector<1x23x1xi32>
    %17 = vector.broadcast %16 : vector<1x23x1xi1> to vector<19x23x1xi1>
    %18 = arith.andi %14, %17 : vector<19x23x1xi1>
    %c8_i32 = arith.constant 8 : i32
    %19 = vector.broadcast %c8_i32 : i32 to vector<1x1x128xi32>
    %20 = arith.cmpi slt, %4, %19 : vector<1x1x128xi32>
    %21 = vector.broadcast %18 : vector<19x23x1xi1> to vector<19x23x128xi1>
    %22 = vector.broadcast %20 : vector<1x1x128xi1> to vector<19x23x128xi1>
    %23 = arith.andi %21, %22 : vector<19x23x128xi1>
    %cst = arith.constant 0.000000e+00 : f32
    %24 = vector.broadcast %cst : f32 to vector<19x23x128xf32>
    %25 = arith.select %23, %1, %24 : vector<19x23x128xi1>, vector<19x23x128xf32>
    %26 = vector.shape_cast %25 : vector<19x23x128xf32> to vector<1x19x23x128xf32>
    %cst_5 = arith.constant dense<0.000000e+00> : vector<1xf32>
    %27 = vector.multi_reduction <add>, %26, %cst_5 [1, 2, 3] : vector<1x19x23x128xf32> to vector<1xf32>
    %28 = vector.shape_cast %27 : vector<1xf32> to vector<1x1x1x1xf32>
    %29 = vector.extract %28[0, 0, 0, 0] : f32 from vector<1x1x1x1xf32>
    %cst_6 = arith.constant 4.8828125E-4 : f32
    %30 = arith.mulf %29, %cst_6 : f32
    %31 = vector.broadcast %30 : f32 to vector<19x23x128xf32>
    %32 = arith.subf %1, %31 : vector<19x23x128xf32>
    %33 = arith.mulf %32, %32 : vector<19x23x128xf32>
    %cst_7 = arith.constant 0.000000e+00 : f32
    %34 = vector.broadcast %cst_7 : f32 to vector<19x23x128xf32>
    %35 = arith.select %23, %33, %34 : vector<19x23x128xi1>, vector<19x23x128xf32>
    %36 = vector.shape_cast %35 : vector<19x23x128xf32> to vector<1x19x23x128xf32>
    %cst_8 = arith.constant dense<0.000000e+00> : vector<1xf32>
    %37 = vector.multi_reduction <add>, %36, %cst_8 [1, 2, 3] : vector<1x19x23x128xf32> to vector<1xf32>
    %38 = vector.shape_cast %37 : vector<1xf32> to vector<1x1x1x1xf32>
    %39 = vector.extract %38[0, 0, 0, 0] : f32 from vector<1x1x1x1xf32>
    %cst_9 = arith.constant 4.8828125E-4 : f32
    %40 = arith.mulf %39, %cst_9 : f32
    %41 = vector.broadcast %30 : f32 to vector<19x23x128xf32>
    %42 = arith.subf %1, %41 : vector<19x23x128xf32>
    %cst_10 = arith.constant 9.99999974E-6 : f32
    %43 = arith.addf %40, %cst_10 : f32
    %44 = math.rsqrt %43 : f32
    %45 = vector.broadcast %44 : f32 to vector<19x23x128xf32>
    %46 = arith.mulf %42, %45 : vector<19x23x128xf32>
    %c0_11 = arith.constant 0 : index
    %c0_12 = arith.constant 0 : index
    %47 = vector.load %arg2[%c0_11, %c0_12] : memref<1x128xf32, #tpu.memory_space<vmem>>, vector<1x128xf32>
    %48 = vector.shape_cast %47 : vector<1x128xf32> to vector<1x1x128xf32>
    %49 = vector.broadcast %48 : vector<1x1x128xf32> to vector<19x23x128xf32>
    %50 = arith.mulf %46, %49 : vector<19x23x128xf32>
    %c0_13 = arith.constant 0 : index
    %c0_14 = arith.constant 0 : index
    %51 = vector.load %arg3[%c0_13, %c0_14] : memref<1x128xf32, #tpu.memory_space<vmem>>, vector<1x128xf32>
    %52 = vector.shape_cast %51 : vector<1x128xf32> to vector<1x1x128xf32>
    %53 = vector.broadcast %52 : vector<1x1x128xf32> to vector<19x23x128xf32>
    %54 = arith.addf %50, %53 : vector<19x23x128xf32>
    %cst_15 = arith.constant 0.000000e+00 : f32
    %55 = vector.broadcast %cst_15 : f32 to vector<19x23x128xf32>
    %56 = arith.select %23, %54, %55 : vector<19x23x128xi1>, vector<19x23x128xf32>
    %c0_16 = arith.constant 0 : index
    %c0_17 = arith.constant 0 : index
    %c0_18 = arith.constant 0 : index
    %c0_19 = arith.constant 0 : index
    %57 = vector.load %arg4[%c0_16, %c0_17, %c0_18, %c0_19] : memref<1x19x23x128xf32, #tpu.memory_space<vmem>>, vector<1x19x23x128xf32>
    %58 = vector.shape_cast %57 : vector<1x19x23x128xf32> to vector<19x23x128xf32>
    %59 = vector.shape_cast %56 : vector<19x23x128xf32> to vector<1x19x23x128xf32>
    tpu.vector_store %arg4[%c0_16, %c0_17, %c0_18, %c0_19], %59 {strides = array<i32>} : memref<1x19x23x128xf32, #tpu.memory_space<vmem>>, vector<1x19x23x128xf32>,
    return
  }
  func.func @transform_0(%arg0: i32) -> (i32, i32, i32, i32) {
    %c0_i32 = arith.constant 0 : i32
    %c0_i32_0 = arith.constant 0 : i32
    %c0_i32_1 = arith.constant 0 : i32
    %c0_i32_2 = arith.constant 0 : i32
    return %arg0, %c0_i32, %c0_i32_0, %c0_i32_1 : i32, i32, i32, i32
  }
  func.func @transform_1(%arg0: i32) -> (i32, i32) {
    %c0_i32 = arith.constant 0 : i32
    %c0_i32_0 = arith.constant 0 : i32
    %c0_i32_1 = arith.constant 0 : i32
    return %c0_i32, %c0_i32_0 : i32, i32
  }
  func.func @transform_2(%arg0: i32) -> (i32, i32) {
    %c0_i32 = arith.constant 0 : i32
    %c0_i32_0 = arith.constant 0 : i32
    %c0_i32_1 = arith.constant 0 : i32
    return %c0_i32, %c0_i32_0 : i32, i32
  }
  func.func @transform_3(%arg0: i32) -> (i32, i32, i32, i32) {
    %c0_i32 = arith.constant 0 : i32
    %c0_i32_0 = arith.constant 0 : i32
    %c0_i32_1 = arith.constant 0 : i32
    %c0_i32_2 = arith.constant 0 : i32
    return %arg0, %c0_i32, %c0_i32_0, %c0_i32_1 : i32, i32, i32, i32
  }
}

module attributes {stable_mosaic.version = 11 : i64} {
  func.func @_gn_kernel(%arg0: i32, %arg1: memref<1x19x23x128xf32, #tpu.memory_space<vmem>>, %arg2: memref<1x128xf32, #tpu.memory_space<vmem>>, %arg3: memref<1x128xf32, #tpu.memory_space<vmem>>, %arg4: memref<1x19x23x128xf32, #tpu.memory_space<vmem>>, %arg5: memref<1x19x23x128xf32, #tpu.memory_space<vmem>>) attributes {dimension_semantics = [#tpu.dimension_semantics<parallel>], iteration_bounds = array<i64: 2>, scalar_prefetch = 0 : i64, scratch_operands = 0 : i64, tpu.core_type = #tpu.core_type<tc>, window_params = [{transform_indices = @transform_0, window_bounds = array<i64: 1, 19, 23, 128>}, {pipeline_mode = #tpu.pipeline_mode<synchronous>, transform_indices = @transform_1, window_bounds = array<i64: 1, 128>}, {pipeline_mode = #tpu.pipeline_mode<synchronous>, transform_indices = @transform_2, window_bounds = array<i64: 1, 128>}, {transform_indices = @transform_3, window_bounds = array<i64: 1, 19, 23, 128>}, {transform_indices = @transform_4, window_bounds = array<i64: 1, 19, 23, 128>}]} {
    %c0 = arith.constant 0 : index
    %c0_0 = arith.constant 0 : index
    %c0_1 = arith.constant 0 : index
    %c0_2 = arith.constant 0 : index
    %0 = vector.load %arg1[%c0, %c0_0, %c0_1, %c0_2] : memref<1x19x23x128xf32, #tpu.memory_space<vmem>>, vector<1x19x23x128xf32>
    %1 = vector.shape_cast %0 : vector<1x19x23x128xf32> to vector<19x23x128xf32>
    %2 = tpu.iota {dimensions = array<i32: 0>} : vector<19x1x1xi32>
    %3 = tpu.iota {dimensions = array<i32: 1>} : vector<1x23x1xi32>
    %4 = tpu.iota {dimensions = array<i32: 2>} : vector<1x1x128xi32>
    %c1_i32 = arith.constant 1 : i32
    %5 = vector.broadcast %c1_i32 : i32 to vector<19x1x1xi32>
    %6 = arith.cmpi sge, %2, %5 : vector<19x1x1xi32>
    %c16_i32 = arith.constant 16 : i32
    %7 = vector.broadcast %c16_i32 : i32 to vector<19x1x1xi32>
    %8 = arith.cmpi sle, %2, %7 : vector<19x1x1xi32>
    %9 = arith.andi %6, %8 : vector<19x1x1xi1>
    %c1_i32_3 = arith.constant 1 : i32
    %10 = vector.broadcast %c1_i32_3 : i32 to vector<1x23x1xi32>
    %11 = arith.cmpi sge, %3, %10 : vector<1x23x1xi32>
    %12 = vector.broadcast %9 : vector<19x1x1xi1> to vector<19x23x1xi1>
    %13 = vector.broadcast %11 : vector<1x23x1xi1> to vector<19x23x1xi1>
    %14 = arith.andi %12, %13 : vector<19x23x1xi1>
    %c16_i32_4 = arith.constant 16 : i32
    %15 = vector.broadcast %c16_i32_4 : i32 to vector<1x23x1xi32>
    %16 = arith.cmpi sle, %3, %15 : vector<1x23x1xi32>
    %17 = vector.broadcast %16 : vector<1x23x1xi1> to vector<19x23x1xi1>
    %18 = arith.andi %14, %17 : vector<19x23x1xi1>
    %c8_i32 = arith.constant 8 : i32
    %19 = vector.broadcast %c8_i32 : i32 to vector<1x1x128xi32>
    %20 = arith.cmpi slt, %4, %19 : vector<1x1x128xi32>
    %21 = vector.broadcast %18 : vector<19x23x1xi1> to vector<19x23x128xi1>
    %22 = vector.broadcast %20 : vector<1x1x128xi1> to vector<19x23x128xi1>
    %23 = arith.andi %21, %22 : vector<19x23x128xi1>
    %cst = arith.constant 0.000000e+00 : f32
    %24 = vector.broadcast %cst : f32 to vector<19x23x128xf32>
    %25 = arith.select %23, %1, %24 : vector<19x23x128xi1>, vector<19x23x128xf32>
    %26 = vector.shape_cast %25 : vector<19x23x128xf32> to vector<1x19x23x128xf32>
    %cst_5 = arith.constant dense<0.000000e+00> : vector<1xf32>
    %27 = vector.multi_reduction <add>, %26, %cst_5 [1, 2, 3] : vector<1x19x23x128xf32> to vector<1xf32>
    %28 = vector.shape_cast %27 : vector<1xf32> to vector<1x1x1x1xf32>
    %29 = vector.extract %28[0, 0, 0, 0] : f32 from vector<1x1x1x1xf32>
    %cst_6 = arith.constant 4.8828125E-4 : f32
    %30 = arith.mulf %29, %cst_6 : f32
    %31 = vector.broadcast %30 : f32 to vector<19x23x128xf32>
    %32 = arith.subf %1, %31 : vector<19x23x128xf32>
    %33 = arith.mulf %32, %32 : vector<19x23x128xf32>
    %cst_7 = arith.constant 0.000000e+00 : f32
    %34 = vector.broadcast %cst_7 : f32 to vector<19x23x128xf32>
    %35 = arith.select %23, %33, %34 : vector<19x23x128xi1>, vector<19x23x128xf32>
    %36 = vector.shape_cast %35 : vector<19x23x128xf32> to vector<1x19x23x128xf32>
    %cst_8 = arith.constant dense<0.000000e+00> : vector<1xf32>
    %37 = vector.multi_reduction <add>, %36, %cst_8 [1, 2, 3] : vector<1x19x23x128xf32> to vector<1xf32>
    %38 = vector.shape_cast %37 : vector<1xf32> to vector<1x1x1x1xf32>
    %39 = vector.extract %38[0, 0, 0, 0] : f32 from vector<1x1x1x1xf32>
    %cst_9 = arith.constant 4.8828125E-4 : f32
    %40 = arith.mulf %39, %cst_9 : f32
    %41 = vector.broadcast %30 : f32 to vector<19x23x128xf32>
    %42 = arith.subf %1, %41 : vector<19x23x128xf32>
    %cst_10 = arith.constant 9.99999974E-6 : f32
    %43 = arith.addf %40, %cst_10 : f32
    %44 = math.rsqrt %43 : f32
    %45 = vector.broadcast %44 : f32 to vector<19x23x128xf32>
    %46 = arith.mulf %42, %45 : vector<19x23x128xf32>
    %c0_11 = arith.constant 0 : index
    %c0_12 = arith.constant 0 : index
    %47 = vector.load %arg2[%c0_11, %c0_12] : memref<1x128xf32, #tpu.memory_space<vmem>>, vector<1x128xf32>
    %48 = vector.shape_cast %47 : vector<1x128xf32> to vector<1x1x128xf32>
    %49 = vector.broadcast %48 : vector<1x1x128xf32> to vector<19x23x128xf32>
    %50 = arith.mulf %46, %49 : vector<19x23x128xf32>
    %c0_13 = arith.constant 0 : index
    %c0_14 = arith.constant 0 : index
    %51 = vector.load %arg3[%c0_13, %c0_14] : memref<1x128xf32, #tpu.memory_space<vmem>>, vector<1x128xf32>
    %52 = vector.shape_cast %51 : vector<1x128xf32> to vector<1x1x128xf32>
    %53 = vector.broadcast %52 : vector<1x1x128xf32> to vector<19x23x128xf32>
    %54 = arith.addf %50, %53 : vector<19x23x128xf32>
    %c0_15 = arith.constant 0 : index
    %c0_16 = arith.constant 0 : index
    %c0_17 = arith.constant 0 : index
    %c0_18 = arith.constant 0 : index
    %55 = vector.load %arg4[%c0_15, %c0_16, %c0_17, %c0_18] : memref<1x19x23x128xf32, #tpu.memory_space<vmem>>, vector<1x19x23x128xf32>
    %56 = vector.shape_cast %55 : vector<1x19x23x128xf32> to vector<19x23x128xf32>
    %57 = arith.addf %56, %54 : vector<19x23x128xf32>
    %cst_19 = arith.constant 5.000000e-01 : f32
    %58 = vector.broadcast %cst_19 : f32 to vector<19x23x128xf32>
    %59 = arith.mulf %58, %57 : vector<19x23x128xf32>
    %cst_20 = arith.constant 0.707106769 : f32
    %60 = vector.broadcast %cst_20 : f32 to vector<19x23x128xf32>
    %61 = arith.mulf %57, %60 : vector<19x23x128xf32>
    %62 = math.erf %61 : vector<19x23x128xf32>
    %cst_21 = arith.constant 1.000000e+00 : f32
    %63 = vector.broadcast %cst_21 : f32 to vector<19x23x128xf32>
    %64 = arith.addf %63, %62 : vector<19x23x128xf32>
    %65 = arith.mulf %59, %64 : vector<19x23x128xf32>
    %cst_22 = arith.constant 0.000000e+00 : f32
    %66 = vector.broadcast %cst_22 : f32 to vector<19x23x128xf32>
    %67 = arith.select %23, %65, %66 : vector<19x23x128xi1>, vector<19x23x128xf32>
    %c0_23 = arith.constant 0 : index
    %c0_24 = arith.constant 0 : index
    %c0_25 = arith.constant 0 : index
    %c0_26 = arith.constant 0 : index
    %68 = vector.load %arg5[%c0_23, %c0_24, %c0_25, %c0_26] : memref<1x19x23x128xf32, #tpu.memory_space<vmem>>, vector<1x19x23x128xf32>
    %69 = vector.shape_cast %68 : vector<1x19x23x128xf32> to vector<19x23x128xf32>
    %70 = vector.shape_cast %67 : vector<19x23x128xf32> to vector<1x19x23x128xf32>
    tpu.vector_store %arg5[%c0_23, %c0_24, %c0_25, %c0_26], %70 {strides = array<i32>} : memref<1x19x23x128xf32, #tpu.memory_space<vmem>>, vector<1x19x23x128xf32>,
    return
  }
  func.func @transform_0(%arg0: i32) -> (i32, i32, i32, i32) {
    %c0_i32 = arith.constant 0 : i32
    %c0_i32_0 = arith.constant 0 : i32
    %c0_i32_1 = arith.constant 0 : i32
    %c0_i32_2 = arith.constant 0 : i32
    return %arg0, %c0_i32, %c0_i32_0, %c0_i32_1 : i32, i32, i32, i32
  }
  func.func @transform_1(%arg0: i32) -> (i32, i32) {
    %c0_i32 = arith.constant 0 : i32
    %c0_i32_0 = arith.constant 0 : i32
    %c0_i32_1 = arith.constant 0 : i32
    return %c0_i32, %c0_i32_0 : i32, i32
  }
  func.func @transform_2(%arg0: i32) -> (i32, i32) {
    %c0_i32 = arith.constant 0 : i32
    %c0_i32_0 = arith.constant 0 : i32
    %c0_i32_1 = arith.constant 0 : i32
    return %c0_i32, %c0_i32_0 : i32, i32
  }
  func.func @transform_3(%arg0: i32) -> (i32, i32, i32, i32) {
    %c0_i32 = arith.constant 0 : i32
    %c0_i32_0 = arith.constant 0 : i32
    %c0_i32_1 = arith.constant 0 : i32
    %c0_i32_2 = arith.constant 0 : i32
    return %arg0, %c0_i32, %c0_i32_0, %c0_i32_1 : i32, i32, i32, i32
  }
  func.func @transform_4(%arg0: i32) -> (i32, i32, i32, i32) {
    %c0_i32 = arith.constant 0 : i32
    %c0_i32_0 = arith.constant 0 : i32
    %c0_i32_1 = arith.constant 0 : i32
    %c0_i32_2 = arith.constant 0 : i32
    return %arg0, %c0_i32, %c0_i32_0, %c0_i32_1 : i32, i32, i32, i32
  }
}

</mosaic_0001>

<bundles_post_ra>
// kernel: fwd.9
= control target key start
LH: loop header
LB: loop body
LE: loop exit
PB: predicated region body
PF: predicated region fallthrough
CT: control target
= control target key end

     0   :  { %s1925_s12 = smov 0   ;;  %s3577_s0 = inlined_call_operand.vmem [shape: f32[2,19,23,128], index: 0, kind: input, shape index: {}]   ;;  %s3578_s1 = inlined_call_operand.vmem [shape: f32[1,128], index: 1, kind: input, shape index: {}]   ;;  %s3579_s2 = inlined_call_operand.vmem [shape: f32[1,128], index: 2, kind: input, shape index: {}]   ;;  %s3580_s3 = inlined_call_operand.vmem [shape: bf16[2,19,23,128], index: 3, kind: output, shape index: {}]  }
   0x1 LB: > { %s1617_s13 = sadd.s32 4294967295, %s1902_s12   ;;  %p1621_p0 = scmp.ge.s32.totalorder %s1902_s12, 1  ;;  %s1902_s12 = sphi %s1925_s12, %s13_s12  }
   0x2   : > { %p137_p1 = scmp.lt.s32.totalorder %s1902_s12, 3 }
   0x4   : > { %p138_p2 = pnand %p1621_p0, %p137_p1 }
   0x6   : > { %141 = sbr.rel (%p138_p2) target bundleno = 829 (0x33d), region = 32 }
   0xd   : > { %p161_p3 = scmp.lt.s32.totalorder %s1617_s13, 1  ;;  %v228_v0 = vlaneseq  ;;  %v3597_v6 = vmov 0  ;;  %v3600_v10 = vmov 0  ;;  %vm343_vm5 = vcmask 1046528  }
   0xe   : > { %vm1466_vm6 = vcmask 1043456   ;;  %vm1467_vm7 = vsmask.f32 3328 }
   0xf   : > { %s3711_s13 = smov (!%p161_p3, %s1617_s13), 1  ;;  %v229_v1 = vshrl.u32 %v228_v0, 7  ;;  %v1936_v2 = vand.u32 127, %v228_v0  ;;  %vm2675_vm8 = vmand %vm1466_vm6, %vm1467_vm7 }
  0x10   : > { %s1781_s14 = smul.u32 456, %s3711_s13 }
  0x11   : > { %3596 = vst [vmem:[#allocation2_spill] sm:$0xff] %v1936_v2  ;;  %v231_v3 = vadd.s32 16, %v229_v1  ;;  %vm234_vm0 = vcmp.ge.s32.totalorder %v229_v1, 1  ;;  %vm264_vm1 = vcmp.lt.s32.totalorder %v1936_v2, 8  ;;  %s1782_s23 = smul.u32 228, %s3711_s13 }
  0x12   : > { %s1941_s17 = scalar_lea.vmem %s3577_s0, %s1781_s14  ;;  %vm1952_vm2 = vmand %vm234_vm0, %vm264_vm1 }
  0x13   : > { %v1945_v4 = vld [vmem:[%s1941_s17 + $0x18] sm:$0xff]  ;;  %v1948_v5 = vld [vmem:[%s1941_s17 + $0x20] sm:$0xff]  ;;  %v3598_v6 = vsel %vm1952_vm2, 4294967295, %v3597_v6  ;;  %vm251_vm3 = vcmp.le.s32.totalorder %v231_v3, 16  ;;  %v1957_v7 = vld [vmem:[%s1941_s17 + $0x28] sm:$0x7f]  ;;  %s2666_s26 = scalar_lea.vmem %s3580_s3, %s1782_s23 }
  0x14   : > { %3599 = vst [vmem:[#allocation3_spill] sm:$0xff] %v3598_v6  ;;  %v288_v8 = vsel %vm1952_vm2, %v1945_v4, 0.0  ;;  %v289_v9 = vsel %vm264_vm1, %v1948_v5, 0.0  ;;  %vm1967_vm4 = vmand %vm251_vm3, %vm264_vm1  ;;  %v1972_v11 = vld [vmem:[%s1941_s17 + $0x30] sm:$0xff]  ;;  %v1978_v14 = vld [vmem:[%s1941_s17 + $0x40] sm:$0x7f] }
  0x15   : > { %v3601_v10 = vsel %vm1967_vm4, 4294967295, %v3600_v10  ;;  %v290_v12 = vsel %vm1967_vm4, %v1957_v7, 0.0  ;;  %v347_v13 = vadd.f32 %v289_v9, %v288_v8  ;;  %v1981_v15 = vld [vmem:[%s1941_s17 + $0x38] sm:$0xff]  ;;  %v291_v16 = vsel %vm1952_vm2, %v1972_v11, 0.0  ;;  %v1994_v21 = vld [vmem:[%s1941_s17 + $0x48] sm:$0xff]  ;;  %v2001_v25 = vld [vmem:[%s1941_s17 + $0x50] sm:$0xff] }
  0x16   : > { %3602 = vst [vmem:[#allocation4_spill] sm:$0xff] %v3601_v10  ;;  %v348_v17 = vsel %vm343_vm5, %v290_v12, 0.0  ;;  %v293_v18 = vsel %vm1967_vm4, %v1978_v14, 0.0  ;;  %v292_v20 = vsel %vm264_vm1, %v1981_v15, 0.0  ;;  %v1997_v23 = vld [vmem:[%s1941_s17 + $0x58] sm:$0x7f] }
  0x17   : > { %v349_v19 = vadd.f32 %v348_v17, %v347_v13  ;;  %v352_v24 = vsel %vm343_vm5, %v293_v18, 0.0  ;;  %v294_v27 = vsel %vm1952_vm2, %v1994_v21, 0.0  ;;  %v296_v28 = vsel %vm1967_vm4, %v1997_v23, 0.0  ;;  %v2013_v31 = vld [vmem:[%s1941_s17 + $0x60] sm:$0xff]  ;;  %v2016_v33 = vld [vmem:[%s1941_s17 + $0x70] sm:$0x7f] }
  0x18   : > { %v295_v30 = vsel %vm264_vm1, %v2001_v25, 0.0  ;;  %v356_v34 = vsel %vm343_vm5, %v296_v28, 0.0  ;;  %v2020_v35 = vld [vmem:[%s1941_s17 + $0x68] sm:$0xff]  ;;  %v297_v37 = vsel %vm1952_vm2, %v2013_v31, 0.0  ;;  %v299_v38 = vsel %vm1967_vm4, %v2016_v33, 0.0  ;;  %v2032_v41 = vld [vmem:[%s1941_s17 + $0x78] sm:$0xff] }
  0x19   : > { %v350_v22 = vadd.f32 %v349_v19, %v291_v16  ;;  %v298_v40 = vsel %vm264_vm1, %v2020_v35, 0.0  ;;  %v2035_v43 = vld [vmem:[%s1941_s17 + $0x88] sm:$0x7f]  ;;  %v360_v44 = vsel %vm343_vm5, %v299_v38, 0.0  ;;  %v2039_v45 = vld [vmem:[%s1941_s17 + $0x80] sm:$0xff]  ;;  %v300_v47 = vsel %vm1952_vm2, %v2032_v41, 0.0 }
  0x1a   : > { %v302_v48 = vsel %vm1967_vm4, %v2035_v43, 0.0  ;;  %v301_v50 = vsel %vm264_vm1, %v2039_v45, 0.0  ;;  %v2051_v51 = vld [vmem:[%s1941_s17 + $0x90] sm:$0xff]  ;;  %v2054_v53 = vld [vmem:[%s1941_s17 + $0xa0] sm:$0x7f]  ;;  %v2058_v55 = vld [vmem:[%s1941_s17 + $0x98] sm:$0xff] }
  0x1b   : > { %v351_v26 = vadd.f32 %v350_v22, %v292_v20  ;;  %v364_v54 = vsel %vm343_vm5, %v302_v48, 0.0  ;;  %v303_v57 = vsel %vm1952_vm2, %v2051_v51, 0.0  ;;  %v305_v58 = vsel %vm1967_vm4, %v2054_v53, 0.0  ;;  %v2070_v61 = vld [vmem:[%s1941_s17 + $0xa8] sm:$0xff]  ;;  %v2073_v63 = vld [vmem:[%s1941_s17 + $0xb8] sm:$0x7f] }
  0x1c   : > { %v304_v60 = vsel %vm264_vm1, %v2058_v55, 0.0  ;;  %v368_v0 = vsel %vm343_vm5, %v305_v58, 0.0  ;;  %v2077_v1 = vld [vmem:[%s1941_s17 + $0xb0] sm:$0xff]  ;;  %v306_v8 = vsel %vm1952_vm2, %v2070_v61, 0.0  ;;  %v308_v9 = vsel %vm1967_vm4, %v2073_v63, 0.0  ;;  %v2089_v16 = vld [vmem:[%s1941_s17 + $0xc0] sm:$0xff] }
  0x1d   : > { %v353_v29 = vadd.f32 %v352_v24, %v351_v26  ;;  %v307_v13 = vsel %vm264_vm1, %v2077_v1, 0.0  ;;  %v2092_v18 = vld [vmem:[%s1941_s17 + $0xd0] sm:$0x7f]  ;;  %v372_v19 = vsel %vm343_vm5, %v308_v9, 0.0  ;;  %v2096_v20 = vld [vmem:[%s1941_s17 + $0xc8] sm:$0xff]  ;;  %v309_v24 = vsel %vm1952_vm2, %v2089_v16, 0.0 }
  0x1e   : > { %v311_v26 = vsel %vm1967_vm4, %v2092_v18, 0.0  ;;  %v310_v28 = vsel %vm264_vm1, %v2096_v20, 0.0  ;;  %v2146_v58 = vld [vmem:[%s1941_s17 + $0x108] sm:$0xff] }
  0x1f   : > { %v354_v32 = vadd.f32 %v353_v29, %v294_v27  ;;  %v2108_v29 = vld [vmem:[%s1941_s17 + $0xd8] sm:$0xff] }
  0x20   : > { %v312_v38 = vsel %vm1952_vm2, %v2108_v29, 0.0 }
  0x21   : > { %v355_v36 = vadd.f32 %v354_v32, %v295_v30  ;;  %v2111_v32 = vld [vmem:[%s1941_s17 + $0xe8] sm:$0x7f] }
  0x23   : > { %v357_v39 = vadd.f32 %v356_v34, %v355_v36  ;;  %v376_v34 = vsel %vm343_vm5, %v311_v26, 0.0  ;;  %v2115_v36 = vld [vmem:[%s1941_s17 + $0xe0] sm:$0xff]  ;;  %v2172_v26 = vld [vmem:[%s1941_s17 + $0x128] sm:$0xff] }
  0x25   : > { %v358_v42 = vadd.f32 %v357_v39, %v297_v37  ;;  %v314_v39 = vsel %vm1967_vm4, %v2111_v32, 0.0 }
  0x26   : > { %v380_v48 = vsel %vm343_vm5, %v314_v39, 0.0 }
  0x27   : > { %v359_v46 = vadd.f32 %v358_v42, %v298_v40  ;;  %v313_v42 = vsel %vm264_vm1, %v2115_v36, 0.0 }
  0x29   : > { %v361_v49 = vadd.f32 %v360_v44, %v359_v46  ;;  %v2127_v44 = vld [vmem:[%s1941_s17 + $0xf0] sm:$0xff] }
  0x2b   : > { %v362_v52 = vadd.f32 %v361_v49, %v300_v47  ;;  %v2130_v47 = vld [vmem:[%s1941_s17 + $0x100] sm:$0x7f]  ;;  %v2134_v49 = vld [vmem:[%s1941_s17 + $0xf8] sm:$0xff] }
  0x2d   : > { %v363_v56 = vadd.f32 %v362_v52, %v301_v50  ;;  %v315_v52 = vsel %vm1952_vm2, %v2127_v44, 0.0 }
  0x2f   : > { %v365_v59 = vadd.f32 %v364_v54, %v363_v56  ;;  %v317_v54 = vsel %vm1967_vm4, %v2130_v47, 0.0 }
  0x31   : > { %v366_v62 = vadd.f32 %v365_v59, %v303_v57  ;;  %v316_v57 = vsel %vm264_vm1, %v2134_v49, 0.0 }
  0x33   : > { %v367_v3 = vadd.f32 %v366_v62, %v304_v60  ;;  %v2149_v60 = vld [vmem:[%s1941_s17 + $0x118] sm:$0x7f]  ;;  %v384_v62 = vsel %vm343_vm5, %v317_v54, 0.0 }
  0x34   : > { %v320_v9 = vsel %vm1967_vm4, %v2149_v60, 0.0 }
  0x35   : > { %v369_v12 = vadd.f32 %v368_v0, %v367_v3  ;;  %v2153_v0 = vld [vmem:[%s1941_s17 + $0x110] sm:$0xff] }
  0x37   : > { %v370_v17 = vadd.f32 %v369_v12, %v306_v8  ;;  %v318_v8 = vsel %vm1952_vm2, %v2146_v58, 0.0 }
  0x39   : > { %v371_v22 = vadd.f32 %v370_v17, %v307_v13  ;;  %v319_v13 = vsel %vm264_vm1, %v2153_v0, 0.0  ;;  %v2165_v17 = vld [vmem:[%s1941_s17 + $0x120] sm:$0xff] }
  0x3b   : > { %v373_v27 = vadd.f32 %v372_v19, %v371_v22  ;;  %v2168_v22 = vld [vmem:[%s1941_s17 + $0x130] sm:$0x7f] }
  0x3d   : > { %v374_v30 = vadd.f32 %v373_v27, %v309_v24  ;;  %v388_v24 = vsel %vm343_vm5, %v320_v9, 0.0 }
  0x3f   : > { %v375_v37 = vadd.f32 %v374_v30, %v310_v28  ;;  %v321_v28 = vsel %vm1952_vm2, %v2165_v17, 0.0  ;;  %v323_v30 = vsel %vm1967_vm4, %v2168_v22, 0.0 }
  0x41   : > { %v377_v40 = vadd.f32 %v376_v34, %v375_v37  ;;  %v322_v37 = vsel %vm264_vm1, %v2172_v26, 0.0 }
  0x43   : > { %v378_v46 = vadd.f32 %v377_v40, %v312_v38  ;;  %v2184_v38 = vld [vmem:[%s1941_s17 + $0x138] sm:$0xff]  ;;  %v2187_v40 = vld [vmem:[%s1941_s17 + $0x148] sm:$0x7f] }
  0x45   : > { %v379_v50 = vadd.f32 %v378_v46, %v313_v42  ;;  %v392_v42 = vsel %vm343_vm5, %v323_v30, 0.0  ;;  %v2191_v46 = vld [vmem:[%s1941_s17 + $0x140] sm:$0xff]  ;;  %v2225_v30 = vld [vmem:[%s1941_s17 + $0x178] sm:$0x7f] }
  0x46   : > { %3604 = vst [vmem:[#allocation6_spill] sm:$0xff] %v2225_v30 }
  0x47   : > { %v381_v56 = vadd.f32 %v380_v48, %v379_v50  ;;  %v324_v50 = vsel %vm1952_vm2, %v2184_v38, 0.0 }
  0x49   : > { %v382_v59 = vadd.f32 %v381_v56, %v315_v52  ;;  %v326_v52 = vsel %vm1967_vm4, %v2187_v40, 0.0  ;;  %v325_v56 = vsel %vm264_vm1, %v2191_v46, 0.0 }
  0x4b   : > { %v383_v3 = vadd.f32 %v382_v59, %v316_v57  ;;  %v2203_v57 = vld [vmem:[%s1941_s17 + $0x150] sm:$0xff] }
  0x4d   : > { %v385_v12 = vadd.f32 %v384_v62, %v383_v3  ;;  %v2206_v62 = vld [vmem:[%s1941_s17 + $0x160] sm:$0x7f]  ;;  %v396_v3 = vsel %vm343_vm5, %v326_v52, 0.0 }
  0x4f   : > { %v386_v19 = vadd.f32 %v385_v12, %v318_v8  ;;  %v2210_v8 = vld [vmem:[%s1941_s17 + $0x158] sm:$0xff]  ;;  %v327_v12 = vsel %vm1952_vm2, %v2203_v57, 0.0 }
  0x51   : > { %v387_v27 = vadd.f32 %v386_v19, %v319_v13  ;;  %v329_v13 = vsel %vm1967_vm4, %v2206_v62, 0.0 }
  0x53   : > { %v389_v34 = vadd.f32 %v388_v24, %v387_v27  ;;  %v328_v24 = vsel %vm264_vm1, %v2210_v8, 0.0  ;;  %v2222_v27 = vld [vmem:[%s1941_s17 + $0x168] sm:$0xff] }
  0x54   : > { %3603 = vst [vmem:[#allocation5_spill] sm:$0xff] %v2222_v27 }
  0x55   : > { %v390_v39 = vadd.f32 %v389_v34, %v321_v28  ;;  %v400_v34 = vsel %vm343_vm5, %v329_v13, 0.0 }
  0x57   : > { %v391_v48 = vadd.f32 %v390_v39, %v322_v37  ;;  %v2229_v37 = vld [vmem:[%s1941_s17 + $0x170] sm:$0xff] }
  0x58   : > { %3605 = vst [vmem:[#allocation7_spill] sm:$0xff] %v2229_v37  ;;  %v331_v52 = vsel %vm264_vm1, %v2229_v37, 0.0 }
  0x59   : > { %v393_v54 = vadd.f32 %v392_v42, %v391_v48  ;;  %v330_v42 = vsel %vm1952_vm2, %v2222_v27, 0.0  ;;  %v332_v48 = vsel %vm1967_vm4, %v2225_v30, 0.0 }
  0x5b   : > { %v394_v59 = vadd.f32 %v393_v54, %v324_v50  ;;  %v2241_v54 = vld [vmem:[%s1941_s17 + $0x180] sm:$0xff] }
  0x5c   : > { %3606 = vst [vmem:[#allocation8_spill] sm:$0xff] %v2241_v54  ;;  %v333_v13 = vsel %vm1952_vm2, %v2241_v54, 0.0 }
  0x5d   : > { %v395_v9 = vadd.f32 %v394_v59, %v325_v56  ;;  %v2244_v59 = vld [vmem:[%s1941_s17 + $0x190] sm:$0x7f] }
  0x5f   : > { %v397_v19 = vadd.f32 %v396_v3, %v395_v9  ;;  %v404_v3 = vsel %vm343_vm5, %v332_v48, 0.0  ;;  %v2248_v9 = vld [vmem:[%s1941_s17 + $0x188] sm:$0xff] }
  0x61   : > { %v398_v28 = vadd.f32 %v397_v19, %v327_v12  ;;  %v335_v19 = vsel %vm1967_vm4, %v2244_v59, 0.0 }
  0x63   : > { %v399_v39 = vadd.f32 %v398_v28, %v328_v24  ;;  %v334_v28 = vsel %vm264_vm1, %v2248_v9, 0.0 }
  0x65   : > { %v401_v50 = vadd.f32 %v400_v34, %v399_v39  ;;  %v408_v39 = vsel %vm343_vm5, %v335_v19, 0.0 }
  0x67   : > { %v402_v56 = vadd.f32 %v401_v50, %v330_v42 }
  0x69   : > { %v403_v12 = vadd.f32 %v402_v56, %v331_v52 }
  0x6b   : > { %v405_v24 = vadd.f32 %v404_v3, %v403_v12 }
  0x6d   : > { %v406_v34 = vadd.f32 %v405_v24, %v333_v13 }
  0x6f   : > { %v407_v42 = vadd.f32 %v406_v34, %v334_v28 }
  0x71   : > { %v409_v48 = vadd.f32 %v408_v39, %v407_v42 }
  0x73   : > { %418 = vadd.xlane.f32.xlu0 %v409_v48 }
 0x100   : > { %v419_v50 = vpop.xlane.xlu0 %418 }
 0x101   : > { %v420_v52 = vrot.slane %v419_v50, 4 }
 0x103   : > { %v421_v56 = vadd.f32 %v420_v52, %v419_v50 }
 0x105   : > { %v422_v37 = vrot.slane %v421_v56, 2 }
 0x107   : > { %v423_v54 = vadd.f32 %v422_v37, %v421_v56 }
 0x109   : > { %v424_v30 = vrot.slane %v423_v54, 1 }
 0x10b   : > { %v425_v27 = vadd.f32 %v424_v30, %v423_v54 }
 0x10d   : > { %1783 = vpush %v425_v27 }
 0x13e   : > { %s1784_s18 = spop %1783 }
 0x13f   : > { %s427_s19 = smul.f32 0.00048828125, %s1784_s18 }
 0x141   : > { %v2260_v3 = vstv %s427_s19 }
 0x142   : > { %v2264_v12 = vsub.f32 %v1945_v4, %v2260_v3  ;;  %v2268_v13 = vsub.f32 %v1948_v5, %v2260_v3  ;;  %v2272_v19 = vsub.f32 %v1957_v7, %v2260_v3  ;;  %v2282_v4 = vsub.f32 %v1972_v11, %v2260_v3 }
 0x143   : > { %v2286_v5 = vsub.f32 %v1978_v14, %v2260_v3  ;;  %v2290_v7 = vsub.f32 %v1981_v15, %v2260_v3  ;;  %v2305_v15 = vsub.f32 %v1994_v21, %v2260_v3  ;;  %v2311_v48 = vsub.f32 %v1997_v23, %v2260_v3 }
 0x144   : > { %v489_v30 = vmul.f32 %v2264_v12, %v2264_v12  ;;  %v490_v27 = vmul.f32 %v2268_v13, %v2268_v13  ;;  %v491_v37 = vmul.f32 %v2272_v19, %v2272_v19  ;;  %v492_v11 = vmul.f32 %v2282_v4, %v2282_v4 }
 0x145   : > { %v494_v14 = vmul.f32 %v2286_v5, %v2286_v5  ;;  %v493_v42 = vmul.f32 %v2290_v7, %v2290_v7  ;;  %v2315_v52 = vsub.f32 %v2001_v25, %v2260_v3  ;;  %v497_v23 = vmul.f32 %v2311_v48, %v2311_v48 }
 0x146   : > { %v546_v54 = vsel %vm1952_vm2, %v489_v30, 0.0  ;;  %v547_v24 = vsel %vm264_vm1, %v490_v27, 0.0  ;;  %v548_v28 = vsel %vm1967_vm4, %v491_v37, 0.0  ;;  %v549_v56 = vsel %vm1952_vm2, %v492_v11, 0.0 }
 0x147   : > { %v604_v34 = vadd.f32 %v547_v24, %v546_v54  ;;  %v605_v39 = vsel %vm343_vm5, %v548_v28, 0.0  ;;  %v551_v30 = vsel %vm1967_vm4, %v494_v14, 0.0  ;;  %v495_v27 = vmul.f32 %v2305_v15, %v2305_v15 }
 0x148   : > { %v550_v37 = vsel %vm264_vm1, %v493_v42, 0.0  ;;  %v2329_v25 = vsub.f32 %v2013_v31, %v2260_v3  ;;  %v496_v24 = vmul.f32 %v2315_v52, %v2315_v52  ;;  %v609_v28 = vsel %vm343_vm5, %v551_v30, 0.0 }
 0x149   : > { %v606_v50 = vadd.f32 %v605_v39, %v604_v34  ;;  %v2336_v11 = vsub.f32 %v2016_v33, %v2260_v3  ;;  %v2340_v34 = vsub.f32 %v2020_v35, %v2260_v3  ;;  %v552_v39 = vsel %vm1952_vm2, %v495_v27, 0.0 }
 0x14a   : > { %v554_v31 = vsel %vm1967_vm4, %v497_v23, 0.0  ;;  %v2354_v35 = vsub.f32 %v2032_v41, %v2260_v3 }
 0x14b   : > { %v607_v21 = vadd.f32 %v606_v50, %v549_v56  ;;  %v498_v50 = vmul.f32 %v2329_v25, %v2329_v25  ;;  %v553_v56 = vsel %vm264_vm1, %v496_v24, 0.0  ;;  %v500_v33 = vmul.f32 %v2336_v11, %v2336_v11 }
 0x14c   : > { %v613_v27 = vsel %vm343_vm5, %v554_v31, 0.0 }
 0x14d   : > { %v608_v54 = vadd.f32 %v607_v21, %v550_v37  ;;  %v499_v21 = vmul.f32 %v2340_v34, %v2340_v34  ;;  %v2361_v37 = vsub.f32 %v2035_v43, %v2260_v3  ;;  %v555_v24 = vsel %vm1952_vm2, %v498_v50, 0.0 }
 0x14e   : > { %v557_v41 = vsel %vm1967_vm4, %v500_v33, 0.0 }
 0x14f   : > { %v610_v14 = vadd.f32 %v609_v28, %v608_v54  ;;  %v2365_v54 = vsub.f32 %v2039_v45, %v2260_v3  ;;  %v503_v43 = vmul.f32 %v2361_v37, %v2361_v37  ;;  %v2379_v45 = vsub.f32 %v2051_v51, %v2260_v3 }
 0x150   : > { %v617_v50 = vsel %vm343_vm5, %v557_v41, 0.0 }
 0x151   : > { %v611_v42 = vadd.f32 %v610_v14, %v552_v39  ;;  %v501_v14 = vmul.f32 %v2354_v35, %v2354_v35  ;;  %v556_v39 = vsel %vm264_vm1, %v499_v21, 0.0  ;;  %v560_v51 = vsel %vm1967_vm4, %v503_v43, 0.0 }
 0x153   : > { %v612_v30 = vadd.f32 %v611_v42, %v553_v56  ;;  %v502_v42 = vmul.f32 %v2365_v54, %v2365_v54  ;;  %v2386_v56 = vsub.f32 %v2054_v53, %v2260_v3  ;;  %v558_v21 = vsel %vm1952_vm2, %v501_v14, 0.0 }
 0x154   : > { %v621_v14 = vsel %vm343_vm5, %v560_v51, 0.0 }
 0x155   : > { %v614_v23 = vadd.f32 %v613_v27, %v612_v30  ;;  %v2390_v30 = vsub.f32 %v2058_v55, %v2260_v3  ;;  %v506_v53 = vmul.f32 %v2386_v56, %v2386_v56  ;;  %v2404_v55 = vsub.f32 %v2070_v61, %v2260_v3 }
 0x157   : > { %v615_v28 = vadd.f32 %v614_v23, %v555_v24  ;;  %v504_v23 = vmul.f32 %v2379_v45, %v2379_v45  ;;  %v559_v24 = vsel %vm264_vm1, %v502_v42, 0.0  ;;  %v563_v61 = vsel %vm1967_vm4, %v506_v53, 0.0 }
 0x159   : > { %v616_v31 = vadd.f32 %v615_v28, %v556_v39  ;;  %v505_v28 = vmul.f32 %v2390_v30, %v2390_v30  ;;  %v2411_v39 = vsub.f32 %v2073_v63, %v2260_v3  ;;  %v561_v42 = vsel %vm1952_vm2, %v504_v23, 0.0 }
 0x15a   : > { %v625_v23 = vsel %vm343_vm5, %v563_v61, 0.0 }
 0x15b   : > { %v618_v33 = vadd.f32 %v617_v50, %v616_v31  ;;  %v2415_v31 = vsub.f32 %v2077_v1, %v2260_v3  ;;  %v509_v63 = vmul.f32 %v2411_v39, %v2411_v39  ;;  %v2429_v1 = vsub.f32 %v2089_v16, %v2260_v3 }
 0x15d   : > { %v619_v27 = vadd.f32 %v618_v33, %v558_v21  ;;  %v507_v33 = vmul.f32 %v2404_v55, %v2404_v55  ;;  %v562_v21 = vsel %vm264_vm1, %v505_v28, 0.0  ;;  %v566_v16 = vsel %vm1967_vm4, %v509_v63, 0.0 }
 0x15f   : > { %v620_v41 = vadd.f32 %v619_v27, %v559_v24  ;;  %v508_v27 = vmul.f32 %v2415_v31, %v2415_v31  ;;  %v2436_v24 = vsub.f32 %v2092_v18, %v2260_v3  ;;  %v564_v28 = vsel %vm1952_vm2, %v507_v33, 0.0 }
 0x160   : > { %v629_v33 = vsel %vm343_vm5, %v566_v16, 0.0 }
 0x161   : > { %v622_v43 = vadd.f32 %v621_v14, %v620_v41  ;;  %v2440_v41 = vsub.f32 %v2096_v20, %v2260_v3  ;;  %v512_v18 = vmul.f32 %v2436_v24, %v2436_v24  ;;  %v2454_v20 = vsub.f32 %v2108_v29, %v2260_v3 }
 0x163   : > { %v623_v50 = vadd.f32 %v622_v43, %v561_v42  ;;  %v510_v43 = vmul.f32 %v2429_v1, %v2429_v1  ;;  %v565_v42 = vsel %vm264_vm1, %v508_v27, 0.0  ;;  %v569_v29 = vsel %vm1967_vm4, %v512_v18, 0.0 }
 0x165   : > { %v624_v51 = vadd.f32 %v623_v50, %v562_v21  ;;  %v511_v50 = vmul.f32 %v2440_v41, %v2440_v41  ;;  %v2461_v21 = vsub.f32 %v2111_v32, %v2260_v3  ;;  %v567_v27 = vsel %vm1952_vm2, %v510_v43, 0.0 }
 0x166   : > { %v633_v43 = vsel %vm343_vm5, %v569_v29, 0.0 }
 0x167   : > { %v626_v53 = vadd.f32 %v625_v23, %v624_v51  ;;  %v2465_v51 = vsub.f32 %v2115_v36, %v2260_v3  ;;  %v515_v32 = vmul.f32 %v2461_v21, %v2461_v21  ;;  %v2479_v36 = vsub.f32 %v2127_v44, %v2260_v3 }
 0x169   : > { %v627_v14 = vadd.f32 %v626_v53, %v564_v28  ;;  %v513_v53 = vmul.f32 %v2454_v20, %v2454_v20  ;;  %v568_v28 = vsel %vm264_vm1, %v511_v50, 0.0  ;;  %v572_v44 = vsel %vm1967_vm4, %v515_v32, 0.0 }
 0x16b   : > { %v628_v61 = vadd.f32 %v627_v14, %v565_v42  ;;  %v514_v14 = vmul.f32 %v2465_v51, %v2465_v51  ;;  %v2486_v42 = vsub.f32 %v2130_v47, %v2260_v3  ;;  %v570_v50 = vsel %vm1952_vm2, %v513_v53, 0.0 }
 0x16c   : > { %v637_v53 = vsel %vm343_vm5, %v572_v44, 0.0 }
 0x16d   : > { %v630_v63 = vadd.f32 %v629_v33, %v628_v61  ;;  %v2490_v61 = vsub.f32 %v2134_v49, %v2260_v3  ;;  %v518_v47 = vmul.f32 %v2486_v42, %v2486_v42  ;;  %v2504_v49 = vsub.f32 %v2146_v58, %v2260_v3 }
 0x16f   : > { %v631_v23 = vadd.f32 %v630_v63, %v567_v27  ;;  %v516_v63 = vmul.f32 %v2479_v36, %v2479_v36  ;;  %v571_v27 = vsel %vm264_vm1, %v514_v14, 0.0  ;;  %v575_v58 = vsel %vm1967_vm4, %v518_v47, 0.0 }
 0x171   : > { %v632_v16 = vadd.f32 %v631_v23, %v568_v28  ;;  %v517_v23 = vmul.f32 %v2490_v61, %v2490_v61  ;;  %v2511_v28 = vsub.f32 %v2149_v60, %v2260_v3  ;;  %v573_v14 = vsel %vm1952_vm2, %v516_v63, 0.0 }
 0x172   : > { %v641_v63 = vsel %vm343_vm5, %v575_v58, 0.0 }
 0x173   : > { %v634_v18 = vadd.f32 %v633_v43, %v632_v16  ;;  %v2515_v16 = vsub.f32 %v2153_v0, %v2260_v3  ;;  %v521_v60 = vmul.f32 %v2511_v28, %v2511_v28  ;;  %v2529_v0 = vsub.f32 %v2165_v17, %v2260_v3 }
 0x175   : > { %v635_v33 = vadd.f32 %v634_v18, %v570_v50  ;;  %v519_v18 = vmul.f32 %v2504_v49, %v2504_v49  ;;  %v574_v50 = vsel %vm264_vm1, %v517_v23, 0.0  ;;  %v578_v17 = vsel %vm1967_vm4, %v521_v60, 0.0 }
 0x177   : > { %v636_v29 = vadd.f32 %v635_v33, %v571_v27  ;;  %v520_v33 = vmul.f32 %v2515_v16, %v2515_v16  ;;  %v2536_v27 = vsub.f32 %v2168_v22, %v2260_v3  ;;  %v576_v23 = vsel %vm1952_vm2, %v519_v18, 0.0 }
 0x178   : > { %v645_v18 = vsel %vm343_vm5, %v578_v17, 0.0 }
 0x179   : > { %v638_v32 = vadd.f32 %v637_v53, %v636_v29  ;;  %v2540_v29 = vsub.f32 %v2172_v26, %v2260_v3  ;;  %v524_v22 = vmul.f32 %v2536_v27, %v2536_v27  ;;  %v2554_v26 = vsub.f32 %v2184_v38, %v2260_v3 }
 0x17b   : > { %v639_v43 = vadd.f32 %v638_v32, %v573_v14  ;;  %v522_v32 = vmul.f32 %v2529_v0, %v2529_v0  ;;  %v577_v14 = vsel %vm264_vm1, %v520_v33, 0.0  ;;  %v581_v38 = vsel %vm1967_vm4, %v524_v22, 0.0 }
 0x17d   : > { %v640_v44 = vadd.f32 %v639_v43, %v574_v50  ;;  %v523_v43 = vmul.f32 %v2540_v29, %v2540_v29  ;;  %v2561_v50 = vsub.f32 %v2187_v40, %v2260_v3  ;;  %v579_v33 = vsel %vm1952_vm2, %v522_v32, 0.0 }
 0x17e   : > { %v649_v32 = vsel %vm343_vm5, %v581_v38, 0.0 }
 0x17f   : > { %v642_v47 = vadd.f32 %v641_v63, %v640_v44  ;;  %v2565_v44 = vsub.f32 %v2191_v46, %v2260_v3  ;;  %v527_v40 = vmul.f32 %v2561_v50, %v2561_v50  ;;  %v2579_v46 = vsub.f32 %v2203_v57, %v2260_v3 }
 0x181   : > { %v643_v53 = vadd.f32 %v642_v47, %v576_v23  ;;  %v525_v47 = vmul.f32 %v2554_v26, %v2554_v26  ;;  %v580_v23 = vsel %vm264_vm1, %v523_v43, 0.0  ;;  %v584_v57 = vsel %vm1967_vm4, %v527_v40, 0.0  ;;  %v3608_v40 = vld [vmem:[#allocation6_spill] sm:$0xff] }
 0x183   : > { %v644_v58 = vadd.f32 %v643_v53, %v577_v14  ;;  %v526_v53 = vmul.f32 %v2565_v44, %v2565_v44  ;;  %v2586_v14 = vsub.f32 %v2206_v62, %v2260_v3  ;;  %v582_v43 = vsel %vm1952_vm2, %v525_v47, 0.0 }
 0x185   : > { %v646_v60 = vadd.f32 %v645_v18, %v644_v58  ;;  %v2590_v58 = vsub.f32 %v2210_v8, %v2260_v3  ;;  %v530_v62 = vmul.f32 %v2586_v14, %v2586_v14  ;;  %v3607_v8 = vld [vmem:[#allocation5_spill] sm:$0xff] }
 0x187   : > { %v647_v63 = vadd.f32 %v646_v60, %v579_v33  ;;  %v528_v60 = vmul.f32 %v2579_v46, %v2579_v46  ;;  %v583_v33 = vsel %vm264_vm1, %v526_v53, 0.0  ;;  %v529_v47 = vmul.f32 %v2590_v58, %v2590_v58  ;;  %v3610_v53 = vld [vmem:[#allocation7_spill] sm:$0xff] }
 0x189   : > { %v648_v17 = vadd.f32 %v647_v63, %v580_v23  ;;  %v2604_v63 = vsub.f32 %v3607_v8, %v2260_v3  ;;  %v653_v23 = vsel %vm343_vm5, %v584_v57, 0.0  ;;  %v586_v57 = vsel %vm264_vm1, %v529_v47, 0.0 }
 0x18a   : > { %v2640_v47 = vsub.f32 %v2248_v9, %v2260_v3 }
 0x18b   : > { %v650_v22 = vadd.f32 %v649_v32, %v648_v17  ;;  %v2611_v17 = vsub.f32 %v3608_v40, %v2260_v3  ;;  %v531_v8 = vmul.f32 %v2604_v63, %v2604_v63  ;;  %v3611_v40 = vld [vmem:[#allocation8_spill] sm:$0xff] }
 0x18c   : > { %3613 = vst [vmem:[#allocation7_spill] sm:$0xff] %v2640_v47  ;;  %v535_v9 = vmul.f32 %v2640_v47, %v2640_v47 }
 0x18d   : > { %v651_v18 = vadd.f32 %v650_v22, %v582_v43  ;;  %3609 = vst [vmem:[#allocation5_spill] sm:$0xff] %v2611_v17  ;;  %v2615_v22 = vsub.f32 %v3610_v53, %v2260_v3  ;;  %v585_v43 = vsel %vm1952_vm2, %v528_v60, 0.0  ;;  %v2629_v53 = vsub.f32 %v3611_v40, %v2260_v3 }
 0x18f   : > { %v652_v38 = vadd.f32 %v651_v18, %v583_v33  ;;  %v587_v18 = vsel %vm1967_vm4, %v530_v62, 0.0  ;;  %v532_v60 = vmul.f32 %v2615_v22, %v2615_v22 }
 0x190   : > { %v657_v62 = vsel %vm343_vm5, %v587_v18, 0.0 }
 0x191   : > { %v654_v32 = vadd.f32 %v653_v23, %v652_v38  ;;  %v533_v38 = vmul.f32 %v2611_v17, %v2611_v17  ;;  %v534_v17 = vmul.f32 %v2629_v53, %v2629_v53  ;;  %v589_v18 = vsel %vm264_vm1, %v532_v60, 0.0 }
 0x192   : > { %v592_v60 = vsel %vm264_vm1, %v535_v9, 0.0 }
 0x193   : > { %v655_v33 = vadd.f32 %v654_v32, %v585_v43  ;;  %v2636_v32 = vsub.f32 %v2244_v59, %v2260_v3 }
 0x195   : > { %v656_v23 = vadd.f32 %v655_v33, %v586_v57  ;;  %3612 = vst [vmem:[#allocation6_spill] sm:$0xff] %v2636_v32  ;;  %v588_v33 = vsel %vm1952_vm2, %v531_v8, 0.0  ;;  %v590_v57 = vsel %vm1967_vm4, %v533_v38, 0.0  ;;  %v536_v59 = vmul.f32 %v2636_v32, %v2636_v32 }
 0x196   : > { %v661_v3 = vsel %vm343_vm5, %v590_v57, 0.0  ;;  %v591_v38 = vsel %vm1952_vm2, %v534_v17, 0.0 }
 0x197   : > { %v658_v43 = vadd.f32 %v657_v62, %v656_v23  ;;  %v593_v62 = vsel %vm1967_vm4, %v536_v59, 0.0 }
 0x198   : > { %v665_v32 = vsel %vm343_vm5, %v593_v62, 0.0 }
 0x199   : > { %v659_v40 = vadd.f32 %v658_v43, %v588_v33 }
 0x19b   : > { %v660_v23 = vadd.f32 %v659_v40, %v589_v18 }
 0x19d   : > { %v662_v8 = vadd.f32 %v661_v3, %v660_v23 }
 0x19f   : > { %v663_v43 = vadd.f32 %v662_v8, %v591_v38  ;;  %v1469_v8 = vld [vmem:[%s2666_s26 + $0x8] sm:$0xf]  ;;  %v3614_v38 = vmov 0 }
 0x1a0   : > { %v3615_v38 = vsel %vm2675_vm8, 4294967295, %v3614_v38 }
 0x1a1   : > { %v664_v33 = vadd.f32 %v663_v43, %v592_v60  ;;  %3616 = vst [vmem:[#allocation8_spill] sm:$0xff] %v3615_v38  ;;  %v1554_v43 = vld [vmem:[%s2666_s26 + $0xd4] sm:$0xf]  ;;  %v1559_v60 = vld [vmem:[%s2666_s26 + $0xe0] sm:$0xf] }
 0x1a3   : > { %v666_v40 = vadd.f32 %v665_v32, %v664_v33 }
 0x1a5   : > { %675 = vadd.xlane.f32.xlu0 %v666_v40 }
 0x232   : > { %v676_v18 = vpop.xlane.xlu0 %675 }
 0x233   : > { %v677_v47 = vrot.slane %v676_v18, 4 }
 0x235   : > { %v678_v57 = vadd.f32 %v677_v47, %v676_v18 }
 0x237   : > { %v679_v23 = vrot.slane %v678_v57, 2 }
 0x239   : > { %v680_v3 = vadd.f32 %v679_v23, %v678_v57 }
 0x23b   : > { %v681_v6 = vrot.slane %v680_v3, 1 }
 0x23d   : > { %v682_v17 = vadd.f32 %v681_v6, %v680_v3  ;;  %v1904_v6 = vmov 0.0|0.0  }
 0x23e   : > { %v1626_v32 = vcombine.low %v1904_v6, %v1904_v6  ;;  %v1627_v47 = vcombine.high %v1904_v6, %v1904_v6 }
 0x23f   : > { %1785 = vpush %v682_v17 }
 0x240   : > { %1464 = vst [vmem:[%s2666_s26] sm:$0xf] %v1626_v32  ;;  %1465 = vst [vmem:[%s2666_s26 + $0x4] sm:$0xf] %v1627_v47  ;;  %v1470_v62 = vsel %vm2675_vm8, %v1626_v32, %v1469_v8  ;;  %v1555_v33 = vsel %vm2675_vm8, %v1626_v32, %v1554_v43  ;;  %v1560_v40 = vsel %vm2675_vm8, %v1626_v32, %v1559_v60  ;;  %v3619_v60 = vld [vmem:[#allocation6_spill] sm:$0xff] }
 0x241   : > { %1552 = vst [vmem:[%s2666_s26 + $0xcc] sm:$0xf] %v1626_v32  ;;  %1553 = vst [vmem:[%s2666_s26 + $0xd0] sm:$0xf] %v1627_v47 }
 0x242   : > { %1557 = vst [vmem:[%s2666_s26 + $0xd8] sm:$0xf] %v1626_v32  ;;  %1558 = vst [vmem:[%s2666_s26 + $0xdc] sm:$0xf] %v1627_v47 }
 0x243   : > { %1471 = vst [vmem:[%s2666_s26 + $0x8] sm:$0xf] %v1470_v62  ;;  %1556 = vst [vmem:[%s2666_s26 + $0xd4] sm:$0xf] %v1555_v33  ;;  %v3618_v62 = vld [vmem:[#allocation7_spill] sm:$0xff] }
 0x244   : > { %1561 = vst [vmem:[%s2666_s26 + $0xe0] sm:$0xf] %v1560_v40 }
 0x270   : > { %s1786_s20 = spop %1785 }
 0x271   : > { %s684_s21 = smul.f32 0.00048828125, %s1786_s20 }
 0x273   : > { %s685_s22 = sadd.f32 1e-05, %s684_s21 }
 0x275   : > { %v686_v59 = vstv %s685_s22 }
 0x276   : > { %1798 = vrsqrt.f32 %v686_v59 }
 0x280   : > { %v1799_v9 = vpop.eup %1798 }
 0x281   : > { %1787 = vpush %v1799_v9 }
 0x2b2   : > { %s1788_s27 = spop %1787 }
 0x2b3   : > { %v689_v18 = vstv %s1788_s27 }
 0x2b4   : > { %v693_v57 = vmul.f32 %v689_v18, %v2264_v12  ;;  %v694_v23 = vmul.f32 %v689_v18, %v2268_v13  ;;  %v695_v3 = vmul.f32 %v689_v18, %v2272_v19  ;;  %v696_v17 = vmul.f32 %v689_v18, %v2282_v4 }
 0x2b5   : > { %v697_v59 = vmul.f32 %v689_v18, %v2290_v7  ;;  %v698_v9 = vmul.f32 %v689_v18, %v2286_v5  ;;  %v699_v6 = vmul.f32 %v689_v18, %v2305_v15  ;;  %v700_v32 = vmul.f32 %v689_v18, %v2315_v52 }
 0x2b6   : > { %v701_v47 = vmul.f32 %v689_v18, %v2311_v48  ;;  %v702_v8 = vmul.f32 %v689_v18, %v2329_v25  ;;  %v703_v12 = vmul.f32 %v689_v18, %v2340_v34  ;;  %v704_v13 = vmul.f32 %v689_v18, %v2336_v11 }
 0x2b7   : > { %v705_v19 = vmul.f32 %v689_v18, %v2354_v35  ;;  %v706_v4 = vmul.f32 %v689_v18, %v2365_v54  ;;  %v707_v7 = vmul.f32 %v689_v18, %v2361_v37  ;;  %v708_v5 = vmul.f32 %v689_v18, %v2379_v45 }
 0x2b8   : > { %v709_v15 = vmul.f32 %v689_v18, %v2390_v30  ;;  %v710_v52 = vmul.f32 %v689_v18, %v2386_v56  ;;  %v711_v48 = vmul.f32 %v689_v18, %v2404_v55  ;;  %v712_v25 = vmul.f32 %v689_v18, %v2415_v31 }
 0x2b9   : > { %v713_v34 = vmul.f32 %v689_v18, %v2411_v39  ;;  %v714_v11 = vmul.f32 %v689_v18, %v2429_v1  ;;  %v715_v35 = vmul.f32 %v689_v18, %v2440_v41  ;;  %v716_v54 = vmul.f32 %v689_v18, %v2436_v24 }
 0x2ba   : > { %v717_v37 = vmul.f32 %v689_v18, %v2454_v20  ;;  %v718_v45 = vmul.f32 %v689_v18, %v2465_v51  ;;  %v719_v30 = vmul.f32 %v689_v18, %v2461_v21  ;;  %v720_v56 = vmul.f32 %v689_v18, %v2479_v36 }
 0x2bb   : > { %v721_v55 = vmul.f32 %v689_v18, %v2490_v61  ;;  %v722_v31 = vmul.f32 %v689_v18, %v2486_v42  ;;  %v723_v39 = vmul.f32 %v689_v18, %v2504_v49  ;;  %v724_v1 = vmul.f32 %v689_v18, %v2515_v16  ;;  %v1624_v42 = vld [vmem:[%s3578_s1] ss:$0 sm:$0xff] }
 0x2bc   : > { %v725_v41 = vmul.f32 %v689_v18, %v2511_v28  ;;  %v726_v24 = vmul.f32 %v689_v18, %v2529_v0  ;;  %v727_v20 = vmul.f32 %v689_v18, %v2540_v29  ;;  %v728_v51 = vmul.f32 %v689_v18, %v2536_v27  ;;  %v3617_v29 = vld [vmem:[#allocation5_spill] sm:$0xff] }
 0x2bd   : > { %v729_v21 = vmul.f32 %v689_v18, %v2554_v26  ;;  %v730_v36 = vmul.f32 %v689_v18, %v2565_v44  ;;  %v731_v61 = vmul.f32 %v689_v18, %v2561_v50  ;;  %v732_v49 = vmul.f32 %v689_v18, %v2579_v46 }
 0x2be   : > { %v733_v28 = vmul.f32 %v689_v18, %v2590_v58  ;;  %v734_v16 = vmul.f32 %v689_v18, %v2586_v14  ;;  %v735_v0 = vmul.f32 %v689_v18, %v2604_v63  ;;  %v736_v27 = vmul.f32 %v689_v18, %v2615_v22 }
 0x2bf   : > { %v737_v26 = vmul.f32 %v689_v18, %v3617_v29  ;;  %v738_v44 = vmul.f32 %v689_v18, %v2629_v53  ;;  %v739_v43 = vmul.f32 %v689_v18, %v3618_v62  ;;  %v740_v33 = vmul.f32 %v689_v18, %v3619_v60 }
 0x2c0   : > { %v757_v40 = vmul.f32 %v1624_v42, %v693_v57  ;;  %v758_v50 = vmul.f32 %v1624_v42, %v694_v23  ;;  %v759_v38 = vmul.f32 %v1624_v42, %v695_v3  ;;  %v760_v46 = vmul.f32 %v1624_v42, %v696_v17 }
 0x2c1   : > { %v761_v10 = vmul.f32 %v1624_v42, %v697_v59  ;;  %v762_v58 = vmul.f32 %v1624_v42, %v698_v9  ;;  %v763_v2 = vmul.f32 %v1624_v42, %v699_v6  ;;  %v764_v14 = vmul.f32 %v1624_v42, %v700_v32 }
 0x2c2   : > { %v765_v63 = vmul.f32 %v1624_v42, %v701_v47  ;;  %v766_v22 = vmul.f32 %v1624_v42, %v702_v8  ;;  %v767_v29 = vmul.f32 %v1624_v42, %v703_v12  ;;  %v768_v53 = vmul.f32 %v1624_v42, %v704_v13 }
 0x2c3   : > { %v769_v62 = vmul.f32 %v1624_v42, %v705_v19  ;;  %v770_v18 = vmul.f32 %v1624_v42, %v706_v4  ;;  %v771_v60 = vmul.f32 %v1624_v42, %v707_v7  ;;  %v772_v57 = vmul.f32 %v1624_v42, %v708_v5 }
 0x2c4   : > { %v773_v23 = vmul.f32 %v1624_v42, %v709_v15  ;;  %v774_v3 = vmul.f32 %v1624_v42, %v710_v52  ;;  %v775_v17 = vmul.f32 %v1624_v42, %v711_v48  ;;  %v776_v59 = vmul.f32 %v1624_v42, %v712_v25 }
 0x2c5   : > { %v777_v9 = vmul.f32 %v1624_v42, %v713_v34  ;;  %v778_v6 = vmul.f32 %v1624_v42, %v714_v11  ;;  %v779_v32 = vmul.f32 %v1624_v42, %v715_v35  ;;  %v780_v47 = vmul.f32 %v1624_v42, %v716_v54  ;;  %v1625_v54 = vld [vmem:[%s3579_s2] ss:$0 sm:$0xff] }
 0x2c6   : > { %v781_v8 = vmul.f32 %v1624_v42, %v717_v37  ;;  %v782_v12 = vmul.f32 %v1624_v42, %v718_v45  ;;  %v783_v13 = vmul.f32 %v1624_v42, %v719_v30  ;;  %v784_v19 = vmul.f32 %v1624_v42, %v720_v56 }
 0x2c7   : > { %v785_v4 = vmul.f32 %v1624_v42, %v721_v55  ;;  %v786_v7 = vmul.f32 %v1624_v42, %v722_v31  ;;  %v787_v5 = vmul.f32 %v1624_v42, %v723_v39  ;;  %v788_v15 = vmul.f32 %v1624_v42, %v724_v1 }
 0x2c8   : > { %v789_v52 = vmul.f32 %v1624_v42, %v725_v41  ;;  %v790_v48 = vmul.f32 %v1624_v42, %v726_v24  ;;  %v791_v25 = vmul.f32 %v1624_v42, %v727_v20  ;;  %v792_v34 = vmul.f32 %v1624_v42, %v728_v51 }
 0x2c9   : > { %v793_v11 = vmul.f32 %v1624_v42, %v729_v21  ;;  %v794_v35 = vmul.f32 %v1624_v42, %v730_v36  ;;  %v795_v37 = vmul.f32 %v1624_v42, %v731_v61  ;;  %v796_v45 = vmul.f32 %v1624_v42, %v732_v49 }
 0x2ca   : > { %v797_v30 = vmul.f32 %v1624_v42, %v733_v28  ;;  %v798_v56 = vmul.f32 %v1624_v42, %v734_v16  ;;  %v799_v55 = vmul.f32 %v1624_v42, %v735_v0  ;;  %v800_v31 = vmul.f32 %v1624_v42, %v736_v27 }
 0x2cb   : > { %v801_v39 = vmul.f32 %v1624_v42, %v737_v26  ;;  %v802_v1 = vmul.f32 %v1624_v42, %v738_v44  ;;  %v803_v41 = vmul.f32 %v1624_v42, %v739_v43  ;;  %v804_v24 = vmul.f32 %v1624_v42, %v740_v33 }
 0x2cc   : > { %v2744_v20 = vadd.f32 %v1625_v54, %v757_v40  ;;  %v2746_v51 = vadd.f32 %v1625_v54, %v758_v50  ;;  %v2748_v21 = vadd.f32 %v1625_v54, %v759_v38  ;;  %v2750_v36 = vadd.f32 %v1625_v54, %v760_v46 }
 0x2cd   : > { %v2752_v61 = vadd.f32 %v1625_v54, %v761_v10  ;;  %v2754_v49 = vadd.f32 %v1625_v54, %v762_v58  ;;  %v2756_v28 = vadd.f32 %v1625_v54, %v763_v2  ;;  %v2758_v16 = vadd.f32 %v1625_v54, %v764_v14 }
 0x2ce   : > { %v2760_v0 = vadd.f32 %v1625_v54, %v765_v63  ;;  %v2762_v27 = vadd.f32 %v1625_v54, %v766_v22  ;;  %v2764_v42 = vadd.f32 %v1625_v54, %v767_v29  ;;  %v2766_v26 = vadd.f32 %v1625_v54, %v768_v53 }
 0x2cf   : > { %v2768_v38 = vadd.f32 %v1625_v54, %v769_v62  ;;  %v2770_v44 = vadd.f32 %v1625_v54, %v770_v18  ;;  %v2772_v10 = vadd.f32 %v1625_v54, %v771_v60  ;;  %v2774_v43 = vadd.f32 %v1625_v54, %v772_v57 }
 0x2d0   : > { %v2776_v2 = vadd.f32 %v1625_v54, %v773_v23  ;;  %v2778_v33 = vadd.f32 %v1625_v54, %v774_v3  ;;  %v2780_v40 = vadd.f32 %v1625_v54, %v775_v17  ;;  %v2782_v50 = vadd.f32 %v1625_v54, %v776_v59 }
 0x2d1   : > { %v2784_v46 = vadd.f32 %v1625_v54, %v777_v9  ;;  %v2786_v58 = vadd.f32 %v1625_v54, %v778_v6  ;;  %v2788_v14 = vadd.f32 %v1625_v54, %v779_v32  ;;  %v2790_v63 = vadd.f32 %v1625_v54, %v780_v47 }
 0x2d2   : > { %v2792_v22 = vadd.f32 %v1625_v54, %v781_v8  ;;  %v2794_v29 = vadd.f32 %v1625_v54, %v782_v12  ;;  %v2796_v53 = vadd.f32 %v1625_v54, %v783_v13  ;;  %v2798_v62 = vadd.f32 %v1625_v54, %v784_v19 }
 0x2d3   : > { %v2800_v18 = vadd.f32 %v1625_v54, %v785_v4  ;;  %v2802_v60 = vadd.f32 %v1625_v54, %v786_v7  ;;  %v2804_v57 = vadd.f32 %v1625_v54, %v787_v5  ;;  %v2806_v23 = vadd.f32 %v1625_v54, %v788_v15 }
 0x2d4   : > { %v2808_v3 = vadd.f32 %v1625_v54, %v789_v52  ;;  %v2810_v17 = vadd.f32 %v1625_v54, %v790_v48  ;;  %v2812_v59 = vadd.f32 %v1625_v54, %v791_v25  ;;  %v2814_v9 = vadd.f32 %v1625_v54, %v792_v34 }
 0x2d5   : > { %v2816_v6 = vadd.f32 %v1625_v54, %v793_v11  ;;  %v2818_v32 = vadd.f32 %v1625_v54, %v794_v35  ;;  %v2820_v47 = vadd.f32 %v1625_v54, %v795_v37  ;;  %v2822_v8 = vadd.f32 %v1625_v54, %v796_v45 }
 0x2d6   : > { %v2824_v12 = vadd.f32 %v1625_v54, %v797_v30  ;;  %v2826_v13 = vadd.f32 %v1625_v54, %v798_v56  ;;  %v2828_v19 = vadd.f32 %v1625_v54, %v799_v55  ;;  %v2830_v4 = vadd.f32 %v1625_v54, %v800_v31 }
 0x2d7   : > { %v2832_v7 = vadd.f32 %v1625_v54, %v801_v39  ;;  %v2834_v5 = vadd.f32 %v1625_v54, %v802_v1  ;;  %v2836_v15 = vadd.f32 %v1625_v54, %v803_v41  ;;  %v2838_v52 = vadd.f32 %v1625_v54, %v804_v24 }
 0x2d8   : > { %v2841_v48 = vmul.f32 0.5, %v2744_v20  ;;  %v2844_v25 = vmul.f32 0.5, %v2746_v51  ;;  %v2847_v34 = vmul.f32 0.5, %v2748_v21  ;;  %v2850_v11 = vmul.f32 0.5, %v2750_v36 }
 0x2d9   : > { %v2853_v35 = vmul.f32 0.5, %v2752_v61  ;;  %v2856_v37 = vmul.f32 0.5, %v2754_v49  ;;  %v2859_v54 = vmul.f32 0.5, %v2756_v28  ;;  %v2862_v45 = vmul.f32 0.5, %v2758_v16 }
 0x2da   : > { %v2865_v30 = vmul.f32 0.5, %v2760_v0  ;;  %v2868_v56 = vmul.f32 0.5, %v2762_v27  ;;  %v2871_v55 = vmul.f32 0.5, %v2764_v42  ;;  %v2874_v31 = vmul.f32 0.5, %v2766_v26 }
 0x2db   : > { %3620 = vst [vmem:[#allocation5_spill] sm:$0xff] %v2862_v45  ;;  %v2877_v39 = vmul.f32 0.5, %v2768_v38  ;;  %v2880_v1 = vmul.f32 0.5, %v2770_v44  ;;  %v2883_v41 = vmul.f32 0.5, %v2772_v10  ;;  %v2886_v24 = vmul.f32 0.5, %v2774_v43 }
 0x2dc   : > { %3621 = vst [vmem:[#allocation7_spill] sm:$0xff] %v2865_v30  ;;  %3622 = vst [vmem:[#allocation6_spill] sm:$0xff] %v2868_v56  ;;  %v2889_v56 = vmul.f32 0.5, %v2776_v2  ;;  %v936_v30 = vmul.f32 0.70710677, %v2746_v51 }
 0x2dd   : > { %3623 = vst [vmem:[#allocation9_spill] sm:$0xff] %v2871_v55  ;;  %3624 = vst [vmem:[#allocation10_spill] sm:$0xff] %v2874_v31  ;;  %v2892_v55 = vmul.f32 0.5, %v2778_v33  ;;  %v2895_v31 = vmul.f32 0.5, %v2780_v40  ;;  %v939_v45 = vmul.f32 0.70710677, %v2752_v61 }
 0x2de   : > { %3625 = vst [vmem:[#allocation11_spill] sm:$0xff] %v2877_v39  ;;  %3626 = vst [vmem:[#allocation12_spill] sm:$0xff] %v2880_v1  ;;  %v2898_v39 = vmul.f32 0.5, %v2782_v50  ;;  %v2901_v1 = vmul.f32 0.5, %v2784_v46  ;;  %v943_v51 = vmul.f32 0.70710677, %v2760_v0 }
 0x2df   : > { %3627 = vst [vmem:[#allocation13_spill] sm:$0xff] %v2883_v41  ;;  %3628 = vst [vmem:[#allocation14_spill] sm:$0xff] %v2886_v24  ;;  %v2904_v41 = vmul.f32 0.5, %v2786_v58  ;;  %v2907_v24 = vmul.f32 0.5, %v2788_v14  ;;  %v948_v61 = vmul.f32 0.70710677, %v2770_v44 }
 0x2e0   : > { %3629 = vst [vmem:[#allocation15_spill] sm:$0xff] %v2889_v56  ;;  %3630 = vst [vmem:[#allocation16_spill] sm:$0xff] %v2892_v55  ;;  %v2910_v56 = vmul.f32 0.5, %v2790_v63  ;;  %v2913_v55 = vmul.f32 0.5, %v2792_v22  ;;  %v952_v0 = vmul.f32 0.70710677, %v2778_v33 }
 0x2e1   : > { %3631 = vst [vmem:[#allocation17_spill] sm:$0xff] %v2895_v31  ;;  %3632 = vst [vmem:[#allocation18_spill] sm:$0xff] %v2898_v39  ;;  %v2916_v31 = vmul.f32 0.5, %v2794_v29  ;;  %v2919_v39 = vmul.f32 0.5, %v2796_v53  ;;  %v3015_v44 = vmul.f32 0.70710677, %v2788_v14 }
 0x2e2   : > { %3633 = vst [vmem:[#allocation19_spill] sm:$0xff] %v2901_v1  ;;  %3634 = vst [vmem:[#allocation20_spill] sm:$0xff] %v2904_v41  ;;  %v2922_v1 = vmul.f32 0.5, %v2798_v62  ;;  %v2925_v41 = vmul.f32 0.5, %v2800_v18  ;;  %v3027_v33 = vmul.f32 0.70710677, %v2796_v53 }
 0x2e3   : > { %3635 = vst [vmem:[#allocation21_spill] sm:$0xff] %v2907_v24  ;;  %3636 = vst [vmem:[#allocation22_spill] sm:$0xff] %v2910_v56  ;;  %v2928_v24 = vmul.f32 0.5, %v2802_v60  ;;  %v2931_v56 = vmul.f32 0.5, %v2804_v57  ;;  %v3042_v14 = vmul.f32 0.70710677, %v2806_v23 }
 0x2e4   : > { %3637 = vst [vmem:[#allocation23_spill] sm:$0xff] %v2913_v55  ;;  %3638 = vst [vmem:[#allocation24_spill] sm:$0xff] %v2916_v31  ;;  %v2934_v55 = vmul.f32 0.5, %v2806_v23  ;;  %v2937_v31 = vmul.f32 0.5, %v2808_v3  ;;  %v3063_v23 = vmul.f32 0.70710677, %v2820_v47 }
 0x2e5   : > { %3639 = vst [vmem:[#allocation25_spill] sm:$0xff] %v2919_v39  ;;  %3640 = vst [vmem:[#allocation26_spill] sm:$0xff] %v2922_v1  ;;  %v2940_v39 = vmul.f32 0.5, %v2810_v17  ;;  %v2943_v1 = vmul.f32 0.5, %v2812_v59 }
 0x2e6   : > { %3641 = vst [vmem:[#allocation27_spill] sm:$0xff] %v2925_v41  ;;  %3642 = vst [vmem:[#allocation28_spill] sm:$0xff] %v2928_v24  ;;  %v2946_v41 = vmul.f32 0.5, %v2814_v9  ;;  %v2949_v24 = vmul.f32 0.5, %v2816_v6 }
 0x2e7   : > { %3643 = vst [vmem:[#allocation29_spill] sm:$0xff] %v2931_v56  ;;  %3644 = vst [vmem:[#allocation30_spill] sm:$0xff] %v2934_v55  ;;  %v2952_v56 = vmul.f32 0.5, %v2818_v32  ;;  %v2955_v55 = vmul.f32 0.5, %v2820_v47 }
 0x2e8   : > { %3645 = vst [vmem:[#allocation31_spill] sm:$0xff] %v2937_v31  ;;  %3646 = vst [vmem:[#allocation32_spill] sm:$0xff] %v2940_v39  ;;  %v2958_v31 = vmul.f32 0.5, %v2822_v8  ;;  %v2961_v39 = vmul.f32 0.5, %v2824_v12 }
 0x2e9   : > { %3647 = vst [vmem:[#allocation33_spill] sm:$0xff] %v2943_v1  ;;  %3648 = vst [vmem:[#allocation34_spill] sm:$0xff] %v2946_v41  ;;  %v2964_v1 = vmul.f32 0.5, %v2826_v13  ;;  %v2967_v41 = vmul.f32 0.5, %v2828_v19 }
 0x2ea   : > { %3649 = vst [vmem:[#allocation35_spill] sm:$0xff] %v2949_v24  ;;  %3650 = vst [vmem:[#allocation36_spill] sm:$0xff] %v2952_v56  ;;  %v2970_v24 = vmul.f32 0.5, %v2830_v4  ;;  %v2973_v56 = vmul.f32 0.5, %v2832_v7 }
 0x2eb   : > { %3651 = vst [vmem:[#allocation37_spill] sm:$0xff] %v2955_v55  ;;  %3652 = vst [vmem:[#allocation38_spill] sm:$0xff] %v2958_v31  ;;  %v2976_v55 = vmul.f32 0.5, %v2834_v5  ;;  %v935_v31 = vmul.f32 0.70710677, %v2744_v20 }
 0x2ec   : > { %3653 = vst [vmem:[#allocation39_spill] sm:$0xff] %v2961_v39  ;;  %3654 = vst [vmem:[#allocation40_spill] sm:$0xff] %v2964_v1  ;;  %v937_v39 = vmul.f32 0.70710677, %v2748_v21  ;;  %v2982_v1 = vmul.f32 0.5, %v2836_v15 }
 0x2ed   : > { %3655 = vst [vmem:[#allocation41_spill] sm:$0xff] %v2967_v41  ;;  %3656 = vst [vmem:[#allocation42_spill] sm:$0xff] %v2970_v24  ;;  %v2985_v41 = vmul.f32 0.5, %v2838_v52  ;;  %v938_v24 = vmul.f32 0.70710677, %v2750_v36  ;;  %1800 = verf.f32 %v935_v31 }
 0x2ee   : > { %3657 = vst [vmem:[#allocation43_spill] sm:$0xff] %v2973_v56  ;;  %3658 = vst [vmem:[#allocation44_spill] sm:$0xff] %v2976_v55  ;;  %v940_v56 = vmul.f32 0.70710677, %v2754_v49  ;;  %v941_v55 = vmul.f32 0.70710677, %v2756_v28  ;;  %1802 = verf.f32 %v936_v30 }
 0x2ef   : > { %3659 = vst [vmem:[#allocation45_spill] sm:$0xff] %v2982_v1  ;;  %3660 = vst [vmem:[#allocation46_spill] sm:$0xff] %v2985_v41  ;;  %v942_v20 = vmul.f32 0.70710677, %v2758_v16  ;;  %v944_v21 = vmul.f32 0.70710677, %v2762_v27  ;;  %1804 = verf.f32 %v937_v39 }
 0x2f0   : > { %v945_v1 = vmul.f32 0.70710677, %v2764_v42  ;;  %v946_v41 = vmul.f32 0.70710677, %v2766_v26  ;;  %v947_v36 = vmul.f32 0.70710677, %v2768_v38  ;;  %1806 = verf.f32 %v938_v24 }
 0x2f1   : > { %v949_v49 = vmul.f32 0.70710677, %v2772_v10  ;;  %v950_v28 = vmul.f32 0.70710677, %v2774_v43  ;;  %v951_v16 = vmul.f32 0.70710677, %v2776_v2  ;;  %1808 = verf.f32 %v939_v45 }
 0x2f2   : > { %v3003_v27 = vmul.f32 0.70710677, %v2780_v40  ;;  %v3006_v42 = vmul.f32 0.70710677, %v2782_v50  ;;  %v3009_v26 = vmul.f32 0.70710677, %v2784_v46  ;;  %1810 = verf.f32 %v940_v56 }
 0x2f3   : > { %v3012_v38 = vmul.f32 0.70710677, %v2786_v58  ;;  %v3018_v10 = vmul.f32 0.70710677, %v2790_v63  ;;  %v3021_v43 = vmul.f32 0.70710677, %v2792_v22  ;;  %1812 = verf.f32 %v941_v55 }
 0x2f4   : > { %v3024_v2 = vmul.f32 0.70710677, %v2794_v29  ;;  %v3030_v40 = vmul.f32 0.70710677, %v2798_v62  ;;  %v3033_v50 = vmul.f32 0.70710677, %v2800_v18  ;;  %1814 = verf.f32 %v942_v20 }
 0x2f5   : > { %v3036_v46 = vmul.f32 0.70710677, %v2802_v60  ;;  %v3039_v58 = vmul.f32 0.70710677, %v2804_v57  ;;  %1816 = verf.f32 %v943_v51  ;;  %v3045_v63 = vmul.f32 0.70710677, %v2808_v3 }
 0x2f6   : > { %v3048_v22 = vmul.f32 0.70710677, %v2810_v17  ;;  %v3051_v29 = vmul.f32 0.70710677, %v2812_v59  ;;  %1818 = verf.f32 %v944_v21  ;;  %v3054_v62 = vmul.f32 0.70710677, %v2814_v9 }
 0x2f7   : > { %v1801_v53 = vpop.eup %1800  ;;  %v3057_v18 = vmul.f32 0.70710677, %v2816_v6  ;;  %v3060_v60 = vmul.f32 0.70710677, %v2818_v32  ;;  %1820 = verf.f32 %v945_v1  ;;  %v3066_v3 = vmul.f32 0.70710677, %v2822_v8 }
 0x2f8   : > { %v1803_v57 = vpop.eup %1802  ;;  %v3069_v17 = vmul.f32 0.70710677, %v2824_v12  ;;  %1822 = verf.f32 %v946_v41  ;;  %v3072_v9 = vmul.f32 0.70710677, %v2826_v13  ;;  %v3075_v6 = vmul.f32 0.70710677, %v2828_v19 }
 0x2f9   : > { %v1805_v59 = vpop.eup %1804  ;;  %v3078_v32 = vmul.f32 0.70710677, %v2830_v4  ;;  %1824 = verf.f32 %v947_v36  ;;  %v3081_v45 = vmul.f32 0.70710677, %v2832_v7  ;;  %v3084_v8 = vmul.f32 0.70710677, %v2834_v5 }
 0x2fa   : > { %v1807_v47 = vpop.eup %1806  ;;  %v3087_v12 = vmul.f32 0.70710677, %v2836_v15  ;;  %1826 = verf.f32 %v948_v61  ;;  %v1049_v30 = vadd.f32 1.0, %v1801_v53  ;;  %v1050_v19 = vadd.f32 1.0, %v1803_v57  ;;  %v3664_v57 = vld [vmem:[#allocation7_spill] sm:$0xff] }
 0x2fb   : > { %v1809_v13 = vpop.eup %1808  ;;  %1828 = verf.f32 %v949_v49  ;;  %v1051_v56 = vadd.f32 1.0, %v1805_v59  ;;  %v3090_v4 = vmul.f32 0.70710677, %v2838_v52  ;;  %v1052_v31 = vadd.f32 1.0, %v1807_v47 }
 0x2fc   : > { %v1811_v55 = vpop.eup %1810  ;;  %1830 = verf.f32 %v950_v28  ;;  %v1053_v7 = vadd.f32 1.0, %v1809_v13  ;;  %v1106_v1 = vmul.f32 %v1049_v30, %v2841_v48  ;;  %v1107_v15 = vmul.f32 %v1050_v19, %v2844_v25  ;;  %v3666_v30 = vld [vmem:[#allocation6_spill] sm:$0xff] }
 0x2fd   : > { %v1813_v39 = vpop.eup %1812  ;;  %1832 = verf.f32 %v951_v16  ;;  %v1054_v5 = vadd.f32 1.0, %v1811_v55  ;;  %v1108_v20 = vmul.f32 %v1051_v56, %v2847_v34  ;;  %v3096_v51 = vmul.f32 %v1052_v31, %v2850_v11  ;;  %v3667_v31 = vld [vmem:[#allocation9_spill] sm:$0xff] }
 0x2fe   : > { %v1815_v41 = vpop.eup %1814  ;;  %1834 = verf.f32 %v952_v0  ;;  %v1055_v24 = vadd.f32 1.0, %v1813_v39  ;;  %v1110_v36 = vmul.f32 %v1053_v7, %v2853_v35  ;;  %v3105_v34 = vsel %vm1952_vm2, %v1106_v1, 0.0  ;;  %v3662_v0 = vld [vmem:[#allocation5_spill] sm:$0xff]  ;;  %v3668_v1 = vld [vmem:[#allocation10_spill] sm:$0xff] }
 0x2ff   : > { %v1817_v52 = vpop.eup %1816  ;;  %1836 = verf.f32 %v3003_v27  ;;  %v1056_v21 = vadd.f32 1.0, %v1815_v41  ;;  %v1111_v61 = vmul.f32 %v1054_v5, %v2856_v37  ;;  %v3111_v35 = vsel %vm264_vm1, %v1107_v15, 0.0 }
 0x300   : > { %v1819_v49 = vpop.eup %1818  ;;  %1838 = verf.f32 %v3006_v42  ;;  %v1057_v48 = vadd.f32 1.0, %v1817_v52  ;;  %v1112_v25 = vmul.f32 %v1055_v24, %v2859_v54  ;;  %v3117_v47 = vsel %vm1967_vm4, %v1108_v20, 0.0  ;;  %v3669_v20 = vld [vmem:[#allocation11_spill] sm:$0xff] }
 0x301   : > { %v1821_v11 = vpop.eup %1820  ;;  %1840 = verf.f32 %v3009_v26  ;;  %v1058_v16 = vadd.f32 1.0, %v1819_v49  ;;  %v1113_v27 = vmul.f32 %v1056_v21, %v3662_v0  ;;  %v1166_v56 = vsel %vm1952_vm2, %v3096_v51, 0.0  ;;  %v3670_v49 = vld [vmem:[#allocation12_spill] sm:$0xff] }
 0x302   : > { %v1823_v37 = vpop.eup %1822  ;;  %1842 = verf.f32 %v3012_v38  ;;  %v1059_v42 = vadd.f32 1.0, %v1821_v11  ;;  %v1114_v54 = vmul.f32 %v1057_v48, %v3664_v57  ;;  %v3130_v39 = vsel %vm264_vm1, %v1110_v36, 0.0 }
 0x303   : > { %v1825_v13 = vpop.eup %1824  ;;  %1844 = verf.f32 %v3015_v44  ;;  %v1060_v26 = vadd.f32 1.0, %v1823_v37  ;;  %v3121_v19 = vmul.f32 %v1058_v16, %v3666_v30  ;;  %v3136_v41 = vsel %vm1967_vm4, %v1111_v61, 0.0  ;;  %v3671_v16 = vld [vmem:[#allocation13_spill] sm:$0xff] }
 0x304   : > { %v1827_v55 = vpop.eup %1826  ;;  %1846 = verf.f32 %v3018_v10  ;;  %v1061_v38 = vadd.f32 1.0, %v1825_v13  ;;  %v1116_v7 = vmul.f32 %v1059_v42, %v3667_v31  ;;  %v3142_v21 = vsel %vm1952_vm2, %v1112_v25, 0.0  ;;  %v3672_v42 = vld [vmem:[#allocation14_spill] sm:$0xff] }
 0x305   : > { %v1829_v5 = vpop.eup %1828  ;;  %1848 = verf.f32 %v3021_v43  ;;  %v1062_v44 = vadd.f32 1.0, %v1827_v55  ;;  %v1117_v15 = vmul.f32 %v1060_v26, %v3668_v1  ;;  %v3148_v61 = vsel %vm264_vm1, %v1113_v27, 0.0  ;;  %v3673_v26 = vld [vmem:[#allocation15_spill] sm:$0xff]  ;;  %v3675_v1 = vld [vmem:[#allocation17_spill] sm:$0xff] }
 0x306   : > { %v1831_v24 = vpop.eup %1830  ;;  %1850 = verf.f32 %v3024_v2  ;;  %v1063_v10 = vadd.f32 1.0, %v1829_v5  ;;  %v1118_v52 = vmul.f32 %v1061_v38, %v3669_v20  ;;  %v3154_v25 = vsel %vm1967_vm4, %v1114_v54, 0.0  ;;  %v3674_v38 = vld [vmem:[#allocation16_spill] sm:$0xff]  ;;  %v3676_v20 = vld [vmem:[#allocation18_spill] sm:$0xff] }
 0x307   : > { %v1833_v36 = vpop.eup %1832  ;;  %1852 = verf.f32 %v3027_v33  ;;  %v1064_v43 = vadd.f32 1.0, %v1831_v24  ;;  %v1119_v48 = vmul.f32 %v1062_v44, %v3670_v49  ;;  %v1172_v27 = vsel %vm1952_vm2, %v3121_v19, 0.0  ;;  %v3677_v49 = vld [vmem:[#allocation19_spill] sm:$0xff] }
 0x308   : > { %v1835_v11 = vpop.eup %1834  ;;  %1854 = verf.f32 %v3030_v40  ;;  %v1065_v2 = vadd.f32 1.0, %v1833_v36  ;;  %v1120_v0 = vmul.f32 %v1063_v10, %v3671_v16  ;;  %v3167_v54 = vsel %vm264_vm1, %v1116_v7, 0.0  ;;  %v3678_v16 = vld [vmem:[#allocation20_spill] sm:$0xff] }
 0x309   : > { %v1837_v37 = vpop.eup %1836  ;;  %1856 = verf.f32 %v3033_v50  ;;  %v1066_v33 = vadd.f32 1.0, %v1835_v11  ;;  %v3158_v57 = vmul.f32 %v1064_v43, %v3672_v42  ;;  %v3173_v5 = vsel %vm1967_vm4, %v1117_v15, 0.0  ;;  %v3679_v42 = vld [vmem:[#allocation21_spill] sm:$0xff] }
 0x30a   : > { %v1839_v13 = vpop.eup %1838  ;;  %1858 = verf.f32 %v3036_v46  ;;  %v1067_v40 = vadd.f32 1.0, %v1837_v37  ;;  %v1122_v30 = vmul.f32 %v1065_v2, %v3673_v26  ;;  %v3179_v7 = vsel %vm1952_vm2, %v1118_v52, 0.0  ;;  %v3680_v26 = vld [vmem:[#allocation22_spill] sm:$0xff] }
 0x30b   : > { %v1841_v55 = vpop.eup %1840  ;;  %1860 = verf.f32 %v3039_v58  ;;  %v1068_v50 = vadd.f32 1.0, %v1839_v13  ;;  %v1123_v31 = vmul.f32 %v1066_v33, %v3674_v38  ;;  %v3185_v15 = vsel %vm264_vm1, %v1119_v48, 0.0 }
 0x30c   : > { %v1843_v44 = vpop.eup %1842  ;;  %1862 = verf.f32 %v3042_v14  ;;  %v1069_v46 = vadd.f32 1.0, %v1841_v55  ;;  %v1124_v24 = vmul.f32 %v1067_v40, %v3675_v1  ;;  %v3191_v52 = vsel %vm1967_vm4, %v1120_v0, 0.0 }
 0x30d   : > { %v1845_v10 = vpop.eup %1844  ;;  %1864 = verf.f32 %v3045_v63  ;;  %v1070_v58 = vadd.f32 1.0, %v1843_v44  ;;  %v1125_v36 = vmul.f32 %v1068_v50, %v3676_v20  ;;  %v1178_v48 = vsel %vm1952_vm2, %v3158_v57, 0.0  ;;  %v3681_v44 = vld [vmem:[#allocation23_spill] sm:$0xff] }
 0x30e   : > { %v1847_v43 = vpop.eup %1846  ;;  %1866 = verf.f32 %v3048_v22  ;;  %v1071_v14 = vadd.f32 1.0, %v1845_v10  ;;  %v1126_v11 = vmul.f32 %v1069_v46, %v3677_v49  ;;  %v3204_v0 = vsel %vm264_vm1, %v1122_v30, 0.0  ;;  %v3682_v10 = vld [vmem:[#allocation24_spill] sm:$0xff] }
 0x30f   : > { %v1849_v2 = vpop.eup %1848  ;;  %1868 = verf.f32 %v3051_v29  ;;  %v1072_v63 = vadd.f32 1.0, %v1847_v43  ;;  %v3195_v37 = vmul.f32 %v1070_v58, %v3678_v16  ;;  %v3210_v50 = vsel %vm1967_vm4, %v1123_v31, 0.0  ;;  %v3683_v43 = vld [vmem:[#allocation25_spill] sm:$0xff] }
 0x310   : > { %v1851_v33 = vpop.eup %1850  ;;  %1870 = verf.f32 %v3054_v62  ;;  %v1073_v22 = vadd.f32 1.0, %v1849_v2  ;;  %v1128_v13 = vmul.f32 %v1071_v14, %v3679_v42  ;;  %v3216_v30 = vsel %vm1952_vm2, %v1124_v24, 0.0  ;;  %v3684_v2 = vld [vmem:[#allocation26_spill] sm:$0xff] }
 0x311   : > { %v1853_v40 = vpop.eup %1852  ;;  %1872 = verf.f32 %v3057_v18  ;;  %v1074_v29 = vadd.f32 1.0, %v1851_v33  ;;  %v1129_v55 = vmul.f32 %v1072_v63, %v3680_v26  ;;  %v3222_v31 = vsel %vm264_vm1, %v1125_v36, 0.0  ;;  %v3685_v33 = vld [vmem:[#allocation27_spill] sm:$0xff] }
 0x312   : > { %v1855_v38 = vpop.eup %1854  ;;  %1874 = verf.f32 %v3060_v60  ;;  %v1075_v62 = vadd.f32 1.0, %v1853_v40  ;;  %v1130_v46 = vmul.f32 %v1073_v22, %v3681_v44  ;;  %v3228_v24 = vsel %vm1967_vm4, %v1126_v11, 0.0  ;;  %v3686_v40 = vld [vmem:[#allocation28_spill] sm:$0xff] }
 0x313   : > { %v1857_v1 = vpop.eup %1856  ;;  %1876 = verf.f32 %v3063_v23  ;;  %v1076_v18 = vadd.f32 1.0, %v1855_v38  ;;  %v1131_v58 = vmul.f32 %v1074_v29, %v3682_v10  ;;  %v3241_v11 = vsel %vm264_vm1, %v1128_v13, 0.0 }
 0x314   : > { %v1859_v20 = vpop.eup %1858  ;;  %1878 = verf.f32 %v3066_v3  ;;  %v1077_v60 = vadd.f32 1.0, %v1857_v1  ;;  %v1132_v14 = vmul.f32 %v1075_v62, %v3683_v43  ;;  %v3247_v26 = vsel %vm1967_vm4, %v1129_v55, 0.0  ;;  %v3687_v62 = vld [vmem:[#allocation29_spill] sm:$0xff] }
 0x315   : > { %v1861_v49 = vpop.eup %1860  ;;  %1880 = verf.f32 %v3069_v17  ;;  %v1078_v23 = vadd.f32 1.0, %v1859_v20  ;;  %v3232_v63 = vmul.f32 %v1076_v18, %v3684_v2  ;;  %v3253_v13 = vsel %vm1952_vm2, %v1130_v46, 0.0  ;;  %v3688_v18 = vld [vmem:[#allocation30_spill] sm:$0xff] }
 0x316   : > { %v1863_v16 = vpop.eup %1862  ;;  %1882 = verf.f32 %v3072_v9  ;;  %v1079_v3 = vadd.f32 1.0, %v1861_v49  ;;  %v1134_v22 = vmul.f32 %v1077_v60, %v3685_v33  ;;  %v3259_v55 = vsel %vm264_vm1, %v1131_v58, 0.0  ;;  %v3689_v60 = vld [vmem:[#allocation31_spill] sm:$0xff] }
 0x317   : > { %v1865_v42 = vpop.eup %1864  ;;  %1884 = verf.f32 %v3075_v6  ;;  %v1080_v17 = vadd.f32 1.0, %v1863_v16  ;;  %v1135_v29 = vmul.f32 %v1078_v23, %v3686_v40  ;;  %v3265_v46 = vsel %vm1967_vm4, %v1132_v14, 0.0  ;;  %v3690_v23 = vld [vmem:[#allocation32_spill] sm:$0xff] }
 0x318   : > { %v1867_v38 = vpop.eup %1866  ;;  %1886 = verf.f32 %v3078_v32  ;;  %v1081_v9 = vadd.f32 1.0, %v1865_v42  ;;  %v1136_v44 = vmul.f32 %v1079_v3, %v3687_v62  ;;  %v3691_v3 = vld [vmem:[#allocation33_spill] sm:$0xff]  ;;  %v3278_v14 = vsel %vm264_vm1, %v1134_v22, 0.0 }
 0x319   : > { %v1869_v1 = vpop.eup %1868  ;;  %1888 = verf.f32 %v3081_v45  ;;  %v1082_v6 = vadd.f32 1.0, %v1867_v38  ;;  %v1137_v10 = vmul.f32 %v1080_v17, %v3688_v18  ;;  %v3692_v17 = vld [vmem:[#allocation34_spill] sm:$0xff]  ;;  %v3283_v38 = vsel %vm1967_vm4, %v1135_v29, 0.0  ;;  %v3694_v29 = vld [vmem:[#allocation36_spill] sm:$0xff] }
 0x31a   : > { %v1871_v20 = vpop.eup %1870  ;;  %1890 = verf.f32 %v3084_v8  ;;  %v1083_v32 = vadd.f32 1.0, %v1869_v1  ;;  %v1138_v43 = vmul.f32 %v1081_v9, %v3689_v60  ;;  %v3287_v9 = vsel %vm1952_vm2, %v1136_v44, 0.0  ;;  %v3693_v1 = vld [vmem:[#allocation35_spill] sm:$0xff] }
 0x31b   : > { %v1873_v49 = vpop.eup %1872  ;;  %1892 = verf.f32 %v3087_v12  ;;  %v1084_v45 = vadd.f32 1.0, %v1871_v20  ;;  %v3269_v2 = vmul.f32 %v1082_v6, %v3690_v23  ;;  %v3292_v22 = vsel %vm264_vm1, %v1137_v10, 0.0  ;;  %v3695_v10 = vld [vmem:[#allocation37_spill] sm:$0xff] }
 0x31c   : > { %v1875_v16 = vpop.eup %1874  ;;  %1894 = verf.f32 %v3090_v4  ;;  %v1085_v8 = vadd.f32 1.0, %v1873_v49  ;;  %v1140_v33 = vmul.f32 %v1083_v32, %v3691_v3  ;;  %v3296_v18 = vsel %vm1967_vm4, %v1138_v43, 0.0 }
 0x31d   : > { %v1877_v42 = vpop.eup %1876  ;;  %v1086_v12 = vadd.f32 1.0, %v1875_v16  ;;  %v1141_v40 = vmul.f32 %v1084_v45, %v3692_v17  ;;  %v1705_v53 = vpack.c.bf16 %v3228_v24, %v3228_v24  ;;  %v1711_v59 = vpack.c.bf16 %v3265_v46, %v3265_v46 }
 0x31e   : > { %v1879_v4 = vpop.eup %1878  ;;  %v1087_v62 = vadd.f32 1.0, %v1877_v42  ;;  %v1142_v6 = vmul.f32 %v1085_v8, %v3693_v1  ;;  %v3304_v49 = vsel %vm264_vm1, %v1140_v33, 0.0  ;;  %v3697_v1 = vld [vmem:[#allocation39_spill] sm:$0xff]  ;;  %v1715_v24 = vpack.c.bf16 %v3287_v9, %v3287_v9  ;;  %v1479_v9 = vld [vmem:[%s2666_s26 + $0x20] sm:$0xf] }
 0x31f   : > { %v1881_v20 = vpop.eup %1880  ;;  %v1088_v32 = vadd.f32 1.0, %v1879_v4  ;;  %v1143_v60 = vmul.f32 %v1086_v12, %v3694_v29  ;;  %v3309_v43 = vsel %vm1967_vm4, %v1141_v40, 0.0  ;;  %v3696_v12 = vld [vmem:[#allocation38_spill] sm:$0xff]  ;;  %v1685_v4 = vpack.c.bf16 %v3105_v34, %v3105_v34 }
 0x320   : > { %v1883_v45 = vpop.eup %1882  ;;  %v1089_v23 = vadd.f32 1.0, %v1881_v20  ;;  %v1144_v16 = vmul.f32 %v1087_v62, %v3695_v10  ;;  %v3313_v8 = vsel %vm1952_vm2, %v1142_v6, 0.0  ;;  %v3698_v10 = vld [vmem:[#allocation40_spill] sm:$0xff]  ;;  %v1720_v46 = vpack.c.bf16 %v3309_v43, %v3309_v43  ;;  %1522 = vst [vmem:[%s2666_s26 + $0x84] sm:$0xf] %v1715_v24 }
 0x321   : > { %v1885_v3 = vpop.eup %1884  ;;  %v1090_v42 = vadd.f32 1.0, %v1883_v45  ;;  %v3316_v17 = vmul.f32 %v1088_v32, %v3696_v12  ;;  %v3320_v33 = vsel %vm264_vm1, %v1143_v60, 0.0  ;;  %v1686_v32 = vpack.c.bf16 %v3111_v35, %v3111_v35  ;;  %1472 = vst [vmem:[%s2666_s26 + $0xc] sm:$0xf] %v1685_v4 }
 0x322   : > { %v1887_v62 = vpop.eup %1886  ;;  %v1091_v40 = vadd.f32 1.0, %v1885_v3  ;;  %v1146_v20 = vmul.f32 %v1089_v23, %v3697_v1  ;;  %v3327_v6 = vsel %vm1967_vm4, %v1144_v16, 0.0  ;;  %v1687_v3 = vpack.c.bf16 %v3117_v47, %v3117_v47  ;;  %v3699_v1 = vld [vmem:[#allocation41_spill] sm:$0xff] }
 0x323   : > { %v1889_v29 = vpop.eup %1888  ;;  %v1092_v45 = vadd.f32 1.0, %v1887_v62  ;;  %v1147_v60 = vmul.f32 %v1090_v42, %v3698_v10  ;;  %v1690_v35 = vpack.c.bf16 %v3136_v41, %v3136_v41  ;;  %1473 = vst [vmem:[%s2666_s26 + $0x10] sm:$0xf] %v1686_v32  ;;  %v3700_v10 = vld [vmem:[#allocation42_spill] sm:$0xff]  ;;  %v1692_v32 = vpack.c.bf16 %v3148_v61, %v3148_v61 }
 0x324   : > { %v1891_v23 = vpop.eup %1890  ;;  %v1093_v12 = vadd.f32 1.0, %v1889_v29  ;;  %v1148_v16 = vmul.f32 %v1091_v40, %v3699_v1  ;;  %v3341_v44 = vsel %vm264_vm1, %v1146_v20, 0.0  ;;  %v1691_v40 = vpack.c.bf16 %v3142_v21, %v3142_v21  ;;  %v3701_v1 = vld [vmem:[#allocation43_spill] sm:$0xff] }
 0x325   : > { %v1893_v42 = vpop.eup %1892  ;;  %v1094_v62 = vadd.f32 1.0, %v1891_v23  ;;  %v1149_v34 = vmul.f32 %v1092_v45, %v3700_v10  ;;  %v3349_v4 = vsel %vm1967_vm4, %v1147_v60, 0.0  ;;  %v3702_v23 = vld [vmem:[#allocation44_spill] sm:$0xff]  ;;  %v1693_v21 = vpack.c.bf16 %v3154_v25, %v3154_v25  ;;  %1483 = vst [vmem:[%s2666_s26 + $0x28] sm:$0xf] %v1692_v32 }
 0x326   : > { %v1895_v29 = vpop.eup %1894  ;;  %v1095_v20 = vadd.f32 1.0, %v1893_v42  ;;  %v1150_v58 = vmul.f32 %v1093_v12, %v3701_v1  ;;  %v3356_v36 = vsel %vm1952_vm2, %v1148_v16, 0.0  ;;  %1482 = vst [vmem:[%s2666_s26 + $0x24] sm:$0xf] %v1691_v40  ;;  %v3703_v12 = vld [vmem:[#allocation45_spill] sm:$0xff]  ;;  %v1696_v61 = vpack.c.bf16 %v3173_v5, %v3173_v5 }
 0x327   : > { %v1096_v45 = vadd.f32 1.0, %v1895_v29  ;;  %v3361_v10 = vmul.f32 %v1094_v62, %v3702_v23  ;;  %v3365_v60 = vsel %vm264_vm1, %v1149_v34, 0.0  ;;  %v1697_v62 = vpack.c.bf16 %v3179_v7, %v3179_v7  ;;  %v3704_v34 = vld [vmem:[#allocation46_spill] sm:$0xff] }
 0x328   : > { %v1152_v42 = vmul.f32 %v1095_v20, %v3703_v12  ;;  %v3373_v16 = vsel %vm1967_vm4, %v1150_v58, 0.0  ;;  %v1698_v40 = vpack.c.bf16 %v3185_v15, %v3185_v15  ;;  %v1699_v58 = vpack.c.bf16 %v3191_v52, %v3191_v52  ;;  %v1489_v12 = vld [vmem:[%s2666_s26 + $0x38] sm:$0xf] }
 0x329   : > { %v1153_v29 = vmul.f32 %v1096_v45, %v3704_v34  ;;  %v1208_v25 = vsel %vm1952_vm2, %v3361_v10, 0.0  ;;  %v1702_v7 = vpack.c.bf16 %v3210_v50, %v3210_v50  ;;  %v1703_v20 = vpack.c.bf16 %v3216_v30, %v3216_v30  ;;  %1492 = vst [vmem:[%s2666_s26 + $0x3c] sm:$0xf] %v1697_v62  ;;  %v1484_v45 = vld [vmem:[%s2666_s26 + $0x2c] sm:$0xf] }
 0x32a   : > { %v3390_v5 = vsel %vm264_vm1, %v1152_v42, 0.0  ;;  %v1704_v1 = vpack.c.bf16 %v3222_v31, %v3222_v31  ;;  %v1708_v52 = vpack.c.bf16 %v3247_v26, %v3247_v26  ;;  %v1709_v50 = vpack.c.bf16 %v3253_v13, %v3253_v13  ;;  %1493 = vst [vmem:[%s2666_s26 + $0x40] sm:$0xf] %v1698_v40  ;;  %v1474_v26 = vld [vmem:[%s2666_s26 + $0x14] sm:$0xf] }
 0x32b   : > { %v3401_v15 = vsel %vm1967_vm4, %v1153_v29, 0.0  ;;  %v1710_v30 = vpack.c.bf16 %v3259_v55, %v3259_v55  ;;  %v1714_v31 = vpack.c.bf16 %v3283_v38, %v3283_v38  ;;  %1502 = vst [vmem:[%s2666_s26 + $0x54] sm:$0xf] %v1703_v20  ;;  %v1716_v13 = vpack.c.bf16 %v3292_v22, %v3292_v22  ;;  %v1494_v42 = vld [vmem:[%s2666_s26 + $0x44] sm:$0xf] }
 0x32c   : > { %1503 = vst [vmem:[%s2666_s26 + $0x58] sm:$0xf] %v1704_v1  ;;  %v1717_v55 = vpack.c.bf16 %v3296_v18, %v3296_v18  ;;  %v1721_v32 = vpack.c.bf16 %v3313_v8, %v3313_v8  ;;  %1512 = vst [vmem:[%s2666_s26 + $0x6c] sm:$0xf] %v1709_v50  ;;  %v1722_v23 = vpack.c.bf16 %v3320_v33, %v3320_v33  ;;  %v1499_v62 = vld [vmem:[%s2666_s26 + $0x50] sm:$0xf] }
 0x32d   : > { %v1723_v22 = vpack.c.bf16 %v3327_v6, %v3327_v6  ;;  %v1726_v18 = vpack.c.bf16 %v3349_v4, %v3349_v4  ;;  %v1727_v8 = vpack.c.bf16 %v3356_v36, %v3356_v36  ;;  %1513 = vst [vmem:[%s2666_s26 + $0x70] sm:$0xf] %v1710_v30  ;;  %v1728_v33 = vpack.c.bf16 %v3365_v60, %v3365_v60  ;;  %v1504_v29 = vld [vmem:[%s2666_s26 + $0x5c] sm:$0xf]  ;;  %v1509_v40 = vld [vmem:[%s2666_s26 + $0x68] sm:$0xf] }
 0x32e   : > { %v1729_v6 = vpack.c.bf16 %v3373_v16, %v3373_v16  ;;  %v1732_v4 = vpack.c.bf16 %v3401_v15, %v3401_v15  ;;  %v1475_v34 = vsel %vm2675_vm8, %v1687_v3, %v1474_v26  ;;  %v1514_v20 = vld [vmem:[%s2666_s26 + $0x74] sm:$0xf]  ;;  %1523 = vst [vmem:[%s2666_s26 + $0x88] sm:$0xf] %v1716_v13  ;;  %1532 = vst [vmem:[%s2666_s26 + $0x9c] sm:$0xf] %v1721_v32 }
 0x32f   : > { %1476 = vst [vmem:[%s2666_s26 + $0x14] sm:$0xf] %v1475_v34  ;;  %v1736_v60 = vpack.c.bf16 %v3130_v39, %v1166_v56  ;;  %v1480_v47 = vsel %vm2675_vm8, %v1690_v35, %v1479_v9  ;;  %v1485_v3 = vsel %vm2675_vm8, %v1693_v21, %v1484_v45  ;;  %v1741_v51 = vpack.c.bf16 %v3167_v54, %v1172_v27  ;;  %v1519_v56 = vld [vmem:[%s2666_s26 + $0x80] sm:$0xf]  ;;  %v1524_v39 = vld [vmem:[%s2666_s26 + $0x8c] sm:$0xf] }
 0x330   : > { %1533 = vst [vmem:[%s2666_s26 + $0xa0] sm:$0xf] %v1722_v23  ;;  %1542 = vst [vmem:[%s2666_s26 + $0xb4] sm:$0xf] %v1727_v8  ;;  %v1490_v41 = vsel %vm2675_vm8, %v1696_v61, %v1489_v12  ;;  %v1495_v35 = vsel %vm2675_vm8, %v1699_v58, %v1494_v42  ;;  %v1746_v19 = vpack.c.bf16 %v3204_v0, %v1178_v48  ;;  %v1529_v54 = vld [vmem:[%s2666_s26 + $0x98] sm:$0xf] }
 0x331   : > { %1481 = vst [vmem:[%s2666_s26 + $0x20] sm:$0xf] %v1480_v47  ;;  %1486 = vst [vmem:[%s2666_s26 + $0x2c] sm:$0xf] %v1485_v3  ;;  %v1500_v27 = vsel %vm2675_vm8, %v1702_v7, %v1499_v62  ;;  %v1534_v21 = vld [vmem:[%s2666_s26 + $0xa4] sm:$0xf]  ;;  %v1505_v57 = vsel %vm2675_vm8, %v1705_v53, %v1504_v29  ;;  %v1510_v61 = vsel %vm2675_vm8, %v1708_v52, %v1509_v40 }
 0x332   : > { %v1539_v16 = vld [vmem:[%s2666_s26 + $0xb0] sm:$0xf]  ;;  %1543 = vst [vmem:[%s2666_s26 + $0xb8] sm:$0xf] %v1728_v33  ;;  %1773 = vst [vmem:[%s2666_s26 + $0x18] sm:$0xff] %v1736_v60   ;;  %v3706_v48 = vsel %vm1952_vm2, %v3195_v37, 0.0  ;;  %v1515_v58 = vsel %vm2675_vm8, %v1711_v59, %v1514_v20  ;;  %v1520_v15 = vsel %vm2675_vm8, %v1714_v31, %v1519_v56  ;;  %v1525_v53 = vsel %vm2675_vm8, %v1717_v55, %v1524_v39 }
 0x333   : > { %1774 = vst [vmem:[%s2666_s26 + $0x30] sm:$0xff] %v1741_v51   ;;  %1491 = vst [vmem:[%s2666_s26 + $0x38] sm:$0xf] %v1490_v41  ;;  %v1751_v0 = vpack.c.bf16 %v3241_v11, %v3706_v48  ;;  %v1544_v7 = vld [vmem:[%s2666_s26 + $0xbc] sm:$0xf]  ;;  %v3707_v37 = vsel %vm1952_vm2, %v3232_v63, 0.0  ;;  %v1530_v63 = vsel %vm2675_vm8, %v1720_v46, %v1529_v54  ;;  %v1771_v30 = vpack.c.bf16 %v3390_v5, %v1208_v25 }
 0x334   : > { %1496 = vst [vmem:[%s2666_s26 + $0x44] sm:$0xf] %v1495_v35  ;;  %1501 = vst [vmem:[%s2666_s26 + $0x50] sm:$0xf] %v1500_v27  ;;  %v1549_v1 = vld [vmem:[%s2666_s26 + $0xc8] sm:$0xf]  ;;  %v1756_v11 = vpack.c.bf16 %v3278_v14, %v3707_v37  ;;  %v1535_v14 = vsel %vm2675_vm8, %v1723_v22, %v1534_v21  ;;  %v1545_v43 = vsel %vm2675_vm8, %v1729_v6, %v1544_v7 }
 0x335   : > { %1775 = vst [vmem:[%s2666_s26 + $0x48] sm:$0xff] %v1746_v19   ;;  %1506 = vst [vmem:[%s2666_s26 + $0x5c] sm:$0xf] %v1505_v57  ;;  %v3708_v52 = vsel %vm1952_vm2, %v3269_v2, 0.0  ;;  %v3709_v2 = vsel %vm1952_vm2, %v3316_v17, 0.0 }
 0x336   : > { %1511 = vst [vmem:[%s2666_s26 + $0x68] sm:$0xf] %v1510_v61  ;;  %1516 = vst [vmem:[%s2666_s26 + $0x74] sm:$0xf] %v1515_v58  ;;  %v1761_v50 = vpack.c.bf16 %v3304_v49, %v3708_v52  ;;  %v1766_v38 = vpack.c.bf16 %v3341_v44, %v3709_v2  ;;  %v1540_v49 = vsel %vm2675_vm8, %v1726_v18, %v1539_v16 }
 0x337   : > { %1776 = vst [vmem:[%s2666_s26 + $0x60] sm:$0xff] %v1751_v0   ;;  %1521 = vst [vmem:[%s2666_s26 + $0x80] sm:$0xf] %v1520_v15  ;;  %v1550_v44 = vsel %vm2675_vm8, %v1732_v4, %v1549_v1 }
 0x338   : > { %1526 = vst [vmem:[%s2666_s26 + $0x8c] sm:$0xf] %v1525_v53  ;;  %1777 = vst [vmem:[%s2666_s26 + $0x78] sm:$0xff] %v1756_v11  }
 0x339   : > { %1778 = vst [vmem:[%s2666_s26 + $0x90] sm:$0xff] %v1761_v50   ;;  %1531 = vst [vmem:[%s2666_s26 + $0x98] sm:$0xf] %v1530_v63 }
 0x33a   : > { %1536 = vst [vmem:[%s2666_s26 + $0xa4] sm:$0xf] %v1535_v14  ;;  %1541 = vst [vmem:[%s2666_s26 + $0xb0] sm:$0xf] %v1540_v49 }
 0x33b   : > { %1779 = vst [vmem:[%s2666_s26 + $0xa8] sm:$0xff] %v1766_v38   ;;  %1546 = vst [vmem:[%s2666_s26 + $0xbc] sm:$0xf] %v1545_v43 }
 0x33c   : > { %1551 = vst [vmem:[%s2666_s26 + $0xc8] sm:$0xf] %v1550_v44  ;;  %1780 = vst [vmem:[%s2666_s26 + $0xc0] sm:$0xff] %v1771_v30  }
 0x33d PF: > { %s13_s12 = sadd.s32 1, %s1902_s12  }
 0x33e   : > { %p10_p4 = scmp.ge.s32.totalorder %s13_s12, 4  }
 0x340   :  { %12 = sbr.rel (!%p10_p4) target bundleno = 1 (0x1), region = 62 }

// kernel: fwd.11
= control target key start
LH: loop header
LB: loop body
LE: loop exit
PB: predicated region body
PF: predicated region fallthrough
CT: control target
= control target key end

     0   :  { %s1102_s12 = smov 0   ;;  %s2166_s0 = inlined_call_operand.vmem [shape: f32[2,19,23,128], index: 0, kind: input, shape index: {}]   ;;  %s2167_s1 = inlined_call_operand.vmem [shape: f32[1,128], index: 1, kind: input, shape index: {}]   ;;  %s2168_s2 = inlined_call_operand.vmem [shape: f32[1,128], index: 2, kind: input, shape index: {}]   ;;  %s2169_s3 = inlined_call_operand.vmem [shape: f32[2,19,23,128], index: 3, kind: output, shape index: {}]  }
   0x1 LB: > { %s1044_s13 = sadd.s32 4294967295, %s1079_s12   ;;  %p1048_p0 = scmp.ge.s32.totalorder %s1079_s12, 1  ;;  %s1079_s12 = sphi %s1102_s12, %s13_s12  }
   0x2   : > { %p137_p1 = scmp.lt.s32.totalorder %s1079_s12, 3 }
   0x4   : > { %p138_p2 = pnand %p1048_p0, %p137_p1 }
   0x6   : > { %141 = sbr.rel (%p138_p2) target bundleno = 753 (0x2f1), region = 32 }
   0xd   : > { %p161_p3 = scmp.lt.s32.totalorder %s1044_s13, 1  ;;  %v228_v0 = vlaneseq  ;;  %v2184_v6 = vmov 0  ;;  %v2187_v10 = vmov 0  ;;  %vm343_vm5 = vcmask 1046528  }
   0xf   : > { %s2208_s13 = smov (!%p161_p3, %s1044_s13), 1  ;;  %v229_v1 = vshrl.u32 %v228_v0, 7  ;;  %v1113_v2 = vand.u32 127, %v228_v0 }
  0x10   : > { %s1055_s14 = smul.u32 456, %s2208_s13 }
  0x11   : > { %2183 = vst [vmem:[#allocation2_spill] sm:$0xff] %v1113_v2  ;;  %v231_v3 = vadd.s32 16, %v229_v1  ;;  %vm234_vm0 = vcmp.ge.s32.totalorder %v229_v1, 1  ;;  %vm264_vm1 = vcmp.lt.s32.totalorder %v1113_v2, 8 }
  0x12   : > { %s1120_s17 = scalar_lea.vmem %s2166_s0, %s1055_s14  ;;  %vm1131_vm2 = vmand %vm234_vm0, %vm264_vm1  ;;  %s1846_s22 = scalar_lea.vmem %s2169_s3, %s1055_s14 }
  0x13   : > { %v1124_v4 = vld [vmem:[%s1120_s17 + $0x18] sm:$0xff]  ;;  %v1127_v5 = vld [vmem:[%s1120_s17 + $0x20] sm:$0xff]  ;;  %v2185_v6 = vsel %vm1131_vm2, 4294967295, %v2184_v6  ;;  %vm251_vm3 = vcmp.le.s32.totalorder %v231_v3, 16  ;;  %v1136_v7 = vld [vmem:[%s1120_s17 + $0x28] sm:$0x7f] }
  0x14   : > { %2186 = vst [vmem:[#allocation3_spill] sm:$0xff] %v2185_v6  ;;  %v288_v8 = vsel %vm1131_vm2, %v1124_v4, 0.0  ;;  %v289_v9 = vsel %vm264_vm1, %v1127_v5, 0.0  ;;  %vm1146_vm4 = vmand %vm251_vm3, %vm264_vm1  ;;  %v1151_v11 = vld [vmem:[%s1120_s17 + $0x30] sm:$0xff]  ;;  %v1157_v14 = vld [vmem:[%s1120_s17 + $0x40] sm:$0x7f] }
  0x15   : > { %v2188_v10 = vsel %vm1146_vm4, 4294967295, %v2187_v10  ;;  %v290_v12 = vsel %vm1146_vm4, %v1136_v7, 0.0  ;;  %v347_v13 = vadd.f32 %v289_v9, %v288_v8  ;;  %v1160_v15 = vld [vmem:[%s1120_s17 + $0x38] sm:$0xff]  ;;  %v291_v16 = vsel %vm1131_vm2, %v1151_v11, 0.0  ;;  %v1173_v21 = vld [vmem:[%s1120_s17 + $0x48] sm:$0xff]  ;;  %v1180_v25 = vld [vmem:[%s1120_s17 + $0x50] sm:$0xff] }
  0x16   : > { %2189 = vst [vmem:[#allocation4_spill] sm:$0xff] %v2188_v10  ;;  %v348_v17 = vsel %vm343_vm5, %v290_v12, 0.0  ;;  %v293_v18 = vsel %vm1146_vm4, %v1157_v14, 0.0  ;;  %v292_v20 = vsel %vm264_vm1, %v1160_v15, 0.0  ;;  %v1176_v23 = vld [vmem:[%s1120_s17 + $0x58] sm:$0x7f] }
  0x17   : > { %v349_v19 = vadd.f32 %v348_v17, %v347_v13  ;;  %v352_v24 = vsel %vm343_vm5, %v293_v18, 0.0  ;;  %v294_v27 = vsel %vm1131_vm2, %v1173_v21, 0.0  ;;  %v296_v28 = vsel %vm1146_vm4, %v1176_v23, 0.0  ;;  %v1192_v31 = vld [vmem:[%s1120_s17 + $0x60] sm:$0xff]  ;;  %v1195_v33 = vld [vmem:[%s1120_s17 + $0x70] sm:$0x7f] }
  0x18   : > { %v295_v30 = vsel %vm264_vm1, %v1180_v25, 0.0  ;;  %v356_v34 = vsel %vm343_vm5, %v296_v28, 0.0  ;;  %v1199_v35 = vld [vmem:[%s1120_s17 + $0x68] sm:$0xff]  ;;  %v297_v37 = vsel %vm1131_vm2, %v1192_v31, 0.0  ;;  %v299_v38 = vsel %vm1146_vm4, %v1195_v33, 0.0  ;;  %v1211_v41 = vld [vmem:[%s1120_s17 + $0x78] sm:$0xff] }
  0x19   : > { %v350_v22 = vadd.f32 %v349_v19, %v291_v16  ;;  %v298_v40 = vsel %vm264_vm1, %v1199_v35, 0.0  ;;  %v1214_v43 = vld [vmem:[%s1120_s17 + $0x88] sm:$0x7f]  ;;  %v360_v44 = vsel %vm343_vm5, %v299_v38, 0.0  ;;  %v1218_v45 = vld [vmem:[%s1120_s17 + $0x80] sm:$0xff]  ;;  %v300_v47 = vsel %vm1131_vm2, %v1211_v41, 0.0 }
  0x1a   : > { %v302_v48 = vsel %vm1146_vm4, %v1214_v43, 0.0  ;;  %v301_v50 = vsel %vm264_vm1, %v1218_v45, 0.0  ;;  %v1230_v51 = vld [vmem:[%s1120_s17 + $0x90] sm:$0xff]  ;;  %v1233_v53 = vld [vmem:[%s1120_s17 + $0xa0] sm:$0x7f]  ;;  %v1237_v55 = vld [vmem:[%s1120_s17 + $0x98] sm:$0xff] }
  0x1b   : > { %v351_v26 = vadd.f32 %v350_v22, %v292_v20  ;;  %v364_v54 = vsel %vm343_vm5, %v302_v48, 0.0  ;;  %v303_v57 = vsel %vm1131_vm2, %v1230_v51, 0.0  ;;  %v305_v58 = vsel %vm1146_vm4, %v1233_v53, 0.0  ;;  %v1249_v61 = vld [vmem:[%s1120_s17 + $0xa8] sm:$0xff]  ;;  %v1252_v63 = vld [vmem:[%s1120_s17 + $0xb8] sm:$0x7f] }
  0x1c   : > { %v304_v60 = vsel %vm264_vm1, %v1237_v55, 0.0  ;;  %v368_v0 = vsel %vm343_vm5, %v305_v58, 0.0  ;;  %v1256_v1 = vld [vmem:[%s1120_s17 + $0xb0] sm:$0xff]  ;;  %v306_v8 = vsel %vm1131_vm2, %v1249_v61, 0.0  ;;  %v308_v9 = vsel %vm1146_vm4, %v1252_v63, 0.0  ;;  %v1268_v16 = vld [vmem:[%s1120_s17 + $0xc0] sm:$0xff] }
  0x1d   : > { %v353_v29 = vadd.f32 %v352_v24, %v351_v26  ;;  %v307_v13 = vsel %vm264_vm1, %v1256_v1, 0.0  ;;  %v1271_v18 = vld [vmem:[%s1120_s17 + $0xd0] sm:$0x7f]  ;;  %v372_v19 = vsel %vm343_vm5, %v308_v9, 0.0  ;;  %v1275_v20 = vld [vmem:[%s1120_s17 + $0xc8] sm:$0xff]  ;;  %v309_v24 = vsel %vm1131_vm2, %v1268_v16, 0.0 }
  0x1e   : > { %v311_v26 = vsel %vm1146_vm4, %v1271_v18, 0.0  ;;  %v310_v28 = vsel %vm264_vm1, %v1275_v20, 0.0  ;;  %v1325_v58 = vld [vmem:[%s1120_s17 + $0x108] sm:$0xff] }
  0x1f   : > { %v354_v32 = vadd.f32 %v353_v29, %v294_v27  ;;  %v1287_v29 = vld [vmem:[%s1120_s17 + $0xd8] sm:$0xff] }
  0x20   : > { %v312_v38 = vsel %vm1131_vm2, %v1287_v29, 0.0 }
  0x21   : > { %v355_v36 = vadd.f32 %v354_v32, %v295_v30  ;;  %v1290_v32 = vld [vmem:[%s1120_s17 + $0xe8] sm:$0x7f] }
  0x23   : > { %v357_v39 = vadd.f32 %v356_v34, %v355_v36  ;;  %v376_v34 = vsel %vm343_vm5, %v311_v26, 0.0  ;;  %v1294_v36 = vld [vmem:[%s1120_s17 + $0xe0] sm:$0xff]  ;;  %v1351_v26 = vld [vmem:[%s1120_s17 + $0x128] sm:$0xff] }
  0x25   : > { %v358_v42 = vadd.f32 %v357_v39, %v297_v37  ;;  %v314_v39 = vsel %vm1146_vm4, %v1290_v32, 0.0 }
  0x26   : > { %v380_v48 = vsel %vm343_vm5, %v314_v39, 0.0 }
  0x27   : > { %v359_v46 = vadd.f32 %v358_v42, %v298_v40  ;;  %v313_v42 = vsel %vm264_vm1, %v1294_v36, 0.0 }
  0x29   : > { %v361_v49 = vadd.f32 %v360_v44, %v359_v46  ;;  %v1306_v44 = vld [vmem:[%s1120_s17 + $0xf0] sm:$0xff] }
  0x2b   : > { %v362_v52 = vadd.f32 %v361_v49, %v300_v47  ;;  %v1309_v47 = vld [vmem:[%s1120_s17 + $0x100] sm:$0x7f]  ;;  %v1313_v49 = vld [vmem:[%s1120_s17 + $0xf8] sm:$0xff] }
  0x2d   : > { %v363_v56 = vadd.f32 %v362_v52, %v301_v50  ;;  %v315_v52 = vsel %vm1131_vm2, %v1306_v44, 0.0 }
  0x2f   : > { %v365_v59 = vadd.f32 %v364_v54, %v363_v56  ;;  %v317_v54 = vsel %vm1146_vm4, %v1309_v47, 0.0 }
  0x31   : > { %v366_v62 = vadd.f32 %v365_v59, %v303_v57  ;;  %v316_v57 = vsel %vm264_vm1, %v1313_v49, 0.0 }
  0x33   : > { %v367_v3 = vadd.f32 %v366_v62, %v304_v60  ;;  %v1328_v60 = vld [vmem:[%s1120_s17 + $0x118] sm:$0x7f]  ;;  %v384_v62 = vsel %vm343_vm5, %v317_v54, 0.0 }
  0x34   : > { %v320_v9 = vsel %vm1146_vm4, %v1328_v60, 0.0 }
  0x35   : > { %v369_v12 = vadd.f32 %v368_v0, %v367_v3  ;;  %v1332_v0 = vld [vmem:[%s1120_s17 + $0x110] sm:$0xff] }
  0x37   : > { %v370_v17 = vadd.f32 %v369_v12, %v306_v8  ;;  %v318_v8 = vsel %vm1131_vm2, %v1325_v58, 0.0 }
  0x39   : > { %v371_v22 = vadd.f32 %v370_v17, %v307_v13  ;;  %v319_v13 = vsel %vm264_vm1, %v1332_v0, 0.0  ;;  %v1344_v17 = vld [vmem:[%s1120_s17 + $0x120] sm:$0xff] }
  0x3b   : > { %v373_v27 = vadd.f32 %v372_v19, %v371_v22  ;;  %v1347_v22 = vld [vmem:[%s1120_s17 + $0x130] sm:$0x7f] }
  0x3d   : > { %v374_v30 = vadd.f32 %v373_v27, %v309_v24  ;;  %v388_v24 = vsel %vm343_vm5, %v320_v9, 0.0 }
  0x3f   : > { %v375_v37 = vadd.f32 %v374_v30, %v310_v28  ;;  %v321_v28 = vsel %vm1131_vm2, %v1344_v17, 0.0  ;;  %v323_v30 = vsel %vm1146_vm4, %v1347_v22, 0.0 }
  0x41   : > { %v377_v40 = vadd.f32 %v376_v34, %v375_v37  ;;  %v322_v37 = vsel %vm264_vm1, %v1351_v26, 0.0 }
  0x43   : > { %v378_v46 = vadd.f32 %v377_v40, %v312_v38  ;;  %v1363_v38 = vld [vmem:[%s1120_s17 + $0x138] sm:$0xff]  ;;  %v1366_v40 = vld [vmem:[%s1120_s17 + $0x148] sm:$0x7f] }
  0x45   : > { %v379_v50 = vadd.f32 %v378_v46, %v313_v42  ;;  %v392_v42 = vsel %vm343_vm5, %v323_v30, 0.0  ;;  %v1370_v46 = vld [vmem:[%s1120_s17 + $0x140] sm:$0xff]  ;;  %v1404_v30 = vld [vmem:[%s1120_s17 + $0x178] sm:$0x7f] }
  0x46   : > { %2191 = vst [vmem:[#allocation6_spill] sm:$0xff] %v1404_v30 }
  0x47   : > { %v381_v56 = vadd.f32 %v380_v48, %v379_v50  ;;  %v324_v50 = vsel %vm1131_vm2, %v1363_v38, 0.0 }
  0x49   : > { %v382_v59 = vadd.f32 %v381_v56, %v315_v52  ;;  %v326_v52 = vsel %vm1146_vm4, %v1366_v40, 0.0  ;;  %v325_v56 = vsel %vm264_vm1, %v1370_v46, 0.0 }
  0x4b   : > { %v383_v3 = vadd.f32 %v382_v59, %v316_v57  ;;  %v1382_v57 = vld [vmem:[%s1120_s17 + $0x150] sm:$0xff] }
  0x4d   : > { %v385_v12 = vadd.f32 %v384_v62, %v383_v3  ;;  %v1385_v62 = vld [vmem:[%s1120_s17 + $0x160] sm:$0x7f]  ;;  %v396_v3 = vsel %vm343_vm5, %v326_v52, 0.0 }
  0x4f   : > { %v386_v19 = vadd.f32 %v385_v12, %v318_v8  ;;  %v1389_v8 = vld [vmem:[%s1120_s17 + $0x158] sm:$0xff]  ;;  %v327_v12 = vsel %vm1131_vm2, %v1382_v57, 0.0 }
  0x51   : > { %v387_v27 = vadd.f32 %v386_v19, %v319_v13  ;;  %v329_v13 = vsel %vm1146_vm4, %v1385_v62, 0.0 }
  0x53   : > { %v389_v34 = vadd.f32 %v388_v24, %v387_v27  ;;  %v328_v24 = vsel %vm264_vm1, %v1389_v8, 0.0  ;;  %v1401_v27 = vld [vmem:[%s1120_s17 + $0x168] sm:$0xff] }
  0x54   : > { %2190 = vst [vmem:[#allocation5_spill] sm:$0xff] %v1401_v27 }
  0x55   : > { %v390_v39 = vadd.f32 %v389_v34, %v321_v28  ;;  %v400_v34 = vsel %vm343_vm5, %v329_v13, 0.0 }
  0x57   : > { %v391_v48 = vadd.f32 %v390_v39, %v322_v37  ;;  %v1408_v37 = vld [vmem:[%s1120_s17 + $0x170] sm:$0xff] }
  0x58   : > { %2192 = vst [vmem:[#allocation7_spill] sm:$0xff] %v1408_v37  ;;  %v331_v52 = vsel %vm264_vm1, %v1408_v37, 0.0 }
  0x59   : > { %v393_v54 = vadd.f32 %v392_v42, %v391_v48  ;;  %v330_v42 = vsel %vm1131_vm2, %v1401_v27, 0.0  ;;  %v332_v48 = vsel %vm1146_vm4, %v1404_v30, 0.0 }
  0x5b   : > { %v394_v59 = vadd.f32 %v393_v54, %v324_v50  ;;  %v1420_v54 = vld [vmem:[%s1120_s17 + $0x180] sm:$0xff] }
  0x5c   : > { %2193 = vst [vmem:[#allocation8_spill] sm:$0xff] %v1420_v54  ;;  %v333_v13 = vsel %vm1131_vm2, %v1420_v54, 0.0 }
  0x5d   : > { %v395_v9 = vadd.f32 %v394_v59, %v325_v56  ;;  %v1423_v59 = vld [vmem:[%s1120_s17 + $0x190] sm:$0x7f] }
  0x5f   : > { %v397_v19 = vadd.f32 %v396_v3, %v395_v9  ;;  %v404_v3 = vsel %vm343_vm5, %v332_v48, 0.0  ;;  %v1427_v9 = vld [vmem:[%s1120_s17 + $0x188] sm:$0xff] }
  0x61   : > { %v398_v28 = vadd.f32 %v397_v19, %v327_v12  ;;  %v335_v19 = vsel %vm1146_vm4, %v1423_v59, 0.0 }
  0x63   : > { %v399_v39 = vadd.f32 %v398_v28, %v328_v24  ;;  %v334_v28 = vsel %vm264_vm1, %v1427_v9, 0.0 }
  0x65   : > { %v401_v50 = vadd.f32 %v400_v34, %v399_v39  ;;  %v408_v39 = vsel %vm343_vm5, %v335_v19, 0.0 }
  0x67   : > { %v402_v56 = vadd.f32 %v401_v50, %v330_v42 }
  0x69   : > { %v403_v12 = vadd.f32 %v402_v56, %v331_v52 }
  0x6b   : > { %v405_v24 = vadd.f32 %v404_v3, %v403_v12 }
  0x6d   : > { %v406_v34 = vadd.f32 %v405_v24, %v333_v13 }
  0x6f   : > { %v407_v42 = vadd.f32 %v406_v34, %v334_v28 }
  0x71   : > { %v409_v48 = vadd.f32 %v408_v39, %v407_v42 }
  0x73   : > { %418 = vadd.xlane.f32.xlu0 %v409_v48 }
 0x100   : > { %v419_v50 = vpop.xlane.xlu0 %418 }
 0x101   : > { %v420_v52 = vrot.slane %v419_v50, 4 }
 0x103   : > { %v421_v56 = vadd.f32 %v420_v52, %v419_v50 }
 0x105   : > { %v422_v37 = vrot.slane %v421_v56, 2 }
 0x107   : > { %v423_v54 = vadd.f32 %v422_v37, %v421_v56 }
 0x109   : > { %v424_v30 = vrot.slane %v423_v54, 1 }
 0x10b   : > { %v425_v27 = vadd.f32 %v424_v30, %v423_v54 }
 0x10d   : > { %1056 = vpush %v425_v27 }
 0x13e   : > { %s1057_s18 = spop %1056 }
 0x13f   : > { %s427_s19 = smul.f32 0.00048828125, %s1057_s18 }
 0x141   : > { %v1439_v3 = vstv %s427_s19 }
 0x142   : > { %v1443_v12 = vsub.f32 %v1124_v4, %v1439_v3  ;;  %v1447_v13 = vsub.f32 %v1127_v5, %v1439_v3  ;;  %v1451_v19 = vsub.f32 %v1136_v7, %v1439_v3  ;;  %v1461_v4 = vsub.f32 %v1151_v11, %v1439_v3 }
 0x143   : > { %v1465_v5 = vsub.f32 %v1157_v14, %v1439_v3  ;;  %v1469_v7 = vsub.f32 %v1160_v15, %v1439_v3  ;;  %v1484_v15 = vsub.f32 %v1173_v21, %v1439_v3  ;;  %v1490_v48 = vsub.f32 %v1176_v23, %v1439_v3 }
 0x144   : > { %v489_v30 = vmul.f32 %v1443_v12, %v1443_v12  ;;  %v490_v27 = vmul.f32 %v1447_v13, %v1447_v13  ;;  %v491_v37 = vmul.f32 %v1451_v19, %v1451_v19  ;;  %v492_v11 = vmul.f32 %v1461_v4, %v1461_v4 }
 0x145   : > { %v494_v14 = vmul.f32 %v1465_v5, %v1465_v5  ;;  %v493_v42 = vmul.f32 %v1469_v7, %v1469_v7  ;;  %v1494_v52 = vsub.f32 %v1180_v25, %v1439_v3  ;;  %v497_v23 = vmul.f32 %v1490_v48, %v1490_v48 }
 0x146   : > { %v546_v54 = vsel %vm1131_vm2, %v489_v30, 0.0  ;;  %v547_v24 = vsel %vm264_vm1, %v490_v27, 0.0  ;;  %v548_v28 = vsel %vm1146_vm4, %v491_v37, 0.0  ;;  %v549_v56 = vsel %vm1131_vm2, %v492_v11, 0.0 }
 0x147   : > { %v604_v34 = vadd.f32 %v547_v24, %v546_v54  ;;  %v605_v39 = vsel %vm343_vm5, %v548_v28, 0.0  ;;  %v551_v30 = vsel %vm1146_vm4, %v494_v14, 0.0  ;;  %v495_v27 = vmul.f32 %v1484_v15, %v1484_v15 }
 0x148   : > { %v550_v37 = vsel %vm264_vm1, %v493_v42, 0.0  ;;  %v1508_v25 = vsub.f32 %v1192_v31, %v1439_v3  ;;  %v496_v24 = vmul.f32 %v1494_v52, %v1494_v52  ;;  %v609_v28 = vsel %vm343_vm5, %v551_v30, 0.0 }
 0x149   : > { %v606_v50 = vadd.f32 %v605_v39, %v604_v34  ;;  %v1515_v11 = vsub.f32 %v1195_v33, %v1439_v3  ;;  %v1519_v34 = vsub.f32 %v1199_v35, %v1439_v3  ;;  %v552_v39 = vsel %vm1131_vm2, %v495_v27, 0.0 }
 0x14a   : > { %v554_v31 = vsel %vm1146_vm4, %v497_v23, 0.0  ;;  %v1533_v35 = vsub.f32 %v1211_v41, %v1439_v3 }
 0x14b   : > { %v607_v21 = vadd.f32 %v606_v50, %v549_v56  ;;  %v498_v50 = vmul.f32 %v1508_v25, %v1508_v25  ;;  %v553_v56 = vsel %vm264_vm1, %v496_v24, 0.0  ;;  %v500_v33 = vmul.f32 %v1515_v11, %v1515_v11 }
 0x14c   : > { %v613_v27 = vsel %vm343_vm5, %v554_v31, 0.0 }
 0x14d   : > { %v608_v54 = vadd.f32 %v607_v21, %v550_v37  ;;  %v499_v21 = vmul.f32 %v1519_v34, %v1519_v34  ;;  %v1540_v37 = vsub.f32 %v1214_v43, %v1439_v3  ;;  %v555_v24 = vsel %vm1131_vm2, %v498_v50, 0.0 }
 0x14e   : > { %v557_v41 = vsel %vm1146_vm4, %v500_v33, 0.0 }
 0x14f   : > { %v610_v14 = vadd.f32 %v609_v28, %v608_v54  ;;  %v1544_v54 = vsub.f32 %v1218_v45, %v1439_v3  ;;  %v503_v43 = vmul.f32 %v1540_v37, %v1540_v37  ;;  %v1558_v45 = vsub.f32 %v1230_v51, %v1439_v3 }
 0x150   : > { %v617_v50 = vsel %vm343_vm5, %v557_v41, 0.0 }
 0x151   : > { %v611_v42 = vadd.f32 %v610_v14, %v552_v39  ;;  %v501_v14 = vmul.f32 %v1533_v35, %v1533_v35  ;;  %v556_v39 = vsel %vm264_vm1, %v499_v21, 0.0  ;;  %v560_v51 = vsel %vm1146_vm4, %v503_v43, 0.0 }
 0x153   : > { %v612_v30 = vadd.f32 %v611_v42, %v553_v56  ;;  %v502_v42 = vmul.f32 %v1544_v54, %v1544_v54  ;;  %v1565_v56 = vsub.f32 %v1233_v53, %v1439_v3  ;;  %v558_v21 = vsel %vm1131_vm2, %v501_v14, 0.0 }
 0x154   : > { %v621_v14 = vsel %vm343_vm5, %v560_v51, 0.0 }
 0x155   : > { %v614_v23 = vadd.f32 %v613_v27, %v612_v30  ;;  %v1569_v30 = vsub.f32 %v1237_v55, %v1439_v3  ;;  %v506_v53 = vmul.f32 %v1565_v56, %v1565_v56  ;;  %v1583_v55 = vsub.f32 %v1249_v61, %v1439_v3 }
 0x157   : > { %v615_v28 = vadd.f32 %v614_v23, %v555_v24  ;;  %v504_v23 = vmul.f32 %v1558_v45, %v1558_v45  ;;  %v559_v24 = vsel %vm264_vm1, %v502_v42, 0.0  ;;  %v563_v61 = vsel %vm1146_vm4, %v506_v53, 0.0 }
 0x159   : > { %v616_v31 = vadd.f32 %v615_v28, %v556_v39  ;;  %v505_v28 = vmul.f32 %v1569_v30, %v1569_v30  ;;  %v1590_v39 = vsub.f32 %v1252_v63, %v1439_v3  ;;  %v561_v42 = vsel %vm1131_vm2, %v504_v23, 0.0 }
 0x15a   : > { %v625_v23 = vsel %vm343_vm5, %v563_v61, 0.0 }
 0x15b   : > { %v618_v33 = vadd.f32 %v617_v50, %v616_v31  ;;  %v1594_v31 = vsub.f32 %v1256_v1, %v1439_v3  ;;  %v509_v63 = vmul.f32 %v1590_v39, %v1590_v39  ;;  %v1608_v1 = vsub.f32 %v1268_v16, %v1439_v3 }
 0x15d   : > { %v619_v27 = vadd.f32 %v618_v33, %v558_v21  ;;  %v507_v33 = vmul.f32 %v1583_v55, %v1583_v55  ;;  %v562_v21 = vsel %vm264_vm1, %v505_v28, 0.0  ;;  %v566_v16 = vsel %vm1146_vm4, %v509_v63, 0.0 }
 0x15f   : > { %v620_v41 = vadd.f32 %v619_v27, %v559_v24  ;;  %v508_v27 = vmul.f32 %v1594_v31, %v1594_v31  ;;  %v1615_v24 = vsub.f32 %v1271_v18, %v1439_v3  ;;  %v564_v28 = vsel %vm1131_vm2, %v507_v33, 0.0 }
 0x160   : > { %v629_v33 = vsel %vm343_vm5, %v566_v16, 0.0 }
 0x161   : > { %v622_v43 = vadd.f32 %v621_v14, %v620_v41  ;;  %v1619_v41 = vsub.f32 %v1275_v20, %v1439_v3  ;;  %v512_v18 = vmul.f32 %v1615_v24, %v1615_v24  ;;  %v1633_v20 = vsub.f32 %v1287_v29, %v1439_v3 }
 0x163   : > { %v623_v50 = vadd.f32 %v622_v43, %v561_v42  ;;  %v510_v43 = vmul.f32 %v1608_v1, %v1608_v1  ;;  %v565_v42 = vsel %vm264_vm1, %v508_v27, 0.0  ;;  %v569_v29 = vsel %vm1146_vm4, %v512_v18, 0.0 }
 0x165   : > { %v624_v51 = vadd.f32 %v623_v50, %v562_v21  ;;  %v511_v50 = vmul.f32 %v1619_v41, %v1619_v41  ;;  %v1640_v21 = vsub.f32 %v1290_v32, %v1439_v3  ;;  %v567_v27 = vsel %vm1131_vm2, %v510_v43, 0.0 }
 0x166   : > { %v633_v43 = vsel %vm343_vm5, %v569_v29, 0.0 }
 0x167   : > { %v626_v53 = vadd.f32 %v625_v23, %v624_v51  ;;  %v1644_v51 = vsub.f32 %v1294_v36, %v1439_v3  ;;  %v515_v32 = vmul.f32 %v1640_v21, %v1640_v21  ;;  %v1658_v36 = vsub.f32 %v1306_v44, %v1439_v3 }
 0x169   : > { %v627_v14 = vadd.f32 %v626_v53, %v564_v28  ;;  %v513_v53 = vmul.f32 %v1633_v20, %v1633_v20  ;;  %v568_v28 = vsel %vm264_vm1, %v511_v50, 0.0  ;;  %v572_v44 = vsel %vm1146_vm4, %v515_v32, 0.0 }
 0x16b   : > { %v628_v61 = vadd.f32 %v627_v14, %v565_v42  ;;  %v514_v14 = vmul.f32 %v1644_v51, %v1644_v51  ;;  %v1665_v42 = vsub.f32 %v1309_v47, %v1439_v3  ;;  %v570_v50 = vsel %vm1131_vm2, %v513_v53, 0.0 }
 0x16c   : > { %v637_v53 = vsel %vm343_vm5, %v572_v44, 0.0 }
 0x16d   : > { %v630_v63 = vadd.f32 %v629_v33, %v628_v61  ;;  %v1669_v61 = vsub.f32 %v1313_v49, %v1439_v3  ;;  %v518_v47 = vmul.f32 %v1665_v42, %v1665_v42  ;;  %v1683_v49 = vsub.f32 %v1325_v58, %v1439_v3 }
 0x16f   : > { %v631_v23 = vadd.f32 %v630_v63, %v567_v27  ;;  %v516_v63 = vmul.f32 %v1658_v36, %v1658_v36  ;;  %v571_v27 = vsel %vm264_vm1, %v514_v14, 0.0  ;;  %v575_v58 = vsel %vm1146_vm4, %v518_v47, 0.0 }
 0x171   : > { %v632_v16 = vadd.f32 %v631_v23, %v568_v28  ;;  %v517_v23 = vmul.f32 %v1669_v61, %v1669_v61  ;;  %v1690_v28 = vsub.f32 %v1328_v60, %v1439_v3  ;;  %v573_v14 = vsel %vm1131_vm2, %v516_v63, 0.0 }
 0x172   : > { %v641_v63 = vsel %vm343_vm5, %v575_v58, 0.0 }
 0x173   : > { %v634_v18 = vadd.f32 %v633_v43, %v632_v16  ;;  %v1694_v16 = vsub.f32 %v1332_v0, %v1439_v3  ;;  %v521_v60 = vmul.f32 %v1690_v28, %v1690_v28  ;;  %v1708_v0 = vsub.f32 %v1344_v17, %v1439_v3 }
 0x175   : > { %v635_v33 = vadd.f32 %v634_v18, %v570_v50  ;;  %v519_v18 = vmul.f32 %v1683_v49, %v1683_v49  ;;  %v574_v50 = vsel %vm264_vm1, %v517_v23, 0.0  ;;  %v578_v17 = vsel %vm1146_vm4, %v521_v60, 0.0 }
 0x177   : > { %v636_v29 = vadd.f32 %v635_v33, %v571_v27  ;;  %v520_v33 = vmul.f32 %v1694_v16, %v1694_v16  ;;  %v1715_v27 = vsub.f32 %v1347_v22, %v1439_v3  ;;  %v576_v23 = vsel %vm1131_vm2, %v519_v18, 0.0 }
 0x178   : > { %v645_v18 = vsel %vm343_vm5, %v578_v17, 0.0 }
 0x179   : > { %v638_v32 = vadd.f32 %v637_v53, %v636_v29  ;;  %v1719_v29 = vsub.f32 %v1351_v26, %v1439_v3  ;;  %v524_v22 = vmul.f32 %v1715_v27, %v1715_v27  ;;  %v1733_v26 = vsub.f32 %v1363_v38, %v1439_v3 }
 0x17b   : > { %v639_v43 = vadd.f32 %v638_v32, %v573_v14  ;;  %v522_v32 = vmul.f32 %v1708_v0, %v1708_v0  ;;  %v577_v14 = vsel %vm264_vm1, %v520_v33, 0.0  ;;  %v581_v38 = vsel %vm1146_vm4, %v524_v22, 0.0 }
 0x17d   : > { %v640_v44 = vadd.f32 %v639_v43, %v574_v50  ;;  %v523_v43 = vmul.f32 %v1719_v29, %v1719_v29  ;;  %v1740_v50 = vsub.f32 %v1366_v40, %v1439_v3  ;;  %v579_v33 = vsel %vm1131_vm2, %v522_v32, 0.0 }
 0x17e   : > { %v649_v32 = vsel %vm343_vm5, %v581_v38, 0.0 }
 0x17f   : > { %v642_v47 = vadd.f32 %v641_v63, %v640_v44  ;;  %v1744_v44 = vsub.f32 %v1370_v46, %v1439_v3  ;;  %v527_v40 = vmul.f32 %v1740_v50, %v1740_v50  ;;  %v1758_v46 = vsub.f32 %v1382_v57, %v1439_v3 }
 0x181   : > { %v643_v53 = vadd.f32 %v642_v47, %v576_v23  ;;  %v525_v47 = vmul.f32 %v1733_v26, %v1733_v26  ;;  %v580_v23 = vsel %vm264_vm1, %v523_v43, 0.0  ;;  %v584_v57 = vsel %vm1146_vm4, %v527_v40, 0.0  ;;  %v2195_v40 = vld [vmem:[#allocation6_spill] sm:$0xff] }
 0x183   : > { %v644_v58 = vadd.f32 %v643_v53, %v577_v14  ;;  %v526_v53 = vmul.f32 %v1744_v44, %v1744_v44  ;;  %v1765_v14 = vsub.f32 %v1385_v62, %v1439_v3  ;;  %v582_v43 = vsel %vm1131_vm2, %v525_v47, 0.0 }
 0x185   : > { %v646_v60 = vadd.f32 %v645_v18, %v644_v58  ;;  %v1769_v58 = vsub.f32 %v1389_v8, %v1439_v3  ;;  %v530_v62 = vmul.f32 %v1765_v14, %v1765_v14  ;;  %v2194_v8 = vld [vmem:[#allocation5_spill] sm:$0xff] }
 0x187   : > { %v647_v63 = vadd.f32 %v646_v60, %v579_v33  ;;  %v528_v60 = vmul.f32 %v1758_v46, %v1758_v46  ;;  %v583_v33 = vsel %vm264_vm1, %v526_v53, 0.0  ;;  %v529_v47 = vmul.f32 %v1769_v58, %v1769_v58  ;;  %v2197_v53 = vld [vmem:[#allocation7_spill] sm:$0xff] }
 0x189   : > { %v648_v17 = vadd.f32 %v647_v63, %v580_v23  ;;  %v1783_v63 = vsub.f32 %v2194_v8, %v1439_v3  ;;  %v653_v23 = vsel %vm343_vm5, %v584_v57, 0.0  ;;  %v586_v57 = vsel %vm264_vm1, %v529_v47, 0.0 }
 0x18a   : > { %v1819_v47 = vsub.f32 %v1427_v9, %v1439_v3 }
 0x18b   : > { %v650_v22 = vadd.f32 %v649_v32, %v648_v17  ;;  %v1790_v17 = vsub.f32 %v2195_v40, %v1439_v3  ;;  %v531_v8 = vmul.f32 %v1783_v63, %v1783_v63  ;;  %v2198_v40 = vld [vmem:[#allocation8_spill] sm:$0xff] }
 0x18c   : > { %2200 = vst [vmem:[#allocation7_spill] sm:$0xff] %v1819_v47  ;;  %v535_v9 = vmul.f32 %v1819_v47, %v1819_v47 }
 0x18d   : > { %v651_v18 = vadd.f32 %v650_v22, %v582_v43  ;;  %2196 = vst [vmem:[#allocation5_spill] sm:$0xff] %v1790_v17  ;;  %v1794_v22 = vsub.f32 %v2197_v53, %v1439_v3  ;;  %v585_v43 = vsel %vm1131_vm2, %v528_v60, 0.0  ;;  %v1808_v53 = vsub.f32 %v2198_v40, %v1439_v3 }
 0x18f   : > { %v652_v38 = vadd.f32 %v651_v18, %v583_v33  ;;  %v587_v18 = vsel %vm1146_vm4, %v530_v62, 0.0  ;;  %v532_v60 = vmul.f32 %v1794_v22, %v1794_v22 }
 0x190   : > { %v657_v62 = vsel %vm343_vm5, %v587_v18, 0.0 }
 0x191   : > { %v654_v32 = vadd.f32 %v653_v23, %v652_v38  ;;  %v533_v38 = vmul.f32 %v1790_v17, %v1790_v17  ;;  %v534_v17 = vmul.f32 %v1808_v53, %v1808_v53  ;;  %v589_v18 = vsel %vm264_vm1, %v532_v60, 0.0 }
 0x192   : > { %v592_v60 = vsel %vm264_vm1, %v535_v9, 0.0 }
 0x193   : > { %v655_v33 = vadd.f32 %v654_v32, %v585_v43  ;;  %v1815_v32 = vsub.f32 %v1423_v59, %v1439_v3 }
 0x195   : > { %v656_v23 = vadd.f32 %v655_v33, %v586_v57  ;;  %2199 = vst [vmem:[#allocation6_spill] sm:$0xff] %v1815_v32  ;;  %v588_v33 = vsel %vm1131_vm2, %v531_v8, 0.0  ;;  %v590_v57 = vsel %vm1146_vm4, %v533_v38, 0.0  ;;  %v536_v59 = vmul.f32 %v1815_v32, %v1815_v32 }
 0x196   : > { %v661_v3 = vsel %vm343_vm5, %v590_v57, 0.0  ;;  %v591_v38 = vsel %vm1131_vm2, %v534_v17, 0.0 }
 0x197   : > { %v658_v43 = vadd.f32 %v657_v62, %v656_v23  ;;  %v593_v62 = vsel %vm1146_vm4, %v536_v59, 0.0 }
 0x199   : > { %v659_v40 = vadd.f32 %v658_v43, %v588_v33 }
 0x19b   : > { %v660_v23 = vadd.f32 %v659_v40, %v589_v18  ;;  %v665_v40 = vsel %vm343_vm5, %v593_v62, 0.0 }
 0x19d   : > { %v662_v8 = vadd.f32 %v661_v3, %v660_v23 }
 0x19f   : > { %v663_v43 = vadd.f32 %v662_v8, %v591_v38 }
 0x1a1   : > { %v664_v33 = vadd.f32 %v663_v43, %v592_v60 }
 0x1a3   : > { %v666_v18 = vadd.f32 %v665_v40, %v664_v33 }
 0x1a5   : > { %675 = vadd.xlane.f32.xlu0 %v666_v18 }
 0x232   : > { %v676_v32 = vpop.xlane.xlu0 %675 }
 0x233   : > { %v677_v47 = vrot.slane %v676_v32, 4 }
 0x235   : > { %v678_v57 = vadd.f32 %v677_v47, %v676_v32  ;;  %v1081_v32 = vmov 0.0  }
 0x236   : > { %932 = vst [vmem:[%s1846_s22] sm:$0xff] %v1081_v32  ;;  %933 = vst [vmem:[%s1846_s22 + $0x8] sm:$0xff] %v1081_v32 }
 0x237   : > { %v679_v23 = vrot.slane %v678_v57, 2  ;;  %934 = vst [vmem:[%s1846_s22 + $0x10] sm:$0x7f] %v1081_v32  ;;  %983 = vst [vmem:[%s1846_s22 + $0x198] sm:$0xff] %v1081_v32 }
 0x238   : > { %984 = vst [vmem:[%s1846_s22 + $0x1a0] sm:$0xff] %v1081_v32  ;;  %985 = vst [vmem:[%s1846_s22 + $0x1a8] sm:$0x7f] %v1081_v32 }
 0x239   : > { %v680_v3 = vadd.f32 %v679_v23, %v678_v57  ;;  %986 = vst [vmem:[%s1846_s22 + $0x1b0] sm:$0xff] %v1081_v32  ;;  %987 = vst [vmem:[%s1846_s22 + $0x1b8] sm:$0xff] %v1081_v32  ;;  %v2202_v23 = vld [vmem:[#allocation7_spill] sm:$0xff] }
 0x23a   : > { %988 = vst [vmem:[%s1846_s22 + $0x1c0] sm:$0x7f] %v1081_v32 }
 0x23b   : > { %v681_v6 = vrot.slane %v680_v3, 1 }
 0x23d   : > { %v682_v17 = vadd.f32 %v681_v6, %v680_v3  ;;  %v2203_v3 = vld [vmem:[#allocation6_spill] sm:$0xff] }
 0x23f   : > { %1058 = vpush %v682_v17 }
 0x270   : > { %s1059_s23 = spop %1058 }
 0x271   : > { %s684_s24 = smul.f32 0.00048828125, %s1059_s23 }
 0x273   : > { %s685_s25 = sadd.f32 1e-05, %s684_s24 }
 0x275   : > { %v686_v6 = vstv %s685_s25 }
 0x276   : > { %1071 = vrsqrt.f32 %v686_v6 }
 0x280   : > { %v1072_v47 = vpop.eup %1071 }
 0x281   : > { %1060 = vpush %v1072_v47 }
 0x2b2   : > { %s1061_s26 = spop %1060 }
 0x2b3   : > { %v689_v59 = vstv %s1061_s26 }
 0x2b4   : > { %v693_v9 = vmul.f32 %v689_v59, %v1443_v12  ;;  %v694_v8 = vmul.f32 %v689_v59, %v1447_v13  ;;  %v695_v38 = vmul.f32 %v689_v59, %v1451_v19  ;;  %v696_v62 = vmul.f32 %v689_v59, %v1461_v4 }
 0x2b5   : > { %v697_v43 = vmul.f32 %v689_v59, %v1469_v7  ;;  %v698_v60 = vmul.f32 %v689_v59, %v1465_v5  ;;  %v699_v33 = vmul.f32 %v689_v59, %v1484_v15  ;;  %v700_v40 = vmul.f32 %v689_v59, %v1494_v52 }
 0x2b6   : > { %v701_v18 = vmul.f32 %v689_v59, %v1490_v48  ;;  %v702_v57 = vmul.f32 %v689_v59, %v1508_v25  ;;  %v703_v12 = vmul.f32 %v689_v59, %v1519_v34  ;;  %v704_v13 = vmul.f32 %v689_v59, %v1515_v11 }
 0x2b7   : > { %v705_v19 = vmul.f32 %v689_v59, %v1533_v35  ;;  %v706_v4 = vmul.f32 %v689_v59, %v1544_v54  ;;  %v707_v7 = vmul.f32 %v689_v59, %v1540_v37  ;;  %v708_v5 = vmul.f32 %v689_v59, %v1558_v45 }
 0x2b8   : > { %v709_v15 = vmul.f32 %v689_v59, %v1569_v30  ;;  %v710_v52 = vmul.f32 %v689_v59, %v1565_v56  ;;  %v711_v48 = vmul.f32 %v689_v59, %v1583_v55  ;;  %v712_v25 = vmul.f32 %v689_v59, %v1594_v31 }
 0x2b9   : > { %v713_v34 = vmul.f32 %v689_v59, %v1590_v39  ;;  %v714_v11 = vmul.f32 %v689_v59, %v1608_v1  ;;  %v715_v35 = vmul.f32 %v689_v59, %v1619_v41  ;;  %v716_v54 = vmul.f32 %v689_v59, %v1615_v24 }
 0x2ba   : > { %v717_v37 = vmul.f32 %v689_v59, %v1633_v20  ;;  %v718_v45 = vmul.f32 %v689_v59, %v1644_v51  ;;  %v719_v30 = vmul.f32 %v689_v59, %v1640_v21  ;;  %v720_v56 = vmul.f32 %v689_v59, %v1658_v36 }
 0x2bb   : > { %v721_v55 = vmul.f32 %v689_v59, %v1669_v61  ;;  %v722_v31 = vmul.f32 %v689_v59, %v1665_v42  ;;  %v723_v39 = vmul.f32 %v689_v59, %v1683_v49  ;;  %v724_v1 = vmul.f32 %v689_v59, %v1694_v16  ;;  %v1051_v49 = vld [vmem:[%s2167_s1] ss:$0 sm:$0xff] }
 0x2bc   : > { %v725_v41 = vmul.f32 %v689_v59, %v1690_v28  ;;  %v726_v24 = vmul.f32 %v689_v59, %v1708_v0  ;;  %v727_v20 = vmul.f32 %v689_v59, %v1719_v29  ;;  %v728_v51 = vmul.f32 %v689_v59, %v1715_v27  ;;  %v2201_v29 = vld [vmem:[#allocation5_spill] sm:$0xff] }
 0x2bd   : > { %v729_v21 = vmul.f32 %v689_v59, %v1733_v26  ;;  %v730_v36 = vmul.f32 %v689_v59, %v1744_v44  ;;  %v731_v61 = vmul.f32 %v689_v59, %v1740_v50  ;;  %v732_v42 = vmul.f32 %v689_v59, %v1758_v46 }
 0x2be   : > { %v733_v28 = vmul.f32 %v689_v59, %v1769_v58  ;;  %v734_v16 = vmul.f32 %v689_v59, %v1765_v14  ;;  %v735_v0 = vmul.f32 %v689_v59, %v1783_v63  ;;  %v736_v27 = vmul.f32 %v689_v59, %v1794_v22 }
 0x2bf   : > { %v737_v26 = vmul.f32 %v689_v59, %v2201_v29  ;;  %v738_v44 = vmul.f32 %v689_v59, %v1808_v53  ;;  %v739_v50 = vmul.f32 %v689_v59, %v2202_v23  ;;  %v740_v46 = vmul.f32 %v689_v59, %v2203_v3 }
 0x2c0   : > { %v757_v17 = vmul.f32 %v1051_v49, %v693_v9  ;;  %v758_v32 = vmul.f32 %v1051_v49, %v694_v8  ;;  %v759_v6 = vmul.f32 %v1051_v49, %v695_v38  ;;  %v760_v47 = vmul.f32 %v1051_v49, %v696_v62 }
 0x2c1   : > { %v761_v10 = vmul.f32 %v1051_v49, %v697_v43  ;;  %v762_v58 = vmul.f32 %v1051_v49, %v698_v60  ;;  %v763_v2 = vmul.f32 %v1051_v49, %v699_v33  ;;  %v764_v14 = vmul.f32 %v1051_v49, %v700_v40 }
 0x2c2   : > { %v765_v63 = vmul.f32 %v1051_v49, %v701_v18  ;;  %v766_v22 = vmul.f32 %v1051_v49, %v702_v57  ;;  %v767_v29 = vmul.f32 %v1051_v49, %v703_v12  ;;  %v768_v53 = vmul.f32 %v1051_v49, %v704_v13 }
 0x2c3   : > { %v769_v23 = vmul.f32 %v1051_v49, %v705_v19  ;;  %v770_v3 = vmul.f32 %v1051_v49, %v706_v4  ;;  %v771_v59 = vmul.f32 %v1051_v49, %v707_v7  ;;  %v772_v9 = vmul.f32 %v1051_v49, %v708_v5 }
 0x2c4   : > { %v773_v8 = vmul.f32 %v1051_v49, %v709_v15  ;;  %v774_v38 = vmul.f32 %v1051_v49, %v710_v52  ;;  %v775_v62 = vmul.f32 %v1051_v49, %v711_v48  ;;  %v776_v43 = vmul.f32 %v1051_v49, %v712_v25 }
 0x2c5   : > { %v777_v60 = vmul.f32 %v1051_v49, %v713_v34  ;;  %v778_v33 = vmul.f32 %v1051_v49, %v714_v11  ;;  %v779_v40 = vmul.f32 %v1051_v49, %v715_v35  ;;  %v780_v18 = vmul.f32 %v1051_v49, %v716_v54 }
 0x2c6   : > { %v781_v57 = vmul.f32 %v1051_v49, %v717_v37  ;;  %v782_v12 = vmul.f32 %v1051_v49, %v718_v45  ;;  %v783_v13 = vmul.f32 %v1051_v49, %v719_v30  ;;  %v784_v19 = vmul.f32 %v1051_v49, %v720_v56  ;;  %v1052_v45 = vld [vmem:[%s2168_s2] ss:$0 sm:$0xff] }
 0x2c7   : > { %v785_v4 = vmul.f32 %v1051_v49, %v721_v55  ;;  %v786_v7 = vmul.f32 %v1051_v49, %v722_v31  ;;  %v787_v5 = vmul.f32 %v1051_v49, %v723_v39  ;;  %v788_v15 = vmul.f32 %v1051_v49, %v724_v1 }
 0x2c8   : > { %v789_v52 = vmul.f32 %v1051_v49, %v725_v41  ;;  %v790_v48 = vmul.f32 %v1051_v49, %v726_v24  ;;  %v791_v25 = vmul.f32 %v1051_v49, %v727_v20  ;;  %v792_v34 = vmul.f32 %v1051_v49, %v728_v51 }
 0x2c9   : > { %v793_v11 = vmul.f32 %v1051_v49, %v729_v21  ;;  %v794_v35 = vmul.f32 %v1051_v49, %v730_v36  ;;  %v795_v54 = vmul.f32 %v1051_v49, %v731_v61  ;;  %v796_v37 = vmul.f32 %v1051_v49, %v732_v42 }
 0x2ca   : > { %v797_v30 = vmul.f32 %v1051_v49, %v733_v28  ;;  %v798_v56 = vmul.f32 %v1051_v49, %v734_v16  ;;  %v799_v55 = vmul.f32 %v1051_v49, %v735_v0  ;;  %v800_v31 = vmul.f32 %v1051_v49, %v736_v27 }
 0x2cb   : > { %v801_v39 = vmul.f32 %v1051_v49, %v737_v26  ;;  %v802_v1 = vmul.f32 %v1051_v49, %v738_v44  ;;  %v803_v41 = vmul.f32 %v1051_v49, %v739_v50  ;;  %v804_v24 = vmul.f32 %v1051_v49, %v740_v46 }
 0x2cc   : > { %v821_v20 = vadd.f32 %v1052_v45, %v757_v17  ;;  %v822_v51 = vadd.f32 %v1052_v45, %v758_v32  ;;  %v823_v21 = vadd.f32 %v1052_v45, %v759_v6  ;;  %v824_v36 = vadd.f32 %v1052_v45, %v760_v47 }
 0x2cd   : > { %v825_v61 = vadd.f32 %v1052_v45, %v761_v10  ;;  %v826_v42 = vadd.f32 %v1052_v45, %v762_v58  ;;  %v827_v28 = vadd.f32 %v1052_v45, %v763_v2  ;;  %v828_v16 = vadd.f32 %v1052_v45, %v764_v14 }
 0x2ce   : > { %v1911_v0 = vadd.f32 %v1052_v45, %v765_v63  ;;  %v1913_v27 = vadd.f32 %v1052_v45, %v766_v22  ;;  %v831_v26 = vadd.f32 %v1052_v45, %v767_v29  ;;  %v1915_v44 = vadd.f32 %v1052_v45, %v768_v53 }
 0x2cf   : > { %v1917_v50 = vadd.f32 %v1052_v45, %v769_v23  ;;  %v834_v46 = vadd.f32 %v1052_v45, %v770_v3  ;;  %v1919_v49 = vadd.f32 %v1052_v45, %v771_v59  ;;  %v1921_v17 = vadd.f32 %v1052_v45, %v772_v9 }
 0x2d0   : > { %v837_v32 = vadd.f32 %v1052_v45, %v773_v8  ;;  %v1923_v6 = vadd.f32 %v1052_v45, %v774_v38  ;;  %v1925_v10 = vadd.f32 %v1052_v45, %v775_v62  ;;  %v840_v2 = vadd.f32 %v1052_v45, %v776_v43 }
 0x2d1   : > { %v1927_v47 = vadd.f32 %v1052_v45, %v777_v60  ;;  %v1929_v58 = vadd.f32 %v1052_v45, %v778_v33  ;;  %v1931_v14 = vadd.f32 %v1052_v45, %v779_v40  ;;  %v1933_v63 = vadd.f32 %v1052_v45, %v780_v18 }
 0x2d2   : > { %v1935_v22 = vadd.f32 %v1052_v45, %v781_v57  ;;  %v1937_v29 = vadd.f32 %v1052_v45, %v782_v12  ;;  %v1939_v53 = vadd.f32 %v1052_v45, %v783_v13  ;;  %v1941_v23 = vadd.f32 %v1052_v45, %v784_v19 }
 0x2d3   : > { %v1943_v3 = vadd.f32 %v1052_v45, %v785_v4  ;;  %v1945_v59 = vadd.f32 %v1052_v45, %v786_v7  ;;  %v1947_v9 = vadd.f32 %v1052_v45, %v787_v5  ;;  %v1949_v8 = vadd.f32 %v1052_v45, %v788_v15 }
 0x2d4   : > { %v1951_v38 = vadd.f32 %v1052_v45, %v789_v52  ;;  %v1953_v62 = vadd.f32 %v1052_v45, %v790_v48  ;;  %v1955_v43 = vadd.f32 %v1052_v45, %v791_v25  ;;  %v1957_v60 = vadd.f32 %v1052_v45, %v792_v34 }
 0x2d5   : > { %v1959_v33 = vadd.f32 %v1052_v45, %v793_v11  ;;  %v1961_v40 = vadd.f32 %v1052_v45, %v794_v35  ;;  %v1963_v18 = vadd.f32 %v1052_v45, %v795_v54  ;;  %v1965_v57 = vadd.f32 %v1052_v45, %v796_v37 }
 0x2d6   : > { %v1967_v12 = vadd.f32 %v1052_v45, %v797_v30  ;;  %v1969_v13 = vadd.f32 %v1052_v45, %v798_v56  ;;  %v1971_v19 = vadd.f32 %v1052_v45, %v799_v55  ;;  %v1973_v4 = vadd.f32 %v1052_v45, %v800_v31 }
 0x2d7   : > { %v1975_v7 = vadd.f32 %v1052_v45, %v801_v39  ;;  %v1977_v5 = vadd.f32 %v1052_v45, %v802_v1  ;;  %v1979_v15 = vadd.f32 %v1052_v45, %v803_v41  ;;  %v1981_v52 = vadd.f32 %v1052_v45, %v804_v24 }
 0x2d8   : > { %v878_v25 = vsel %vm1131_vm2, %v821_v20, 0.0  ;;  %v879_v11 = vsel %vm264_vm1, %v822_v51, 0.0  ;;  %v880_v54 = vsel %vm1146_vm4, %v823_v21, 0.0  ;;  %v881_v37 = vsel %vm1131_vm2, %v824_v36, 0.0 }
 0x2d9   : > { %v882_v45 = vsel %vm264_vm1, %v825_v61, 0.0  ;;  %v883_v30 = vsel %vm1146_vm4, %v826_v42, 0.0  ;;  %v884_v56 = vsel %vm1131_vm2, %v827_v28, 0.0  ;;  %v885_v55 = vsel %vm264_vm1, %v828_v16, 0.0  ;;  %935 = vst [vmem:[%s1846_s22 + $0x18] sm:$0xff] %v878_v25  ;;  %936 = vst [vmem:[%s1846_s22 + $0x20] sm:$0xff] %v879_v11 }
 0x2da   : > { %937 = vst [vmem:[%s1846_s22 + $0x28] sm:$0x7f] %v880_v54  ;;  %938 = vst [vmem:[%s1846_s22 + $0x30] sm:$0xff] %v881_v37  ;;  %v886_v31 = vsel %vm1146_vm4, %v1911_v0, 0.0  ;;  %v887_v39 = vsel %vm1131_vm2, %v1913_v27, 0.0  ;;  %v888_v1 = vsel %vm264_vm1, %v831_v26, 0.0 }
 0x2db   : > { %v889_v41 = vsel %vm1146_vm4, %v1915_v44, 0.0  ;;  %939 = vst [vmem:[%s1846_s22 + $0x38] sm:$0xff] %v882_v45  ;;  %940 = vst [vmem:[%s1846_s22 + $0x40] sm:$0x7f] %v883_v30  ;;  %v890_v24 = vsel %vm1131_vm2, %v1917_v50, 0.0  ;;  %v891_v20 = vsel %vm264_vm1, %v834_v46, 0.0 }
 0x2dc   : > { %941 = vst [vmem:[%s1846_s22 + $0x48] sm:$0xff] %v884_v56  ;;  %942 = vst [vmem:[%s1846_s22 + $0x50] sm:$0xff] %v885_v55  ;;  %v892_v51 = vsel %vm1146_vm4, %v1919_v49, 0.0  ;;  %v893_v21 = vsel %vm1131_vm2, %v1921_v17, 0.0  ;;  %v894_v36 = vsel %vm264_vm1, %v837_v32, 0.0  ;;  %v895_v61 = vsel %vm1146_vm4, %v1923_v6, 0.0 }
 0x2dd   : > { %943 = vst [vmem:[%s1846_s22 + $0x58] sm:$0x7f] %v886_v31  ;;  %944 = vst [vmem:[%s1846_s22 + $0x60] sm:$0xff] %v887_v39  ;;  %v896_v42 = vsel %vm1131_vm2, %v1925_v10, 0.0  ;;  %v897_v28 = vsel %vm264_vm1, %v840_v2, 0.0  ;;  %v898_v16 = vsel %vm1146_vm4, %v1927_v47, 0.0 }
 0x2de   : > { %945 = vst [vmem:[%s1846_s22 + $0x68] sm:$0xff] %v888_v1  ;;  %946 = vst [vmem:[%s1846_s22 + $0x70] sm:$0x7f] %v889_v41  ;;  %v899_v0 = vsel %vm1131_vm2, %v1929_v58, 0.0  ;;  %v900_v27 = vsel %vm264_vm1, %v1931_v14, 0.0  ;;  %v901_v26 = vsel %vm1146_vm4, %v1933_v63, 0.0 }
 0x2df   : > { %947 = vst [vmem:[%s1846_s22 + $0x78] sm:$0xff] %v890_v24  ;;  %948 = vst [vmem:[%s1846_s22 + $0x80] sm:$0xff] %v891_v20  ;;  %v902_v44 = vsel %vm1131_vm2, %v1935_v22, 0.0  ;;  %v903_v50 = vsel %vm264_vm1, %v1937_v29, 0.0  ;;  %v904_v46 = vsel %vm1146_vm4, %v1939_v53, 0.0  ;;  %v905_v49 = vsel %vm1131_vm2, %v1941_v23, 0.0 }
 0x2e0   : > { %949 = vst [vmem:[%s1846_s22 + $0x88] sm:$0x7f] %v892_v51  ;;  %950 = vst [vmem:[%s1846_s22 + $0x90] sm:$0xff] %v893_v21  ;;  %v906_v17 = vsel %vm264_vm1, %v1943_v3, 0.0  ;;  %v907_v32 = vsel %vm1146_vm4, %v1945_v59, 0.0  ;;  %v908_v6 = vsel %vm1131_vm2, %v1947_v9, 0.0 }
 0x2e1   : > { %951 = vst [vmem:[%s1846_s22 + $0x98] sm:$0xff] %v894_v36  ;;  %952 = vst [vmem:[%s1846_s22 + $0xa0] sm:$0x7f] %v895_v61  ;;  %v909_v10 = vsel %vm264_vm1, %v1949_v8, 0.0  ;;  %v910_v2 = vsel %vm1146_vm4, %v1951_v38, 0.0  ;;  %v911_v47 = vsel %vm1131_vm2, %v1953_v62, 0.0 }
 0x2e2   : > { %953 = vst [vmem:[%s1846_s22 + $0xa8] sm:$0xff] %v896_v42  ;;  %954 = vst [vmem:[%s1846_s22 + $0xb0] sm:$0xff] %v897_v28  ;;  %v912_v58 = vsel %vm264_vm1, %v1955_v43, 0.0  ;;  %v913_v14 = vsel %vm1146_vm4, %v1957_v60, 0.0  ;;  %v914_v63 = vsel %vm1131_vm2, %v1959_v33, 0.0  ;;  %v915_v22 = vsel %vm264_vm1, %v1961_v40, 0.0 }
 0x2e3   : > { %955 = vst [vmem:[%s1846_s22 + $0xb8] sm:$0x7f] %v898_v16  ;;  %956 = vst [vmem:[%s1846_s22 + $0xc0] sm:$0xff] %v899_v0  ;;  %v916_v29 = vsel %vm1146_vm4, %v1963_v18, 0.0  ;;  %v917_v53 = vsel %vm1131_vm2, %v1965_v57, 0.0  ;;  %v918_v23 = vsel %vm264_vm1, %v1967_v12, 0.0 }
 0x2e4   : > { %957 = vst [vmem:[%s1846_s22 + $0xc8] sm:$0xff] %v900_v27  ;;  %958 = vst [vmem:[%s1846_s22 + $0xd0] sm:$0x7f] %v901_v26  ;;  %v919_v3 = vsel %vm1146_vm4, %v1969_v13, 0.0  ;;  %v920_v59 = vsel %vm1131_vm2, %v1971_v19, 0.0  ;;  %v921_v9 = vsel %vm264_vm1, %v1973_v4, 0.0 }
 0x2e5   : > { %959 = vst [vmem:[%s1846_s22 + $0xd8] sm:$0xff] %v902_v44  ;;  %960 = vst [vmem:[%s1846_s22 + $0xe0] sm:$0xff] %v903_v50  ;;  %v922_v8 = vsel %vm1146_vm4, %v1975_v7, 0.0  ;;  %v923_v38 = vsel %vm1131_vm2, %v1977_v5, 0.0  ;;  %v924_v62 = vsel %vm264_vm1, %v1979_v15, 0.0  ;;  %v925_v43 = vsel %vm1146_vm4, %v1981_v52, 0.0 }
 0x2e6   : > { %961 = vst [vmem:[%s1846_s22 + $0xe8] sm:$0x7f] %v904_v46  ;;  %962 = vst [vmem:[%s1846_s22 + $0xf0] sm:$0xff] %v905_v49 }
 0x2e7   : > { %963 = vst [vmem:[%s1846_s22 + $0xf8] sm:$0xff] %v906_v17  ;;  %964 = vst [vmem:[%s1846_s22 + $0x100] sm:$0x7f] %v907_v32 }
 0x2e8   : > { %965 = vst [vmem:[%s1846_s22 + $0x108] sm:$0xff] %v908_v6  ;;  %966 = vst [vmem:[%s1846_s22 + $0x110] sm:$0xff] %v909_v10 }
 0x2e9   : > { %967 = vst [vmem:[%s1846_s22 + $0x118] sm:$0x7f] %v910_v2  ;;  %968 = vst [vmem:[%s1846_s22 + $0x120] sm:$0xff] %v911_v47 }
 0x2ea   : > { %969 = vst [vmem:[%s1846_s22 + $0x128] sm:$0xff] %v912_v58  ;;  %970 = vst [vmem:[%s1846_s22 + $0x130] sm:$0x7f] %v913_v14 }
 0x2eb   : > { %971 = vst [vmem:[%s1846_s22 + $0x138] sm:$0xff] %v914_v63  ;;  %972 = vst [vmem:[%s1846_s22 + $0x140] sm:$0xff] %v915_v22 }
 0x2ec   : > { %973 = vst [vmem:[%s1846_s22 + $0x148] sm:$0x7f] %v916_v29  ;;  %974 = vst [vmem:[%s1846_s22 + $0x150] sm:$0xff] %v917_v53 }
 0x2ed   : > { %975 = vst [vmem:[%s1846_s22 + $0x158] sm:$0xff] %v918_v23  ;;  %976 = vst [vmem:[%s1846_s22 + $0x160] sm:$0x7f] %v919_v3 }
 0x2ee   : > { %977 = vst [vmem:[%s1846_s22 + $0x168] sm:$0xff] %v920_v59  ;;  %978 = vst [vmem:[%s1846_s22 + $0x170] sm:$0xff] %v921_v9 }
 0x2ef   : > { %979 = vst [vmem:[%s1846_s22 + $0x178] sm:$0x7f] %v922_v8  ;;  %980 = vst [vmem:[%s1846_s22 + $0x180] sm:$0xff] %v923_v38 }
 0x2f0   : > { %981 = vst [vmem:[%s1846_s22 + $0x188] sm:$0xff] %v924_v62  ;;  %982 = vst [vmem:[%s1846_s22 + $0x190] sm:$0x7f] %v925_v43 }
 0x2f1 PF: > { %s13_s12 = sadd.s32 1, %s1079_s12  }
 0x2f2   : > { %p10_p4 = scmp.ge.s32.totalorder %s13_s12, 4  }
 0x2f4   :  { %12 = sbr.rel (!%p10_p4) target bundleno = 1 (0x1), region = 62 }

// kernel: fwd.8
= control target key start
LH: loop header
LB: loop body
LE: loop exit
PB: predicated region body
PF: predicated region fallthrough
CT: control target
= control target key end

     0   :  { %s7347_s9 = smov 0   ;;  %s8642_s0 = inlined_call_operand.vmem [shape: bf16[2,437,16], index: 0, kind: input, shape index: {}]   ;;  %s8643_s1 = inlined_call_operand.vmem [shape: bf16[9,16,128], index: 1, kind: input, shape index: {}]   ;;  %s8644_s2 = inlined_call_operand.vmem [shape: f32[2,437,128], index: 2, kind: output, shape index: {}]  }
   0x1 LB: > { %s4939_s10 = sadd.s32 4294967295, %s7328_s9   ;;  %p4943_p0 = scmp.ge.s32.totalorder %s7328_s9, 1  ;;  %s7328_s9 = sphi %s7347_s9, %s12_s9  }
   0x2   : > { %p112_p1 = scmp.lt.s32.totalorder %s7328_s9, 3 }
   0x4   : > { %p113_p2 = pnand %p4943_p0, %p112_p1 }
   0x5   : > { %v7310_v0 = vld [vmem:[%s8643_s1] sm:$0xff] (!%p113_p2)   ;;  %v7330_v1 = vmov (!%p113_p2), 0.0   ;;  %vm7331_vm0 = vmmov (!%p113_p2), 0   ;;  %p134_p3 = scmp.lt.s32.totalorder (!%p113_p2), %s4939_s10, 1  ;;  %vm255_vm1 = vcmask (!%p113_p2), 130048   ;;  %v7312_v56 = vld [vmem:[%s8643_s1 + $0x8] sm:$0xff] (!%p113_p2)  }
   0x6   : > { %116 = sbr.rel (%p113_p2) target bundleno = 1075 (0x433), region = 28  ;;  %5530 = vmatprep.subr.bf16.mxu1 (!%p113_p2), %v7330_v1  ;;  %5906 = vmatprep.subr.bf16.mxu0 (!%p113_p2), %v7330_v1  ;;  %v7311_v2 = vld [vmem:[%s8643_s1 + $0x20] sm:$0xff] (!%p113_p2)   ;;  %v7313_v63 = vld [vmem:[%s8643_s1 + $0x28] sm:$0xff] (!%p113_p2)  }
   0x7   : > { %5531 = vmatpush3.bf16.msra.mxu1 (!%p113_p2), %v7310_v0  ;;  %5532 = vmatprep.mubr.msk.bf16.mxu1 (!%p113_p2), %vm7331_vm0, %v7330_v1 }
   0x8   : > { %5907 = vmatpush3.bf16.msra.mxu0 (!%p113_p2), %v7311_v2  ;;  %5624 = vmatprep.subr.bf16.mxu1 (!%p113_p2), %v7330_v1 }
   0x9   : > { %5908 = vmatprep.mubr.msk.bf16.mxu0 (!%p113_p2), %vm7331_vm0, %v7330_v1  ;;  %6000 = vmatprep.subr.bf16.mxu0 (!%p113_p2), %v7330_v1 }
   0xd   : > { %s8646_s10 = smov (!%p134_p3, %s4939_s10), 1 }
   0xe   : > { %s7298_s15 = smul.u32 220, %s8646_s10 }
   0xf   : > { %s7299_s16 = smul.u32 440, %s8646_s10 }
  0x10   : > { %s7372_s19 = scalar_lea.vmem %s8642_s0, %s7298_s15 }
  0x11   : > { %s7377_s22 = scalar_lea.vmem %s8644_s2, %s7299_s16  ;;  %v5181_v3 = vld [vmem:[%s7372_s19] sm:$0xff]   ;;  %v5288_v6 = vld [vmem:[%s7372_s19 + $0x8] sm:$0xff]   ;;  %v5289_v7 = vld [vmem:[%s7372_s19 + $0x10] sm:$0xff]  }
  0x12   : > { %v5182_v4 = vunpack.c.l.bf16 %v5181_v3  ;;  %v5183_v5 = vunpack.c.h.bf16 %v5181_v3  ;;  %312 = vst [vmem:[%s7377_s22] sm:$0xff] %v7330_v1  ;;  %313 = vst [vmem:[%s7377_s22 + $0x8] sm:$0xff] %v7330_v1  ;;  %v5290_v8 = vld [vmem:[%s7372_s19 + $0x18] sm:$0xff]   ;;  %v5187_v9 = vunpack.c.h.bf16 %v5288_v6  ;;  %v5190_v10 = vunpack.c.l.bf16 %v5289_v7  ;;  %v5291_v12 = vld [vmem:[%s7372_s19 + $0x20] sm:$0xff]  }
  0x13   : > { %314 = vst [vmem:[%s7377_s22 + $0x10] sm:$0xff] %v7330_v1  ;;  %361 = vst [vmem:[%s7377_s22 + $0x188] sm:$0xff] %v7330_v1  ;;  %v5186_v11 = vunpack.c.l.bf16 %v5288_v6  ;;  %v5292_v13 = vld [vmem:[%s7372_s19 + $0x28] sm:$0xff]   ;;  %v5293_v14 = vld [vmem:[%s7372_s19 + $0x30] sm:$0xff]   ;;  %v5191_v15 = vunpack.c.h.bf16 %v5289_v7  ;;  %v5194_v16 = vunpack.c.l.bf16 %v5290_v8  ;;  %v5195_v17 = vunpack.c.h.bf16 %v5290_v8 }
  0x14   : > { %362 = vst [vmem:[%s7377_s22 + $0x190] sm:$0xff] %v7330_v1  ;;  %363 = vst [vmem:[%s7377_s22 + $0x198] sm:$0xff] %v7330_v1  ;;  %v5198_v18 = vunpack.c.l.bf16 %v5291_v12  ;;  %v5294_v19 = vld [vmem:[%s7372_s19 + $0x38] sm:$0xff]   ;;  %v5295_v20 = vld [vmem:[%s7372_s19 + $0x40] sm:$0xff]   ;;  %v5199_v22 = vunpack.c.h.bf16 %v5291_v12  ;;  %v5202_v23 = vunpack.c.l.bf16 %v5292_v13  ;;  %v5203_v24 = vunpack.c.h.bf16 %v5292_v13 }
  0x15   : > { %364 = vst [vmem:[%s7377_s22 + $0x1a0] sm:$0xff] %v7330_v1  ;;  %365 = vst [vmem:[%s7377_s22 + $0x1a8] sm:$0xff] %v7330_v1  ;;  %v5296_v21 = vld [vmem:[%s7372_s19 + $0x48] sm:$0xff]   ;;  %v5206_v25 = vunpack.c.l.bf16 %v5293_v14  ;;  %v5297_v26 = vld [vmem:[%s7372_s19 + $0x50] sm:$0xff]   ;;  %v5207_v29 = vunpack.c.h.bf16 %v5293_v14  ;;  %v5210_v30 = vunpack.c.l.bf16 %v5294_v19  ;;  %v5211_v31 = vunpack.c.h.bf16 %v5294_v19 }
  0x16   : > { %366 = vst [vmem:[%s7377_s22 + $0x1b0] sm:$0x1f] %v7330_v1  ;;  %256 = vst.msk [vmem:[#allocation2] sm:$0xff] %vm255_vm1, %v5182_v4  ;;  %v5298_v27 = vld [vmem:[%s7372_s19 + $0x58] sm:$0xff]   ;;  %v5299_v28 = vld [vmem:[%s7372_s19 + $0x60] sm:$0xff]   ;;  %v5214_v32 = vunpack.c.l.bf16 %v5295_v20  ;;  %v5215_v35 = vunpack.c.h.bf16 %v5295_v20  ;;  %v5218_v36 = vunpack.c.l.bf16 %v5296_v21  ;;  %v5219_v37 = vunpack.c.h.bf16 %v5296_v21 }
  0x17   : > { %257 = vst.msk [vmem:[#allocation2 + $0x8] sm:$0xff] %vm255_vm1, %v5183_v5  ;;  %259 = vst.msk [vmem:[#allocation2 + $0x18] sm:$0xff] %vm255_vm1, %v5187_v9  ;;  %v5300_v33 = vld [vmem:[%s7372_s19 + $0x68] sm:$0xff]   ;;  %v5301_v34 = vld [vmem:[%s7372_s19 + $0x70] sm:$0xff]   ;;  %v5222_v38 = vunpack.c.l.bf16 %v5297_v26  ;;  %v5223_v41 = vunpack.c.h.bf16 %v5297_v26  ;;  %v5226_v42 = vunpack.c.l.bf16 %v5298_v27  ;;  %v5227_v43 = vunpack.c.h.bf16 %v5298_v27 }
  0x18   : > { %260 = vst.msk [vmem:[#allocation2 + $0x20] sm:$0xff] %vm255_vm1, %v5190_v10  ;;  %258 = vst.msk [vmem:[#allocation2 + $0x10] sm:$0xff] %vm255_vm1, %v5186_v11  ;;  %v5302_v39 = vld [vmem:[%s7372_s19 + $0x78] sm:$0xff]   ;;  %v5303_v40 = vld [vmem:[%s7372_s19 + $0x80] sm:$0xff]   ;;  %v5230_v44 = vunpack.c.l.bf16 %v5299_v28  ;;  %v5231_v45 = vunpack.c.h.bf16 %v5299_v28  ;;  %v5234_v46 = vunpack.c.l.bf16 %v5300_v33  ;;  %v5235_v47 = vunpack.c.h.bf16 %v5300_v33 }
  0x19   : > { %261 = vst.msk [vmem:[#allocation2 + $0x28] sm:$0xff] %vm255_vm1, %v5191_v15  ;;  %262 = vst.msk [vmem:[#allocation2 + $0x30] sm:$0xff] %vm255_vm1, %v5194_v16  ;;  %v5238_v48 = vunpack.c.l.bf16 %v5301_v34  ;;  %v5239_v49 = vunpack.c.h.bf16 %v5301_v34  ;;  %v5242_v50 = vunpack.c.l.bf16 %v5302_v39  ;;  %v5243_v51 = vunpack.c.h.bf16 %v5302_v39  ;;  %v5304_v53 = vld [vmem:[%s7372_s19 + $0x88] sm:$0xff]   ;;  %v5305_v11 = vld [vmem:[%s7372_s19 + $0x90] sm:$0xff]  }
  0x1a   : > { %263 = vst.msk [vmem:[#allocation2 + $0x38] sm:$0xff] %vm255_vm1, %v5195_v17  ;;  %264 = vst.msk [vmem:[#allocation2 + $0x40] sm:$0xff] %vm255_vm1, %v5198_v18  ;;  %v5246_v52 = vunpack.c.l.bf16 %v5303_v40  ;;  %v5247_v57 = vunpack.c.h.bf16 %v5303_v40  ;;  %v5250_v58 = vunpack.c.l.bf16 %v5304_v53  ;;  %v5251_v59 = vunpack.c.h.bf16 %v5304_v53  ;;  %v5306_v12 = vld [vmem:[%s7372_s19 + $0x98] sm:$0xff]   ;;  %v5307_v20 = vld [vmem:[%s7372_s19 + $0xa0] sm:$0xff]  }
  0x1b   : > { %265 = vst.msk [vmem:[#allocation2 + $0x48] sm:$0xff] %vm255_vm1, %v5199_v22  ;;  %266 = vst.msk [vmem:[#allocation2 + $0x50] sm:$0xff] %vm255_vm1, %v5202_v23  ;;  %v5254_v13 = vunpack.c.l.bf16 %v5305_v11  ;;  %v5255_v14 = vunpack.c.h.bf16 %v5305_v11  ;;  %v5258_v15 = vunpack.c.l.bf16 %v5306_v12  ;;  %v5259_v16 = vunpack.c.h.bf16 %v5306_v12  ;;  %v5308_v27 = vld [vmem:[%s7372_s19 + $0xa8] sm:$0xff]   ;;  %v5309_v34 = vld [vmem:[%s7372_s19 + $0xb0] sm:$0xff]  }
  0x1c   : > { %267 = vst.msk [vmem:[#allocation2 + $0x58] sm:$0xff] %vm255_vm1, %v5203_v24  ;;  %268 = vst.msk [vmem:[#allocation2 + $0x60] sm:$0xff] %vm255_vm1, %v5206_v25  ;;  %v5262_v22 = vunpack.c.l.bf16 %v5307_v20  ;;  %v5263_v23 = vunpack.c.h.bf16 %v5307_v20 }
  0x1d   : > { %269 = vst.msk [vmem:[#allocation2 + $0x68] sm:$0xff] %vm255_vm1, %v5207_v29  ;;  %270 = vst.msk [vmem:[#allocation2 + $0x70] sm:$0xff] %vm255_vm1, %v5210_v30  ;;  %v367_v54 = vld [vmem:[#allocation2] sm:$0xff]  ;;  %v5266_v29 = vunpack.c.l.bf16 %v5308_v27  ;;  %v5267_v30 = vunpack.c.h.bf16 %v5308_v27  ;;  %v5310_v27 = vld [vmem:[%s7372_s19 + $0xb8] sm:$0xff]  }
  0x1e   : > { %271 = vst.msk [vmem:[#allocation2 + $0x78] sm:$0xff] %vm255_vm1, %v5211_v31  ;;  %272 = vst.msk [vmem:[#allocation2 + $0x80] sm:$0xff] %vm255_vm1, %v5214_v32  ;;  %v368_v55 = vld [vmem:[#allocation2 + $0x8] sm:$0xff]  ;;  %v2374_v61 = vld [vmem:[#allocation2 + $0x18] sm:$0xff] }
  0x1f   : > { %273 = vst.msk [vmem:[#allocation2 + $0x88] sm:$0xff] %vm255_vm1, %v5215_v35  ;;  %274 = vst.msk [vmem:[#allocation2 + $0x90] sm:$0xff] %vm255_vm1, %v5218_v36  ;;  %v413_v60 = vpack.c.bf16 %v368_v55, %v367_v54  ;;  %v2375_v62 = vld [vmem:[#allocation2 + $0x20] sm:$0xff]  ;;  %v369_v2 = vld [vmem:[#allocation2 + $0x10] sm:$0xff]  ;;  %v5270_v36 = vunpack.c.l.bf16 %v5309_v34 }
  0x20   : > { %275 = vst.msk [vmem:[#allocation2 + $0x98] sm:$0xff] %vm255_vm1, %v5219_v37  ;;  %276 = vst.msk [vmem:[#allocation2 + $0xa0] sm:$0xff] %vm255_vm1, %v5222_v38  ;;  %v2420_v0 = vpack.c.bf16 %v2375_v62, %v2374_v61  ;;  %v2376_v3 = vld [vmem:[#allocation2 + $0x28] sm:$0xff]  ;;  %v2377_v4 = vld [vmem:[#allocation2 + $0x30] sm:$0xff]  ;;  %v414_v5 = vpack.c.bf16 %v2374_v61, %v369_v2  ;;  %v5271_v37 = vunpack.c.h.bf16 %v5309_v34 }
  0x21   : > { %277 = vst.msk [vmem:[#allocation2 + $0xa8] sm:$0xff] %vm255_vm1, %v5223_v41  ;;  %278 = vst.msk [vmem:[#allocation2 + $0xb0] sm:$0xff] %vm255_vm1, %v5226_v42  ;;  %5533 = vmatmul.mubr.msk.bf16.vlgmr.msra.gmra.mrb[0].mxu1 %vm255_vm1, %v413_v60  ;;  %v2421_v6 = vpack.c.bf16 %v2377_v4, %v2376_v3  ;;  %v2378_v7 = vld [vmem:[#allocation2 + $0x38] sm:$0xff]  ;;  %v2379_v8 = vld [vmem:[#allocation2 + $0x40] sm:$0xff]  ;;  %v415_v9 = vpack.c.bf16 %v2376_v3, %v2375_v62 }
  0x22   : > { %279 = vst.msk [vmem:[#allocation2 + $0xb8] sm:$0xff] %vm255_vm1, %v5227_v43  ;;  %280 = vst.msk [vmem:[#allocation2 + $0xc0] sm:$0xff] %vm255_vm1, %v5230_v44  ;;  %5625 = vmatpush3.bf16.msra.mxu1 %v7312_v56  ;;  %5909 = vmatmul.mubr.msk.bf16.vlgmr.msra.gmra.mrb[0].mxu0 %vm255_vm1, %v2420_v0  ;;  %v2422_v10 = vpack.c.bf16 %v2379_v8, %v2378_v7  ;;  %v2380_v17 = vld [vmem:[#allocation2 + $0x48] sm:$0xff]  ;;  %v2381_v18 = vld [vmem:[#allocation2 + $0x50] sm:$0xff]  ;;  %v416_v19 = vpack.c.bf16 %v2378_v7, %v2377_v4 }
  0x23   : > { %281 = vst.msk [vmem:[#allocation2 + $0xc8] sm:$0xff] %vm255_vm1, %v5231_v45  ;;  %282 = vst.msk [vmem:[#allocation2 + $0xd0] sm:$0xff] %vm255_vm1, %v5234_v46  ;;  %6001 = vmatpush3.bf16.msra.mxu0 %v7313_v63  ;;  %5536 = vmatprep.mubr.msk.bf16.mxu1 %vm7331_vm0, %v7330_v1  ;;  %v2423_v21 = vpack.c.bf16 %v2381_v18, %v2380_v17  ;;  %v2382_v24 = vld [vmem:[#allocation2 + $0x58] sm:$0xff]  ;;  %v2383_v25 = vld [vmem:[#allocation2 + $0x60] sm:$0xff]  ;;  %v417_v26 = vpack.c.bf16 %v2380_v17, %v2379_v8 }
  0x24   : > { %283 = vst.msk [vmem:[#allocation2 + $0xd8] sm:$0xff] %vm255_vm1, %v5235_v47  ;;  %284 = vst.msk [vmem:[#allocation2 + $0xe0] sm:$0xff] %vm255_vm1, %v5238_v48  ;;  %5912 = vmatprep.mubr.msk.bf16.mxu0 %vm7331_vm0, %v7330_v1  ;;  %6094 = vmatprep.subr.bf16.mxu0 %v7330_v1  ;;  %v2424_v28 = vpack.c.bf16 %v2383_v25, %v2382_v24  ;;  %v2384_v31 = vld [vmem:[#allocation2 + $0x68] sm:$0xff]  ;;  %v2385_v32 = vld [vmem:[#allocation2 + $0x70] sm:$0xff]  ;;  %v418_v33 = vpack.c.bf16 %v2382_v24, %v2381_v18 }
  0x25   : > { %285 = vst.msk [vmem:[#allocation2 + $0xe8] sm:$0xff] %vm255_vm1, %v5239_v49  ;;  %286 = vst.msk [vmem:[#allocation2 + $0xf0] sm:$0xff] %vm255_vm1, %v5242_v50  ;;  %5718 = vmatprep.subr.bf16.mxu1 %v7330_v1  ;;  %v2425_v35 = vpack.c.bf16 %v2385_v32, %v2384_v31  ;;  %v2386_v38 = vld [vmem:[#allocation2 + $0x78] sm:$0xff]  ;;  %v2387_v39 = vld [vmem:[#allocation2 + $0x80] sm:$0xff]  ;;  %v419_v40 = vpack.c.bf16 %v2384_v31, %v2383_v25 }
  0x26   : > { %287 = vst.msk [vmem:[#allocation2 + $0xf8] sm:$0xff] %vm255_vm1, %v5243_v51  ;;  %288 = vst.msk [vmem:[#allocation2 + $0x100] sm:$0xff] %vm255_vm1, %v5246_v52  ;;  %v2426_v41 = vpack.c.bf16 %v2387_v39, %v2386_v38  ;;  %v2388_v42 = vld [vmem:[#allocation2 + $0x88] sm:$0xff]  ;;  %v2389_v43 = vld [vmem:[#allocation2 + $0x90] sm:$0xff]  ;;  %v420_v44 = vpack.c.bf16 %v2386_v38, %v2385_v32 }
  0x27   : > { %289 = vst.msk [vmem:[#allocation2 + $0x108] sm:$0xff] %vm255_vm1, %v5247_v57  ;;  %290 = vst.msk [vmem:[#allocation2 + $0x110] sm:$0xff] %vm255_vm1, %v5250_v58  ;;  %v2427_v45 = vpack.c.bf16 %v2389_v43, %v2388_v42  ;;  %v2390_v46 = vld [vmem:[#allocation2 + $0x98] sm:$0xff]  ;;  %v2391_v47 = vld [vmem:[#allocation2 + $0xa0] sm:$0xff]  ;;  %v421_v48 = vpack.c.bf16 %v2388_v42, %v2387_v39 }
  0x28   : > { %291 = vst.msk [vmem:[#allocation2 + $0x118] sm:$0xff] %vm255_vm1, %v5251_v59  ;;  %292 = vst.msk [vmem:[#allocation2 + $0x120] sm:$0xff] %vm255_vm1, %v5254_v13  ;;  %v2428_v49 = vpack.c.bf16 %v2391_v47, %v2390_v46  ;;  %v7526_v50 = vld [vmem:[#allocation2 + $0x21] sm:$0xff]  ;;  %v7528_v51 = vld [vmem:[#allocation2 + $0x29] sm:$0xff]  ;;  %v422_v55 = vpack.c.bf16 %v2390_v46, %v2389_v43 }
  0x29   : > { %5537 = vmatmul.mubr.msk.bf16.gmra.mrb[4].mxu1 %vm255_vm1, %v414_v5  ;;  %293 = vst.msk [vmem:[#allocation2 + $0x128] sm:$0xff] %vm255_vm1, %v5255_v14  ;;  %294 = vst.msk [vmem:[#allocation2 + $0x130] sm:$0xff] %vm255_vm1, %v5258_v15  ;;  %v2392_v52 = vld [vmem:[#allocation2 + $0xa8] sm:$0xff]  ;;  %v2393_v53 = vld [vmem:[#allocation2 + $0xb0] sm:$0xff]  ;;  %v916_v54 = vpack.c.bf16 %v7528_v51, %v7526_v50 }
  0x2a   : > { %5913 = vmatmul.mubr.msk.bf16.gmra.mrb[4].mxu0 %vm255_vm1, %v2421_v6  ;;  %5540 = vmatprep.mubr.msk.bf16.mxu1 %vm7331_vm0, %v7330_v1  ;;  %295 = vst.msk [vmem:[#allocation2 + $0x138] sm:$0xff] %vm255_vm1, %v5259_v16  ;;  %296 = vst.msk [vmem:[#allocation2 + $0x140] sm:$0xff] %vm255_vm1, %v5262_v22  ;;  %v2429_v56 = vpack.c.bf16 %v2393_v53, %v2392_v52  ;;  %v2394_v57 = vld [vmem:[#allocation2 + $0xb8] sm:$0xff]  ;;  %v2395_v58 = vld [vmem:[#allocation2 + $0xc0] sm:$0xff]  ;;  %v423_v59 = vpack.c.bf16 %v2392_v52, %v2391_v47 }
  0x2b   : > { %5916 = vmatprep.mubr.msk.bf16.mxu0 %vm7331_vm0, %v7330_v1  ;;  %297 = vst.msk [vmem:[#allocation2 + $0x148] sm:$0xff] %vm255_vm1, %v5263_v23  ;;  %298 = vst.msk [vmem:[#allocation2 + $0x150] sm:$0xff] %vm255_vm1, %v5266_v29  ;;  %v2430_v60 = vpack.c.bf16 %v2395_v58, %v2394_v57  ;;  %v2396_v61 = vld [vmem:[#allocation2 + $0xc8] sm:$0xff]  ;;  %v2397_v62 = vld [vmem:[#allocation2 + $0xd0] sm:$0xff]  ;;  %v424_v63 = vpack.c.bf16 %v2394_v57, %v2393_v53  ;;  %v5274_v29 = vunpack.c.l.bf16 %v5310_v27 }
  0x2c   : > { %299 = vst.msk [vmem:[#allocation2 + $0x158] sm:$0xff] %vm255_vm1, %v5267_v30  ;;  %300 = vst.msk [vmem:[#allocation2 + $0x160] sm:$0xff] %vm255_vm1, %v5270_v36  ;;  %v2431_v0 = vpack.c.bf16 %v2397_v62, %v2396_v61  ;;  %v7552_v2 = vld [vmem:[#allocation2 + $0x19] sm:$0xff]  ;;  %v425_v3 = vpack.c.bf16 %v2396_v61, %v2395_v58  ;;  %v7314_v5 = vld [vmem:[%s8643_s1 + $0x30] sm:$0xff]   ;;  %v5275_v30 = vunpack.c.h.bf16 %v5310_v27 }
  0x2d   : > { %301 = vst.msk [vmem:[#allocation2 + $0x168] sm:$0xff] %vm255_vm1, %v5271_v37  ;;  %v2922_v4 = vpack.c.bf16 %v7526_v50, %v7552_v2  ;;  %v394_v6 = vld [vmem:[#allocation2 + $0xd8] sm:$0xff]  ;;  %v396_v11 = vld [vmem:[#allocation2 + $0xe8] sm:$0xff]  ;;  %v397_v16 = vld [vmem:[#allocation2 + $0xf0] sm:$0xff] }
  0x2e   : > { %v7565_v7 = vld [vmem:[#allocation2 + $0x31] sm:$0xff]  ;;  %v426_v8 = vpack.c.bf16 %v394_v6, %v2397_v62  ;;  %v7576_v12 = vld [vmem:[#allocation2 + $0x39] sm:$0xff]  ;;  %v7578_v13 = vld [vmem:[#allocation2 + $0x41] sm:$0xff]  ;;  %302 = vst.msk [vmem:[#allocation2 + $0x170] sm:$0xff] %vm255_vm1, %v5274_v29 }
  0x2f   : > { %v2924_v15 = vpack.c.bf16 %v7578_v13, %v7576_v12  ;;  %v398_v17 = vld [vmem:[#allocation2 + $0xf8] sm:$0xff]  ;;  %v7588_v18 = vld [vmem:[#allocation2 + $0x49] sm:$0xff]  ;;  %v399_v22 = vld [vmem:[#allocation2 + $0x100] sm:$0xff]  ;;  %303 = vst.msk [vmem:[#allocation2 + $0x178] sm:$0xff] %vm255_vm1, %v5275_v30 }
  0x30   : > { %v428_v20 = vpack.c.bf16 %v398_v17, %v397_v16  ;;  %v400_v23 = vld [vmem:[#allocation2 + $0x108] sm:$0xff]  ;;  %v7600_v24 = vld [vmem:[#allocation2 + $0x59] sm:$0xff]  ;;  %v401_v31 = vld [vmem:[#allocation2 + $0x110] sm:$0xff] }
  0x31   : > { %5541 = vmatmul.mubr.msk.bf16.gmra.mrb[8].mxu1 %vm255_vm1, %v415_v9  ;;  %v2923_v9 = vpack.c.bf16 %v7565_v7, %v7528_v51  ;;  %v7602_v25 = vld [vmem:[#allocation2 + $0x61] sm:$0xff]  ;;  %v402_v32 = vld [vmem:[#allocation2 + $0x118] sm:$0xff]  ;;  %v405_v46 = vld [vmem:[#allocation2 + $0x130] sm:$0xff] }
  0x32   : > { %5917 = vmatmul.mubr.msk.bf16.gmra.mrb[8].mxu0 %vm255_vm1, %v2422_v10  ;;  %5544 = vmatprep.mubr.msk.bf16.mxu1 %vm7331_vm0, %v7330_v1  ;;  %v395_v10 = vld [vmem:[#allocation2 + $0xe0] sm:$0xff]  ;;  %v7617_v34 = vld [vmem:[#allocation2 + $0x71] sm:$0xff]  ;;  %v7690_v16 = vld [vmem:[#allocation2 + $0xc9] sm:$0xff] }
  0x33   : > { %5920 = vmatprep.mubr.msk.bf16.mxu0 %vm7331_vm0, %v7330_v1  ;;  %v427_v14 = vpack.c.bf16 %v396_v11, %v395_v10  ;;  %v5311_v36 = vld [vmem:[%s7372_s19 + $0xc0] sm:$0xff]   ;;  %v406_v47 = vld [vmem:[#allocation2 + $0x138] sm:$0xff]  ;;  %v409_v61 = vld [vmem:[#allocation2 + $0x150] sm:$0xff] }
  0x34   : > { %v5278_v38 = vunpack.c.l.bf16 %v5311_v36  ;;  %v5279_v39 = vunpack.c.h.bf16 %v5311_v36  ;;  %v7630_v42 = vld [vmem:[#allocation2 + $0x79] sm:$0xff]  ;;  %v7632_v43 = vld [vmem:[#allocation2 + $0x81] sm:$0xff]  ;;  %v432_v52 = vpack.c.bf16 %v406_v47, %v405_v46  ;;  %v7692_v17 = vld [vmem:[#allocation2 + $0xd1] sm:$0xff]  ;;  %v917_v36 = vpack.c.bf16 %v7576_v12, %v7565_v7 }
  0x35   : > { %v7654_v57 = vld [vmem:[#allocation2 + $0x99] sm:$0xff]  ;;  %v7656_v58 = vld [vmem:[#allocation2 + $0xa1] sm:$0xff]  ;;  %v7719_v30 = vld [vmem:[#allocation2 + $0xe9] sm:$0xff]  ;;  %v918_v7 = vpack.c.bf16 %v7588_v18, %v7578_v13 }
  0x36   : > { %304 = vst.msk [vmem:[#allocation2 + $0x180] sm:$0xff] %vm255_vm1, %v5278_v38  ;;  %305 = vst.msk [vmem:[#allocation2 + $0x188] sm:$0xff] %vm255_vm1, %v5279_v39  ;;  %v410_v62 = vld [vmem:[#allocation2 + $0x158] sm:$0xff]  ;;  %v412_v6 = vld [vmem:[#allocation2 + $0x168] sm:$0xff] }
  0x37   : > { %v7707_v27 = vld [vmem:[#allocation2 + $0xe1] sm:$0xff]  ;;  %v7748_v51 = vld [vmem:[#allocation2 + $0x109] sm:$0xff]  ;;  %v7806_v46 = vld [vmem:[#allocation2 + $0x151] sm:$0xff] }
  0x38   : > { %v7764_v38 = vld [vmem:[#allocation2 + $0x121] sm:$0xff]  ;;  %v7776_v39 = vld [vmem:[#allocation2 + $0x129] sm:$0xff]  ;;  %v7818_v47 = vld [vmem:[#allocation2 + $0x159] sm:$0xff] }
  0x39   : > { %5545 = vmatmul.mubr.msk.bf16.gmra.mrb[12].mxu1 %vm255_vm1, %v416_v19  ;;  %v7590_v19 = vld [vmem:[#allocation2 + $0x51] sm:$0xff] }
  0x3a   : > { %5921 = vmatmul.mubr.msk.bf16.gmra.mrb[12].mxu0 %vm255_vm1, %v2423_v21  ;;  %5548 = vmatprep.mubr.msk.bf16.mxu1 %vm7331_vm0, %v7330_v1  ;;  %v2925_v21 = vpack.c.bf16 %v7590_v19, %v7588_v18  ;;  %v919_v13 = vpack.c.bf16 %v7600_v24, %v7590_v19 }
  0x3b   : > { %5924 = vmatprep.mubr.msk.bf16.mxu0 %vm7331_vm0, %v7330_v1 }
  0x41   : > { %5549 = vmatmul.mubr.msk.bf16.gmra.mrb[16].mxu1 %vm255_vm1, %v417_v26  ;;  %v429_v26 = vpack.c.bf16 %v400_v23, %v399_v22  ;;  %v2933_v22 = vpack.c.bf16 %v7692_v17, %v7690_v16  ;;  %v870_v23 = vld [vmem:[#allocation2 + $0x11] sm:$0xff] }
  0x42   : > { %5925 = vmatmul.mubr.msk.bf16.gmra.mrb[16].mxu0 %vm255_vm1, %v2424_v28  ;;  %5552 = vmatprep.mubr.msk.bf16.mxu1 %vm7331_vm0, %v7330_v1  ;;  %v2926_v28 = vpack.c.bf16 %v7602_v25, %v7600_v24 }
  0x43   : > { %5928 = vmatprep.mubr.msk.bf16.mxu0 %vm7331_vm0, %v7330_v1 }
  0x49   : > { %5553 = vmatmul.mubr.msk.bf16.gmra.mrb[20].mxu1 %vm255_vm1, %v418_v33  ;;  %v7615_v33 = vld [vmem:[#allocation2 + $0x69] sm:$0xff] }
  0x4a   : > { %5929 = vmatmul.mubr.msk.bf16.gmra.mrb[20].mxu0 %vm255_vm1, %v2425_v35  ;;  %5556 = vmatprep.mubr.msk.bf16.mxu1 %vm7331_vm0, %v7330_v1  ;;  %v430_v35 = vpack.c.bf16 %v402_v32, %v401_v31  ;;  %v2927_v37 = vpack.c.bf16 %v7617_v34, %v7615_v33  ;;  %v7721_v31 = vld [vmem:[#allocation2 + $0xf1] sm:$0xff]  ;;  %v7734_v32 = vld [vmem:[#allocation2 + $0xf9] sm:$0xff]  ;;  %v920_v19 = vpack.c.bf16 %v7615_v33, %v7602_v25 }
  0x4b   : > { %5932 = vmatprep.mubr.msk.bf16.mxu0 %vm7331_vm0, %v7330_v1  ;;  %v921_v25 = vpack.c.bf16 %v7630_v42, %v7617_v34 }
  0x51   : > { %5557 = vmatmul.mubr.msk.bf16.gmra.mrb[24].mxu1 %vm255_vm1, %v419_v40  ;;  %v403_v40 = vld [vmem:[#allocation2 + $0x120] sm:$0xff] }
  0x52   : > { %5933 = vmatmul.mubr.msk.bf16.gmra.mrb[24].mxu0 %vm255_vm1, %v2426_v41  ;;  %5560 = vmatprep.mubr.msk.bf16.mxu1 %vm7331_vm0, %v7330_v1  ;;  %v404_v41 = vld [vmem:[#allocation2 + $0x128] sm:$0xff] }
  0x53   : > { %5936 = vmatprep.mubr.msk.bf16.mxu0 %vm7331_vm0, %v7330_v1 }
  0x59   : > { %5561 = vmatmul.mubr.msk.bf16.gmra.mrb[28].mxu1 %vm255_vm1, %v420_v44  ;;  %v431_v44 = vpack.c.bf16 %v404_v41, %v403_v40  ;;  %v7778_v40 = vld [vmem:[#allocation2 + $0x131] sm:$0xff]  ;;  %v7790_v41 = vld [vmem:[#allocation2 + $0x139] sm:$0xff] }
  0x5a   : > { %5937 = vmatmul.mubr.msk.bf16.gmra.mrb[28].mxu0 %vm255_vm1, %v2427_v45  ;;  %5564 = vmatprep.mubr.msk.bf16.mxu1 %vm7331_vm0, %v7330_v1  ;;  %v2928_v45 = vpack.c.bf16 %v7632_v43, %v7630_v42  ;;  %v2939_v24 = vpack.c.bf16 %v7778_v40, %v7776_v39 }
  0x5b   : > { %5940 = vmatprep.mubr.msk.bf16.mxu0 %vm7331_vm0, %v7330_v1 }
  0x61   : > { %5565 = vmatmul.mubr.msk.bf16.gmra.mrb[32].mxu1 %vm255_vm1, %v421_v48  ;;  %v7642_v48 = vld [vmem:[#allocation2 + $0x89] sm:$0xff] }
  0x62   : > { %5941 = vmatmul.mubr.msk.bf16.gmra.mrb[32].mxu0 %vm255_vm1, %v2428_v49  ;;  %5568 = vmatprep.mubr.msk.bf16.mxu1 %vm7331_vm0, %v7330_v1  ;;  %v7644_v49 = vld [vmem:[#allocation2 + $0x91] sm:$0xff]  ;;  %v922_v34 = vpack.c.bf16 %v7642_v48, %v7632_v43 }
  0x63   : > { %5944 = vmatprep.mubr.msk.bf16.mxu0 %vm7331_vm0, %v7330_v1  ;;  %v2929_v53 = vpack.c.bf16 %v7644_v49, %v7642_v48  ;;  %v923_v43 = vpack.c.bf16 %v7654_v57, %v7644_v49 }
  0x69   : > { %5569 = vmatmul.mubr.msk.bf16.gmra.mrb[36].mxu1 %vm255_vm1, %v422_v55  ;;  %v407_v55 = vld [vmem:[#allocation2 + $0x140] sm:$0xff] }
  0x6a   : > { %5945 = vmatmul.mubr.msk.bf16.gmra.mrb[36].mxu0 %vm255_vm1, %v2429_v56  ;;  %5572 = vmatprep.mubr.msk.bf16.mxu1 %vm7331_vm0, %v7330_v1  ;;  %v408_v56 = vld [vmem:[#allocation2 + $0x148] sm:$0xff] }
  0x6b   : > { %5948 = vmatprep.mubr.msk.bf16.mxu0 %vm7331_vm0, %v7330_v1 }
  0x71   : > { %5573 = vmatmul.mubr.msk.bf16.gmra.mrb[40].mxu1 %vm255_vm1, %v423_v59  ;;  %v433_v59 = vpack.c.bf16 %v408_v56, %v407_v55  ;;  %v2919_v55 = vld [vmem:[#allocation2 + $0x171] sm:$0xff] }
  0x72   : > { %5949 = vmatmul.mubr.msk.bf16.gmra.mrb[40].mxu0 %vm255_vm1, %v2430_v60  ;;  %5576 = vmatprep.mubr.msk.bf16.mxu1 %vm7331_vm0, %v7330_v1  ;;  %v2930_v60 = vpack.c.bf16 %v7656_v58, %v7654_v57  ;;  %v2920_v57 = vld [vmem:[#allocation2 + $0x179] sm:$0xff] }
  0x73   : > { %5952 = vmatprep.mubr.msk.bf16.mxu0 %vm7331_vm0, %v7330_v1 }
  0x79   : > { %5577 = vmatmul.mubr.msk.bf16.gmra.mrb[44].mxu1 %vm255_vm1, %v424_v63  ;;  %v7666_v63 = vld [vmem:[#allocation2 + $0xa9] sm:$0xff] }
  0x7a   : > { %5953 = vmatmul.mubr.msk.bf16.gmra.mrb[44].mxu0 %vm255_vm1, %v2431_v0  ;;  %5580 = vmatprep.mubr.msk.bf16.mxu1 %vm7331_vm0, %v7330_v1  ;;  %v7668_v0 = vld [vmem:[#allocation2 + $0xb1] sm:$0xff]  ;;  %v924_v56 = vpack.c.bf16 %v7666_v63, %v7656_v58 }
  0x7b   : > { %6002 = vmatprep.mubr.msk.bf16.mxu0 %vm7331_vm0, %v7330_v1  ;;  %v3378_v58 = vld [vmem:[#allocation2 + $0x2e] sm:$0xff] }
  0x81   : > { %5581 = vmatmul.mubr.msk.bf16.gmra.mrb[48].mxu1 %vm255_vm1, %v425_v3  ;;  %v434_v3 = vpack.c.bf16 %v410_v62, %v409_v61  ;;  %v3379_v62 = vld [vmem:[#allocation2 + $0x36] sm:$0xff] }
  0x82   : > { %6003 = vmatmul.mubr.msk.bf16.vlgmr.msra.gmra.mrb[0].mxu0 %vm255_vm1, %v2922_v4  ;;  %5584 = vmatprep.mubr.msk.bf16.mxu1 %vm7331_vm0, %v7330_v1  ;;  %v2931_v4 = vpack.c.bf16 %v7668_v0, %v7666_v63 }
  0x83   : > { %6095 = vmatpush3.bf16.msra.mxu0 %v7314_v5  ;;  %6006 = vmatprep.mubr.msk.bf16.mxu0 %vm7331_vm0, %v7330_v1  ;;  %v411_v5 = vld [vmem:[#allocation2 + $0x160] sm:$0xff] }
  0x84   : > { %6188 = vmatprep.subr.bf16.mxu0 %v7330_v1  ;;  %v435_v10 = vpack.c.bf16 %v412_v6, %v411_v5  ;;  %v3381_v5 = vld [vmem:[#allocation2 + $0x46] sm:$0xff] }
  0x89   : > { %5585 = vmatmul.mubr.msk.bf16.gmra.mrb[52].mxu1 %vm255_vm1, %v426_v8  ;;  %v7678_v8 = vld [vmem:[#allocation2 + $0xb9] sm:$0xff] }
  0x8a   : > { %6007 = vmatmul.mubr.msk.bf16.gmra.mrb[4].mxu0 %vm255_vm1, %v2923_v9  ;;  %5588 = vmatprep.mubr.msk.bf16.mxu1 %vm7331_vm0, %v7330_v1  ;;  %v7680_v9 = vld [vmem:[#allocation2 + $0xc1] sm:$0xff] }
  0x8b   : > { %6010 = vmatprep.mubr.msk.bf16.mxu0 %vm7331_vm0, %v7330_v1  ;;  %v2932_v11 = vpack.c.bf16 %v7680_v9, %v7678_v8  ;;  %v926_v63 = vpack.c.bf16 %v7690_v16, %v7680_v9  ;;  %v3382_v9 = vld [vmem:[#allocation2 + $0x4e] sm:$0xff]  ;;  %v3385_v16 = vld [vmem:[#allocation2 + $0x66] sm:$0xff] }
  0x91   : > { %5589 = vmatmul.mubr.msk.bf16.gmra.mrb[56].mxu1 %vm255_vm1, %v427_v14  ;;  %v868_v14 = vld [vmem:[#allocation2 + $0x1] sm:$0xff] }
  0x92   : > { %6011 = vmatmul.mubr.msk.bf16.gmra.mrb[8].mxu0 %vm255_vm1, %v2924_v15  ;;  %5592 = vmatprep.mubr.msk.bf16.mxu1 %vm7331_vm0, %v7330_v1  ;;  %v869_v15 = vld [vmem:[#allocation2 + $0x9] sm:$0xff] }
  0x93   : > { %6014 = vmatprep.mubr.msk.bf16.mxu0 %vm7331_vm0, %v7330_v1 }
  0x99   : > { %5593 = vmatmul.mubr.msk.bf16.gmra.mrb[60].mxu1 %vm255_vm1, %v428_v20  ;;  %v914_v20 = vpack.c.bf16 %v869_v15, %v868_v14  ;;  %v3384_v15 = vld [vmem:[#allocation2 + $0x5e] sm:$0xff] }
  0x9a   : > { %6015 = vmatmul.mubr.msk.bf16.gmra.mrb[12].mxu0 %vm255_vm1, %v2925_v21  ;;  %5596 = vmatprep.mubr.msk.bf16.mxu1 %vm7331_vm0, %v7330_v1  ;;  %v7315_v21 = vld [vmem:[%s8643_s1 + $0x10] sm:$0xff]  }
  0x9b   : > { %6018 = vmatprep.mubr.msk.bf16.mxu0 %vm7331_vm0, %v7330_v1 }
  0xa1   : > { %5597 = vmatmul.mubr.msk.bf16.gmra.mrb[64].mxu1 %vm255_vm1, %v429_v26  ;;  %v7705_v26 = vld [vmem:[#allocation2 + $0xd9] sm:$0xff] }
  0xa2   : > { %6019 = vmatmul.mubr.msk.bf16.gmra.mrb[16].mxu0 %vm255_vm1, %v2926_v28  ;;  %5600 = vmatprep.mubr.msk.bf16.mxu1 %vm7331_vm0, %v7330_v1  ;;  %v915_v28 = vpack.c.bf16 %v7552_v2, %v870_v23  ;;  %v2934_v29 = vpack.c.bf16 %v7707_v27, %v7705_v26  ;;  %v2935_v2 = vpack.c.bf16 %v7721_v31, %v7719_v30 }
  0xa3   : > { %6022 = vmatprep.mubr.msk.bf16.mxu0 %vm7331_vm0, %v7330_v1  ;;  %v927_v6 = vpack.c.bf16 %v7705_v26, %v7692_v17  ;;  %v929_v17 = vpack.c.bf16 %v7734_v32, %v7721_v31 }
  0xa9   : > { %5601 = vmatmul.mubr.msk.bf16.gmra.mrb[68].mxu1 %vm255_vm1, %v430_v35  ;;  %v7736_v35 = vld [vmem:[#allocation2 + $0x101] sm:$0xff] }
  0xaa   : > { %6023 = vmatmul.mubr.msk.bf16.gmra.mrb[20].mxu0 %vm255_vm1, %v2927_v37  ;;  %5604 = vmatprep.mubr.msk.bf16.mxu1 %vm7331_vm0, %v7330_v1  ;;  %v2936_v50 = vpack.c.bf16 %v7736_v35, %v7734_v32  ;;  %v7762_v37 = vld [vmem:[#allocation2 + $0x119] sm:$0xff]  ;;  %v930_v23 = vpack.c.bf16 %v7748_v51, %v7736_v35  ;;  %v3390_v35 = vld [vmem:[#allocation2 + $0x8e] sm:$0xff] }
  0xab   : > { %6026 = vmatprep.mubr.msk.bf16.mxu0 %vm7331_vm0, %v7330_v1  ;;  %v2938_v18 = vpack.c.bf16 %v7764_v38, %v7762_v37 }
  0xb1   : > { %5605 = vmatmul.mubr.msk.bf16.gmra.mrb[72].mxu1 %vm255_vm1, %v431_v44  ;;  %v7792_v44 = vld [vmem:[#allocation2 + $0x141] sm:$0xff] }
  0xb2   : > { %6027 = vmatmul.mubr.msk.bf16.gmra.mrb[24].mxu0 %vm255_vm1, %v2928_v45  ;;  %5608 = vmatprep.mubr.msk.bf16.mxu1 %vm7331_vm0, %v7330_v1  ;;  %v2940_v33 = vpack.c.bf16 %v7792_v44, %v7790_v41  ;;  %v7804_v45 = vld [vmem:[#allocation2 + $0x149] sm:$0xff] }
  0xb3   : > { %6030 = vmatprep.mubr.msk.bf16.mxu0 %vm7331_vm0, %v7330_v1  ;;  %v2941_v42 = vpack.c.bf16 %v7806_v46, %v7804_v45 }
  0xb9   : > { %5609 = vmatmul.mubr.msk.bf16.gmra.mrb[76].mxu1 %vm255_vm1, %v432_v52  ;;  %v7820_v52 = vld [vmem:[#allocation2 + $0x161] sm:$0xff] }
  0xba   : > { %6031 = vmatmul.mubr.msk.bf16.gmra.mrb[28].mxu0 %vm255_vm1, %v2929_v53  ;;  %5612 = vmatprep.mubr.msk.bf16.mxu1 %vm7331_vm0, %v7330_v1  ;;  %v2942_v48 = vpack.c.bf16 %v7820_v52, %v7818_v47  ;;  %v7832_v53 = vld [vmem:[#allocation2 + $0x169] sm:$0xff] }
  0xbb   : > { %6034 = vmatprep.mubr.msk.bf16.mxu0 %vm7331_vm0, %v7330_v1  ;;  %v2943_v49 = vpack.c.bf16 %v2919_v55, %v7832_v53  ;;  %v1373_v55 = vld [vmem:[#allocation2 + $0x1a] sm:$0xff] }
  0xc1   : > { %5613 = vmatmul.mubr.msk.bf16.gmra.mrb[80].mxu1 %vm255_vm1, %v433_v59  ;;  %v2921_v59 = vld [vmem:[#allocation2 + $0x181] sm:$0xff] }
  0xc2   : > { %6035 = vmatmul.mubr.msk.bf16.gmra.mrb[32].mxu0 %vm255_vm1, %v2930_v60  ;;  %5616 = vmatprep.mubr.msk.bf16.mxu1 %vm7331_vm0, %v7330_v1  ;;  %v925_v60 = vpack.c.bf16 %v7678_v8, %v7668_v0  ;;  %v2944_v61 = vpack.c.bf16 %v2921_v59, %v2920_v57  ;;  %v7316_v0 = vld [vmem:[%s8643_s1 + $0x38] sm:$0xff]  }
  0xc3   : > { %6038 = vmatprep.mubr.msk.bf16.mxu0 %vm7331_vm0, %v7330_v1 }
  0xc9   : > { %5617 = vmatmul.mubr.msk.bf16.gmra.mrb[84].mxu1 %vm255_vm1, %v434_v3  ;;  %v3424_v3 = vpack.c.bf16 %v3379_v62, %v3378_v58  ;;  %v3404_v58 = vld [vmem:[#allocation2 + $0xfe] sm:$0xff]  ;;  %v3405_v62 = vld [vmem:[#allocation2 + $0x106] sm:$0xff] }
  0xca   : > { %6039 = vmatmul.mubr.msk.bf16.gmra.mrb[36].mxu0 %vm255_vm1, %v2931_v4  ;;  %5620 = vmatprep.mubr.msk.bf16.mxu1 %vm7331_vm0, %v7330_v1  ;;  %v3380_v4 = vld [vmem:[#allocation2 + $0x3e] sm:$0xff] }
  0xcb   : > { %6042 = vmatprep.mubr.msk.bf16.mxu0 %vm7331_vm0, %v7330_v1  ;;  %v3425_v8 = vpack.c.bf16 %v3381_v5, %v3380_v4  ;;  %v1377_v4 = vld [vmem:[#allocation2 + $0x3a] sm:$0xff]  ;;  %v3406_v5 = vld [vmem:[#allocation2 + $0x10e] sm:$0xff] }
  0xd1   : > { %5621 = vmatmul.mubr.msk.bf16.gmra.mrb[88].mxu1 %vm255_vm1, %v435_v10  ;;  %v3383_v10 = vld [vmem:[#allocation2 + $0x56] sm:$0xff] }
  0xd2   : > { %6043 = vmatmul.mubr.msk.bf16.gmra.mrb[40].mxu0 %vm255_vm1, %v2932_v11  ;;  %5626 = vmatprep.mubr.msk.bf16.mxu1 %vm7331_vm0, %v7330_v1  ;;  %v928_v11 = vpack.c.bf16 %v7719_v30, %v7707_v27  ;;  %v3426_v14 = vpack.c.bf16 %v3383_v10, %v3382_v9  ;;  %v3388_v27 = vld [vmem:[#allocation2 + $0x7e] sm:$0xff]  ;;  %v5312_v30 = vld [vmem:[%s7372_s19 + $0xc8] sm:$0xff]  }
  0xd3   : > { %6046 = vmatprep.mubr.msk.bf16.mxu0 %vm7331_vm0, %v7330_v1  ;;  %v5283_v32 = vunpack.c.h.bf16 %v5312_v30  ;;  %v1378_v10 = vld [vmem:[#allocation2 + $0x42] sm:$0xff] }
  0xd5   : > { %307 = vst.msk [vmem:[#allocation2 + $0x198] sm:$0xff] %vm255_vm1, %v5283_v32 }
  0xd9   : > { %5627 = vmatmul.mubr.msk.bf16.vlgmr.msra.gmra.mrb[0].mxu1 %vm255_vm1, %v914_v20  ;;  %v3427_v20 = vpack.c.bf16 %v3385_v16, %v3384_v15  ;;  %v3409_v15 = vld [vmem:[#allocation2 + $0x126] sm:$0xff] }
  0xda   : > { %5719 = vmatpush3.bf16.msra.mxu1 %v7315_v21  ;;  %6047 = vmatmul.mubr.msk.bf16.gmra.mrb[44].mxu0 %vm255_vm1, %v2933_v22  ;;  %v3386_v21 = vld [vmem:[#allocation2 + $0x6e] sm:$0xff]  ;;  %v3387_v22 = vld [vmem:[#allocation2 + $0x76] sm:$0xff] }
  0xdb   : > { %5630 = vmatprep.mubr.msk.bf16.mxu1 %vm7331_vm0, %v7330_v1  ;;  %6050 = vmatprep.mubr.msk.bf16.mxu0 %vm7331_vm0, %v7330_v1  ;;  %v3428_v26 = vpack.c.bf16 %v3387_v22, %v3386_v21  ;;  %v1381_v21 = vld [vmem:[#allocation2 + $0x5a] sm:$0xff]  ;;  %v3410_v22 = vld [vmem:[#allocation2 + $0x12e] sm:$0xff] }
  0xdc   : > { %5812 = vmatprep.subr.bf16.mxu1 %v7330_v1 }
  0xe1   : > { %5631 = vmatmul.mubr.msk.bf16.gmra.mrb[4].mxu1 %vm255_vm1, %v915_v28  ;;  %v3389_v28 = vld [vmem:[#allocation2 + $0x86] sm:$0xff] }
  0xe2   : > { %6051 = vmatmul.mubr.msk.bf16.gmra.mrb[48].mxu0 %vm255_vm1, %v2934_v29  ;;  %5634 = vmatprep.mubr.msk.bf16.mxu1 %vm7331_vm0, %v7330_v1  ;;  %v3429_v31 = vpack.c.bf16 %v3389_v28, %v3388_v27  ;;  %v1382_v28 = vld [vmem:[#allocation2 + $0x62] sm:$0xff] }
  0xe3   : > { %6054 = vmatprep.mubr.msk.bf16.mxu0 %vm7331_vm0, %v7330_v1 }
  0xe9   : > { %5635 = vmatmul.mubr.msk.bf16.gmra.mrb[8].mxu1 %vm255_vm1, %v916_v54  ;;  %v7750_v54 = vld [vmem:[#allocation2 + $0x111] sm:$0xff] }
  0xea   : > { %6055 = vmatmul.mubr.msk.bf16.gmra.mrb[52].mxu0 %vm255_vm1, %v2935_v2  ;;  %5638 = vmatprep.mubr.msk.bf16.mxu1 %vm7331_vm0, %v7330_v1  ;;  %v2937_v12 = vpack.c.bf16 %v7750_v54, %v7748_v51  ;;  %v931_v29 = vpack.c.bf16 %v7762_v37, %v7750_v54  ;;  %v5282_v2 = vunpack.c.l.bf16 %v5312_v30  ;;  %v7911_v54 = vld [vmem:[%s7377_s22] sm:$0xff] }
  0xeb   : > { %6058 = vmatprep.mubr.msk.bf16.mxu0 %vm7331_vm0, %v7330_v1  ;;  %v3412_v30 = vld [vmem:[#allocation2 + $0x13e] sm:$0xff] }
  0xec   : > { %306 = vst.msk [vmem:[#allocation2 + $0x190] sm:$0xff] %vm255_vm1, %v5282_v2 }
  0xf1   : > { %5639 = vmatmul.mubr.msk.bf16.gmra.mrb[12].mxu1 %vm255_vm1, %v917_v36  ;;  %v3391_v36 = vld [vmem:[#allocation2 + $0x96] sm:$0xff] }
  0xf2   : > { %6059 = vmatmul.mubr.msk.bf16.gmra.mrb[56].mxu0 %vm255_vm1, %v2936_v50  ;;  %5642 = vmatprep.mubr.msk.bf16.mxu1 %vm7331_vm0, %v7330_v1  ;;  %v932_v50 = vpack.c.bf16 %v7776_v39, %v7764_v38  ;;  %v3430_v51 = vpack.c.bf16 %v3391_v36, %v3390_v35  ;;  %v3394_v38 = vld [vmem:[#allocation2 + $0xae] sm:$0xff]  ;;  %v1385_v36 = vld [vmem:[#allocation2 + $0x7a] sm:$0xff] }
  0xf3   : > { %6062 = vmatprep.mubr.msk.bf16.mxu0 %vm7331_vm0, %v7330_v1  ;;  %v1384_v35 = vld [vmem:[#allocation2 + $0x72] sm:$0xff] }
  0xf9   : > { %5643 = vmatmul.mubr.msk.bf16.gmra.mrb[16].mxu1 %vm255_vm1, %v918_v7  ;;  %v3392_v7 = vld [vmem:[#allocation2 + $0x9e] sm:$0xff] }
  0xfa   : > { %6063 = vmatmul.mubr.msk.bf16.gmra.mrb[60].mxu0 %vm255_vm1, %v2937_v12  ;;  %5646 = vmatprep.mubr.msk.bf16.mxu1 %vm7331_vm0, %v7330_v1  ;;  %v933_v12 = vpack.c.bf16 %v7790_v41, %v7778_v40  ;;  %v3396_v40 = vld [vmem:[#allocation2 + $0xbe] sm:$0xff] }
  0xfb   : > { %6066 = vmatprep.mubr.msk.bf16.mxu0 %vm7331_vm0, %v7330_v1 }
 0x101   : > { %5647 = vmatmul.mubr.msk.bf16.gmra.mrb[20].mxu1 %vm255_vm1, %v919_v13  ;;  %v3395_v13 = vld [vmem:[#allocation2 + $0xb6] sm:$0xff] }
 0x102   : > { %6067 = vmatmul.mubr.msk.bf16.gmra.mrb[64].mxu0 %vm255_vm1, %v2938_v18  ;;  %5650 = vmatprep.mubr.msk.bf16.mxu1 %vm7331_vm0, %v7330_v1  ;;  %v934_v18 = vpack.c.bf16 %v7804_v45, %v7792_v44  ;;  %v3432_v39 = vpack.c.bf16 %v3395_v13, %v3394_v38  ;;  %v3398_v44 = vld [vmem:[#allocation2 + $0xce] sm:$0xff]  ;;  %v3416_v38 = vld [vmem:[#allocation2 + $0x15e] sm:$0xff]  ;;  %v3417_v13 = vld [vmem:[#allocation2 + $0x166] sm:$0xff] }
 0x103   : > { %6070 = vmatprep.mubr.msk.bf16.mxu0 %vm7331_vm0, %v7330_v1 }
 0x109   : > { %5651 = vmatmul.mubr.msk.bf16.gmra.mrb[24].mxu1 %vm255_vm1, %v920_v19  ;;  %v3397_v19 = vld [vmem:[#allocation2 + $0xc6] sm:$0xff] }
 0x10a   : > { %6071 = vmatmul.mubr.msk.bf16.gmra.mrb[68].mxu0 %vm255_vm1, %v2939_v24  ;;  %5654 = vmatprep.mubr.msk.bf16.mxu1 %vm7331_vm0, %v7330_v1  ;;  %v935_v24 = vpack.c.bf16 %v7818_v47, %v7806_v46  ;;  %v3433_v41 = vpack.c.bf16 %v3397_v19, %v3396_v40  ;;  %v1370_v46 = vld [vmem:[#allocation2 + $0x2] sm:$0xff]  ;;  %v1388_v40 = vld [vmem:[#allocation2 + $0x92] sm:$0xff]  ;;  %v1389_v19 = vld [vmem:[#allocation2 + $0x9a] sm:$0xff] }
 0x10b   : > { %6074 = vmatprep.mubr.msk.bf16.mxu0 %vm7331_vm0, %v7330_v1  ;;  %v3401_v47 = vld [vmem:[#allocation2 + $0xe6] sm:$0xff] }
 0x111   : > { %5655 = vmatmul.mubr.msk.bf16.gmra.mrb[28].mxu1 %vm255_vm1, %v921_v25  ;;  %v3399_v25 = vld [vmem:[#allocation2 + $0xd6] sm:$0xff] }
 0x112   : > { %6075 = vmatmul.mubr.msk.bf16.gmra.mrb[72].mxu0 %vm255_vm1, %v2940_v33  ;;  %5658 = vmatprep.mubr.msk.bf16.mxu1 %vm7331_vm0, %v7330_v1  ;;  %v936_v33 = vpack.c.bf16 %v7832_v53, %v7820_v52  ;;  %v3434_v45 = vpack.c.bf16 %v3399_v25, %v3398_v44  ;;  %v7317_v52 = vld [vmem:[%s8643_s1 + $0x18] sm:$0xff]   ;;  %v1425_v44 = vpack.c.bf16 %v1389_v19, %v1388_v40  ;;  %v8114_v19 = vld [vmem:[#allocation2 + $0xa7] sm:$0xff] }
 0x113   : > { %6078 = vmatprep.mubr.msk.bf16.mxu0 %vm7331_vm0, %v7330_v1  ;;  %v1372_v53 = vld [vmem:[#allocation2 + $0x12] sm:$0xff]  ;;  %v8112_v40 = vld [vmem:[#allocation2 + $0x9f] sm:$0xff] }
 0x114   : > { %v1417_v57 = vpack.c.bf16 %v1373_v55, %v1372_v53  ;;  %v3423_v53 = vld [vmem:[#allocation2 + $0x196] sm:$0xff] }
 0x119   : > { %5659 = vmatmul.mubr.msk.bf16.gmra.mrb[32].mxu1 %vm255_vm1, %v922_v34  ;;  %v1371_v34 = vld [vmem:[#allocation2 + $0xa] sm:$0xff] }
 0x11a   : > { %6079 = vmatmul.mubr.msk.bf16.gmra.mrb[76].mxu0 %vm255_vm1, %v2941_v42  ;;  %5662 = vmatprep.mubr.msk.bf16.mxu1 %vm7331_vm0, %v7330_v1  ;;  %v3400_v42 = vld [vmem:[#allocation2 + $0xde] sm:$0xff] }
 0x11b   : > { %6082 = vmatprep.mubr.msk.bf16.mxu0 %vm7331_vm0, %v7330_v1 }
 0x121   : > { %5663 = vmatmul.mubr.msk.bf16.gmra.mrb[36].mxu1 %vm255_vm1, %v923_v43  ;;  %v1416_v43 = vpack.c.bf16 %v1371_v34, %v1370_v46  ;;  %v3420_v46 = vld [vmem:[#allocation2 + $0x17e] sm:$0xff]  ;;  %v3421_v34 = vld [vmem:[#allocation2 + $0x186] sm:$0xff] }
 0x122   : > { %6083 = vmatmul.mubr.msk.bf16.gmra.mrb[80].mxu0 %vm255_vm1, %v2942_v48  ;;  %5666 = vmatprep.mubr.msk.bf16.mxu1 %vm7331_vm0, %v7330_v1  ;;  %v3435_v48 = vpack.c.bf16 %v3401_v47, %v3400_v42  ;;  %v3445_v47 = vpack.c.bf16 %v3421_v34, %v3420_v46 }
 0x123   : > { %6086 = vmatprep.mubr.msk.bf16.mxu0 %vm7331_vm0, %v7330_v1 }
 0x129   : > { %5667 = vmatmul.mubr.msk.bf16.gmra.mrb[40].mxu1 %vm255_vm1, %v924_v56  ;;  %v3402_v56 = vld [vmem:[#allocation2 + $0xee] sm:$0xff] }
 0x12a   : > { %6087 = vmatmul.mubr.msk.bf16.gmra.mrb[84].mxu0 %vm255_vm1, %v2943_v49  ;;  %5670 = vmatprep.mubr.msk.bf16.mxu1 %vm7331_vm0, %v7330_v1  ;;  %v3403_v49 = vld [vmem:[#allocation2 + $0xf6] sm:$0xff] }
 0x12b   : > { %6090 = vmatprep.mubr.msk.bf16.mxu0 %vm7331_vm0, %v7330_v1  ;;  %v3436_v59 = vpack.c.bf16 %v3403_v49, %v3402_v56  ;;  %v1394_v49 = vld [vmem:[#allocation2 + $0xc2] sm:$0xff] }
 0x131   : > { %5671 = vmatmul.mubr.msk.bf16.gmra.mrb[44].mxu1 %vm255_vm1, %v925_v60  ;;  %v1374_v60 = vld [vmem:[#allocation2 + $0x22] sm:$0xff] }
 0x132   : > { %6091 = vmatmul.mubr.msk.bf16.gmra.mrb[88].mxu0 %vm255_vm1, %v2944_v61  ;;  %5674 = vmatprep.mubr.msk.bf16.mxu1 %vm7331_vm0, %v7330_v1  ;;  %v1375_v61 = vld [vmem:[#allocation2 + $0x2a] sm:$0xff] }
 0x133   : > { %6096 = vmatprep.mubr.msk.bf16.mxu0 %vm7331_vm0, %v7330_v1 }
 0x139   : > { %5675 = vmatmul.mubr.msk.bf16.gmra.mrb[48].mxu1 %vm255_vm1, %v926_v63  ;;  %v1418_v63 = vpack.c.bf16 %v1375_v61, %v1374_v60  ;;  %v8027_v60 = vld [vmem:[#allocation2 + $0x37] sm:$0xff] }
 0x13a   : > { %6097 = vmatmul.mubr.msk.bf16.vlgmr.msra.gmra.mrb[0].mxu0 %vm255_vm1, %v3424_v3  ;;  %5678 = vmatprep.mubr.msk.bf16.mxu1 %vm7331_vm0, %v7330_v1  ;;  %v3437_v3 = vpack.c.bf16 %v3405_v62, %v3404_v58  ;;  %v7318_v62 = vld [vmem:[%s8643_s1 + $0x40] sm:$0xff]  }
 0x13b   : > { %6189 = vmatpush3.bf16.msra.mxu0 %v7316_v0  ;;  %6100 = vmatprep.mubr.msk.bf16.mxu0 %vm7331_vm0, %v7330_v1  ;;  %v1376_v0 = vld [vmem:[#allocation2 + $0x32] sm:$0xff] }
 0x13c   : > { %6282 = vmatprep.subr.bf16.mxu0 %v7330_v1 }
 0x141   : > { %5679 = vmatmul.mubr.msk.bf16.gmra.mrb[52].mxu1 %vm255_vm1, %v927_v6  ;;  %v3407_v6 = vld [vmem:[#allocation2 + $0x116] sm:$0xff] }
 0x142   : > { %6101 = vmatmul.mubr.msk.bf16.gmra.mrb[4].mxu0 %vm255_vm1, %v3425_v8  ;;  %5682 = vmatprep.mubr.msk.bf16.mxu1 %vm7331_vm0, %v7330_v1  ;;  %v1419_v8 = vpack.c.bf16 %v1377_v4, %v1376_v0  ;;  %v3438_v9 = vpack.c.bf16 %v3407_v6, %v3406_v5  ;;  %v8040_v0 = vld [vmem:[#allocation2 + $0x3f] sm:$0xff]  ;;  %v8042_v4 = vld [vmem:[#allocation2 + $0x47] sm:$0xff] }
 0x143   : > { %6104 = vmatprep.mubr.msk.bf16.mxu0 %vm7331_vm0, %v7330_v1  ;;  %v3927_v6 = vpack.c.bf16 %v8042_v4, %v8040_v0 }
 0x149   : > { %5683 = vmatmul.mubr.msk.bf16.gmra.mrb[56].mxu1 %vm255_vm1, %v928_v11  ;;  %v1379_v11 = vld [vmem:[#allocation2 + $0x4a] sm:$0xff] }
 0x14a   : > { %6105 = vmatmul.mubr.msk.bf16.gmra.mrb[8].mxu0 %vm255_vm1, %v3426_v14  ;;  %5686 = vmatprep.mubr.msk.bf16.mxu1 %vm7331_vm0, %v7330_v1  ;;  %v3408_v14 = vld [vmem:[#allocation2 + $0x11e] sm:$0xff]  ;;  %v1420_v16 = vpack.c.bf16 %v1379_v11, %v1378_v10  ;;  %v8052_v10 = vld [vmem:[#allocation2 + $0x4f] sm:$0xff] }
 0x14b   : > { %6108 = vmatprep.mubr.msk.bf16.mxu0 %vm7331_vm0, %v7330_v1  ;;  %v8054_v11 = vld [vmem:[#allocation2 + $0x57] sm:$0xff] }
 0x151   : > { %5687 = vmatmul.mubr.msk.bf16.gmra.mrb[60].mxu1 %vm255_vm1, %v929_v17  ;;  %v3439_v17 = vpack.c.bf16 %v3409_v15, %v3408_v14  ;;  %v3928_v15 = vpack.c.bf16 %v8054_v11, %v8052_v10 }
 0x152   : > { %6109 = vmatmul.mubr.msk.bf16.gmra.mrb[12].mxu0 %vm255_vm1, %v3427_v20  ;;  %5690 = vmatprep.mubr.msk.bf16.mxu1 %vm7331_vm0, %v7330_v1  ;;  %v1380_v20 = vld [vmem:[#allocation2 + $0x52] sm:$0xff] }
 0x153   : > { %6112 = vmatprep.mubr.msk.bf16.mxu0 %vm7331_vm0, %v7330_v1 }
 0x159   : > { %5691 = vmatmul.mubr.msk.bf16.gmra.mrb[64].mxu1 %vm255_vm1, %v930_v23  ;;  %v3411_v23 = vld [vmem:[#allocation2 + $0x136] sm:$0xff] }
 0x15a   : > { %6113 = vmatmul.mubr.msk.bf16.gmra.mrb[16].mxu0 %vm255_vm1, %v3428_v26  ;;  %5694 = vmatprep.mubr.msk.bf16.mxu1 %vm7331_vm0, %v7330_v1  ;;  %v1421_v26 = vpack.c.bf16 %v1381_v21, %v1380_v20  ;;  %v3440_v27 = vpack.c.bf16 %v3411_v23, %v3410_v22  ;;  %v8064_v20 = vld [vmem:[#allocation2 + $0x5f] sm:$0xff]  ;;  %v8066_v21 = vld [vmem:[#allocation2 + $0x67] sm:$0xff] }
 0x15b   : > { %6116 = vmatprep.mubr.msk.bf16.mxu0 %vm7331_vm0, %v7330_v1  ;;  %v3929_v23 = vpack.c.bf16 %v8066_v21, %v8064_v20 }
 0x161   : > { %5695 = vmatmul.mubr.msk.bf16.gmra.mrb[68].mxu1 %vm255_vm1, %v931_v29  ;;  %v1383_v29 = vld [vmem:[#allocation2 + $0x6a] sm:$0xff] }
 0x162   : > { %6117 = vmatmul.mubr.msk.bf16.gmra.mrb[20].mxu0 %vm255_vm1, %v3429_v31  ;;  %5698 = vmatprep.mubr.msk.bf16.mxu1 %vm7331_vm0, %v7330_v1  ;;  %v3413_v31 = vld [vmem:[#allocation2 + $0x146] sm:$0xff]  ;;  %v1422_v2 = vpack.c.bf16 %v1383_v29, %v1382_v28  ;;  %v8076_v28 = vld [vmem:[#allocation2 + $0x6f] sm:$0xff]  ;;  %v8078_v29 = vld [vmem:[#allocation2 + $0x77] sm:$0xff] }
 0x163   : > { %6120 = vmatprep.mubr.msk.bf16.mxu0 %vm7331_vm0, %v7330_v1  ;;  %v3393_v1 = vld [vmem:[#allocation2 + $0xa6] sm:$0xff]  ;;  %v3441_v32 = vpack.c.bf16 %v3413_v31, %v3412_v30  ;;  %v3930_v31 = vpack.c.bf16 %v8078_v29, %v8076_v28 }
 0x164   : > { %v3431_v37 = vpack.c.bf16 %v3393_v1, %v3392_v7  ;;  %v1423_v7 = vpack.c.bf16 %v1385_v36, %v1384_v35  ;;  %v8088_v35 = vld [vmem:[#allocation2 + $0x7f] sm:$0xff]  ;;  %v8090_v36 = vld [vmem:[#allocation2 + $0x87] sm:$0xff] }
 0x169   : > { %5699 = vmatmul.mubr.msk.bf16.gmra.mrb[72].mxu1 %vm255_vm1, %v932_v50  ;;  %v3414_v50 = vld [vmem:[#allocation2 + $0x14e] sm:$0xff] }
 0x16a   : > { %6121 = vmatmul.mubr.msk.bf16.gmra.mrb[24].mxu0 %vm255_vm1, %v3430_v51  ;;  %5702 = vmatprep.mubr.msk.bf16.mxu1 %vm7331_vm0, %v7911_v54  ;;  %v3415_v51 = vld [vmem:[#allocation2 + $0x156] sm:$0xff] }
 0x16b   : > { %6124 = vmatprep.mubr.msk.bf16.mxu0 %vm7331_vm0, %v7911_v54  ;;  %v3442_v1 = vpack.c.bf16 %v3415_v51, %v3414_v50  ;;  %v3931_v51 = vpack.c.bf16 %v8090_v36, %v8088_v35 }
 0x171   : > { %5703 = vmatmul.mubr.msk.bf16.gmra.mrb[76].mxu1 %vm255_vm1, %v933_v12  ;;  %v1386_v12 = vld [vmem:[#allocation2 + $0x82] sm:$0xff] }
 0x172   : > { %6125 = vmatmul.mubr.msk.bf16.gmra.mrb[28].mxu0 %vm255_vm1, %v3431_v37  ;;  %5706 = vmatprep.mubr.msk.bf16.mxu1 %vm7331_vm0, %v7911_v54  ;;  %v1387_v37 = vld [vmem:[#allocation2 + $0x8a] sm:$0xff] }
 0x173   : > { %6128 = vmatprep.mubr.msk.bf16.mxu0 %vm7331_vm0, %v7911_v54 }
 0x179   : > { %5707 = vmatmul.mubr.msk.bf16.gmra.mrb[80].mxu1 %vm255_vm1, %v934_v18  ;;  %v1424_v18 = vpack.c.bf16 %v1387_v37, %v1386_v12  ;;  %v8100_v12 = vld [vmem:[#allocation2 + $0x8f] sm:$0xff]  ;;  %v8102_v37 = vld [vmem:[#allocation2 + $0x97] sm:$0xff] }
 0x17a   : > { %6129 = vmatmul.mubr.msk.bf16.gmra.mrb[32].mxu0 %vm255_vm1, %v3432_v39  ;;  %5710 = vmatprep.mubr.msk.bf16.mxu1 %vm7331_vm0, %v7911_v54  ;;  %v3443_v39 = vpack.c.bf16 %v3417_v13, %v3416_v38  ;;  %v3932_v13 = vpack.c.bf16 %v8102_v37, %v8100_v12 }
 0x17b   : > { %6132 = vmatprep.mubr.msk.bf16.mxu0 %vm7331_vm0, %v7911_v54 }
 0x181   : > { %5711 = vmatmul.mubr.msk.bf16.gmra.mrb[84].mxu1 %vm255_vm1, %v935_v24  ;;  %v3418_v24 = vld [vmem:[#allocation2 + $0x16e] sm:$0xff] }
 0x182   : > { %6133 = vmatmul.mubr.msk.bf16.gmra.mrb[36].mxu0 %vm255_vm1, %v3433_v41  ;;  %5714 = vmatprep.mubr.msk.bf16.mxu1 %vm7331_vm0, %v7911_v54  ;;  %v3419_v41 = vld [vmem:[#allocation2 + $0x176] sm:$0xff] }
 0x183   : > { %6136 = vmatprep.mubr.msk.bf16.mxu0 %vm7331_vm0, %v7911_v54  ;;  %v3444_v25 = vpack.c.bf16 %v3419_v41, %v3418_v24  ;;  %v3933_v41 = vpack.c.bf16 %v8114_v19, %v8112_v40 }
 0x189   : > { %5715 = vmatmul.mubr.msk.bf16.gmra.mrb[88].mxu1 %vm255_vm1, %v936_v33  ;;  %v1390_v33 = vld [vmem:[#allocation2 + $0xa2] sm:$0xff] }
 0x18a   : > { %6137 = vmatmul.mubr.msk.bf16.gmra.mrb[40].mxu0 %vm255_vm1, %v3434_v45  ;;  %5720 = vmatprep.mubr.msk.bf16.mxu1 %vm7331_vm0, %v7911_v54  ;;  %v1391_v45 = vld [vmem:[#allocation2 + $0xaa] sm:$0xff] }
 0x18b   : > { %6140 = vmatprep.mubr.msk.bf16.mxu0 %vm7331_vm0, %v7911_v54  ;;  %v1426_v42 = vpack.c.bf16 %v1391_v45, %v1390_v33  ;;  %v8124_v33 = vld [vmem:[#allocation2 + $0xaf] sm:$0xff]  ;;  %v8126_v45 = vld [vmem:[#allocation2 + $0xb7] sm:$0xff] }
 0x18c   : > { %v3934_v34 = vpack.c.bf16 %v8126_v45, %v8124_v33 }
 0x191   : > { %5721 = vmatmul.mubr.msk.bf16.vlgmr.msra.gmra.mrb[0].mxu1 %vm255_vm1, %v1416_v43  ;;  %v1392_v43 = vld [vmem:[#allocation2 + $0xb2] sm:$0xff] }
 0x192   : > { %5813 = vmatpush3.bf16.msra.mxu1 %v7317_v52  ;;  %6141 = vmatmul.mubr.msk.bf16.gmra.mrb[44].mxu0 %vm255_vm1, %v3435_v48  ;;  %v1393_v52 = vld [vmem:[#allocation2 + $0xba] sm:$0xff]  ;;  %v3422_v48 = vld [vmem:[#allocation2 + $0x18e] sm:$0xff] }
 0x193   : > { %5724 = vmatprep.mubr.msk.bf16.mxu1 %vm7331_vm0, %v7911_v54  ;;  %6144 = vmatprep.mubr.msk.bf16.mxu0 %vm7331_vm0, %v7911_v54  ;;  %v1427_v55 = vpack.c.bf16 %v1393_v52, %v1392_v43  ;;  %v3446_v56 = vpack.c.bf16 %v3423_v53, %v3422_v48  ;;  %v8136_v43 = vld [vmem:[#allocation2 + $0xbf] sm:$0xff]  ;;  %v8138_v52 = vld [vmem:[#allocation2 + $0xc7] sm:$0xff] }
 0x194   : > { %6376 = vmatprep.subr.bf16.mxu1 %v7911_v54  ;;  %v3935_v53 = vpack.c.bf16 %v8138_v52, %v8136_v43 }
 0x199   : > { %5725 = vmatmul.mubr.msk.bf16.gmra.mrb[4].mxu1 %vm255_vm1, %v1417_v57  ;;  %v1395_v57 = vld [vmem:[#allocation2 + $0xca] sm:$0xff] }
 0x19a   : > { %6145 = vmatmul.mubr.msk.bf16.gmra.mrb[48].mxu0 %vm255_vm1, %v3436_v59  ;;  %5728 = vmatprep.mubr.msk.bf16.mxu1 %vm7331_vm0, %v7911_v54  ;;  %v8025_v59 = vld [vmem:[#allocation2 + $0x2f] sm:$0xff]  ;;  %v1428_v61 = vpack.c.bf16 %v1395_v57, %v1394_v49  ;;  %v8150_v57 = vld [vmem:[#allocation2 + $0xd7] sm:$0xff] }
 0x19b   : > { %6148 = vmatprep.mubr.msk.bf16.mxu0 %vm7331_vm0, %v7911_v54  ;;  %v3926_v58 = vpack.c.bf16 %v8027_v60, %v8025_v59  ;;  %v8148_v49 = vld [vmem:[#allocation2 + $0xcf] sm:$0xff] }
 0x1a1   : > { %5729 = vmatmul.mubr.msk.bf16.gmra.mrb[8].mxu1 %vm255_vm1, %v1418_v63  ;;  %v1396_v63 = vld [vmem:[#allocation2 + $0xd2] sm:$0xff] }
 0x1a2   : > { %6149 = vmatmul.mubr.msk.bf16.gmra.mrb[52].mxu0 %vm255_vm1, %v3437_v3  ;;  %5732 = vmatprep.mubr.msk.bf16.mxu1 %vm7331_vm0, %v7911_v54  ;;  %v1397_v3 = vld [vmem:[#allocation2 + $0xda] sm:$0xff] }
 0x1a3   : > { %6152 = vmatprep.mubr.msk.bf16.mxu0 %vm7331_vm0, %v7911_v54  ;;  %v1429_v5 = vpack.c.bf16 %v1397_v3, %v1396_v63  ;;  %v1873_v63 = vld [vmem:[#allocation2 + $0x1f] sm:$0xff] }
 0x1a4   : > { %v8160_v3 = vld [vmem:[#allocation2 + $0xdf] sm:$0xff] }
 0x1a9   : > { %5733 = vmatmul.mubr.msk.bf16.gmra.mrb[12].mxu1 %vm255_vm1, %v1419_v8  ;;  %v1398_v8 = vld [vmem:[#allocation2 + $0xe2] sm:$0xff] }
 0x1aa   : > { %6153 = vmatmul.mubr.msk.bf16.gmra.mrb[56].mxu0 %vm255_vm1, %v3438_v9  ;;  %5736 = vmatprep.mubr.msk.bf16.mxu1 %vm7331_vm0, %v7911_v54  ;;  %v1399_v9 = vld [vmem:[#allocation2 + $0xea] sm:$0xff] }
 0x1ab   : > { %6156 = vmatprep.mubr.msk.bf16.mxu0 %vm7331_vm0, %v7911_v54  ;;  %v1430_v14 = vpack.c.bf16 %v1399_v9, %v1398_v8  ;;  %v7320_v9 = vld [vmem:[%s8643_s1 + $0x20] sm:$0xff]  }
 0x1b1   : > { %5737 = vmatmul.mubr.msk.bf16.gmra.mrb[16].mxu1 %vm255_vm1, %v1420_v16  ;;  %v1400_v16 = vld [vmem:[#allocation2 + $0xf2] sm:$0xff] }
 0x1b2   : > { %6157 = vmatmul.mubr.msk.bf16.gmra.mrb[60].mxu0 %vm255_vm1, %v3439_v17  ;;  %5740 = vmatprep.mubr.msk.bf16.mxu1 %vm7331_vm0, %v7911_v54  ;;  %v1401_v17 = vld [vmem:[#allocation2 + $0xfa] sm:$0xff] }
 0x1b3   : > { %6160 = vmatprep.mubr.msk.bf16.mxu0 %vm7331_vm0, %v7911_v54  ;;  %v1431_v22 = vpack.c.bf16 %v1401_v17, %v1400_v16  ;;  %v8177_v16 = vld [vmem:[#allocation2 + $0xf7] sm:$0xff] }
 0x1b9   : > { %5741 = vmatmul.mubr.msk.bf16.gmra.mrb[20].mxu1 %vm255_vm1, %v1421_v26  ;;  %v1402_v26 = vld [vmem:[#allocation2 + $0x102] sm:$0xff] }
 0x1ba   : > { %6161 = vmatmul.mubr.msk.bf16.gmra.mrb[64].mxu0 %vm255_vm1, %v3440_v27  ;;  %5744 = vmatprep.mubr.msk.bf16.mxu1 %vm7331_vm0, %v7911_v54  ;;  %v1403_v27 = vld [vmem:[#allocation2 + $0x10a] sm:$0xff] }
 0x1bb   : > { %6164 = vmatprep.mubr.msk.bf16.mxu0 %vm7331_vm0, %v7911_v54  ;;  %v1432_v30 = vpack.c.bf16 %v1403_v27, %v1402_v26  ;;  %v8190_v26 = vld [vmem:[#allocation2 + $0x107] sm:$0xff] }
 0x1c1   : > { %5745 = vmatmul.mubr.msk.bf16.gmra.mrb[24].mxu1 %vm255_vm1, %v1422_v2  ;;  %v1404_v2 = vld [vmem:[#allocation2 + $0x112] sm:$0xff] }
 0x1c2   : > { %6165 = vmatmul.mubr.msk.bf16.gmra.mrb[68].mxu0 %vm255_vm1, %v3441_v32  ;;  %5748 = vmatprep.mubr.msk.bf16.mxu1 %vm7331_vm0, %v7911_v54  ;;  %v1405_v32 = vld [vmem:[#allocation2 + $0x11a] sm:$0xff] }
 0x1c3   : > { %6168 = vmatprep.mubr.msk.bf16.mxu0 %vm7331_vm0, %v7911_v54  ;;  %v1433_v50 = vpack.c.bf16 %v1405_v32, %v1404_v2  ;;  %v8216_v2 = vld [vmem:[#allocation2 + $0x11f] sm:$0xff]  ;;  %v8218_v32 = vld [vmem:[#allocation2 + $0x127] sm:$0xff] }
 0x1c9   : > { %5749 = vmatmul.mubr.msk.bf16.gmra.mrb[28].mxu1 %vm255_vm1, %v1423_v7  ;;  %v1406_v7 = vld [vmem:[#allocation2 + $0x122] sm:$0xff] }
 0x1ca   : > { %6169 = vmatmul.mubr.msk.bf16.gmra.mrb[72].mxu0 %vm255_vm1, %v3442_v1  ;;  %5752 = vmatprep.mubr.msk.bf16.mxu1 %vm7331_vm0, %v7911_v54  ;;  %v1407_v1 = vld [vmem:[#allocation2 + $0x12a] sm:$0xff] }
 0x1cb   : > { %6172 = vmatprep.mubr.msk.bf16.mxu0 %vm7331_vm0, %v7911_v54  ;;  %v1434_v38 = vpack.c.bf16 %v1407_v1, %v1406_v7  ;;  %v8244_v7 = vld [vmem:[#allocation2 + $0x13f] sm:$0xff]  ;;  %v8246_v1 = vld [vmem:[#allocation2 + $0x147] sm:$0xff] }
 0x1d1   : > { %5753 = vmatmul.mubr.msk.bf16.gmra.mrb[32].mxu1 %vm255_vm1, %v1424_v18  ;;  %v1408_v18 = vld [vmem:[#allocation2 + $0x132] sm:$0xff] }
 0x1d2   : > { %6173 = vmatmul.mubr.msk.bf16.gmra.mrb[76].mxu0 %vm255_vm1, %v3443_v39  ;;  %5756 = vmatprep.mubr.msk.bf16.mxu1 %vm7331_vm0, %v7911_v54  ;;  %v1409_v39 = vld [vmem:[#allocation2 + $0x13a] sm:$0xff] }
 0x1d3   : > { %6176 = vmatprep.mubr.msk.bf16.mxu0 %vm7331_vm0, %v7911_v54  ;;  %v1435_v24 = vpack.c.bf16 %v1409_v39, %v1408_v18  ;;  %v8272_v18 = vld [vmem:[#allocation2 + $0x15f] sm:$0xff]  ;;  %v8274_v39 = vld [vmem:[#allocation2 + $0x167] sm:$0xff] }
 0x1d9   : > { %5757 = vmatmul.mubr.msk.bf16.gmra.mrb[36].mxu1 %vm255_vm1, %v1425_v44  ;;  %v1410_v44 = vld [vmem:[#allocation2 + $0x142] sm:$0xff] }
 0x1da   : > { %6177 = vmatmul.mubr.msk.bf16.gmra.mrb[80].mxu0 %vm255_vm1, %v3444_v25  ;;  %5760 = vmatprep.mubr.msk.bf16.mxu1 %vm7331_vm0, %v7911_v54  ;;  %v1411_v25 = vld [vmem:[#allocation2 + $0x14a] sm:$0xff] }
 0x1db   : > { %6180 = vmatprep.mubr.msk.bf16.mxu0 %vm7331_vm0, %v7911_v54  ;;  %v1436_v46 = vpack.c.bf16 %v1411_v25, %v1410_v44  ;;  %v8300_v44 = vld [vmem:[#allocation2 + $0x17f] sm:$0xff]  ;;  %v3923_v25 = vld [vmem:[#allocation2 + $0x187] sm:$0xff] }
 0x1e1   : > { %5761 = vmatmul.mubr.msk.bf16.gmra.mrb[40].mxu1 %vm255_vm1, %v1426_v42  ;;  %v1412_v42 = vld [vmem:[#allocation2 + $0x152] sm:$0xff] }
 0x1e2   : > { %6181 = vmatmul.mubr.msk.bf16.gmra.mrb[84].mxu0 %vm255_vm1, %v3445_v47  ;;  %5764 = vmatprep.mubr.msk.bf16.mxu1 %vm7331_vm0, %v7911_v54  ;;  %v1413_v47 = vld [vmem:[#allocation2 + $0x15a] sm:$0xff] }
 0x1e3   : > { %6184 = vmatprep.mubr.msk.bf16.mxu0 %vm7331_vm0, %v7911_v54  ;;  %v1437_v48 = vpack.c.bf16 %v1413_v47, %v1412_v42  ;;  %v1929_v42 = vpack.c.bf16 %v8148_v49, %v8138_v52  ;;  %v4384_v52 = vld [vmem:[#allocation2 + $0x40] sm:$0xff] }
 0x1e9   : > { %5765 = vmatmul.mubr.msk.bf16.gmra.mrb[44].mxu1 %vm255_vm1, %v1427_v55  ;;  %v1414_v55 = vld [vmem:[#allocation2 + $0x162] sm:$0xff] }
 0x1ea   : > { %6185 = vmatmul.mubr.msk.bf16.gmra.mrb[88].mxu0 %vm255_vm1, %v3446_v56  ;;  %5768 = vmatprep.mubr.msk.bf16.mxu1 %vm7331_vm0, %v7911_v54  ;;  %v1415_v56 = vld [vmem:[#allocation2 + $0x16a] sm:$0xff] }
 0x1eb   : > { %6190 = vmatprep.mubr.msk.bf16.mxu0 %vm7331_vm0, %v7911_v54 }
 0x1f1   : > { %5769 = vmatmul.mubr.msk.bf16.gmra.mrb[48].mxu1 %vm255_vm1, %v1428_v61  ;;  %v1438_v61 = vpack.c.bf16 %v1415_v56, %v1414_v55  ;;  %v4385_v55 = vld [vmem:[#allocation2 + $0x48] sm:$0xff] }
 0x1f2   : > { %6191 = vmatmul.mubr.msk.bf16.vlgmr.msra.gmra.mrb[0].mxu0 %vm255_vm1, %v3926_v58  ;;  %5772 = vmatprep.mubr.msk.bf16.mxu1 %vm7331_vm0, %v7911_v54  ;;  %v3936_v58 = vpack.c.bf16 %v8150_v57, %v8148_v49  ;;  %v4429_v49 = vpack.c.bf16 %v4385_v55, %v4384_v52  ;;  %v2409_v55 = vld [vmem:[#allocation2 + $0x130] sm:$0xff] }
 0x1f3   : > { %6283 = vmatpush3.bf16.msra.mxu0 %v7318_v62  ;;  %6194 = vmatprep.mubr.msk.bf16.mxu0 %vm7331_vm0, %v7911_v54  ;;  %v1872_v62 = vld [vmem:[#allocation2 + $0x17] sm:$0xff] }
 0x1f9   : > { %5773 = vmatmul.mubr.msk.bf16.gmra.mrb[52].mxu1 %vm255_vm1, %v1429_v5  ;;  %v8162_v5 = vld [vmem:[#allocation2 + $0xe7] sm:$0xff] }
 0x1fa   : > { %6195 = vmatmul.mubr.msk.bf16.gmra.mrb[4].mxu0 %vm255_vm1, %v3927_v6  ;;  %5776 = vmatprep.mubr.msk.bf16.mxu1 %vm7331_vm0, %v7911_v54  ;;  %v1918_v6 = vpack.c.bf16 %v1873_v63, %v1872_v62  ;;  %v3937_v8 = vpack.c.bf16 %v8162_v5, %v8160_v3  ;;  %v4388_v63 = vld [vmem:[#allocation2 + $0x60] sm:$0xff] }
 0x1fb   : > { %6198 = vmatprep.mubr.msk.bf16.mxu0 %vm7331_vm0, %v7911_v54 }
 0x201   : > { %5777 = vmatmul.mubr.msk.bf16.gmra.mrb[56].mxu1 %vm255_vm1, %v1430_v14  ;;  %v1874_v14 = vld [vmem:[#allocation2 + $0x27] sm:$0xff] }
 0x202   : > { %6199 = vmatmul.mubr.msk.bf16.gmra.mrb[8].mxu0 %vm255_vm1, %v3928_v15  ;;  %5780 = vmatprep.mubr.msk.bf16.mxu1 %vm7331_vm0, %v7911_v54  ;;  %v8175_v15 = vld [vmem:[#allocation2 + $0xef] sm:$0xff]  ;;  %v1919_v17 = vpack.c.bf16 %v8025_v59, %v1874_v14  ;;  %v1920_v59 = vpack.c.bf16 %v8040_v0, %v8027_v60  ;;  %v1921_v60 = vpack.c.bf16 %v8052_v10, %v8042_v4 }
 0x203   : > { %6202 = vmatprep.mubr.msk.bf16.mxu0 %vm7331_vm0, %v7911_v54  ;;  %v1922_v4 = vpack.c.bf16 %v8064_v20, %v8054_v11  ;;  %v3941_v10 = vpack.c.bf16 %v8218_v32, %v8216_v2  ;;  %v1923_v11 = vpack.c.bf16 %v8076_v28, %v8066_v21  ;;  %v1924_v21 = vpack.c.bf16 %v8088_v35, %v8078_v29 }
 0x204   : > { %v3943_v28 = vpack.c.bf16 %v8246_v1, %v8244_v7  ;;  %v1925_v29 = vpack.c.bf16 %v8100_v12, %v8090_v36  ;;  %v1926_v36 = vpack.c.bf16 %v8112_v40, %v8102_v37  ;;  %v3945_v12 = vpack.c.bf16 %v8274_v39, %v8272_v18 }
 0x205   : > { %v1927_v37 = vpack.c.bf16 %v8124_v33, %v8114_v19  ;;  %v3947_v19 = vpack.c.bf16 %v3923_v25, %v8300_v44  ;;  %v3924_v33 = vld [vmem:[#allocation2 + $0x18f] sm:$0xff]  ;;  %v1931_v56 = vpack.c.bf16 %v8175_v15, %v8162_v5 }
 0x206   : > { %v2405_v25 = vld [vmem:[#allocation2 + $0x110] sm:$0xff] }
 0x209   : > { %5781 = vmatmul.mubr.msk.bf16.gmra.mrb[60].mxu1 %vm255_vm1, %v1431_v22  ;;  %v3938_v22 = vpack.c.bf16 %v8177_v16, %v8175_v15 }
 0x20a   : > { %6203 = vmatmul.mubr.msk.bf16.gmra.mrb[12].mxu0 %vm255_vm1, %v3929_v23  ;;  %5784 = vmatprep.mubr.msk.bf16.mxu1 %vm7331_vm0, %v7911_v54  ;;  %v8188_v23 = vld [vmem:[#allocation2 + $0xff] sm:$0xff] }
 0x20b   : > { %6206 = vmatprep.mubr.msk.bf16.mxu0 %vm7331_vm0, %v7911_v54  ;;  %v3939_v27 = vpack.c.bf16 %v8190_v26, %v8188_v23 }
 0x211   : > { %5785 = vmatmul.mubr.msk.bf16.gmra.mrb[64].mxu1 %vm255_vm1, %v1432_v30  ;;  %v8202_v30 = vld [vmem:[#allocation2 + $0x10f] sm:$0xff] }
 0x212   : > { %6207 = vmatmul.mubr.msk.bf16.gmra.mrb[16].mxu0 %vm255_vm1, %v3930_v31  ;;  %5788 = vmatprep.mubr.msk.bf16.mxu1 %vm7331_vm0, %v7911_v54  ;;  %v8204_v31 = vld [vmem:[#allocation2 + $0x117] sm:$0xff]  ;;  %v1933_v5 = vpack.c.bf16 %v8202_v30, %v8190_v26 }
 0x213   : > { %6210 = vmatprep.mubr.msk.bf16.mxu0 %vm7331_vm0, %v7911_v54  ;;  %v3940_v0 = vpack.c.bf16 %v8204_v31, %v8202_v30  ;;  %v1934_v14 = vpack.c.bf16 %v8216_v2, %v8204_v31  ;;  %v4394_v26 = vld [vmem:[#allocation2 + $0x90] sm:$0xff]  ;;  %v4396_v31 = vld [vmem:[#allocation2 + $0xa0] sm:$0xff] }
 0x219   : > { %5789 = vmatmul.mubr.msk.bf16.gmra.mrb[68].mxu1 %vm255_vm1, %v1433_v50  ;;  %v8230_v50 = vld [vmem:[#allocation2 + $0x12f] sm:$0xff] }
 0x21a   : > { %6211 = vmatmul.mubr.msk.bf16.gmra.mrb[20].mxu0 %vm255_vm1, %v3931_v51  ;;  %5792 = vmatprep.mubr.msk.bf16.mxu1 %vm7331_vm0, %v7911_v54  ;;  %v8232_v51 = vld [vmem:[#allocation2 + $0x137] sm:$0xff] }
 0x21b   : > { %6214 = vmatprep.mubr.msk.bf16.mxu0 %vm7331_vm0, %v7911_v54  ;;  %v3942_v20 = vpack.c.bf16 %v8232_v51, %v8230_v50 }
 0x221   : > { %5793 = vmatmul.mubr.msk.bf16.gmra.mrb[72].mxu1 %vm255_vm1, %v1434_v38  ;;  %v8258_v38 = vld [vmem:[#allocation2 + $0x14f] sm:$0xff] }
 0x222   : > { %6215 = vmatmul.mubr.msk.bf16.gmra.mrb[24].mxu0 %vm255_vm1, %v3932_v13  ;;  %5796 = vmatprep.mubr.msk.bf16.mxu1 %vm7331_vm0, %v7911_v54  ;;  %v8260_v13 = vld [vmem:[#allocation2 + $0x157] sm:$0xff] }
 0x223   : > { %6218 = vmatprep.mubr.msk.bf16.mxu0 %vm7331_vm0, %v7911_v54  ;;  %v3944_v35 = vpack.c.bf16 %v8260_v13, %v8258_v38 }
 0x229   : > { %5797 = vmatmul.mubr.msk.bf16.gmra.mrb[76].mxu1 %vm255_vm1, %v1435_v24  ;;  %v8286_v24 = vld [vmem:[#allocation2 + $0x16f] sm:$0xff] }
 0x22a   : > { %6219 = vmatmul.mubr.msk.bf16.gmra.mrb[28].mxu0 %vm255_vm1, %v3933_v41  ;;  %5800 = vmatprep.mubr.msk.bf16.mxu1 %vm7331_vm0, %v7911_v54  ;;  %v8288_v41 = vld [vmem:[#allocation2 + $0x177] sm:$0xff] }
 0x22b   : > { %6222 = vmatprep.mubr.msk.bf16.mxu0 %vm7331_vm0, %v7911_v54  ;;  %v3946_v40 = vpack.c.bf16 %v8288_v41, %v8286_v24 }
 0x231   : > { %5801 = vmatmul.mubr.msk.bf16.gmra.mrb[80].mxu1 %vm255_vm1, %v1436_v46  ;;  %v1928_v46 = vpack.c.bf16 %v8136_v43, %v8126_v45  ;;  %v4382_v45 = vld [vmem:[#allocation2 + $0x30] sm:$0xff]  ;;  %v4383_v43 = vld [vmem:[#allocation2 + $0x38] sm:$0xff] }
 0x232   : > { %6223 = vmatmul.mubr.msk.bf16.gmra.mrb[32].mxu0 %vm255_vm1, %v3934_v34  ;;  %5804 = vmatprep.mubr.msk.bf16.mxu1 %vm7331_vm0, %v7911_v54  ;;  %v3925_v34 = vld [vmem:[#allocation2 + $0x197] sm:$0xff] }
 0x233   : > { %6226 = vmatprep.mubr.msk.bf16.mxu0 %vm7331_vm0, %v7911_v54  ;;  %v3948_v47 = vpack.c.bf16 %v3925_v34, %v3924_v33  ;;  %v2407_v34 = vld [vmem:[#allocation2 + $0x120] sm:$0xff] }
 0x239   : > { %5805 = vmatmul.mubr.msk.bf16.gmra.mrb[84].mxu1 %vm255_vm1, %v1437_v48  ;;  %v1930_v48 = vpack.c.bf16 %v8160_v3, %v8150_v57  ;;  %v4386_v57 = vld [vmem:[#allocation2 + $0x50] sm:$0xff]  ;;  %v4389_v3 = vld [vmem:[#allocation2 + $0x68] sm:$0xff] }
 0x23a   : > { %6227 = vmatmul.mubr.msk.bf16.gmra.mrb[36].mxu0 %vm255_vm1, %v3935_v53  ;;  %5808 = vmatprep.mubr.msk.bf16.mxu1 %vm7331_vm0, %v7911_v54  ;;  %v4428_v53 = vpack.c.bf16 %v4383_v43, %v4382_v45 }
 0x23b   : > { %6230 = vmatprep.mubr.msk.bf16.mxu0 %vm7331_vm0, %v7911_v54 }
 0x241   : > { %5809 = vmatmul.mubr.msk.bf16.gmra.mrb[88].mxu1 %vm255_vm1, %v1438_v61  ;;  %v4387_v61 = vld [vmem:[#allocation2 + $0x58] sm:$0xff] }
 0x242   : > { %6231 = vmatmul.mubr.msk.bf16.gmra.mrb[40].mxu0 %vm255_vm1, %v3936_v58  ;;  %5814 = vmatprep.mubr.msk.bf16.mxu1 %vm7331_vm0, %v7911_v54  ;;  %v1932_v58 = vpack.c.bf16 %v8188_v23, %v8177_v16  ;;  %v4430_v62 = vpack.c.bf16 %v4387_v61, %v4386_v57  ;;  %v4392_v16 = vld [vmem:[#allocation2 + $0x80] sm:$0xff] }
 0x243   : > { %6234 = vmatprep.mubr.msk.bf16.mxu0 %vm7331_vm0, %v7911_v54 }
 0x249   : > { %5815 = vmatmul.mubr.msk.bf16.vlgmr.msra.gmra.mrb[0].mxu1 %vm255_vm1, %v1918_v6  ;;  %v4431_v6 = vpack.c.bf16 %v4389_v3, %v4388_v63  ;;  %v2411_v3 = vld [vmem:[#allocation2 + $0x140] sm:$0xff] }
 0x24a   : > { %6377 = vmatpush3.bf16.msra.mxu1 %v7320_v9  ;;  %6235 = vmatmul.mubr.msk.bf16.gmra.mrb[44].mxu0 %vm255_vm1, %v3937_v8  ;;  %v4390_v8 = vld [vmem:[#allocation2 + $0x70] sm:$0xff]  ;;  %v4391_v9 = vld [vmem:[#allocation2 + $0x78] sm:$0xff] }
 0x24b   : > { %5818 = vmatprep.mubr.msk.bf16.mxu1 %vm7331_vm0, %v7911_v54  ;;  %6238 = vmatprep.mubr.msk.bf16.mxu0 %vm7331_vm0, %v7911_v54  ;;  %v4432_v15 = vpack.c.bf16 %v4391_v9, %v4390_v8 }
 0x251   : > { %5819 = vmatmul.mubr.msk.bf16.gmra.mrb[4].mxu1 %vm255_vm1, %v1919_v17  ;;  %v4393_v17 = vld [vmem:[#allocation2 + $0x88] sm:$0xff] }
 0x252   : > { %6239 = vmatmul.mubr.msk.bf16.gmra.mrb[48].mxu0 %vm255_vm1, %v3938_v22  ;;  %5822 = vmatprep.mubr.msk.bf16.mxu1 %vm7331_vm0, %v7911_v54  ;;  %v1935_v22 = vpack.c.bf16 %v8230_v50, %v8218_v32  ;;  %v4433_v23 = vpack.c.bf16 %v4393_v17, %v4392_v16  ;;  %v4398_v32 = vld [vmem:[#allocation2 + $0xb0] sm:$0xff] }
 0x253   : > { %6242 = vmatprep.mubr.msk.bf16.mxu0 %vm7331_vm0, %v7911_v54 }
 0x259   : > { %5823 = vmatmul.mubr.msk.bf16.gmra.mrb[8].mxu1 %vm255_vm1, %v1920_v59  ;;  %v4395_v59 = vld [vmem:[#allocation2 + $0x98] sm:$0xff] }
 0x25a   : > { %6243 = vmatmul.mubr.msk.bf16.gmra.mrb[52].mxu0 %vm255_vm1, %v3939_v27  ;;  %5826 = vmatprep.mubr.msk.bf16.mxu1 %vm7331_vm0, %v7911_v54  ;;  %v1936_v27 = vpack.c.bf16 %v8244_v7, %v8232_v51  ;;  %v4434_v30 = vpack.c.bf16 %v4395_v59, %v4394_v26  ;;  %v4400_v51 = vld [vmem:[#allocation2 + $0xc0] sm:$0xff] }
 0x25b   : > { %6246 = vmatprep.mubr.msk.bf16.mxu0 %vm7331_vm0, %v7911_v54 }
 0x261   : > { %5827 = vmatmul.mubr.msk.bf16.gmra.mrb[12].mxu1 %vm255_vm1, %v1921_v60  ;;  %v4397_v60 = vld [vmem:[#allocation2 + $0xa8] sm:$0xff] }
 0x262   : > { %6247 = vmatmul.mubr.msk.bf16.gmra.mrb[56].mxu0 %vm255_vm1, %v3940_v0  ;;  %5830 = vmatprep.mubr.msk.bf16.mxu1 %vm7331_vm0, %v7911_v54  ;;  %v1937_v0 = vpack.c.bf16 %v8258_v38, %v8246_v1  ;;  %v4435_v2 = vpack.c.bf16 %v4397_v60, %v4396_v31  ;;  %v4402_v1 = vld [vmem:[#allocation2 + $0xd0] sm:$0xff]  ;;  %v2415_v60 = vld [vmem:[#allocation2 + $0x160] sm:$0xff] }
 0x263   : > { %6250 = vmatprep.mubr.msk.bf16.mxu0 %vm7331_vm0, %v7911_v54 }
 0x269   : > { %5831 = vmatmul.mubr.msk.bf16.gmra.mrb[16].mxu1 %vm255_vm1, %v1922_v4  ;;  %v4399_v4 = vld [vmem:[#allocation2 + $0xb8] sm:$0xff] }
 0x26a   : > { %6251 = vmatmul.mubr.msk.bf16.gmra.mrb[60].mxu0 %vm255_vm1, %v3941_v10  ;;  %5834 = vmatprep.mubr.msk.bf16.mxu1 %vm7331_vm0, %v7911_v54  ;;  %v1938_v10 = vpack.c.bf16 %v8272_v18, %v8260_v13  ;;  %v4436_v50 = vpack.c.bf16 %v4399_v4, %v4398_v32  ;;  %v2399_v13 = vld [vmem:[#allocation2 + $0xe0] sm:$0xff] }
 0x26b   : > { %6254 = vmatprep.mubr.msk.bf16.mxu0 %vm7331_vm0, %v7911_v54 }
 0x271   : > { %5835 = vmatmul.mubr.msk.bf16.gmra.mrb[20].mxu1 %vm255_vm1, %v1923_v11  ;;  %v4401_v11 = vld [vmem:[#allocation2 + $0xc8] sm:$0xff] }
 0x272   : > { %6255 = vmatmul.mubr.msk.bf16.gmra.mrb[64].mxu0 %vm255_vm1, %v3942_v20  ;;  %5838 = vmatprep.mubr.msk.bf16.mxu1 %vm7331_vm0, %v7911_v54  ;;  %v1939_v20 = vpack.c.bf16 %v8286_v24, %v8274_v39  ;;  %v4437_v7 = vpack.c.bf16 %v4401_v11, %v4400_v51  ;;  %v2401_v39 = vld [vmem:[#allocation2 + $0xf0] sm:$0xff] }
 0x273   : > { %6258 = vmatprep.mubr.msk.bf16.mxu0 %vm7331_vm0, %v7911_v54  ;;  %v2417_v11 = vld [vmem:[#allocation2 + $0x170] sm:$0xff] }
 0x279   : > { %5839 = vmatmul.mubr.msk.bf16.gmra.mrb[24].mxu1 %vm255_vm1, %v1924_v21  ;;  %v4403_v21 = vld [vmem:[#allocation2 + $0xd8] sm:$0xff] }
 0x27a   : > { %6259 = vmatmul.mubr.msk.bf16.gmra.mrb[68].mxu0 %vm255_vm1, %v3943_v28  ;;  %5842 = vmatprep.mubr.msk.bf16.mxu1 %vm7331_vm0, %v7911_v54  ;;  %v1940_v28 = vpack.c.bf16 %v8300_v44, %v8288_v41  ;;  %v4438_v38 = vpack.c.bf16 %v4403_v21, %v4402_v1  ;;  %v2403_v41 = vld [vmem:[#allocation2 + $0x100] sm:$0xff] }
 0x27b   : > { %6262 = vmatprep.mubr.msk.bf16.mxu0 %vm7331_vm0, %v7911_v54 }
 0x281   : > { %5843 = vmatmul.mubr.msk.bf16.gmra.mrb[28].mxu1 %vm255_vm1, %v1925_v29  ;;  %v4405_v29 = vld [vmem:[#allocation2 + $0xe8] sm:$0xff] }
 0x282   : > { %6263 = vmatmul.mubr.msk.bf16.gmra.mrb[72].mxu0 %vm255_vm1, %v3944_v35  ;;  %5846 = vmatprep.mubr.msk.bf16.mxu1 %vm7331_vm0, %v7911_v54  ;;  %v2432_v35 = vpack.c.bf16 %v2399_v13, %v4403_v21  ;;  %v4439_v18 = vpack.c.bf16 %v4405_v29, %v2399_v13 }
 0x283   : > { %6266 = vmatprep.mubr.msk.bf16.mxu0 %vm7331_vm0, %v7911_v54 }
 0x289   : > { %5847 = vmatmul.mubr.msk.bf16.gmra.mrb[32].mxu1 %vm255_vm1, %v1926_v36  ;;  %v4407_v36 = vld [vmem:[#allocation2 + $0xf8] sm:$0xff] }
 0x28a   : > { %6267 = vmatmul.mubr.msk.bf16.gmra.mrb[76].mxu0 %vm255_vm1, %v3945_v12  ;;  %5850 = vmatprep.mubr.msk.bf16.mxu1 %vm7331_vm0, %v7911_v54  ;;  %v2433_v12 = vpack.c.bf16 %v2401_v39, %v4405_v29  ;;  %v4440_v24 = vpack.c.bf16 %v4407_v36, %v2401_v39  ;;  %v2419_v29 = vld [vmem:[#allocation2 + $0x180] sm:$0xff] }
 0x28b   : > { %6270 = vmatprep.mubr.msk.bf16.mxu0 %vm7331_vm0, %v7911_v54 }
 0x291   : > { %5851 = vmatmul.mubr.msk.bf16.gmra.mrb[36].mxu1 %vm255_vm1, %v1927_v37  ;;  %v4409_v37 = vld [vmem:[#allocation2 + $0x108] sm:$0xff] }
 0x292   : > { %6271 = vmatmul.mubr.msk.bf16.gmra.mrb[80].mxu0 %vm255_vm1, %v3946_v40  ;;  %5854 = vmatprep.mubr.msk.bf16.mxu1 %vm7331_vm0, %v7911_v54  ;;  %v2434_v40 = vpack.c.bf16 %v2403_v41, %v4407_v36  ;;  %v4441_v44 = vpack.c.bf16 %v4409_v37, %v2403_v41 }
 0x293   : > { %6274 = vmatprep.mubr.msk.bf16.mxu0 %vm7331_vm0, %v7911_v54 }
 0x299   : > { %5855 = vmatmul.mubr.msk.bf16.gmra.mrb[40].mxu1 %vm255_vm1, %v1928_v46  ;;  %v4411_v46 = vld [vmem:[#allocation2 + $0x118] sm:$0xff] }
 0x29a   : > { %6275 = vmatmul.mubr.msk.bf16.gmra.mrb[84].mxu0 %vm255_vm1, %v3947_v19  ;;  %5858 = vmatprep.mubr.msk.bf16.mxu1 %vm7331_vm0, %v7911_v54  ;;  %v2435_v19 = vpack.c.bf16 %v2405_v25, %v4409_v37  ;;  %v4442_v33 = vpack.c.bf16 %v4411_v46, %v2405_v25  ;;  %v2436_v43 = vpack.c.bf16 %v2407_v34, %v4411_v46  ;;  %v4426_v37 = vld [vmem:[#allocation2 + $0x190] sm:$0xff] }
 0x29b   : > { %6278 = vmatprep.mubr.msk.bf16.mxu0 %vm7331_vm0, %v7911_v54 }
 0x2a1   : > { %5859 = vmatmul.mubr.msk.bf16.gmra.mrb[44].mxu1 %vm255_vm1, %v1929_v42  ;;  %v4413_v42 = vld [vmem:[#allocation2 + $0x128] sm:$0xff] }
 0x2a2   : > { %6279 = vmatmul.mubr.msk.bf16.gmra.mrb[88].mxu0 %vm255_vm1, %v3948_v47  ;;  %5862 = vmatprep.mubr.msk.bf16.mxu1 %vm7331_vm0, %v7911_v54  ;;  %v2437_v61 = vpack.c.bf16 %v2409_v55, %v4413_v42 }
 0x2a3   : > { %6284 = vmatprep.mubr.msk.bf16.mxu0 %vm7331_vm0, %v7911_v54 }
 0x2a9   : > { %5863 = vmatmul.mubr.msk.bf16.gmra.mrb[48].mxu1 %vm255_vm1, %v1930_v48 }
 0x2aa   : > { %6285 = vmatmul.mubr.msk.bf16.vlgmr.msra.gmra.mrb[0].mxu0 %vm255_vm1, %v4428_v53  ;;  %5866 = vmatprep.mubr.msk.bf16.mxu1 %vm7331_vm0, %v7911_v54  ;;  %v4443_v53 = vpack.c.bf16 %v4413_v42, %v2407_v34 }
 0x2ab   : > { %6288 = vmatprep.mubr.msk.bf16.mxu0 %vm7331_vm0, %v7911_v54 }
 0x2b1   : > { %5867 = vmatmul.mubr.msk.bf16.gmra.mrb[52].mxu1 %vm255_vm1, %v1931_v56  ;;  %v4415_v56 = vld [vmem:[#allocation2 + $0x138] sm:$0xff] }
 0x2b2   : > { %6289 = vmatmul.mubr.msk.bf16.gmra.mrb[4].mxu0 %vm255_vm1, %v4429_v49  ;;  %5870 = vmatprep.mubr.msk.bf16.mxu1 %vm7331_vm0, %v7911_v54 }
 0x2b3   : > { %6292 = vmatprep.mubr.msk.bf16.mxu0 %vm7331_vm0, %v7911_v54 }
 0x2b9   : > { %5871 = vmatmul.mubr.msk.bf16.gmra.mrb[56].mxu1 %vm255_vm1, %v1932_v58 }
 0x2ba   : > { %6293 = vmatmul.mubr.msk.bf16.gmra.mrb[8].mxu0 %vm255_vm1, %v4430_v62  ;;  %5874 = vmatprep.mubr.msk.bf16.mxu1 %vm7331_vm0, %v7911_v54  ;;  %v4444_v62 = vpack.c.bf16 %v4415_v56, %v2409_v55 }
 0x2bb   : > { %6296 = vmatprep.mubr.msk.bf16.mxu0 %vm7331_vm0, %v7911_v54 }
 0x2c1   : > { %5875 = vmatmul.mubr.msk.bf16.gmra.mrb[60].mxu1 %vm255_vm1, %v1933_v5  ;;  %v8450_v5 = vld [vmem:[%s7377_s22] sm:$0xff] }
 0x2c2   : > { %6297 = vmatmul.mubr.msk.bf16.gmra.mrb[12].mxu0 %vm255_vm1, %v4431_v6  ;;  %5878 = vmatprep.mubr.msk.bf16.mxu1 %vm7331_vm0, %v7911_v54  ;;  %v4417_v6 = vld [vmem:[#allocation2 + $0x148] sm:$0xff] }
 0x2c3   : > { %6300 = vmatprep.mubr.msk.bf16.mxu0 %vm7331_vm0, %v7911_v54  ;;  %v4445_v16 = vpack.c.bf16 %v4417_v6, %v2411_v3 }
 0x2c9   : > { %5879 = vmatmul.mubr.msk.bf16.gmra.mrb[64].mxu1 %vm255_vm1, %v1934_v14  ;;  %v2438_v14 = vpack.c.bf16 %v2411_v3, %v4415_v56 }
 0x2ca   : > { %6301 = vmatmul.mubr.msk.bf16.gmra.mrb[16].mxu0 %vm255_vm1, %v4432_v15  ;;  %5882 = vmatprep.mubr.msk.bf16.mxu1 %vm7331_vm0, %v7911_v54 }
 0x2cb   : > { %6304 = vmatprep.mubr.msk.bf16.mxu0 %vm7331_vm0, %v7911_v54 }
 0x2d1   : > { %5883 = vmatmul.mubr.msk.bf16.gmra.mrb[68].mxu1 %vm255_vm1, %v1935_v22  ;;  %v4419_v22 = vld [vmem:[#allocation2 + $0x158] sm:$0xff] }
 0x2d2   : > { %6305 = vmatmul.mubr.msk.bf16.gmra.mrb[20].mxu0 %vm255_vm1, %v4433_v23  ;;  %5886 = vmatprep.mubr.msk.bf16.mxu1 %vm7331_vm0, %v7911_v54  ;;  %v2440_v4 = vpack.c.bf16 %v2415_v60, %v4419_v22 }
 0x2d3   : > { %6308 = vmatprep.mubr.msk.bf16.mxu0 %vm7331_vm0, %v7911_v54 }
 0x2d9   : > { %5887 = vmatmul.mubr.msk.bf16.gmra.mrb[72].mxu1 %vm255_vm1, %v1936_v27 }
 0x2da   : > { %6309 = vmatmul.mubr.msk.bf16.gmra.mrb[24].mxu0 %vm255_vm1, %v4434_v30  ;;  %5890 = vmatprep.mubr.msk.bf16.mxu1 %vm7331_vm0, %v7911_v54 }
 0x2db   : > { %6312 = vmatprep.mubr.msk.bf16.mxu0 %vm7331_vm0, %v7911_v54 }
 0x2e1   : > { %5891 = vmatmul.mubr.msk.bf16.gmra.mrb[76].mxu1 %vm255_vm1, %v1937_v0  ;;  %v4421_v0 = vld [vmem:[#allocation2 + $0x168] sm:$0xff] }
 0x2e2   : > { %6313 = vmatmul.mubr.msk.bf16.gmra.mrb[28].mxu0 %vm255_vm1, %v4435_v2  ;;  %5894 = vmatprep.mubr.msk.bf16.mxu1 %vm7331_vm0, %v7911_v54  ;;  %v2441_v21 = vpack.c.bf16 %v2417_v11, %v4421_v0 }
 0x2e3   : > { %6316 = vmatprep.mubr.msk.bf16.mxu0 %vm7331_vm0, %v7911_v54 }
 0x2e9   : > { %5895 = vmatmul.mubr.msk.bf16.gmra.mrb[80].mxu1 %vm255_vm1, %v1938_v10 }
 0x2ea   : > { %6317 = vmatmul.mubr.msk.bf16.gmra.mrb[32].mxu0 %vm255_vm1, %v4436_v50  ;;  %5898 = vmatprep.mubr.msk.bf16.mxu1 %vm7331_vm0, %v7911_v54  ;;  %v4447_v50 = vpack.c.bf16 %v4421_v0, %v2415_v60 }
 0x2eb   : > { %6320 = vmatprep.mubr.msk.bf16.mxu0 %vm7331_vm0, %v7911_v54 }
 0x2f1   : > { %5899 = vmatmul.mubr.msk.bf16.gmra.mrb[84].mxu1 %vm255_vm1, %v1939_v20  ;;  %v4423_v20 = vld [vmem:[#allocation2 + $0x178] sm:$0xff] }
 0x2f2   : > { %6321 = vmatmul.mubr.msk.bf16.gmra.mrb[36].mxu0 %vm255_vm1, %v4437_v7  ;;  %5902 = vmatprep.mubr.msk.bf16.mxu1 %vm7331_vm0, %v7911_v54  ;;  %v2442_v36 = vpack.c.bf16 %v2419_v29, %v4423_v20 }
 0x2f3   : > { %6324 = vmatprep.mubr.msk.bf16.mxu0 %vm7331_vm0, %v7911_v54 }
 0x2f9   : > { %5903 = vmatmul.mubr.msk.bf16.gmra.mrb[88].mxu1 %vm255_vm1, %v1940_v28 }
 0x2fa   : > { %6325 = vmatmul.mubr.msk.bf16.gmra.mrb[40].mxu0 %vm255_vm1, %v4438_v38  ;;  %5956 = vmatprep.mubr.msk.bf16.mxu1 %vm7331_vm0, %v7911_v54  ;;  %v4448_v38 = vpack.c.bf16 %v4423_v20, %v2417_v11 }
 0x2fb   : > { %6328 = vmatprep.mubr.msk.bf16.mxu0 %vm7331_vm0, %v7911_v54 }
 0x301   : > { %5957 = vmatmul.mubr.msk.bf16.vlgmr.msra.gmra.mrb[48].mxu1 %vm255_vm1, %v2432_v35  ;;  %v4425_v35 = vld [vmem:[#allocation2 + $0x188] sm:$0xff] }
 0x302   : > { %6329 = vmatmul.mubr.msk.bf16.gmra.mrb[44].mxu0 %vm255_vm1, %v4439_v18  ;;  %5960 = vmatprep.mubr.msk.bf16.mxu1 %vm7331_vm0, %v7911_v54 }
 0x303   : > { %6332 = vmatprep.mubr.msk.bf16.mxu0 %vm7331_vm0, %v7911_v54 }
 0x309   : > { %5961 = vmatmul.mubr.msk.bf16.gmra.mrb[52].mxu1 %vm255_vm1, %v2433_v12 }
 0x30a   : > { %6333 = vmatmul.mubr.msk.bf16.gmra.mrb[48].mxu0 %vm255_vm1, %v4440_v24  ;;  %5964 = vmatprep.mubr.msk.bf16.mxu1 %vm7331_vm0, %v7911_v54  ;;  %v4449_v24 = vpack.c.bf16 %v4425_v35, %v2419_v29 }
 0x30b   : > { %6336 = vmatprep.mubr.msk.bf16.mxu0 %vm7331_vm0, %v7911_v54 }
 0x311   : > { %5965 = vmatmul.mubr.msk.bf16.gmra.mrb[56].mxu1 %vm255_vm1, %v2434_v40  ;;  %v4427_v40 = vld [vmem:[#allocation2 + $0x198] sm:$0xff] }
 0x312   : > { %6337 = vmatmul.mubr.msk.bf16.gmra.mrb[52].mxu0 %vm255_vm1, %v4441_v44  ;;  %5968 = vmatprep.mubr.msk.bf16.mxu1 %vm7331_vm0, %v7911_v54 }
 0x313   : > { %6340 = vmatprep.mubr.msk.bf16.mxu0 %vm7331_vm0, %v7911_v54 }
 0x319   : > { %5969 = vmatmul.mubr.msk.bf16.gmra.mrb[60].mxu1 %vm255_vm1, %v2435_v19  ;;  %v4450_v19 = vpack.c.bf16 %v4427_v40, %v4426_v37 }
 0x31a   : > { %6341 = vmatmul.mubr.msk.bf16.gmra.mrb[56].mxu0 %vm255_vm1, %v4442_v33  ;;  %5972 = vmatprep.mubr.msk.bf16.mxu1 %vm7331_vm0, %v7911_v54 }
 0x31b   : > { %6344 = vmatprep.mubr.msk.bf16.mxu0 %vm7331_vm0, %v7911_v54 }
 0x31c   : > { %v8431_v47 = vpop.f32.mrb[0].mxu1 }
 0x31d   : > { %v5816_v45 = vpop.f32.mrb[1].mxu1 }
 0x31e   : > { %v8433_v48 = vpop.f32.mrb[2].mxu1 }
 0x31f   : > { %v5817_v52 = vpop.f32.mrb[3].mxu1 }
 0x321   : > { %5973 = vmatmul.mubr.msk.bf16.gmra.mrb[64].mxu1 %vm255_vm1, %v2436_v43 }
 0x322   : > { %6345 = vmatmul.mubr.msk.bf16.gmra.mrb[60].mxu0 %vm255_vm1, %v4443_v53  ;;  %5976 = vmatprep.mubr.msk.bf16.mxu1 %vm7331_vm0, %v7911_v54 }
 0x323   : > { %6348 = vmatprep.mubr.msk.bf16.mxu0 %vm7331_vm0, %v7911_v54 }
 0x324   : > { %v8441_v49 = vpop.f32.mrb[4].mxu1 }
 0x325   : > { %v5820_v57 = vpop.f32.mrb[5].mxu1  ;;  %v6392_v60 = vadd.f32 %v8450_v5, %v8441_v49 }
 0x326   : > { %v8443_v58 = vpop.f32.mrb[6].mxu1 }
 0x327   : > { %v5821_v63 = vpop.f32.mrb[7].mxu1 }
 0x329   : > { %5977 = vmatmul.mubr.msk.bf16.gmra.mrb[68].mxu1 %vm255_vm1, %v2437_v61 }
 0x32a   : > { %6349 = vmatmul.mubr.msk.bf16.gmra.mrb[64].mxu0 %vm255_vm1, %v4444_v62  ;;  %5980 = vmatprep.mubr.msk.bf16.mxu1 %vm7331_vm0, %v7911_v54  ;;  %v2413_v54 = vld [vmem:[#allocation2 + $0x150] sm:$0xff] }
 0x32b   : > { %6352 = vmatprep.mubr.msk.bf16.mxu0 %vm7331_vm0, %v8450_v5  ;;  %v2439_v59 = vpack.c.bf16 %v2413_v54, %v4417_v6  ;;  %v4446_v30 = vpack.c.bf16 %v4419_v22, %v2413_v54  ;;  %v6386_v54 = vadd.f32 %v8450_v5, %v8433_v48 }
 0x32c   : > { %v8454_v8 = vpop.f32.mrb[8].mxu1 }
 0x32d   : > { %v5824_v9 = vpop.f32.mrb[9].mxu1  ;;  %v6404_v11 = vadd.f32 %v8450_v5, %v8454_v8 }
 0x32e   : > { %v8456_v15 = vpop.f32.mrb[10].mxu1 }
 0x32f   : > { %v5825_v17 = vpop.f32.mrb[11].mxu1  ;;  %v6410_v49 = vadd.f32 %v8450_v5, %v8456_v15 }
 0x331   : > { %5981 = vmatmul.mubr.msk.bf16.gmra.mrb[72].mxu1 %vm255_vm1, %v2438_v14 }
 0x332   : > { %6353 = vmatmul.mubr.msk.bf16.gmra.mrb[68].mxu0 %vm255_vm1, %v4445_v16  ;;  %5984 = vmatprep.mubr.msk.bf16.mxu1 %vm7331_vm0, %v8450_v5  ;;  %v6380_v16 = vadd.f32 %v8450_v5, %v8431_v47  ;;  %v6398_v47 = vadd.f32 %v8450_v5, %v8443_v58 }
 0x333   : > { %6356 = vmatprep.mubr.msk.bf16.mxu0 %vm7331_vm0, %v8450_v5 }
 0x334   : > { %v8464_v23 = vpop.f32.mrb[12].mxu1 }
 0x335   : > { %v5828_v26 = vpop.f32.mrb[13].mxu1  ;;  %v6416_v29 = vadd.f32 %v8450_v5, %v8464_v23 }
 0x336   : > { %v8466_v27 = vpop.f32.mrb[14].mxu1 }
 0x337   : > { %v5829_v31 = vpop.f32.mrb[15].mxu1  ;;  %v6422_v8 = vadd.f32 %v8450_v5, %v8466_v27 }
 0x339   : > { %5985 = vmatmul.mubr.msk.bf16.gmra.mrb[76].mxu1 %vm255_vm1, %v2439_v59 }
 0x33a   : > { %6357 = vmatmul.mubr.msk.bf16.gmra.mrb[72].mxu0 %vm255_vm1, %v4446_v30  ;;  %5988 = vmatprep.mubr.msk.bf16.mxu1 %vm7331_vm0, %v8450_v5 }
 0x33b   : > { %6360 = vmatprep.mubr.msk.bf16.mxu0 %vm7331_vm0, %v8450_v5 }
 0x33c   : > { %v8474_v2 = vpop.f32.mrb[16].mxu1 }
 0x33d   : > { %v5832_v32 = vpop.f32.mrb[17].mxu1  ;;  %v6428_v37 = vadd.f32 %v8450_v5, %v8474_v2 }
 0x33e   : > { %v8476_v10 = vpop.f32.mrb[18].mxu1 }
 0x33f   : > { %v5833_v51 = vpop.f32.mrb[19].mxu1  ;;  %v6434_v23 = vadd.f32 %v8450_v5, %v8476_v10 }
 0x341   : > { %5989 = vmatmul.mubr.msk.bf16.gmra.mrb[80].mxu1 %vm255_vm1, %v2440_v4 }
 0x342   : > { %6361 = vmatmul.mubr.msk.bf16.gmra.mrb[76].mxu0 %vm255_vm1, %v4447_v50  ;;  %5992 = vmatprep.mubr.msk.bf16.mxu1 %vm7331_vm0, %v8450_v5 }
 0x343   : > { %6364 = vmatprep.mubr.msk.bf16.mxu0 %vm7331_vm0, %v8450_v5 }
 0x344   : > { %v8484_v7 = vpop.f32.mrb[20].mxu1 }
 0x345   : > { %v5836_v1 = vpop.f32.mrb[21].mxu1 }
 0x346   : > { %v8486_v28 = vpop.f32.mrb[22].mxu1 }
 0x347   : > { %v5837_v13 = vpop.f32.mrb[23].mxu1  ;;  %v6446_v2 = vadd.f32 %v8450_v5, %v8486_v28 }
 0x349   : > { %5993 = vmatmul.mubr.msk.bf16.gmra.mrb[84].mxu1 %vm255_vm1, %v2441_v21 }
 0x34a   : > { %6365 = vmatmul.mubr.msk.bf16.gmra.mrb[80].mxu0 %vm255_vm1, %v4448_v38  ;;  %5996 = vmatprep.mubr.msk.bf16.mxu1 %vm7331_vm0, %v8450_v5 }
 0x34b   : > { %6368 = vmatprep.mubr.msk.bf16.mxu0 %vm7331_vm0, %v8450_v5 }
 0x34c   : > { %v8494_v18 = vpop.f32.mrb[24].mxu1 }
 0x34d   : > { %v5840_v39 = vpop.f32.mrb[25].mxu1 }
 0x34e   : > { %v8496_v12 = vpop.f32.mrb[26].mxu1 }
 0x34f   : > { %v5841_v41 = vpop.f32.mrb[27].mxu1 }
 0x351   : > { %5997 = vmatmul.mubr.msk.bf16.gmra.mrb[88].mxu1 %vm255_vm1, %v2442_v36 }
 0x352   : > { %6369 = vmatmul.mubr.msk.bf16.gmra.mrb[84].mxu0 %vm255_vm1, %v4449_v24 }
 0x353   : > { %6372 = vmatprep.mubr.msk.bf16.mxu0 %vm7331_vm0, %v8450_v5 }
 0x354   : > { %v8502_v44 = vpop.f32.mrb[28].mxu1 }
 0x355   : > { %v5844_v25 = vpop.f32.mrb[29].mxu1 }
 0x356   : > { %v8504_v46 = vpop.f32.mrb[30].mxu1 }
 0x357   : > { %v5845_v33 = vpop.f32.mrb[31].mxu1 }
 0x35a   : > { %6373 = vmatmul.mubr.msk.bf16.gmra.mrb[88].mxu0 %vm255_vm1, %v4450_v19 }
 0x35c   : > { %v8507_v34 = vpop.f32.mrb[32].mxu1 }
 0x35d   : > { %v5848_v42 = vpop.f32.mrb[33].mxu1 }
 0x35e   : > { %v8509_v45 = vpop.f32.mrb[34].mxu1 }
 0x35f   : > { %v5849_v43 = vpop.f32.mrb[35].mxu1 }
 0x360   : > { %v6440_v43 = vadd.f32 %v8450_v5, %v8484_v7  ;;  %v6458_v7 = vadd.f32 %v8450_v5, %v8496_v12 }
 0x364   : > { %v8511_v53 = vpop.f32.mrb[36].mxu1 }
 0x365   : > { %v5852_v52 = vpop.f32.mrb[37].mxu1 }
 0x366   : > { %v8513_v55 = vpop.f32.mrb[38].mxu1 }
 0x367   : > { %v5853_v56 = vpop.f32.mrb[39].mxu1 }
 0x36c   : > { %v8515_v57 = vpop.f32.mrb[40].mxu1 }
 0x36d   : > { %v5856_v61 = vpop.f32.mrb[41].mxu1 }
 0x36e   : > { %v8517_v62 = vpop.f32.mrb[42].mxu1 }
 0x36f   : > { %v5857_v63 = vpop.f32.mrb[43].mxu1 }
 0x374   : > { %v8519_v3 = vpop.f32.mrb[44].mxu1 }
 0x375   : > { %v5860_v6 = vpop.f32.mrb[45].mxu1 }
 0x376   : > { %v8521_v9 = vpop.f32.mrb[46].mxu1 }
 0x377   : > { %v5861_v14 = vpop.f32.mrb[47].mxu1 }
 0x378   : > { %v6452_v14 = vadd.f32 %v8450_v5, %v8494_v18  ;;  %v6470_v18 = vadd.f32 %v8450_v5, %v8504_v46 }
 0x37d   : > { %v4609_v17 = vpop.f32.mrb[0].mxu0 }
 0x37e   : > { %v6383_v22 = vadd.f32 %v6380_v16, %v4609_v17  ;;  %v6286_v26 = vpop.f32.mrb[1].mxu0 }
 0x37f   : > { %v4612_v59 = vpop.f32.mrb[2].mxu0 }
 0x380   : > { %4838 = vst [vmem:[%s7377_s22 + $0x18] sm:$0xff] %v6383_v22  ;;  %v6389_v30 = vadd.f32 %v6386_v54, %v4612_v59  ;;  %v6287_v31 = vpop.f32.mrb[3].mxu0  ;;  %v6464_v59 = vadd.f32 %v8450_v5, %v8502_v44  ;;  %v6482_v44 = vadd.f32 %v8450_v5, %v8509_v45 }
 0x382   : > { %4839 = vst [vmem:[%s7377_s22 + $0x20] sm:$0xff] %v6389_v30 }
 0x385   : > { %v4617_v0 = vpop.f32.mrb[4].mxu0 }
 0x386   : > { %v6395_v32 = vadd.f32 %v6392_v60, %v4617_v0  ;;  %v6290_v4 = vpop.f32.mrb[5].mxu0 }
 0x387   : > { %v4620_v48 = vpop.f32.mrb[6].mxu0 }
 0x388   : > { %4840 = vst [vmem:[%s7377_s22 + $0x28] sm:$0xff] %v6395_v32  ;;  %v6401_v50 = vadd.f32 %v6398_v47, %v4620_v48  ;;  %v6291_v51 = vpop.f32.mrb[7].mxu0  ;;  %v6476_v32 = vadd.f32 %v8450_v5, %v8507_v34  ;;  %v6494_v34 = vadd.f32 %v8450_v5, %v8513_v55 }
 0x38a   : > { %4841 = vst [vmem:[%s7377_s22 + $0x30] sm:$0xff] %v6401_v50 }
 0x38d   : > { %v4625_v20 = vpop.f32.mrb[8].mxu0 }
 0x38e   : > { %v6407_v1 = vadd.f32 %v6404_v11, %v4625_v20  ;;  %v6294_v21 = vpop.f32.mrb[9].mxu0  ;;  %v6488_v20 = vadd.f32 %v8450_v5, %v8511_v53  ;;  %v6506_v53 = vadd.f32 %v8450_v5, %v8517_v62 }
 0x38f   : > { %v4628_v58 = vpop.f32.mrb[10].mxu0 }
 0x390   : > { %4842 = vst [vmem:[%s7377_s22 + $0x38] sm:$0xff] %v6407_v1  ;;  %v6413_v38 = vadd.f32 %v6410_v49, %v4628_v58  ;;  %v6295_v13 = vpop.f32.mrb[11].mxu0 }
 0x391   : > { %v6500_v13 = vadd.f32 %v8450_v5, %v8515_v57  ;;  %v6518_v57 = vadd.f32 %v8450_v5, %v8521_v9 }
 0x392   : > { %4843 = vst [vmem:[%s7377_s22 + $0x40] sm:$0xff] %v6413_v38 }
 0x395   : > { %v4633_v35 = vpop.f32.mrb[12].mxu0 }
 0x396   : > { %v6419_v39 = vadd.f32 %v6416_v29, %v4633_v35  ;;  %v6298_v36 = vpop.f32.mrb[13].mxu0 }
 0x397   : > { %v4636_v15 = vpop.f32.mrb[14].mxu0 }
 0x398   : > { %4844 = vst [vmem:[%s7377_s22 + $0x48] sm:$0xff] %v6419_v39  ;;  %v6425_v24 = vadd.f32 %v6422_v8, %v4636_v15  ;;  %v6299_v41 = vpop.f32.mrb[15].mxu0  ;;  %v6512_v15 = vadd.f32 %v8450_v5, %v8519_v3 }
 0x39a   : > { %4845 = vst [vmem:[%s7377_s22 + $0x50] sm:$0xff] %v6425_v24 }
 0x39d   : > { %v4641_v40 = vpop.f32.mrb[16].mxu0 }
 0x39e   : > { %v6431_v25 = vadd.f32 %v6428_v37, %v4641_v40  ;;  %v6302_v19 = vpop.f32.mrb[17].mxu0 }
 0x39f   : > { %v4644_v27 = vpop.f32.mrb[18].mxu0 }
 0x3a0   : > { %4846 = vst [vmem:[%s7377_s22 + $0x58] sm:$0xff] %v6431_v25  ;;  %v6437_v33 = vadd.f32 %v6434_v23, %v4644_v27  ;;  %v6303_v42 = vpop.f32.mrb[19].mxu0 }
 0x3a2   : > { %4847 = vst [vmem:[%s7377_s22 + $0x60] sm:$0xff] %v6437_v33 }
 0x3a5   : > { %v4649_v52 = vpop.f32.mrb[20].mxu0 }
 0x3a6   : > { %v6443_v56 = vadd.f32 %v6440_v43, %v4649_v52  ;;  %v6306_v61 = vpop.f32.mrb[21].mxu0 }
 0x3a7   : > { %v4652_v10 = vpop.f32.mrb[22].mxu0 }
 0x3a8   : > { %4848 = vst [vmem:[%s7377_s22 + $0x68] sm:$0xff] %v6443_v56  ;;  %v6449_v63 = vadd.f32 %v6446_v2, %v4652_v10  ;;  %v6307_v6 = vpop.f32.mrb[23].mxu0 }
 0x3aa   : > { %4849 = vst [vmem:[%s7377_s22 + $0x70] sm:$0xff] %v6449_v63 }
 0x3ad   : > { %v4657_v16 = vpop.f32.mrb[24].mxu0 }
 0x3ae   : > { %v6455_v17 = vadd.f32 %v6452_v14, %v4657_v16  ;;  %v6310_v54 = vpop.f32.mrb[25].mxu0 }
 0x3af   : > { %v4660_v28 = vpop.f32.mrb[26].mxu0 }
 0x3b0   : > { %4850 = vst [vmem:[%s7377_s22 + $0x78] sm:$0xff] %v6455_v17  ;;  %v6461_v22 = vadd.f32 %v6458_v7, %v4660_v28  ;;  %v6311_v26 = vpop.f32.mrb[27].mxu0 }
 0x3b2   : > { %4851 = vst [vmem:[%s7377_s22 + $0x80] sm:$0xff] %v6461_v22 }
 0x3b5   : > { %v4665_v30 = vpop.f32.mrb[28].mxu0 }
 0x3b6   : > { %v6467_v31 = vadd.f32 %v6464_v59, %v4665_v30  ;;  %v6314_v60 = vpop.f32.mrb[29].mxu0 }
 0x3b7   : > { %v4668_v12 = vpop.f32.mrb[30].mxu0 }
 0x3b8   : > { %4852 = vst [vmem:[%s7377_s22 + $0x88] sm:$0xff] %v6467_v31  ;;  %v6473_v0 = vadd.f32 %v6470_v18, %v4668_v12  ;;  %v6315_v47 = vpop.f32.mrb[31].mxu0 }
 0x3ba   : > { %4853 = vst [vmem:[%s7377_s22 + $0x90] sm:$0xff] %v6473_v0 }
 0x3bd   : > { %v4673_v4 = vpop.f32.mrb[32].mxu0 }
 0x3be   : > { %v6479_v48 = vadd.f32 %v6476_v32, %v4673_v4  ;;  %v6318_v50 = vpop.f32.mrb[33].mxu0 }
 0x3bf   : > { %v4676_v46 = vpop.f32.mrb[34].mxu0 }
 0x3c0   : > { %4854 = vst [vmem:[%s7377_s22 + $0x98] sm:$0xff] %v6479_v48  ;;  %v6485_v51 = vadd.f32 %v6482_v44, %v4676_v46  ;;  %v6319_v11 = vpop.f32.mrb[35].mxu0 }
 0x3c2   : > { %4855 = vst [vmem:[%s7377_s22 + $0xa0] sm:$0xff] %v6485_v51 }
 0x3c5   : > { %v4681_v49 = vpop.f32.mrb[36].mxu0 }
 0x3c6   : > { %v6491_v1 = vadd.f32 %v6488_v20, %v4681_v49  ;;  %v6322_v21 = vpop.f32.mrb[37].mxu0 }
 0x3c7   : > { %v4684_v45 = vpop.f32.mrb[38].mxu0 }
 0x3c8   : > { %4856 = vst [vmem:[%s7377_s22 + $0xa8] sm:$0xff] %v6491_v1  ;;  %v6497_v58 = vadd.f32 %v6494_v34, %v4684_v45  ;;  %v6323_v38 = vpop.f32.mrb[39].mxu0 }
 0x3ca   : > { %4857 = vst [vmem:[%s7377_s22 + $0xb0] sm:$0xff] %v6497_v58 }
 0x3cd   : > { %v4689_v29 = vpop.f32.mrb[40].mxu0 }
 0x3ce   : > { %v6503_v35 = vadd.f32 %v6500_v13, %v4689_v29  ;;  %v6326_v8 = vpop.f32.mrb[41].mxu0 }
 0x3cf   : > { %v4692_v39 = vpop.f32.mrb[42].mxu0 }
 0x3d0   : > { %4858 = vst [vmem:[%s7377_s22 + $0xb8] sm:$0xff] %v6503_v35  ;;  %v6509_v55 = vadd.f32 %v6506_v53, %v4692_v39  ;;  %v6327_v36 = vpop.f32.mrb[43].mxu0 }
 0x3d2   : > { %4859 = vst [vmem:[%s7377_s22 + $0xc0] sm:$0xff] %v6509_v55 }
 0x3d4   : > { %v2697_v24 = vpop.f32.mrb[48].mxu1 }
 0x3d5   : > { %v4697_v41 = vpop.f32.mrb[44].mxu0  ;;  %v5958_v37 = vpop.f32.mrb[49].mxu1  ;;  %v6524_v42 = vadd.f32 %v8450_v5, %v2697_v24 }
 0x3d6   : > { %v6515_v40 = vadd.f32 %v6512_v15, %v4697_v41  ;;  %v6330_v62 = vpop.f32.mrb[45].mxu0  ;;  %v2700_v23 = vpop.f32.mrb[50].mxu1 }
 0x3d7   : > { %v4700_v25 = vpop.f32.mrb[46].mxu0  ;;  %v5959_v19 = vpop.f32.mrb[51].mxu1  ;;  %v6530_v2 = vadd.f32 %v8450_v5, %v2700_v23 }
 0x3d8   : > { %4860 = vst [vmem:[%s7377_s22 + $0xc8] sm:$0xff] %v6515_v40  ;;  %v6521_v27 = vadd.f32 %v6518_v57, %v4700_v25  ;;  %v6331_v33 = vpop.f32.mrb[47].mxu0 }
 0x3da   : > { %4861 = vst [vmem:[%s7377_s22 + $0xd0] sm:$0xff] %v6521_v27 }
 0x3dc   : > { %v2705_v3 = vpop.f32.mrb[52].mxu1 }
 0x3dd   : > { %v4705_v43 = vpop.f32.mrb[48].mxu0  ;;  %v5962_v52 = vpop.f32.mrb[53].mxu1  ;;  %v6536_v16 = vadd.f32 %v8450_v5, %v2705_v3 }
 0x3de   : > { %v6527_v56 = vadd.f32 %v6524_v42, %v4705_v43  ;;  %v6334_v9 = vpop.f32.mrb[49].mxu0  ;;  %v2708_v61 = vpop.f32.mrb[54].mxu1 }
 0x3df   : > { %v4708_v10 = vpop.f32.mrb[50].mxu0  ;;  %v5963_v63 = vpop.f32.mrb[55].mxu1  ;;  %v6542_v28 = vadd.f32 %v8450_v5, %v2708_v61 }
 0x3e0   : > { %4862 = vst [vmem:[%s7377_s22 + $0xd8] sm:$0xff] %v6527_v56  ;;  %v6533_v6 = vadd.f32 %v6530_v2, %v4708_v10  ;;  %v6335_v14 = vpop.f32.mrb[51].mxu0 }
 0x3e2   : > { %4863 = vst [vmem:[%s7377_s22 + $0xe0] sm:$0xff] %v6533_v6 }
 0x3e4   : > { %v2713_v7 = vpop.f32.mrb[56].mxu1 }
 0x3e5   : > { %v4713_v17 = vpop.f32.mrb[52].mxu0  ;;  %v5966_v54 = vpop.f32.mrb[57].mxu1  ;;  %v6548_v12 = vadd.f32 %v8450_v5, %v2713_v7 }
 0x3e6   : > { %v6539_v22 = vadd.f32 %v6536_v16, %v4713_v17  ;;  %v6338_v26 = vpop.f32.mrb[53].mxu0  ;;  %v2716_v59 = vpop.f32.mrb[58].mxu1 }
 0x3e7   : > { %v4716_v30 = vpop.f32.mrb[54].mxu0  ;;  %v5967_v18 = vpop.f32.mrb[59].mxu1  ;;  %v6554_v4 = vadd.f32 %v8450_v5, %v2716_v59 }
 0x3e8   : > { %4864 = vst [vmem:[%s7377_s22 + $0xe8] sm:$0xff] %v6539_v22  ;;  %v6545_v31 = vadd.f32 %v6542_v28, %v4716_v30  ;;  %v6339_v60 = vpop.f32.mrb[55].mxu0 }
 0x3ea   : > { %4865 = vst [vmem:[%s7377_s22 + $0xf0] sm:$0xff] %v6545_v31 }
 0x3ec   : > { %v2721_v0 = vpop.f32.mrb[60].mxu1 }
 0x3ed   : > { %v4721_v47 = vpop.f32.mrb[56].mxu0  ;;  %v5970_v32 = vpop.f32.mrb[61].mxu1  ;;  %v6560_v49 = vadd.f32 %v8450_v5, %v2721_v0 }
 0x3ee   : > { %v6551_v44 = vadd.f32 %v6548_v12, %v4721_v47  ;;  %v6342_v48 = vpop.f32.mrb[57].mxu0  ;;  %v2724_v50 = vpop.f32.mrb[62].mxu1 }
 0x3ef   : > { %v4724_v46 = vpop.f32.mrb[58].mxu0  ;;  %v5971_v51 = vpop.f32.mrb[63].mxu1  ;;  %v6566_v45 = vadd.f32 %v8450_v5, %v2724_v50 }
 0x3f0   : > { %4866 = vst [vmem:[%s7377_s22 + $0xf8] sm:$0xff] %v6551_v44  ;;  %v6557_v11 = vadd.f32 %v6554_v4, %v4724_v46  ;;  %v6343_v20 = vpop.f32.mrb[59].mxu0 }
 0x3f2   : > { %4867 = vst [vmem:[%s7377_s22 + $0x100] sm:$0xff] %v6557_v11 }
 0x3f4   : > { %v2729_v34 = vpop.f32.mrb[64].mxu1 }
 0x3f5   : > { %v4729_v1 = vpop.f32.mrb[60].mxu0  ;;  %v5974_v21 = vpop.f32.mrb[65].mxu1  ;;  %v6572_v39 = vadd.f32 %v8450_v5, %v2729_v34 }
 0x3f6   : > { %v6563_v58 = vadd.f32 %v6560_v49, %v4729_v1  ;;  %v6346_v38 = vpop.f32.mrb[61].mxu0  ;;  %v2732_v13 = vpop.f32.mrb[66].mxu1 }
 0x3f7   : > { %v4732_v29 = vpop.f32.mrb[62].mxu0  ;;  %v5975_v53 = vpop.f32.mrb[67].mxu1  ;;  %v6578_v24 = vadd.f32 %v8450_v5, %v2732_v13 }
 0x3f8   : > { %4868 = vst [vmem:[%s7377_s22 + $0x108] sm:$0xff] %v6563_v58  ;;  %v6569_v35 = vadd.f32 %v6566_v45, %v4732_v29  ;;  %v6347_v8 = vpop.f32.mrb[63].mxu0 }
 0x3fa   : > { %4869 = vst [vmem:[%s7377_s22 + $0x110] sm:$0xff] %v6569_v35 }
 0x3fc   : > { %v2737_v55 = vpop.f32.mrb[68].mxu1 }
 0x3fd   : > { %v4737_v36 = vpop.f32.mrb[64].mxu0  ;;  %v5978_v15 = vpop.f32.mrb[69].mxu1  ;;  %v6584_v19 = vadd.f32 %v8450_v5, %v2737_v55 }
 0x3fe   : > { %v6575_v41 = vadd.f32 %v6572_v39, %v4737_v36  ;;  %v6350_v37 = vpop.f32.mrb[65].mxu0  ;;  %v2740_v57 = vpop.f32.mrb[70].mxu1 }
 0x3ff   : > { %v4740_v40 = vpop.f32.mrb[66].mxu0  ;;  %v5979_v62 = vpop.f32.mrb[71].mxu1  ;;  %v6590_v3 = vadd.f32 %v8450_v5, %v2740_v57 }
 0x400   : > { %4870 = vst [vmem:[%s7377_s22 + $0x118] sm:$0xff] %v6575_v41  ;;  %v6581_v23 = vadd.f32 %v6578_v24, %v4740_v40  ;;  %v6351_v25 = vpop.f32.mrb[67].mxu0 }
 0x402   : > { %4871 = vst [vmem:[%s7377_s22 + $0x120] sm:$0xff] %v6581_v23 }
 0x404   : > { %v2745_v27 = vpop.f32.mrb[72].mxu1 }
 0x405   : > { %v4745_v33 = vpop.f32.mrb[68].mxu0  ;;  %v5982_v42 = vpop.f32.mrb[73].mxu1  ;;  %v6596_v63 = vadd.f32 %v8450_v5, %v2745_v27 }
 0x406   : > { %v6587_v43 = vadd.f32 %v6584_v19, %v4745_v33  ;;  %v6354_v52 = vpop.f32.mrb[69].mxu0  ;;  %v2748_v2 = vpop.f32.mrb[74].mxu1 }
 0x407   : > { %v4748_v56 = vpop.f32.mrb[70].mxu0  ;;  %v5983_v9 = vpop.f32.mrb[75].mxu1  ;;  %v6602_v7 = vadd.f32 %v8450_v5, %v2748_v2 }
 0x408   : > { %4872 = vst [vmem:[%s7377_s22 + $0x128] sm:$0xff] %v6587_v43  ;;  %v6593_v61 = vadd.f32 %v6590_v3, %v4748_v56  ;;  %v6355_v10 = vpop.f32.mrb[71].mxu0 }
 0x40a   : > { %4873 = vst [vmem:[%s7377_s22 + $0x130] sm:$0xff] %v6593_v61 }
 0x40c   : > { %v2753_v6 = vpop.f32.mrb[76].mxu1 }
 0x40d   : > { %v4753_v14 = vpop.f32.mrb[72].mxu0  ;;  %v5986_v16 = vpop.f32.mrb[77].mxu1  ;;  %v6608_v18 = vadd.f32 %v8450_v5, %v2753_v6 }
 0x40e   : > { %v6599_v17 = vadd.f32 %v6596_v63, %v4753_v14  ;;  %v6358_v54 = vpop.f32.mrb[73].mxu0  ;;  %v2756_v28 = vpop.f32.mrb[78].mxu1 }
 0x40f   : > { %v4756_v22 = vpop.f32.mrb[74].mxu0  ;;  %v5987_v26 = vpop.f32.mrb[79].mxu1  ;;  %v6614_v0 = vadd.f32 %v8450_v5, %v2756_v28 }
 0x410   : > { %4874 = vst [vmem:[%s7377_s22 + $0x138] sm:$0xff] %v6599_v17  ;;  %v6605_v59 = vadd.f32 %v6602_v7, %v4756_v22  ;;  %v6359_v30 = vpop.f32.mrb[75].mxu0 }
 0x412   : > { %4875 = vst [vmem:[%s7377_s22 + $0x140] sm:$0xff] %v6605_v59 }
 0x414   : > { %v2761_v31 = vpop.f32.mrb[80].mxu1 }
 0x415   : > { %v4761_v60 = vpop.f32.mrb[76].mxu0  ;;  %v5990_v12 = vpop.f32.mrb[81].mxu1  ;;  %v6620_v51 = vadd.f32 %v8450_v5, %v2761_v31 }
 0x416   : > { %v6611_v47 = vadd.f32 %v6608_v18, %v4761_v60  ;;  %v6362_v32 = vpop.f32.mrb[77].mxu0  ;;  %v2764_v4 = vpop.f32.mrb[82].mxu1 }
 0x417   : > { %v4764_v44 = vpop.f32.mrb[78].mxu0  ;;  %v5991_v48 = vpop.f32.mrb[83].mxu1  ;;  %v6626_v34 = vadd.f32 %v8450_v5, %v2764_v4 }
 0x418   : > { %4876 = vst [vmem:[%s7377_s22 + $0x148] sm:$0xff] %v6611_v47  ;;  %v6617_v50 = vadd.f32 %v6614_v0, %v4764_v44  ;;  %v6363_v46 = vpop.f32.mrb[79].mxu0 }
 0x41a   : > { %4877 = vst [vmem:[%s7377_s22 + $0x150] sm:$0xff] %v6617_v50 }
 0x41c   : > { %v2769_v11 = vpop.f32.mrb[84].mxu1 }
 0x41d   : > { %v4769_v20 = vpop.f32.mrb[80].mxu0  ;;  %v5994_v49 = vpop.f32.mrb[85].mxu1  ;;  %v6632_v53 = vadd.f32 %v8450_v5, %v2769_v11 }
 0x41e   : > { %v6623_v1 = vadd.f32 %v6620_v51, %v4769_v20  ;;  %v6366_v21 = vpop.f32.mrb[81].mxu0  ;;  %v2772_v45 = vpop.f32.mrb[86].mxu1 }
 0x41f   : > { %v4772_v58 = vpop.f32.mrb[82].mxu0  ;;  %v5995_v38 = vpop.f32.mrb[87].mxu1  ;;  %v6638_v55 = vadd.f32 %v8450_v5, %v2772_v45 }
 0x420   : > { %4878 = vst [vmem:[%s7377_s22 + $0x158] sm:$0xff] %v6623_v1  ;;  %v6629_v13 = vadd.f32 %v6626_v34, %v4772_v58  ;;  %v6367_v29 = vpop.f32.mrb[83].mxu0 }
 0x422   : > { %4879 = vst [vmem:[%s7377_s22 + $0x160] sm:$0xff] %v6629_v13 }
 0x424   : > { %v2777_v35 = vpop.f32.mrb[88].mxu1 }
 0x425   : > { %v4777_v8 = vpop.f32.mrb[84].mxu0  ;;  %v5998_v39 = vpop.f32.mrb[89].mxu1  ;;  %v6644_v62 = vadd.f32 %v8450_v5, %v2777_v35 }
 0x426   : > { %v6635_v36 = vadd.f32 %v6632_v53, %v4777_v8  ;;  %v6370_v15 = vpop.f32.mrb[85].mxu0  ;;  %v2780_v24 = vpop.f32.mrb[90].mxu1 }
 0x427   : > { %v4780_v41 = vpop.f32.mrb[86].mxu0  ;;  %v5999_v37 = vpop.f32.mrb[91].mxu1  ;;  %v6650_v25 = vadd.f32 %v8450_v5, %v2780_v24 }
 0x428   : > { %4880 = vst [vmem:[%s7377_s22 + $0x168] sm:$0xff] %v6635_v36  ;;  %v6641_v57 = vadd.f32 %v6638_v55, %v4780_v41  ;;  %v6371_v40 = vpop.f32.mrb[87].mxu0 }
 0x42a   : > { %4881 = vst [vmem:[%s7377_s22 + $0x170] sm:$0xff] %v6641_v57 }
 0x42d   : > { %v4785_v23 = vpop.f32.mrb[88].mxu0 }
 0x42e   : > { %v6647_v19 = vadd.f32 %v6644_v62, %v4785_v23  ;;  %v6374_v27 = vpop.f32.mrb[89].mxu0 }
 0x42f   : > { %v4788_v33 = vpop.f32.mrb[90].mxu0 }
 0x430   : > { %4882 = vst [vmem:[%s7377_s22 + $0x178] sm:$0xff] %v6647_v19  ;;  %v6653_v42 = vadd.f32 %v6650_v25, %v4788_v33  ;;  %v6375_v3 = vpop.f32.mrb[91].mxu0 }
 0x432   : > { %4883 = vst [vmem:[%s7377_s22 + $0x180] sm:$0xff] %v6653_v42 }
 0x433 PF: > { %s12_s9 = sadd.s32 1, %s7328_s9  }
 0x434   : > { %p9_p4 = scmp.ge.s32.totalorder %s12_s9, 4  }
 0x436   :  { %11 = sbr.rel (!%p9_p4) target bundleno = 1 (0x1), region = 66 }

// kernel: fwd.10
= control target key start
LH: loop header
LB: loop body
LE: loop exit
PB: predicated region body
PF: predicated region fallthrough
CT: control target
= control target key end

     0   :  { %s7505_s9 = smov 0   ;;  %s8866_s0 = inlined_call_operand.vmem [shape: bf16[2,437,128], index: 0, kind: input, shape index: {}]   ;;  %s8867_s1 = inlined_call_operand.vmem [shape: bf16[9,128,128], index: 1, kind: input, shape index: {}]   ;;  %s8868_s2 = inlined_call_operand.vmem [shape: f32[2,437,128], index: 2, kind: output, shape index: {}]  }
   0x1 LB: > { %s4820_s10 = sadd.s32 4294967295, %s7486_s9   ;;  %p4824_p0 = scmp.ge.s32.totalorder %s7486_s9, 1  ;;  %s7486_s9 = sphi %s7505_s9, %s12_s9  }
   0x2   : > { %p112_p1 = scmp.lt.s32.totalorder %s7486_s9, 3 }
   0x4   : > { %p113_p2 = pnand %p4824_p0, %p112_p1 }
   0x5   : > { %v7362_v0 = vld [vmem:[%s8867_s1] sm:$0xff] (!%p113_p2)   ;;  %v7488_v1 = vmov (!%p113_p2), 0.0   ;;  %v7364_v3 = vld [vmem:[%s8867_s1 + $0x8] sm:$0xff] (!%p113_p2)   ;;  %vm7489_vm0 = vmmov (!%p113_p2), 0   ;;  %p134_p3 = scmp.lt.s32.totalorder (!%p113_p2), %s4820_s10, 1  ;;  %v7366_v5 = vld [vmem:[%s8867_s1 + $0x10] sm:$0xff] (!%p113_p2)  }
   0x6   : > { %116 = sbr.rel (%p113_p2) target bundleno = 1080 (0x438), region = 28  ;;  %5442 = vmatprep.subr.bf16.mxu1 (!%p113_p2), %v7488_v1  ;;  %5874 = vmatprep.subr.bf16.mxu0 (!%p113_p2), %v7488_v1  ;;  %v7363_v2 = vld [vmem:[%s8867_s1 + $0x100] sm:$0xff] (!%p113_p2)   ;;  %v7365_v4 = vld [vmem:[%s8867_s1 + $0x108] sm:$0xff] (!%p113_p2)   ;;  %v7367_v6 = vld [vmem:[%s8867_s1 + $0x110] sm:$0xff] (!%p113_p2)  }
   0x7   : > { %5443 = vmatpush3.bf16.msra.mxu1 (!%p113_p2), %v7362_v0  ;;  %5458 = vmatprep.mubr.msk.bf16.mxu1 (!%p113_p2), %vm7489_vm0, %v7488_v1  ;;  %v7368_v7 = vld [vmem:[%s8867_s1 + $0x18] sm:$0xff] (!%p113_p2)   ;;  %v7370_v9 = vld [vmem:[%s8867_s1 + $0x20] sm:$0xff] (!%p113_p2)   ;;  %v7372_v16 = vld [vmem:[%s8867_s1 + $0x28] sm:$0xff] (!%p113_p2)  }
   0x8   : > { %5875 = vmatpush3.bf16.msra.mxu0 (!%p113_p2), %v7363_v2  ;;  %5444 = vmatprep.subr.bf16.mxu1 (!%p113_p2), %v7488_v1  ;;  %v7369_v8 = vld [vmem:[%s8867_s1 + $0x118] sm:$0xff] (!%p113_p2)   ;;  %v7371_v10 = vld [vmem:[%s8867_s1 + $0x120] sm:$0xff] (!%p113_p2)   ;;  %v7373_v20 = vld [vmem:[%s8867_s1 + $0x128] sm:$0xff] (!%p113_p2)  }
   0x9   : > { %5876 = vmatprep.subr.bf16.mxu0 (!%p113_p2), %v7488_v1  ;;  %5890 = vmatprep.mubr.msk.bf16.mxu0 (!%p113_p2), %vm7489_vm0, %v7488_v1  ;;  %v7374_v25 = vld [vmem:[%s8867_s1 + $0x30] sm:$0xff] (!%p113_p2)   ;;  %v7376_v33 = vld [vmem:[%s8867_s1 + $0x38] sm:$0xff] (!%p113_p2)   ;;  %v7380_v43 = vld [vmem:[%s8867_s1 + $0x40] sm:$0xff] (!%p113_p2)  }
   0xa   : > { %v7375_v27 = vld [vmem:[%s8867_s1 + $0x130] sm:$0xff] (!%p113_p2)   ;;  %v7377_v35 = vld [vmem:[%s8867_s1 + $0x138] sm:$0xff] (!%p113_p2)   ;;  %v7381_v45 = vld [vmem:[%s8867_s1 + $0x140] sm:$0xff] (!%p113_p2)  }
   0xb   : > { %5445 = vmatpush3.bf16.msra.mxu1 (!%p113_p2), %v7364_v3  ;;  %v7388_v51 = vld [vmem:[%s8867_s1 + $0x48] sm:$0xff] (!%p113_p2)   ;;  %v7390_v62 = vld [vmem:[%s8867_s1 + $0x150] sm:$0xff] (!%p113_p2)  }
   0xc   : > { %5877 = vmatpush3.bf16.msra.mxu0 (!%p113_p2), %v7365_v4  ;;  %5446 = vmatprep.subr.bf16.mxu1 (!%p113_p2), %v7488_v1  ;;  %v7384_v53 = vld [vmem:[%s8867_s1 + $0x148] sm:$0xff] (!%p113_p2)   ;;  %v7396_v2 = vld [vmem:[%s8867_s1 + $0x50] sm:$0xff] (!%p113_p2)  }
   0xd   : > { %s8870_s10 = smov (!%p134_p3, %s4820_s10), 1  ;;  %5878 = vmatprep.subr.bf16.mxu0 %v7488_v1 }
   0xe   : > { %s7351_s23 = smul.u32 440, %s8870_s10 }
   0xf   : > { %5447 = vmatpush3.bf16.msra.mxu1 %v7366_v5  ;;  %s7350_s3 = smul.u32 220, %s8870_s10 }
  0x10   : > { %s7547_s26 = scalar_lea.vmem %s8868_s2, %s7351_s23  ;;  %5879 = vmatpush3.bf16.msra.mxu0 %v7367_v6  ;;  %5448 = vmatprep.subr.bf16.mxu1 %v7488_v1  ;;  %v7393_v6 = vld [vmem:[%s8867_s1 + $0x158] sm:$0xff]  }
  0x11   : > { %310 = vst [vmem:[%s7547_s26] sm:$0xff] %v7488_v1  ;;  %311 = vst [vmem:[%s7547_s26 + $0x8] sm:$0xff] %v7488_v1  ;;  %5880 = vmatprep.subr.bf16.mxu0 %v7488_v1  ;;  %s7586_s12 = scalar_lea.vmem %s8866_s0, %s7350_s3 }
  0x12   : > { %312 = vst [vmem:[%s7547_s26 + $0x10] sm:$0xff] %v7488_v1  ;;  %359 = vst [vmem:[%s7547_s26 + $0x188] sm:$0xff] %v7488_v1  ;;  %v5030_v11 = vld [vmem:[%s7586_s12] sm:$0xff]   ;;  %v5137_v14 = vld [vmem:[%s7586_s12 + $0x8] sm:$0xff]  }
  0x13   : > { %360 = vst [vmem:[%s7547_s26 + $0x190] sm:$0xff] %v7488_v1  ;;  %361 = vst [vmem:[%s7547_s26 + $0x198] sm:$0xff] %v7488_v1  ;;  %5449 = vmatpush3.bf16.msra.mxu1 %v7368_v7  ;;  %v5031_v12 = vunpack.c.l.bf16 %v5030_v11  ;;  %v5032_v13 = vunpack.c.h.bf16 %v5030_v11  ;;  %v5138_v15 = vld [vmem:[%s7586_s12 + $0x10] sm:$0xff]   ;;  %v5036_v17 = vunpack.c.h.bf16 %v5137_v14  ;;  %v5035_v19 = vunpack.c.l.bf16 %v5137_v14  ;;  %v5139_v22 = vld [vmem:[%s7586_s12 + $0x18] sm:$0xff]  }
  0x14   : > { %362 = vst [vmem:[%s7547_s26 + $0x1a0] sm:$0xff] %v7488_v1  ;;  %363 = vst [vmem:[%s7547_s26 + $0x1a8] sm:$0xff] %v7488_v1  ;;  %5881 = vmatpush3.bf16.msra.mxu0 %v7369_v8  ;;  %5450 = vmatprep.subr.bf16.mxu1 %v7488_v1  ;;  %v5039_v18 = vunpack.c.l.bf16 %v5138_v15  ;;  %v5040_v21 = vunpack.c.h.bf16 %v5138_v15  ;;  %v5043_v23 = vunpack.c.l.bf16 %v5139_v22  ;;  %v5044_v24 = vunpack.c.h.bf16 %v5139_v22  ;;  %v5140_v26 = vld [vmem:[%s7586_s12 + $0x20] sm:$0xff]   ;;  %v5141_v30 = vld [vmem:[%s7586_s12 + $0x28] sm:$0xff]  }
  0x15   : > { %364 = vst [vmem:[%s7547_s26 + $0x1b0] sm:$0x1f] %v7488_v1  ;;  %5882 = vmatprep.subr.bf16.mxu0 %v7488_v1  ;;  %255 = vst [vmem:[#allocation2] sm:$0xff] %v5031_v12  ;;  %v5047_v28 = vunpack.c.l.bf16 %v5140_v26  ;;  %v5048_v29 = vunpack.c.h.bf16 %v5140_v26  ;;  %v5051_v31 = vunpack.c.l.bf16 %v5141_v30  ;;  %v5052_v32 = vunpack.c.h.bf16 %v5141_v30  ;;  %v5142_v34 = vld [vmem:[%s7586_s12 + $0x30] sm:$0xff]   ;;  %v5143_v38 = vld [vmem:[%s7586_s12 + $0x38] sm:$0xff]  }
  0x16   : > { %256 = vst [vmem:[#allocation2 + $0x8] sm:$0xff] %v5032_v13  ;;  %258 = vst [vmem:[#allocation2 + $0x18] sm:$0xff] %v5036_v17  ;;  %v5055_v36 = vunpack.c.l.bf16 %v5142_v34  ;;  %v5056_v37 = vunpack.c.h.bf16 %v5142_v34  ;;  %v7378_v39 = vld [vmem:[%s7586_s12] sm:$0xff]  ;;  %v5059_v40 = vunpack.c.l.bf16 %v5143_v38  ;;  %v5060_v41 = vunpack.c.h.bf16 %v5143_v38  ;;  %v7379_v42 = vld [vmem:[%s7586_s12 + $0xc] ss:$4 sps:$4 sm:$0xff]  }
  0x17   : > { %5451 = vmatpush3.bf16.msra.mxu1 %v7370_v9  ;;  %259 = vst [vmem:[#allocation2 + $0x20] sm:$0xff] %v5039_v18  ;;  %257 = vst [vmem:[#allocation2 + $0x10] sm:$0xff] %v5035_v19  ;;  %v5144_v44 = vld [vmem:[%s7586_s12 + $0x40] sm:$0xff]   ;;  %v5145_v48 = vld [vmem:[%s7586_s12 + $0x48] sm:$0xff]  }
  0x18   : > { %5883 = vmatpush3.bf16.msra.mxu0 %v7371_v10  ;;  %5452 = vmatprep.subr.bf16.mxu1 %v7488_v1  ;;  %260 = vst [vmem:[#allocation2 + $0x28] sm:$0xff] %v5040_v21  ;;  %261 = vst [vmem:[#allocation2 + $0x30] sm:$0xff] %v5043_v23  ;;  %v5063_v46 = vunpack.c.l.bf16 %v5144_v44  ;;  %v5064_v47 = vunpack.c.h.bf16 %v5144_v44  ;;  %v5067_v49 = vunpack.c.l.bf16 %v5145_v48  ;;  %v5068_v50 = vunpack.c.h.bf16 %v5145_v48  ;;  %v5146_v52 = vld [vmem:[%s7586_s12 + $0x50] sm:$0xff]   ;;  %v5147_v56 = vld [vmem:[%s7586_s12 + $0x58] sm:$0xff]  }
  0x19   : > { %5884 = vmatprep.subr.bf16.mxu0 %v7488_v1  ;;  %262 = vst [vmem:[#allocation2 + $0x38] sm:$0xff] %v5044_v24  ;;  %263 = vst [vmem:[#allocation2 + $0x40] sm:$0xff] %v5047_v28  ;;  %v5071_v54 = vunpack.c.l.bf16 %v5146_v52  ;;  %v5072_v55 = vunpack.c.h.bf16 %v5146_v52  ;;  %v7382_v57 = vld [vmem:[%s7586_s12 + $0x8] sm:$0xff]  ;;  %v5075_v58 = vunpack.c.l.bf16 %v5147_v56  ;;  %v5076_v59 = vunpack.c.h.bf16 %v5147_v56  ;;  %v7383_v60 = vld [vmem:[%s7586_s12 + $0x14] ss:$4 sps:$4 sm:$0xff]  }
  0x1a   : > { %264 = vst [vmem:[#allocation2 + $0x48] sm:$0xff] %v5048_v29  ;;  %265 = vst [vmem:[#allocation2 + $0x50] sm:$0xff] %v5051_v31  ;;  %v5148_v61 = vld [vmem:[%s7586_s12 + $0x60] sm:$0xff]   ;;  %v5149_v3 = vld [vmem:[%s7586_s12 + $0x68] sm:$0xff]  }
  0x1b   : > { %5453 = vmatpush3.bf16.msra.mxu1 %v7372_v16  ;;  %266 = vst [vmem:[#allocation2 + $0x58] sm:$0xff] %v5052_v32  ;;  %267 = vst [vmem:[#allocation2 + $0x60] sm:$0xff] %v5055_v36  ;;  %v5079_v63 = vunpack.c.l.bf16 %v5148_v61  ;;  %v5080_v0 = vunpack.c.h.bf16 %v5148_v61  ;;  %v5083_v4 = vunpack.c.l.bf16 %v5149_v3  ;;  %v5084_v5 = vunpack.c.h.bf16 %v5149_v3  ;;  %v7405_v7 = vld [vmem:[%s8867_s1 + $0x58] sm:$0xff]   ;;  %v7385_v8 = vld [vmem:[%s7586_s12 + $0x10] sm:$0xff] }
  0x1c   : > { %5885 = vmatpush3.bf16.msra.mxu0 %v7373_v20  ;;  %5454 = vmatprep.subr.bf16.mxu1 %v7488_v1  ;;  %268 = vst [vmem:[#allocation2 + $0x68] sm:$0xff] %v5056_v37  ;;  %269 = vst [vmem:[#allocation2 + $0x70] sm:$0xff] %v5059_v40  ;;  %v5150_v9 = vld [vmem:[%s7586_s12 + $0x70] sm:$0xff]   ;;  %v7386_v10 = vld [vmem:[%s7586_s12 + $0x1c] ss:$4 sps:$4 sm:$0xff]  }
  0x1d   : > { %5886 = vmatprep.subr.bf16.mxu0 %v7488_v1  ;;  %270 = vst [vmem:[#allocation2 + $0x78] sm:$0xff] %v5060_v41  ;;  %271 = vst [vmem:[#allocation2 + $0x80] sm:$0xff] %v5063_v46  ;;  %v5087_v11 = vunpack.c.l.bf16 %v5150_v9  ;;  %v5088_v12 = vunpack.c.h.bf16 %v5150_v9  ;;  %v7399_v13 = vld [vmem:[%s8867_s1 + $0x160] sm:$0xff]   ;;  %v5151_v14 = vld [vmem:[%s7586_s12 + $0x78] sm:$0xff]  }
  0x1e   : > { %272 = vst [vmem:[#allocation2 + $0x88] sm:$0xff] %v5064_v47  ;;  %273 = vst [vmem:[#allocation2 + $0x90] sm:$0xff] %v5067_v49  ;;  %v7414_v15 = vld [vmem:[%s8867_s1 + $0x60] sm:$0xff]   ;;  %v5091_v16 = vunpack.c.l.bf16 %v5151_v14  ;;  %v5092_v17 = vunpack.c.h.bf16 %v5151_v14  ;;  %v7402_v19 = vld [vmem:[%s8867_s1 + $0x168] sm:$0xff]  }
  0x1f   : > { %5455 = vmatpush3.bf16.msra.mxu1 %v7374_v25  ;;  %274 = vst [vmem:[#allocation2 + $0x98] sm:$0xff] %v5068_v50  ;;  %275 = vst [vmem:[#allocation2 + $0xa0] sm:$0xff] %v5071_v54  ;;  %v5152_v18 = vld [vmem:[%s7586_s12 + $0x80] sm:$0xff]   ;;  %v5153_v22 = vld [vmem:[%s7586_s12 + $0x88] sm:$0xff]  }
  0x20   : > { %5887 = vmatpush3.bf16.msra.mxu0 %v7375_v27  ;;  %5456 = vmatprep.subr.bf16.mxu1 %v7488_v1  ;;  %276 = vst [vmem:[#allocation2 + $0xa8] sm:$0xff] %v5072_v55  ;;  %277 = vst [vmem:[#allocation2 + $0xb0] sm:$0xff] %v5075_v58  ;;  %v5095_v20 = vunpack.c.l.bf16 %v5152_v18  ;;  %v5096_v21 = vunpack.c.h.bf16 %v5152_v18  ;;  %v7419_v23 = vld [vmem:[%s8867_s1 + $0x68] sm:$0xff]   ;;  %v5099_v24 = vunpack.c.l.bf16 %v5153_v22  ;;  %v5100_v25 = vunpack.c.h.bf16 %v5153_v22  ;;  %v7387_v26 = vld [vmem:[%s7586_s12 + $0x18] sm:$0xff] }
  0x21   : > { %5888 = vmatprep.subr.bf16.mxu0 %v7488_v1  ;;  %278 = vst [vmem:[#allocation2 + $0xb8] sm:$0xff] %v5076_v59  ;;  %279 = vst [vmem:[#allocation2 + $0xc0] sm:$0xff] %v5079_v63  ;;  %v5154_v27 = vld [vmem:[%s7586_s12 + $0x90] sm:$0xff]   ;;  %v7389_v28 = vld [vmem:[%s7586_s12 + $0x24] ss:$4 sps:$4 sm:$0xff]  }
  0x22   : > { %280 = vst [vmem:[#allocation2 + $0xc8] sm:$0xff] %v5080_v0  ;;  %281 = vst [vmem:[#allocation2 + $0xd0] sm:$0xff] %v5083_v4  ;;  %v5103_v29 = vunpack.c.l.bf16 %v5154_v27  ;;  %v5104_v30 = vunpack.c.h.bf16 %v5154_v27  ;;  %v7408_v31 = vld [vmem:[%s8867_s1 + $0x170] sm:$0xff]   ;;  %v7391_v36 = vld [vmem:[%s7586_s12 + $0x20] sm:$0xff] }
  0x23   : > { %5457 = vmatpush3.bf16.msra.mxu1 %v7376_v33  ;;  %282 = vst [vmem:[#allocation2 + $0xd8] sm:$0xff] %v5084_v5  ;;  %283 = vst [vmem:[#allocation2 + $0xe0] sm:$0xff] %v5087_v11  ;;  %v7424_v32 = vld [vmem:[%s8867_s1 + $0x70] sm:$0xff]   ;;  %v5155_v33 = vld [vmem:[%s7586_s12 + $0x98] sm:$0xff]  }
  0x24   : > { %5889 = vmatpush3.bf16.msra.mxu0 %v7377_v35  ;;  %5550 = vmatprep.subr.bf16.mxu1 %v7488_v1  ;;  %284 = vst [vmem:[#allocation2 + $0xe8] sm:$0xff] %v5088_v12  ;;  %285 = vst [vmem:[#allocation2 + $0xf0] sm:$0xff] %v5091_v16  ;;  %v5107_v34 = vunpack.c.l.bf16 %v5155_v33  ;;  %v5108_v35 = vunpack.c.h.bf16 %v5155_v33  ;;  %v7411_v37 = vld [vmem:[%s8867_s1 + $0x178] sm:$0xff]   ;;  %v5156_v38 = vld [vmem:[%s7586_s12 + $0xa0] sm:$0xff]  }
  0x25   : > { %5982 = vmatprep.subr.bf16.mxu0 %v7488_v1  ;;  %286 = vst [vmem:[#allocation2 + $0xf8] sm:$0xff] %v5092_v17  ;;  %287 = vst [vmem:[#allocation2 + $0x100] sm:$0xff] %v5095_v20  ;;  %v5111_v40 = vunpack.c.l.bf16 %v5156_v38  ;;  %v5112_v41 = vunpack.c.h.bf16 %v5156_v38  ;;  %v5157_v44 = vld [vmem:[%s7586_s12 + $0xa8] sm:$0xff]   ;;  %v7397_v48 = vld [vmem:[%s7586_s12 + $0x30] sm:$0xff] }
  0x26   : > { %5459 = vmatmul.mubr.bf16.vlgmr.msra.gmra.mrb[0].mxu1 %v7378_v39  ;;  %288 = vst [vmem:[#allocation2 + $0x108] sm:$0xff] %v5096_v21  ;;  %289 = vst [vmem:[#allocation2 + $0x110] sm:$0xff] %v5099_v24  ;;  %v7392_v39 = vld [vmem:[%s7586_s12 + $0x2c] ss:$4 sps:$4 sm:$0xff]   ;;  %v5115_v46 = vunpack.c.l.bf16 %v5157_v44  ;;  %v5116_v47 = vunpack.c.h.bf16 %v5157_v44  ;;  %v7398_v50 = vld [vmem:[%s7586_s12 + $0x3c] ss:$4 sps:$4 sm:$0xff]  }
  0x27   : > { %5891 = vmatmul.mubr.bf16.vlgmr.msra.gmra.mrb[0].mxu0 %v7379_v42  ;;  %5551 = vmatpush3.bf16.msra.mxu1 %v7380_v43  ;;  %290 = vst [vmem:[#allocation2 + $0x118] sm:$0xff] %v5100_v25  ;;  %291 = vst [vmem:[#allocation2 + $0x120] sm:$0xff] %v5103_v29  ;;  %v7429_v42 = vld [vmem:[%s8867_s1 + $0x78] sm:$0xff]   ;;  %v7394_v43 = vld [vmem:[%s7586_s12 + $0x28] sm:$0xff] }
  0x28   : > { %5983 = vmatpush3.bf16.msra.mxu0 %v7381_v45  ;;  %5462 = vmatprep.mubr.msk.bf16.mxu1 %vm7489_vm0, %v7488_v1  ;;  %292 = vst [vmem:[#allocation2 + $0x128] sm:$0xff] %v5104_v30  ;;  %293 = vst [vmem:[#allocation2 + $0x130] sm:$0xff] %v5107_v34  ;;  %v7395_v45 = vld [vmem:[%s7586_s12 + $0x34] ss:$4 sps:$4 sm:$0xff]   ;;  %v7401_v54 = vld [vmem:[%s7586_s12 + $0x44] ss:$4 sps:$4 sm:$0xff]  }
  0x29   : > { %5894 = vmatprep.mubr.msk.bf16.mxu0 %vm7489_vm0, %v7488_v1  ;;  %5984 = vmatprep.subr.bf16.mxu0 %v7488_v1  ;;  %294 = vst [vmem:[#allocation2 + $0x138] sm:$0xff] %v5108_v35  ;;  %295 = vst [vmem:[#allocation2 + $0x140] sm:$0xff] %v5111_v40  ;;  %v5158_v49 = vld [vmem:[%s7586_s12 + $0xb0] sm:$0xff]   ;;  %v7403_v55 = vld [vmem:[%s7586_s12 + $0x40] sm:$0xff] }
  0x2a   : > { %5552 = vmatprep.subr.bf16.mxu1 %v7488_v1  ;;  %296 = vst [vmem:[#allocation2 + $0x148] sm:$0xff] %v5112_v41  ;;  %297 = vst [vmem:[#allocation2 + $0x150] sm:$0xff] %v5115_v46  ;;  %v5120_v52 = vunpack.c.h.bf16 %v5158_v49  ;;  %v7404_v56 = vld [vmem:[%s7586_s12 + $0x4c] ss:$4 sps:$4 sm:$0xff]   ;;  %v7407_v61 = vld [vmem:[%s7586_s12 + $0x54] ss:$4 sps:$4 sm:$0xff]  }
  0x2b   : > { %5553 = vmatpush3.bf16.msra.mxu1 %v7388_v51  ;;  %298 = vst [vmem:[#allocation2 + $0x158] sm:$0xff] %v5116_v47  ;;  %v5119_v51 = vunpack.c.l.bf16 %v5158_v49  ;;  %v7756_v58 = vld [vmem:[#allocation2 + $0x29] sm:$0xff]  ;;  %v7768_v63 = vld [vmem:[#allocation2 + $0x39] sm:$0xff]  ;;  %v7813_v14 = vld [vmem:[#allocation2 + $0x41] sm:$0xff] }
  0x2c   : > { %5985 = vmatpush3.bf16.msra.mxu0 %v7384_v53  ;;  %5554 = vmatprep.subr.bf16.mxu1 %v7488_v1  ;;  %300 = vst [vmem:[#allocation2 + $0x168] sm:$0xff] %v5120_v52  ;;  %v7400_v53 = vld [vmem:[%s7586_s12 + $0x38] sm:$0xff]  ;;  %v7413_v5 = vld [vmem:[%s7586_s12 + $0x64] ss:$4 sps:$4 sm:$0xff]   ;;  %v7418_v16 = vld [vmem:[%s7586_s12 + $0x70] sm:$0xff]  ;;  %v2857_v17 = vpack.c.bf16 %v7813_v14, %v7768_v63 }
  0x2d   : > { %5986 = vmatprep.subr.bf16.mxu0 %v7488_v1  ;;  %299 = vst [vmem:[#allocation2 + $0x160] sm:$0xff] %v5119_v51  ;;  %v7410_v3 = vld [vmem:[%s7586_s12 + $0x5c] ss:$4 sps:$4 sm:$0xff]   ;;  %v7417_v11 = vld [vmem:[%s7586_s12 + $0x68] sm:$0xff]  ;;  %v7832_v20 = vld [vmem:[#allocation2 + $0x51] sm:$0xff] }
  0x2e   : > { %5463 = vmatmul.mubr.bf16.gmra.mrb[4].mxu1 %v7382_v57  ;;  %v7754_v57 = vld [vmem:[#allocation2 + $0x21] sm:$0xff]  ;;  %v7412_v4 = vld [vmem:[%s7586_s12 + $0x58] sm:$0xff]  ;;  %v7438_v24 = vld [vmem:[%s8867_s1 + $0x1b0] sm:$0xff]  }
  0x2f   : > { %5895 = vmatmul.mubr.bf16.gmra.mrb[4].mxu0 %v7383_v60  ;;  %5466 = vmatprep.mubr.msk.bf16.mxu1 %vm7489_vm0, %v7488_v1  ;;  %v901_v59 = vpack.c.bf16 %v7756_v58, %v7754_v57  ;;  %v7406_v60 = vld [vmem:[%s7586_s12 + $0x48] sm:$0xff]  ;;  %v7416_v9 = vld [vmem:[%s8867_s1 + $0x180] sm:$0xff]   ;;  %v7420_v22 = vld [vmem:[%s7586_s12 + $0x78] sm:$0xff] }
  0x30   : > { %5898 = vmatprep.mubr.msk.bf16.mxu0 %vm7489_vm0, %v7488_v1  ;;  %5987 = vmatpush3.bf16.msra.mxu0 %v7390_v62  ;;  %v7766_v62 = vld [vmem:[#allocation2 + $0x31] sm:$0xff]  ;;  %v7434_v18 = vld [vmem:[%s8867_s1 + $0x1a0] sm:$0xff]   ;;  %v7436_v21 = vld [vmem:[%s8867_s1 + $0x1a8] sm:$0xff]  }
  0x31   : > { %5988 = vmatprep.subr.bf16.mxu0 %v7488_v1  ;;  %5555 = vmatpush3.bf16.msra.mxu1 %v7396_v2  ;;  %v902_v0 = vpack.c.bf16 %v7768_v63, %v7766_v62  ;;  %v7409_v2 = vld [vmem:[%s7586_s12 + $0x50] sm:$0xff]  ;;  %v2856_v12 = vpack.c.bf16 %v7766_v62, %v7756_v58  ;;  %v7849_v25 = vld [vmem:[#allocation2 + $0x59] sm:$0xff]  ;;  %v7423_v35 = vld [vmem:[%s7586_s12 + $0x88] sm:$0xff] }
  0x32   : > { %5556 = vmatprep.subr.bf16.mxu1 %v7488_v1  ;;  %v7422_v27 = vld [vmem:[%s7586_s12 + $0x80] sm:$0xff]  ;;  %v7865_v33 = vld [vmem:[#allocation2 + $0x69] sm:$0xff]  ;;  %v7867_v34 = vld [vmem:[#allocation2 + $0x71] sm:$0xff] }
  0x33   : > { %v7878_v40 = vld [vmem:[#allocation2 + $0x79] sm:$0xff]  ;;  %v7880_v41 = vld [vmem:[#allocation2 + $0x81] sm:$0xff]  ;;  %v7889_v44 = vld [vmem:[#allocation2 + $0x89] sm:$0xff] }
  0x34   : > { %5989 = vmatpush3.bf16.msra.mxu0 %v7393_v6  ;;  %v7786_v6 = vld [vmem:[#allocation2 + $0x19] sm:$0xff]  ;;  %v7902_v49 = vld [vmem:[#allocation2 + $0xa1] sm:$0xff]  ;;  %v7445_v58 = vld [vmem:[%s8867_s1 + $0xb0] sm:$0xff]  }
  0x35   : > { %5990 = vmatprep.subr.bf16.mxu0 %v7488_v1  ;;  %5557 = vmatpush3.bf16.msra.mxu1 %v7405_v7  ;;  %v7415_v7 = vld [vmem:[%s7586_s12 + $0x60] sm:$0xff]  ;;  %v7427_v46 = vld [vmem:[%s7586_s12 + $0x98] sm:$0xff] }
  0x36   : > { %5467 = vmatmul.mubr.bf16.gmra.mrb[8].mxu1 %v7385_v8  ;;  %5558 = vmatprep.subr.bf16.mxu1 %v7488_v1  ;;  %v2855_v8 = vpack.c.bf16 %v7754_v57, %v7786_v6  ;;  %v7908_v52 = vld [vmem:[%s7547_s26] sm:$0xff]  ;;  %v7447_v63 = vld [vmem:[%s8867_s1 + $0xb8] sm:$0xff]  }
  0x37   : > { %5899 = vmatmul.mubr.bf16.gmra.mrb[8].mxu0 %v7386_v10  ;;  %5470 = vmatprep.mubr.msk.bf16.mxu1 %vm7489_vm0, %v7488_v1  ;;  %v7421_v10 = vld [vmem:[%s8867_s1 + $0x188] sm:$0xff]  }
  0x38   : > { %5902 = vmatprep.mubr.msk.bf16.mxu0 %vm7489_vm0, %v7488_v1  ;;  %5991 = vmatpush3.bf16.msra.mxu0 %v7399_v13  ;;  %v7426_v13 = vld [vmem:[%s8867_s1 + $0x190] sm:$0xff]  }
  0x39   : > { %5992 = vmatprep.subr.bf16.mxu0 %v7488_v1  ;;  %5559 = vmatpush3.bf16.msra.mxu1 %v7414_v15  ;;  %v7431_v15 = vld [vmem:[%s8867_s1 + $0x198] sm:$0xff]  }
  0x3a   : > { %5560 = vmatprep.subr.bf16.mxu1 %v7488_v1 }
  0x3c   : > { %5993 = vmatpush3.bf16.msra.mxu0 %v7402_v19  ;;  %v7830_v19 = vld [vmem:[#allocation2 + $0x49] sm:$0xff] }
  0x3d   : > { %5994 = vmatprep.subr.bf16.mxu0 %v7488_v1  ;;  %5561 = vmatpush3.bf16.msra.mxu1 %v7419_v23  ;;  %v2858_v23 = vpack.c.bf16 %v7832_v20, %v7830_v19 }
  0x3e   : > { %5471 = vmatmul.mubr.bf16.gmra.mrb[12].mxu1 %v7387_v26  ;;  %5562 = vmatprep.subr.bf16.mxu1 %v7488_v1  ;;  %v7851_v26 = vld [vmem:[#allocation2 + $0x61] sm:$0xff] }
  0x3f   : > { %5903 = vmatmul.mubr.bf16.gmra.mrb[12].mxu0 %v7389_v28  ;;  %5474 = vmatprep.mubr.msk.bf16.mxu1 %vm7489_vm0, %v7488_v1  ;;  %v5159_v28 = vld [vmem:[%s7586_s12 + $0xb8] sm:$0xff]   ;;  %v2859_v29 = vpack.c.bf16 %v7851_v26, %v7849_v25 }
  0x40   : > { %5906 = vmatprep.mubr.msk.bf16.mxu0 %vm7489_vm0, %v7488_v1  ;;  %5995 = vmatpush3.bf16.msra.mxu0 %v7408_v31  ;;  %v5123_v30 = vunpack.c.l.bf16 %v5159_v28  ;;  %v5124_v31 = vunpack.c.h.bf16 %v5159_v28  ;;  %v7991_v28 = vld [vmem:[#allocation2 + $0x101] sm:$0xff] }
  0x41   : > { %5996 = vmatprep.subr.bf16.mxu0 %v7488_v1  ;;  %5563 = vmatpush3.bf16.msra.mxu1 %v7424_v32  ;;  %v7440_v32 = vld [vmem:[%s8867_s1 + $0x1b8] sm:$0xff]  }
  0x42   : > { %5564 = vmatprep.subr.bf16.mxu1 %v7488_v1  ;;  %301 = vst [vmem:[#allocation2 + $0x170] sm:$0xff] %v5123_v30  ;;  %302 = vst [vmem:[#allocation2 + $0x178] sm:$0xff] %v5124_v31  ;;  %v8012_v30 = vld [vmem:[#allocation2 + $0x111] sm:$0xff]  ;;  %v903_v31 = vpack.c.bf16 %v7830_v19, %v7813_v14  ;;  %v904_v14 = vpack.c.bf16 %v7849_v25, %v7832_v20  ;;  %v905_v20 = vpack.c.bf16 %v7865_v33, %v7851_v26 }
  0x44   : > { %5997 = vmatpush3.bf16.msra.mxu0 %v7411_v37  ;;  %v2860_v37 = vpack.c.bf16 %v7867_v34, %v7865_v33  ;;  %v8063_v33 = vld [vmem:[#allocation2 + $0x149] sm:$0xff] }
  0x45   : > { %6090 = vmatprep.subr.bf16.mxu0 %v7488_v1  ;;  %5565 = vmatpush3.bf16.msra.mxu1 %v7429_v42  ;;  %v7425_v42 = vld [vmem:[%s7586_s12 + $0x90] sm:$0xff] }
  0x46   : > { %5475 = vmatmul.mubr.bf16.gmra.mrb[16].mxu1 %v7391_v36  ;;  %5658 = vmatprep.subr.bf16.mxu1 %v7488_v1  ;;  %v5160_v36 = vld [vmem:[%s7586_s12 + $0xc0] sm:$0xff]  }
  0x47   : > { %5907 = vmatmul.mubr.bf16.gmra.mrb[16].mxu0 %v7392_v39  ;;  %5478 = vmatprep.mubr.msk.bf16.mxu1 %vm7489_vm0, %v7488_v1  ;;  %v5127_v38 = vunpack.c.l.bf16 %v5160_v36  ;;  %v5128_v39 = vunpack.c.h.bf16 %v5160_v36  ;;  %v8041_v36 = vld [vmem:[#allocation2 + $0x131] sm:$0xff] }
  0x48   : > { %5910 = vmatprep.mubr.msk.bf16.mxu0 %vm7489_vm0, %v7488_v1 }
  0x49   : > { %303 = vst [vmem:[#allocation2 + $0x180] sm:$0xff] %v5127_v38  ;;  %304 = vst [vmem:[#allocation2 + $0x188] sm:$0xff] %v5128_v39  ;;  %v8053_v38 = vld [vmem:[#allocation2 + $0x141] sm:$0xff]  ;;  %v906_v39 = vpack.c.bf16 %v7878_v40, %v7867_v34 }
  0x4e   : > { %5479 = vmatmul.mubr.bf16.gmra.mrb[20].mxu1 %v7394_v43  ;;  %v2861_v43 = vpack.c.bf16 %v7880_v41, %v7878_v40  ;;  %v8075_v40 = vld [vmem:[#allocation2 + $0x159] sm:$0xff] }
  0x4f   : > { %5911 = vmatmul.mubr.bf16.gmra.mrb[20].mxu0 %v7395_v45  ;;  %5482 = vmatprep.mubr.msk.bf16.mxu1 %vm7489_vm0, %v7488_v1  ;;  %v7891_v45 = vld [vmem:[#allocation2 + $0x91] sm:$0xff] }
  0x50   : > { %5914 = vmatprep.mubr.msk.bf16.mxu0 %vm7489_vm0, %v7488_v1  ;;  %v2862_v47 = vpack.c.bf16 %v7891_v45, %v7889_v44 }
  0x56   : > { %5483 = vmatmul.mubr.bf16.gmra.mrb[24].mxu1 %v7397_v48  ;;  %v7900_v48 = vld [vmem:[#allocation2 + $0x99] sm:$0xff] }
  0x57   : > { %5915 = vmatmul.mubr.bf16.gmra.mrb[24].mxu0 %v7398_v50  ;;  %5486 = vmatprep.mubr.msk.bf16.mxu1 %vm7489_vm0, %v7488_v1  ;;  %v7428_v50 = vld [vmem:[%s7586_s12 + $0xa0] sm:$0xff]  ;;  %v2863_v51 = vpack.c.bf16 %v7902_v49, %v7900_v48 }
  0x58   : > { %5918 = vmatprep.mubr.msk.bf16.mxu0 %vm7489_vm0, %v7488_v1 }
  0x5e   : > { %5487 = vmatmul.mubr.bf16.gmra.mrb[28].mxu1 %v7400_v53  ;;  %v7916_v53 = vld [vmem:[#allocation2 + $0xb1] sm:$0xff] }
  0x5f   : > { %5919 = vmatmul.mubr.bf16.gmra.mrb[28].mxu0 %v7401_v54  ;;  %5490 = vmatprep.mubr.msk.bf16.mxu1 %vm7489_vm0, %v7488_v1  ;;  %v7430_v54 = vld [vmem:[%s7586_s12 + $0xa8] sm:$0xff] }
  0x60   : > { %5922 = vmatprep.mubr.msk.bf16.mxu0 %vm7489_vm0, %v7488_v1 }
  0x66   : > { %5491 = vmatmul.mubr.bf16.gmra.mrb[32].mxu1 %v7403_v55 }
  0x67   : > { %5923 = vmatmul.mubr.bf16.gmra.mrb[32].mxu0 %v7404_v56  ;;  %5494 = vmatprep.mubr.msk.bf16.mxu1 %vm7489_vm0, %v7488_v1  ;;  %v7925_v56 = vld [vmem:[#allocation2 + $0xb9] sm:$0xff] }
  0x68   : > { %5926 = vmatprep.mubr.msk.bf16.mxu0 %vm7489_vm0, %v7488_v1 }
  0x6e   : > { %5495 = vmatmul.mubr.bf16.gmra.mrb[36].mxu1 %v7406_v60  ;;  %v7927_v60 = vld [vmem:[#allocation2 + $0xc1] sm:$0xff] }
  0x6f   : > { %5927 = vmatmul.mubr.bf16.gmra.mrb[36].mxu0 %v7407_v61  ;;  %5498 = vmatprep.mubr.msk.bf16.mxu1 %vm7489_vm0, %v7488_v1  ;;  %v7432_v61 = vld [vmem:[%s7586_s12 + $0xb0] sm:$0xff] }
  0x70   : > { %5930 = vmatprep.mubr.msk.bf16.mxu0 %vm7489_vm0, %v7488_v1 }
  0x76   : > { %5499 = vmatmul.mubr.bf16.gmra.mrb[40].mxu1 %v7409_v2  ;;  %v2865_v2 = vpack.c.bf16 %v7927_v60, %v7925_v56 }
  0x77   : > { %5931 = vmatmul.mubr.bf16.gmra.mrb[40].mxu0 %v7410_v3  ;;  %5502 = vmatprep.mubr.msk.bf16.mxu1 %vm7489_vm0, %v7488_v1  ;;  %v853_v3 = vld [vmem:[#allocation2 + $0x1] sm:$0xff] }
  0x78   : > { %5934 = vmatprep.mubr.msk.bf16.mxu0 %vm7489_vm0, %v7488_v1 }
  0x7e   : > { %5503 = vmatmul.mubr.bf16.gmra.mrb[44].mxu1 %v7412_v4  ;;  %v854_v4 = vld [vmem:[#allocation2 + $0x9] sm:$0xff] }
  0x7f   : > { %5935 = vmatmul.mubr.bf16.gmra.mrb[44].mxu0 %v7413_v5  ;;  %5506 = vmatprep.mubr.msk.bf16.mxu1 %vm7489_vm0, %v7488_v1  ;;  %v7936_v5 = vld [vmem:[#allocation2 + $0xc9] sm:$0xff] }
  0x80   : > { %5998 = vmatprep.mubr.msk.bf16.mxu0 %vm7489_vm0, %v7488_v1 }
  0x86   : > { %5507 = vmatmul.mubr.bf16.gmra.mrb[48].mxu1 %v7415_v7  ;;  %v7938_v7 = vld [vmem:[#allocation2 + $0xd1] sm:$0xff] }
  0x87   : > { %5999 = vmatmul.mubr.bf16.vlgmr.msra.gmra.mrb[0].mxu0 %v2855_v8  ;;  %5510 = vmatprep.mubr.msk.bf16.mxu1 %vm7489_vm0, %v7488_v1  ;;  %v899_v8 = vpack.c.bf16 %v854_v4, %v853_v3  ;;  %v7442_v4 = vld [vmem:[%s8867_s1 + $0x1c0] sm:$0xff]  }
  0x88   : > { %6091 = vmatpush3.bf16.msra.mxu0 %v7416_v9  ;;  %6002 = vmatprep.mubr.msk.bf16.mxu0 %vm7489_vm0, %v7488_v1  ;;  %v2866_v9 = vpack.c.bf16 %v7938_v7, %v7936_v5 }
  0x89   : > { %6092 = vmatprep.subr.bf16.mxu0 %v7488_v1 }
  0x8c   : > { %6093 = vmatpush3.bf16.msra.mxu0 %v7421_v10  ;;  %v7433_v10 = vld [vmem:[%s8867_s1 + $0x80] sm:$0xff]  }
  0x8d   : > { %6094 = vmatprep.subr.bf16.mxu0 %v7488_v1 }
  0x8e   : > { %5511 = vmatmul.mubr.bf16.gmra.mrb[52].mxu1 %v7417_v11  ;;  %v855_v11 = vld [vmem:[#allocation2 + $0x11] sm:$0xff] }
  0x8f   : > { %6003 = vmatmul.mubr.bf16.gmra.mrb[4].mxu0 %v2856_v12  ;;  %5514 = vmatprep.mubr.msk.bf16.mxu1 %vm7489_vm0, %v7488_v1  ;;  %v7435_v12 = vld [vmem:[%s8867_s1 + $0x88] sm:$0xff]  }
  0x90   : > { %6006 = vmatprep.mubr.msk.bf16.mxu0 %vm7489_vm0, %v7488_v1  ;;  %6095 = vmatpush3.bf16.msra.mxu0 %v7426_v13  ;;  %v7952_v13 = vld [vmem:[#allocation2 + $0xd9] sm:$0xff] }
  0x91   : > { %6096 = vmatprep.subr.bf16.mxu0 %v7488_v1 }
  0x94   : > { %6097 = vmatpush3.bf16.msra.mxu0 %v7431_v15  ;;  %v7954_v15 = vld [vmem:[#allocation2 + $0xe1] sm:$0xff] }
  0x95   : > { %6098 = vmatprep.subr.bf16.mxu0 %v7488_v1 }
  0x96   : > { %5515 = vmatmul.mubr.bf16.gmra.mrb[56].mxu1 %v7418_v16  ;;  %v900_v16 = vpack.c.bf16 %v7786_v6, %v855_v11  ;;  %v7970_v6 = vld [vmem:[#allocation2 + $0xf1] sm:$0xff] }
  0x97   : > { %6007 = vmatmul.mubr.bf16.gmra.mrb[8].mxu0 %v2857_v17  ;;  %5518 = vmatprep.mubr.msk.bf16.mxu1 %vm7489_vm0, %v7488_v1  ;;  %v2867_v17 = vpack.c.bf16 %v7954_v15, %v7952_v13  ;;  %v3303_v11 = vld [vmem:[#allocation2 + $0x56] sm:$0xff] }
  0x98   : > { %6010 = vmatprep.mubr.msk.bf16.mxu0 %vm7489_vm0, %v7488_v1  ;;  %6099 = vmatpush3.bf16.msra.mxu0 %v7434_v18  ;;  %v7437_v18 = vld [vmem:[%s8867_s1 + $0x90] sm:$0xff]  }
  0x99   : > { %6100 = vmatprep.subr.bf16.mxu0 %v7488_v1 }
  0x9c   : > { %6101 = vmatpush3.bf16.msra.mxu0 %v7436_v21  ;;  %v7968_v21 = vld [vmem:[#allocation2 + $0xe9] sm:$0xff] }
  0x9d   : > { %6102 = vmatprep.subr.bf16.mxu0 %v7488_v1 }
  0x9e   : > { %5519 = vmatmul.mubr.bf16.gmra.mrb[60].mxu1 %v7420_v22  ;;  %v7439_v22 = vld [vmem:[%s8867_s1 + $0x98] sm:$0xff]  }
  0x9f   : > { %6011 = vmatmul.mubr.bf16.gmra.mrb[12].mxu0 %v2858_v23  ;;  %5522 = vmatprep.mubr.msk.bf16.mxu1 %vm7489_vm0, %v7488_v1  ;;  %v2868_v23 = vpack.c.bf16 %v7970_v6, %v7968_v21 }
  0xa0   : > { %6014 = vmatprep.mubr.msk.bf16.mxu0 %vm7489_vm0, %v7488_v1  ;;  %6103 = vmatpush3.bf16.msra.mxu0 %v7438_v24  ;;  %v7441_v24 = vld [vmem:[%s8867_s1 + $0xa0] sm:$0xff]  }
  0xa1   : > { %6104 = vmatprep.subr.bf16.mxu0 %v7488_v1 }
  0xa4   : > { %6105 = vmatpush3.bf16.msra.mxu0 %v7440_v32  ;;  %v8028_v32 = vld [vmem:[#allocation2 + $0x121] sm:$0xff] }
  0xa5   : > { %6198 = vmatprep.subr.bf16.mxu0 %v7488_v1 }
  0xa6   : > { %5523 = vmatmul.mubr.bf16.gmra.mrb[64].mxu1 %v7422_v27  ;;  %v7989_v27 = vld [vmem:[#allocation2 + $0xf9] sm:$0xff] }
  0xa7   : > { %6015 = vmatmul.mubr.bf16.gmra.mrb[16].mxu0 %v2859_v29  ;;  %5526 = vmatprep.mubr.msk.bf16.mxu1 %vm7489_vm0, %v7488_v1  ;;  %v7443_v29 = vld [vmem:[%s8867_s1 + $0xa8] sm:$0xff]   ;;  %v2869_v57 = vpack.c.bf16 %v7991_v28, %v7989_v27 }
  0xa8   : > { %6018 = vmatprep.mubr.msk.bf16.mxu0 %vm7489_vm0, %v7488_v1 }
  0xae   : > { %5527 = vmatmul.mubr.bf16.gmra.mrb[68].mxu1 %v7423_v35  ;;  %v8039_v35 = vld [vmem:[#allocation2 + $0x129] sm:$0xff] }
  0xaf   : > { %6019 = vmatmul.mubr.bf16.gmra.mrb[20].mxu0 %v2860_v37  ;;  %5530 = vmatprep.mubr.msk.bf16.mxu1 %vm7489_vm0, %v7488_v1  ;;  %v2872_v25 = vpack.c.bf16 %v8041_v36, %v8039_v35  ;;  %v8051_v37 = vld [vmem:[#allocation2 + $0x139] sm:$0xff] }
  0xb0   : > { %6022 = vmatprep.mubr.msk.bf16.mxu0 %vm7489_vm0, %v7488_v1  ;;  %v2873_v26 = vpack.c.bf16 %v8053_v38, %v8051_v37 }
  0xb6   : > { %5531 = vmatmul.mubr.bf16.gmra.mrb[72].mxu1 %v7425_v42  ;;  %v8065_v42 = vld [vmem:[#allocation2 + $0x151] sm:$0xff] }
  0xb7   : > { %6023 = vmatmul.mubr.bf16.gmra.mrb[24].mxu0 %v2861_v43  ;;  %5534 = vmatprep.mubr.msk.bf16.mxu1 %vm7489_vm0, %v7488_v1  ;;  %v907_v43 = vpack.c.bf16 %v7889_v44, %v7880_v41  ;;  %v2874_v34 = vpack.c.bf16 %v8065_v42, %v8063_v33  ;;  %v8087_v44 = vld [vmem:[#allocation2 + $0x169] sm:$0xff] }
  0xb8   : > { %6026 = vmatprep.mubr.msk.bf16.mxu0 %vm7489_vm0, %v7488_v1 }
  0xbe   : > { %5535 = vmatmul.mubr.bf16.gmra.mrb[76].mxu1 %v7427_v46  ;;  %v8077_v46 = vld [vmem:[#allocation2 + $0x161] sm:$0xff] }
  0xbf   : > { %6027 = vmatmul.mubr.bf16.gmra.mrb[28].mxu0 %v2862_v47  ;;  %5538 = vmatprep.mubr.msk.bf16.mxu1 %vm7489_vm0, %v7488_v1  ;;  %v908_v47 = vpack.c.bf16 %v7900_v48, %v7891_v45  ;;  %v2875_v41 = vpack.c.bf16 %v8077_v46, %v8075_v40  ;;  %v2853_v45 = vld [vmem:[#allocation2 + $0x179] sm:$0xff]  ;;  %v2854_v48 = vld [vmem:[#allocation2 + $0x181] sm:$0xff] }
  0xc0   : > { %6030 = vmatprep.mubr.msk.bf16.mxu0 %vm7489_vm0, %v7488_v1  ;;  %v7914_v1 = vld [vmem:[#allocation2 + $0xa9] sm:$0xff] }
  0xc1   : > { %v2864_v55 = vpack.c.bf16 %v7916_v53, %v7914_v1 }
  0xc6   : > { %5539 = vmatmul.mubr.bf16.gmra.mrb[80].mxu1 %v7428_v50  ;;  %v2852_v50 = vld [vmem:[#allocation2 + $0x171] sm:$0xff] }
  0xc7   : > { %6031 = vmatmul.mubr.bf16.gmra.mrb[32].mxu0 %v2863_v51  ;;  %5542 = vmatprep.mubr.msk.bf16.mxu1 %vm7489_vm0, %v7908_v52  ;;  %v909_v51 = vpack.c.bf16 %v7914_v1, %v7902_v49  ;;  %v3298_v49 = vld [vmem:[#allocation2 + $0x2e] sm:$0xff]  ;;  %v3299_v1 = vld [vmem:[#allocation2 + $0x36] sm:$0xff] }
  0xc8   : > { %6034 = vmatprep.mubr.msk.bf16.mxu0 %vm7489_vm0, %v7908_v52  ;;  %v3344_v3 = vpack.c.bf16 %v3299_v1, %v3298_v49  ;;  %v7449_v49 = vld [vmem:[%s8867_s1 + $0xc0] sm:$0xff]   ;;  %v7451_v1 = vld [vmem:[%s8867_s1 + $0xc8] sm:$0xff]  }
  0xce   : > { %5543 = vmatmul.mubr.bf16.gmra.mrb[84].mxu1 %v7430_v54  ;;  %v2876_v54 = vpack.c.bf16 %v2852_v50, %v8087_v44 }
  0xcf   : > { %6035 = vmatmul.mubr.bf16.gmra.mrb[36].mxu0 %v2864_v55  ;;  %5546 = vmatprep.mubr.msk.bf16.mxu1 %vm7489_vm0, %v7908_v52  ;;  %v910_v55 = vpack.c.bf16 %v7925_v56, %v7916_v53  ;;  %v3300_v53 = vld [vmem:[#allocation2 + $0x3e] sm:$0xff]  ;;  %v3301_v56 = vld [vmem:[#allocation2 + $0x46] sm:$0xff] }
  0xd0   : > { %6038 = vmatprep.mubr.msk.bf16.mxu0 %vm7489_vm0, %v7908_v52 }
  0xd6   : > { %5547 = vmatmul.mubr.bf16.gmra.mrb[88].mxu1 %v7432_v61  ;;  %v2877_v61 = vpack.c.bf16 %v2854_v48, %v2853_v45  ;;  %v3320_v45 = vld [vmem:[#allocation2 + $0xde] sm:$0xff]  ;;  %v3321_v48 = vld [vmem:[#allocation2 + $0xe6] sm:$0xff] }
  0xd7   : > { %6039 = vmatmul.mubr.bf16.gmra.mrb[40].mxu0 %v2865_v2  ;;  %5566 = vmatprep.mubr.msk.bf16.mxu1 %vm7489_vm0, %v7908_v52  ;;  %v911_v2 = vpack.c.bf16 %v7936_v5, %v7927_v60  ;;  %v7444_v60 = vld [vmem:[%s8867_s1 + $0x1c8] sm:$0xff]   ;;  %v912_v5 = vpack.c.bf16 %v7952_v13, %v7938_v7  ;;  %v7448_v7 = vld [vmem:[%s8867_s1 + $0x1d8] sm:$0xff]  }
  0xd8   : > { %6042 = vmatprep.mubr.msk.bf16.mxu0 %vm7489_vm0, %v7908_v52 }
  0xde   : > { %5567 = vmatmul.mubr.bf16.vlgmr.msra.gmra.mrb[0].mxu1 %v899_v8  ;;  %v3345_v8 = vpack.c.bf16 %v3301_v56, %v3300_v53  ;;  %v7453_v56 = vld [vmem:[%s8867_s1 + $0xd0] sm:$0xff]  }
  0xdf   : > { %6043 = vmatmul.mubr.bf16.gmra.mrb[44].mxu0 %v2866_v9  ;;  %5659 = vmatpush3.bf16.msra.mxu1 %v7433_v10  ;;  %v7446_v9 = vld [vmem:[%s8867_s1 + $0x1d0] sm:$0xff]  }
  0xe0   : > { %5570 = vmatprep.mubr.msk.bf16.mxu1 %vm7489_vm0, %v7908_v52  ;;  %6046 = vmatprep.mubr.msk.bf16.mxu0 %vm7489_vm0, %v7908_v52  ;;  %v3302_v10 = vld [vmem:[#allocation2 + $0x4e] sm:$0xff] }
  0xe1   : > { %5660 = vmatprep.subr.bf16.mxu1 %v7908_v52  ;;  %v3346_v13 = vpack.c.bf16 %v3303_v11, %v3302_v10  ;;  %v7455_v10 = vld [vmem:[%s8867_s1 + $0xd8] sm:$0xff]  }
  0xe3   : > { %5661 = vmatpush3.bf16.msra.mxu1 %v7435_v12  ;;  %v913_v12 = vpack.c.bf16 %v7968_v21, %v7954_v15  ;;  %v7452_v15 = vld [vmem:[%s8867_s1 + $0x1e8] sm:$0xff]   ;;  %v914_v21 = vpack.c.bf16 %v7989_v27, %v7970_v6 }
  0xe4   : > { %5662 = vmatprep.subr.bf16.mxu1 %v7908_v52 }
  0xe6   : > { %5571 = vmatmul.mubr.bf16.gmra.mrb[4].mxu1 %v900_v16  ;;  %v7450_v16 = vld [vmem:[%s8867_s1 + $0x1e0] sm:$0xff]  }
  0xe7   : > { %6047 = vmatmul.mubr.bf16.gmra.mrb[48].mxu0 %v2867_v17  ;;  %5574 = vmatprep.mubr.msk.bf16.mxu1 %vm7489_vm0, %v7908_v52  ;;  %v3304_v17 = vld [vmem:[#allocation2 + $0x5e] sm:$0xff] }
  0xe8   : > { %6050 = vmatprep.mubr.msk.bf16.mxu0 %vm7489_vm0, %v7908_v52  ;;  %5663 = vmatpush3.bf16.msra.mxu1 %v7437_v18  ;;  %v3305_v18 = vld [vmem:[#allocation2 + $0x66] sm:$0xff] }
  0xe9   : > { %5664 = vmatprep.subr.bf16.mxu1 %v7908_v52 }
  0xec   : > { %5665 = vmatpush3.bf16.msra.mxu1 %v7439_v22  ;;  %v3347_v22 = vpack.c.bf16 %v3305_v18, %v3304_v17  ;;  %v3326_v17 = vld [vmem:[#allocation2 + $0x10e] sm:$0xff]  ;;  %v3327_v18 = vld [vmem:[#allocation2 + $0x116] sm:$0xff] }
  0xed   : > { %5666 = vmatprep.subr.bf16.mxu1 %v7908_v52 }
  0xee   : > { %5575 = vmatmul.mubr.bf16.gmra.mrb[8].mxu1 %v901_v59  ;;  %v8010_v59 = vld [vmem:[#allocation2 + $0x109] sm:$0xff] }
  0xef   : > { %6051 = vmatmul.mubr.bf16.gmra.mrb[52].mxu0 %v2868_v23  ;;  %5578 = vmatprep.mubr.msk.bf16.mxu1 %vm7489_vm0, %v7908_v52  ;;  %v2870_v62 = vpack.c.bf16 %v8012_v30, %v8010_v59  ;;  %v7454_v23 = vld [vmem:[%s8867_s1 + $0x1f0] sm:$0xff]   ;;  %v915_v6 = vpack.c.bf16 %v8010_v59, %v7991_v28  ;;  %v5161_v28 = vld [vmem:[%s7586_s12 + $0xc8] sm:$0xff]  }
  0xf0   : > { %6054 = vmatprep.mubr.msk.bf16.mxu0 %vm7489_vm0, %v7908_v52  ;;  %5667 = vmatpush3.bf16.msra.mxu1 %v7441_v24  ;;  %v3306_v24 = vld [vmem:[#allocation2 + $0x6e] sm:$0xff] }
  0xf1   : > { %5668 = vmatprep.subr.bf16.mxu1 %v7908_v52 }
  0xf4   : > { %5669 = vmatpush3.bf16.msra.mxu1 %v7443_v29  ;;  %v3307_v29 = vld [vmem:[#allocation2 + $0x76] sm:$0xff] }
  0xf5   : > { %5670 = vmatprep.subr.bf16.mxu1 %v7908_v52  ;;  %v3348_v27 = vpack.c.bf16 %v3307_v29, %v3306_v24  ;;  %v1350_v24 = vld [vmem:[#allocation2 + $0x42] sm:$0xff]  ;;  %v1351_v29 = vld [vmem:[#allocation2 + $0x4a] sm:$0xff] }
  0xf6   : > { %5579 = vmatmul.mubr.bf16.gmra.mrb[12].mxu1 %v902_v0  ;;  %v8026_v0 = vld [vmem:[#allocation2 + $0x119] sm:$0xff] }
  0xf7   : > { %6055 = vmatmul.mubr.bf16.gmra.mrb[56].mxu0 %v2869_v57  ;;  %5582 = vmatprep.mubr.msk.bf16.mxu1 %vm7489_vm0, %v7908_v52  ;;  %v2871_v19 = vpack.c.bf16 %v8028_v32, %v8026_v0  ;;  %v7456_v57 = vld [vmem:[%s8867_s1 + $0x1f8] sm:$0xff]  }
  0xf8   : > { %6058 = vmatprep.mubr.msk.bf16.mxu0 %vm7489_vm0, %v7908_v52  ;;  %5671 = vmatpush3.bf16.msra.mxu1 %v7445_v58  ;;  %v3308_v58 = vld [vmem:[#allocation2 + $0x7e] sm:$0xff] }
  0xf9   : > { %5672 = vmatprep.subr.bf16.mxu1 %v7908_v52 }
  0xfc   : > { %5673 = vmatpush3.bf16.msra.mxu1 %v7447_v63  ;;  %v5131_v63 = vunpack.c.l.bf16 %v5161_v28 }
  0xfd   : > { %5766 = vmatprep.subr.bf16.mxu1 %v7908_v52 }
  0xfe   : > { %5583 = vmatmul.mubr.bf16.gmra.mrb[16].mxu1 %v903_v31  ;;  %v3309_v31 = vld [vmem:[#allocation2 + $0x86] sm:$0xff]  ;;  %305 = vst [vmem:[#allocation2 + $0x190] sm:$0xff] %v5131_v63  ;;  %v3331_v63 = vld [vmem:[#allocation2 + $0x136] sm:$0xff] }
  0xff   : > { %6059 = vmatmul.mubr.bf16.gmra.mrb[60].mxu0 %v2870_v62  ;;  %5586 = vmatprep.mubr.msk.bf16.mxu1 %vm7489_vm0, %v7908_v52  ;;  %v916_v62 = vpack.c.bf16 %v8026_v0, %v8012_v30  ;;  %v3349_v59 = vpack.c.bf16 %v3309_v31, %v3308_v58  ;;  %v917_v30 = vpack.c.bf16 %v8039_v35, %v8028_v32  ;;  %v3314_v32 = vld [vmem:[#allocation2 + $0xae] sm:$0xff]  ;;  %v3315_v35 = vld [vmem:[#allocation2 + $0xb6] sm:$0xff] }
 0x100   : > { %6062 = vmatprep.mubr.msk.bf16.mxu0 %vm7489_vm0, %v7908_v52  ;;  %v1352_v31 = vld [vmem:[#allocation2 + $0x52] sm:$0xff] }
 0x106   : > { %5587 = vmatmul.mubr.bf16.gmra.mrb[20].mxu1 %v904_v14  ;;  %v5132_v14 = vunpack.c.h.bf16 %v5161_v28  ;;  %v7463_v28 = vld [vmem:[%s8867_s1 + $0xf8] sm:$0xff]  }
 0x107   : > { %6063 = vmatmul.mubr.bf16.gmra.mrb[64].mxu0 %v2871_v19  ;;  %5590 = vmatprep.mubr.msk.bf16.mxu1 %vm7489_vm0, %v7908_v52  ;;  %v3310_v19 = vld [vmem:[#allocation2 + $0x8e] sm:$0xff] }
 0x108   : > { %6066 = vmatprep.mubr.msk.bf16.mxu0 %vm7489_vm0, %v7908_v52  ;;  %306 = vst [vmem:[#allocation2 + $0x198] sm:$0xff] %v5132_v14 }
 0x10e   : > { %5591 = vmatmul.mubr.bf16.gmra.mrb[24].mxu1 %v905_v20  ;;  %v3311_v20 = vld [vmem:[#allocation2 + $0x96] sm:$0xff] }
 0x10f   : > { %6067 = vmatmul.mubr.bf16.gmra.mrb[68].mxu0 %v2872_v25  ;;  %5594 = vmatprep.mubr.msk.bf16.mxu1 %vm7489_vm0, %v7908_v52  ;;  %v3350_v0 = vpack.c.bf16 %v3311_v20, %v3310_v19  ;;  %v3312_v25 = vld [vmem:[#allocation2 + $0x9e] sm:$0xff] }
 0x110   : > { %6070 = vmatprep.mubr.msk.bf16.mxu0 %vm7489_vm0, %v7908_v52  ;;  %v1354_v20 = vld [vmem:[#allocation2 + $0x62] sm:$0xff] }
 0x116   : > { %5595 = vmatmul.mubr.bf16.gmra.mrb[28].mxu1 %v906_v39  ;;  %v3313_v39 = vld [vmem:[#allocation2 + $0xa6] sm:$0xff] }
 0x117   : > { %6071 = vmatmul.mubr.bf16.gmra.mrb[72].mxu0 %v2873_v26  ;;  %5598 = vmatprep.mubr.msk.bf16.mxu1 %vm7489_vm0, %v7908_v52  ;;  %v918_v26 = vpack.c.bf16 %v8051_v37, %v8041_v36  ;;  %v3316_v36 = vld [vmem:[#allocation2 + $0xbe] sm:$0xff]  ;;  %v3317_v37 = vld [vmem:[#allocation2 + $0xc6] sm:$0xff] }
 0x118   : > { %6074 = vmatprep.mubr.msk.bf16.mxu0 %vm7489_vm0, %v7908_v52  ;;  %v3353_v50 = vpack.c.bf16 %v3317_v37, %v3316_v36  ;;  %v1358_v37 = vld [vmem:[#allocation2 + $0x82] sm:$0xff] }
 0x11e   : > { %5599 = vmatmul.mubr.bf16.gmra.mrb[32].mxu1 %v907_v43  ;;  %v3351_v43 = vpack.c.bf16 %v3313_v39, %v3312_v25  ;;  %v3333_v25 = vld [vmem:[#allocation2 + $0x146] sm:$0xff] }
 0x11f   : > { %6075 = vmatmul.mubr.bf16.gmra.mrb[76].mxu0 %v2874_v34  ;;  %5602 = vmatprep.mubr.msk.bf16.mxu1 %vm7489_vm0, %v7908_v52  ;;  %v919_v34 = vpack.c.bf16 %v8063_v33, %v8053_v38  ;;  %v3318_v38 = vld [vmem:[#allocation2 + $0xce] sm:$0xff]  ;;  %v3319_v33 = vld [vmem:[#allocation2 + $0xd6] sm:$0xff] }
 0x120   : > { %6078 = vmatprep.mubr.msk.bf16.mxu0 %vm7489_vm0, %v7908_v52 }
 0x126   : > { %5603 = vmatmul.mubr.bf16.gmra.mrb[36].mxu1 %v908_v47  ;;  %v3352_v47 = vpack.c.bf16 %v3315_v35, %v3314_v32  ;;  %v1357_v32 = vld [vmem:[#allocation2 + $0x7a] sm:$0xff]  ;;  %v3334_v35 = vld [vmem:[#allocation2 + $0x14e] sm:$0xff] }
 0x127   : > { %6079 = vmatmul.mubr.bf16.gmra.mrb[80].mxu0 %v2875_v41  ;;  %5606 = vmatprep.mubr.msk.bf16.mxu1 %vm7489_vm0, %v7908_v52  ;;  %v920_v41 = vpack.c.bf16 %v8075_v40, %v8065_v42  ;;  %v1342_v42 = vld [vmem:[#allocation2 + $0x2] sm:$0xff]  ;;  %v1343_v40 = vld [vmem:[#allocation2 + $0xa] sm:$0xff] }
 0x128   : > { %6082 = vmatprep.mubr.msk.bf16.mxu0 %vm7489_vm0, %v7908_v52 }
 0x12e   : > { %5607 = vmatmul.mubr.bf16.gmra.mrb[40].mxu1 %v909_v51  ;;  %v921_v51 = vpack.c.bf16 %v8087_v44, %v8077_v46  ;;  %v1344_v46 = vld [vmem:[#allocation2 + $0x12] sm:$0xff]  ;;  %v1345_v44 = vld [vmem:[#allocation2 + $0x1a] sm:$0xff] }
 0x12f   : > { %6083 = vmatmul.mubr.bf16.gmra.mrb[84].mxu0 %v2876_v54  ;;  %5610 = vmatprep.mubr.msk.bf16.mxu1 %vm7489_vm0, %v7908_v52  ;;  %v3354_v54 = vpack.c.bf16 %v3319_v33, %v3318_v38  ;;  %v3337_v38 = vld [vmem:[#allocation2 + $0x166] sm:$0xff] }
 0x130   : > { %6086 = vmatprep.mubr.msk.bf16.mxu0 %vm7489_vm0, %v7908_v52 }
 0x136   : > { %5611 = vmatmul.mubr.bf16.gmra.mrb[44].mxu1 %v910_v55  ;;  %v1388_v55 = vpack.c.bf16 %v1343_v40, %v1342_v42  ;;  %v1361_v42 = vld [vmem:[#allocation2 + $0x9a] sm:$0xff]  ;;  %v3338_v40 = vld [vmem:[#allocation2 + $0x16e] sm:$0xff] }
 0x137   : > { %6087 = vmatmul.mubr.bf16.gmra.mrb[88].mxu0 %v2877_v61  ;;  %5614 = vmatprep.mubr.msk.bf16.mxu1 %vm7489_vm0, %v7908_v52  ;;  %v3355_v61 = vpack.c.bf16 %v3321_v48, %v3320_v45  ;;  %v3339_v45 = vld [vmem:[#allocation2 + $0x176] sm:$0xff] }
 0x138   : > { %6106 = vmatprep.mubr.msk.bf16.mxu0 %vm7489_vm0, %v7908_v52 }
 0x13e   : > { %5615 = vmatmul.mubr.bf16.gmra.mrb[48].mxu1 %v911_v2  ;;  %v3322_v2 = vld [vmem:[#allocation2 + $0xee] sm:$0xff] }
 0x13f   : > { %6107 = vmatmul.mubr.bf16.vlgmr.msra.gmra.mrb[0].mxu0 %v3344_v3  ;;  %5618 = vmatprep.mubr.msk.bf16.mxu1 %vm7489_vm0, %v7908_v52  ;;  %v3323_v3 = vld [vmem:[#allocation2 + $0xf6] sm:$0xff] }
 0x140   : > { %6199 = vmatpush3.bf16.msra.mxu0 %v7442_v4  ;;  %6110 = vmatprep.mubr.msk.bf16.mxu0 %vm7489_vm0, %v7908_v52  ;;  %v1389_v4 = vpack.c.bf16 %v1345_v44, %v1344_v46  ;;  %v3356_v53 = vpack.c.bf16 %v3323_v3, %v3322_v2  ;;  %v3340_v46 = vld [vmem:[#allocation2 + $0x17e] sm:$0xff]  ;;  %v3341_v44 = vld [vmem:[#allocation2 + $0x186] sm:$0xff]  ;;  %v1364_v3 = vld [vmem:[#allocation2 + $0xb2] sm:$0xff] }
 0x141   : > { %6200 = vmatprep.subr.bf16.mxu0 %v7908_v52  ;;  %v3365_v2 = vpack.c.bf16 %v3341_v44, %v3340_v46  ;;  %v8384_v46 = vld [vmem:[#allocation2 + $0xa7] sm:$0xff] }
 0x144   : > { %6201 = vmatpush3.bf16.msra.mxu0 %v7444_v60  ;;  %v1346_v60 = vld [vmem:[#allocation2 + $0x22] sm:$0xff] }
 0x145   : > { %6202 = vmatprep.subr.bf16.mxu0 %v7908_v52 }
 0x146   : > { %5619 = vmatmul.mubr.bf16.gmra.mrb[52].mxu1 %v912_v5  ;;  %v1347_v5 = vld [vmem:[#allocation2 + $0x2a] sm:$0xff] }
 0x147   : > { %6111 = vmatmul.mubr.bf16.gmra.mrb[4].mxu0 %v3345_v8  ;;  %5622 = vmatprep.mubr.msk.bf16.mxu1 %vm7489_vm0, %v7908_v52  ;;  %v3324_v8 = vld [vmem:[#allocation2 + $0xfe] sm:$0xff]  ;;  %v1390_v11 = vpack.c.bf16 %v1347_v5, %v1346_v60 }
 0x148   : > { %6114 = vmatprep.mubr.msk.bf16.mxu0 %vm7489_vm0, %v7908_v52  ;;  %6203 = vmatpush3.bf16.msra.mxu0 %v7446_v9  ;;  %v3325_v9 = vld [vmem:[#allocation2 + $0x106] sm:$0xff] }
 0x149   : > { %6204 = vmatprep.subr.bf16.mxu0 %v7908_v52 }
 0x14c   : > { %6205 = vmatpush3.bf16.msra.mxu0 %v7448_v7  ;;  %v3357_v7 = vpack.c.bf16 %v3325_v9, %v3324_v8  ;;  %v1366_v8 = vld [vmem:[#allocation2 + $0xc2] sm:$0xff]  ;;  %v1367_v9 = vld [vmem:[#allocation2 + $0xca] sm:$0xff] }
 0x14d   : > { %6206 = vmatprep.subr.bf16.mxu0 %v7908_v52 }
 0x14e   : > { %5623 = vmatmul.mubr.bf16.gmra.mrb[56].mxu1 %v913_v12  ;;  %v7457_v12 = vld [vmem:[%s8867_s1 + $0xe0] sm:$0xff]  }
 0x14f   : > { %6115 = vmatmul.mubr.bf16.gmra.mrb[8].mxu0 %v3346_v13  ;;  %5626 = vmatprep.mubr.msk.bf16.mxu1 %vm7489_vm0, %v7908_v52  ;;  %v1348_v13 = vld [vmem:[#allocation2 + $0x32] sm:$0xff] }
 0x150   : > { %6118 = vmatprep.mubr.msk.bf16.mxu0 %vm7489_vm0, %v7908_v52  ;;  %6207 = vmatpush3.bf16.msra.mxu0 %v7450_v16  ;;  %v1349_v16 = vld [vmem:[#allocation2 + $0x3a] sm:$0xff] }
 0x151   : > { %6208 = vmatprep.subr.bf16.mxu0 %v7908_v52 }
 0x154   : > { %6209 = vmatpush3.bf16.msra.mxu0 %v7452_v15  ;;  %v7459_v15 = vld [vmem:[%s8867_s1 + $0xe8] sm:$0xff]  }
 0x155   : > { %6210 = vmatprep.subr.bf16.mxu0 %v7908_v52 }
 0x156   : > { %5627 = vmatmul.mubr.bf16.gmra.mrb[60].mxu1 %v914_v21  ;;  %v1391_v21 = vpack.c.bf16 %v1349_v16, %v1348_v13  ;;  %v7458_v13 = vld [vmem:[%s8867_s1 + $0x200] sm:$0xff]   ;;  %v1368_v16 = vld [vmem:[#allocation2 + $0xd2] sm:$0xff] }
 0x157   : > { %6119 = vmatmul.mubr.bf16.gmra.mrb[12].mxu0 %v3347_v22  ;;  %5630 = vmatprep.mubr.msk.bf16.mxu1 %vm7489_vm0, %v7908_v52  ;;  %v3358_v22 = vpack.c.bf16 %v3327_v18, %v3326_v17  ;;  %v1369_v17 = vld [vmem:[#allocation2 + $0xda] sm:$0xff] }
 0x158   : > { %6122 = vmatprep.mubr.msk.bf16.mxu0 %vm7489_vm0, %v7908_v52  ;;  %6211 = vmatpush3.bf16.msra.mxu0 %v7454_v23  ;;  %v7461_v23 = vld [vmem:[%s8867_s1 + $0xf0] sm:$0xff]   ;;  %v8294_v18 = vld [vmem:[#allocation2 + $0x3f] sm:$0xff] }
 0x159   : > { %6212 = vmatprep.subr.bf16.mxu0 %v7908_v52 }
 0x15c   : > { %6213 = vmatpush3.bf16.msra.mxu0 %v7456_v57  ;;  %v1392_v57 = vpack.c.bf16 %v1351_v29, %v1350_v24  ;;  %v7462_v24 = vld [vmem:[%s8867_s1 + $0x210] sm:$0xff]   ;;  %v1370_v29 = vld [vmem:[#allocation2 + $0xe2] sm:$0xff] }
 0x15d   : > { %6306 = vmatprep.subr.bf16.mxu0 %v7908_v52 }
 0x15e   : > { %5631 = vmatmul.mubr.bf16.gmra.mrb[64].mxu1 %v915_v6  ;;  %v3328_v6 = vld [vmem:[#allocation2 + $0x11e] sm:$0xff] }
 0x15f   : > { %6123 = vmatmul.mubr.bf16.gmra.mrb[16].mxu0 %v3348_v27  ;;  %5634 = vmatprep.mubr.msk.bf16.mxu1 %vm7489_vm0, %v7908_v52  ;;  %v3329_v27 = vld [vmem:[#allocation2 + $0x126] sm:$0xff] }
 0x160   : > { %6126 = vmatprep.mubr.msk.bf16.mxu0 %vm7489_vm0, %v7908_v52  ;;  %v3359_v58 = vpack.c.bf16 %v3329_v27, %v3328_v6  ;;  %v1371_v6 = vld [vmem:[#allocation2 + $0xea] sm:$0xff] }
 0x161   : > { %v8312_v27 = vld [vmem:[#allocation2 + $0x4f] sm:$0xff] }
 0x166   : > { %5635 = vmatmul.mubr.bf16.gmra.mrb[68].mxu1 %v916_v62  ;;  %v1353_v62 = vld [vmem:[#allocation2 + $0x5a] sm:$0xff] }
 0x167   : > { %6127 = vmatmul.mubr.bf16.gmra.mrb[20].mxu0 %v3349_v59  ;;  %5638 = vmatprep.mubr.msk.bf16.mxu1 %vm7489_vm0, %v7908_v52  ;;  %v3330_v59 = vld [vmem:[#allocation2 + $0x12e] sm:$0xff]  ;;  %v1393_v14 = vpack.c.bf16 %v1353_v62, %v1352_v31  ;;  %v1402_v31 = vpack.c.bf16 %v1371_v6, %v1370_v29  ;;  %v1831_v29 = vld [vmem:[#allocation2 + $0x17] sm:$0xff]  ;;  %v1832_v6 = vld [vmem:[#allocation2 + $0x1f] sm:$0xff] }
 0x168   : > { %6130 = vmatprep.mubr.msk.bf16.mxu0 %vm7489_vm0, %v7908_v52  ;;  %v3360_v19 = vpack.c.bf16 %v3331_v63, %v3330_v59  ;;  %v1372_v59 = vld [vmem:[#allocation2 + $0xf2] sm:$0xff]  ;;  %v1373_v63 = vld [vmem:[#allocation2 + $0xfa] sm:$0xff] }
 0x16e   : > { %5639 = vmatmul.mubr.bf16.gmra.mrb[72].mxu1 %v917_v30  ;;  %v1355_v30 = vld [vmem:[#allocation2 + $0x6a] sm:$0xff] }
 0x16f   : > { %6131 = vmatmul.mubr.bf16.gmra.mrb[24].mxu0 %v3350_v0  ;;  %5642 = vmatprep.mubr.msk.bf16.mxu1 %vm7489_vm0, %v7908_v52  ;;  %v3332_v0 = vld [vmem:[#allocation2 + $0x13e] sm:$0xff]  ;;  %v1394_v39 = vpack.c.bf16 %v1355_v30, %v1354_v20  ;;  %v7466_v20 = vld [vmem:[%s8867_s1 + $0x228] sm:$0xff]   ;;  %v1403_v30 = vpack.c.bf16 %v1373_v63, %v1372_v59 }
 0x170   : > { %6134 = vmatprep.mubr.msk.bf16.mxu0 %vm7489_vm0, %v7908_v52  ;;  %v7471_v59 = vld [vmem:[%s8867_s1 + $0x100] sm:$0xff]  }
 0x171   : > { %v1833_v63 = vld [vmem:[#allocation2 + $0x27] sm:$0xff] }
 0x176   : > { %5643 = vmatmul.mubr.bf16.gmra.mrb[76].mxu1 %v918_v26  ;;  %v3361_v26 = vpack.c.bf16 %v3333_v25, %v3332_v0  ;;  %v7467_v25 = vld [vmem:[%s8867_s1 + $0x230] sm:$0xff]  }
 0x177   : > { %6135 = vmatmul.mubr.bf16.gmra.mrb[28].mxu0 %v3351_v43  ;;  %5646 = vmatprep.mubr.msk.bf16.mxu1 %vm7489_vm0, %v7908_v52  ;;  %v1356_v43 = vld [vmem:[#allocation2 + $0x72] sm:$0xff] }
 0x178   : > { %6138 = vmatprep.mubr.msk.bf16.mxu0 %vm7489_vm0, %v7908_v52 }
 0x17e   : > { %5647 = vmatmul.mubr.bf16.gmra.mrb[80].mxu1 %v919_v34  ;;  %v3335_v34 = vld [vmem:[#allocation2 + $0x156] sm:$0xff] }
 0x17f   : > { %6139 = vmatmul.mubr.bf16.gmra.mrb[32].mxu0 %v3352_v47  ;;  %5650 = vmatprep.mubr.msk.bf16.mxu1 %vm7489_vm0, %v7908_v52  ;;  %v1395_v47 = vpack.c.bf16 %v1357_v32, %v1356_v43  ;;  %v3362_v36 = vpack.c.bf16 %v3335_v34, %v3334_v35  ;;  %v8348_v43 = vld [vmem:[#allocation2 + $0x6f] sm:$0xff]  ;;  %v8350_v32 = vld [vmem:[#allocation2 + $0x77] sm:$0xff] }
 0x180   : > { %6142 = vmatprep.mubr.msk.bf16.mxu0 %vm7489_vm0, %v7908_v52  ;;  %v3837_v34 = vpack.c.bf16 %v8350_v32, %v8348_v43 }
 0x186   : > { %5651 = vmatmul.mubr.bf16.gmra.mrb[84].mxu1 %v920_v41  ;;  %v1359_v41 = vld [vmem:[#allocation2 + $0x8a] sm:$0xff] }
 0x187   : > { %6143 = vmatmul.mubr.bf16.gmra.mrb[36].mxu0 %v3353_v50  ;;  %5654 = vmatprep.mubr.msk.bf16.mxu1 %vm7489_vm0, %v7908_v52  ;;  %v3336_v50 = vld [vmem:[#allocation2 + $0x15e] sm:$0xff]  ;;  %v1396_v33 = vpack.c.bf16 %v1359_v41, %v1358_v37 }
 0x188   : > { %6146 = vmatprep.mubr.msk.bf16.mxu0 %vm7489_vm0, %v7908_v52  ;;  %v7468_v37 = vld [vmem:[%s8867_s1 + $0x238] sm:$0xff]  }
 0x189   : > { %v8362_v41 = vld [vmem:[#allocation2 + $0x7f] sm:$0xff] }
 0x18e   : > { %5655 = vmatmul.mubr.bf16.gmra.mrb[88].mxu1 %v921_v51  ;;  %v3363_v51 = vpack.c.bf16 %v3337_v38, %v3336_v50  ;;  %v8364_v50 = vld [vmem:[#allocation2 + $0x87] sm:$0xff] }
 0x18f   : > { %6147 = vmatmul.mubr.bf16.gmra.mrb[40].mxu0 %v3354_v54  ;;  %5674 = vmatprep.mubr.msk.bf16.mxu1 %vm7489_vm0, %v7908_v52  ;;  %v1360_v54 = vld [vmem:[#allocation2 + $0x92] sm:$0xff] }
 0x190   : > { %6150 = vmatprep.mubr.msk.bf16.mxu0 %vm7489_vm0, %v7908_v52  ;;  %v1397_v48 = vpack.c.bf16 %v1361_v42, %v1360_v54  ;;  %v1379_v54 = vld [vmem:[#allocation2 + $0x12a] sm:$0xff] }
 0x191   : > { %v8372_v42 = vld [vmem:[#allocation2 + $0x8f] sm:$0xff] }
 0x196   : > { %5675 = vmatmul.mubr.bf16.vlgmr.msra.gmra.mrb[0].mxu1 %v1388_v55  ;;  %v3364_v55 = vpack.c.bf16 %v3339_v45, %v3338_v40  ;;  %v8374_v40 = vld [vmem:[#allocation2 + $0x97] sm:$0xff] }
 0x197   : > { %6151 = vmatmul.mubr.bf16.gmra.mrb[44].mxu0 %v3355_v61  ;;  %5767 = vmatpush3.bf16.msra.mxu1 %v7449_v49  ;;  %v1362_v61 = vld [vmem:[#allocation2 + $0xa2] sm:$0xff]  ;;  %v1363_v49 = vld [vmem:[#allocation2 + $0xaa] sm:$0xff] }
 0x198   : > { %5678 = vmatprep.mubr.msk.bf16.mxu1 %vm7489_vm0, %v7908_v52  ;;  %6154 = vmatprep.mubr.msk.bf16.mxu0 %vm7489_vm0, %v7908_v52 }
 0x199   : > { %5768 = vmatprep.subr.bf16.mxu1 %v7908_v52 }
 0x19b   : > { %5769 = vmatpush3.bf16.msra.mxu1 %v7451_v1  ;;  %v1398_v1 = vpack.c.bf16 %v1363_v49, %v1362_v61  ;;  %v1381_v61 = vld [vmem:[#allocation2 + $0x13a] sm:$0xff] }
 0x19c   : > { %5770 = vmatprep.subr.bf16.mxu1 %v7908_v52  ;;  %v8382_v49 = vld [vmem:[#allocation2 + $0x9f] sm:$0xff] }
 0x19e   : > { %5679 = vmatmul.mubr.bf16.gmra.mrb[4].mxu1 %v1389_v4  ;;  %v1365_v4 = vld [vmem:[#allocation2 + $0xba] sm:$0xff] }
 0x19f   : > { %6155 = vmatmul.mubr.bf16.gmra.mrb[48].mxu0 %v3356_v53  ;;  %5682 = vmatprep.mubr.msk.bf16.mxu1 %vm7489_vm0, %v7908_v52  ;;  %v3342_v53 = vld [vmem:[#allocation2 + $0x18e] sm:$0xff]  ;;  %v1399_v60 = vpack.c.bf16 %v1365_v4, %v1364_v3 }
 0x1a0   : > { %6158 = vmatprep.mubr.msk.bf16.mxu0 %vm7489_vm0, %v7908_v52  ;;  %5771 = vmatpush3.bf16.msra.mxu1 %v7453_v56  ;;  %v3343_v56 = vld [vmem:[#allocation2 + $0x196] sm:$0xff]  ;;  %v1383_v3 = vld [vmem:[#allocation2 + $0x14a] sm:$0xff] }
 0x1a1   : > { %5772 = vmatprep.subr.bf16.mxu1 %v7908_v52  ;;  %v3366_v5 = vpack.c.bf16 %v3343_v56, %v3342_v53  ;;  %v8392_v4 = vld [vmem:[#allocation2 + $0xaf] sm:$0xff]  ;;  %v8394_v53 = vld [vmem:[#allocation2 + $0xb7] sm:$0xff] }
 0x1a4   : > { %5773 = vmatpush3.bf16.msra.mxu1 %v7455_v10  ;;  %v8281_v10 = vld [vmem:[#allocation2 + $0x2f] sm:$0xff] }
 0x1a5   : > { %5774 = vmatprep.subr.bf16.mxu1 %v7908_v52 }
 0x1a6   : > { %5683 = vmatmul.mubr.bf16.gmra.mrb[8].mxu1 %v1390_v11  ;;  %v8283_v11 = vld [vmem:[#allocation2 + $0x37] sm:$0xff] }
 0x1a7   : > { %6159 = vmatmul.mubr.bf16.gmra.mrb[52].mxu0 %v3357_v7  ;;  %5686 = vmatprep.mubr.msk.bf16.mxu1 %vm7489_vm0, %v7908_v52  ;;  %v1400_v7 = vpack.c.bf16 %v1367_v9, %v1366_v8  ;;  %v1385_v8 = vld [vmem:[#allocation2 + $0x15a] sm:$0xff] }
 0x1a8   : > { %6162 = vmatprep.mubr.msk.bf16.mxu0 %vm7489_vm0, %v7908_v52  ;;  %5775 = vmatpush3.bf16.msra.mxu1 %v7457_v12  ;;  %v3833_v12 = vpack.c.bf16 %v8283_v11, %v8281_v10  ;;  %v8401_v9 = vld [vmem:[%s7547_s26] sm:$0xff] }
 0x1a9   : > { %5776 = vmatprep.subr.bf16.mxu1 %v7908_v52 }
 0x1ac   : > { %5777 = vmatpush3.bf16.msra.mxu1 %v7459_v15  ;;  %v8296_v15 = vld [vmem:[#allocation2 + $0x47] sm:$0xff] }
 0x1ad   : > { %5778 = vmatprep.subr.bf16.mxu1 %v7908_v52 }
 0x1ae   : > { %5687 = vmatmul.mubr.bf16.gmra.mrb[12].mxu1 %v1391_v21  ;;  %v7460_v21 = vld [vmem:[%s8867_s1 + $0x208] sm:$0xff]  }
 0x1af   : > { %6163 = vmatmul.mubr.bf16.gmra.mrb[56].mxu0 %v3358_v22  ;;  %5690 = vmatprep.mubr.msk.bf16.mxu1 %vm7489_vm0, %v7908_v52  ;;  %v1401_v22 = vpack.c.bf16 %v1369_v17, %v1368_v16  ;;  %v1387_v17 = vld [vmem:[#allocation2 + $0x16a] sm:$0xff] }
 0x1b0   : > { %6166 = vmatprep.mubr.msk.bf16.mxu0 %vm7489_vm0, %v7908_v52  ;;  %5779 = vmatpush3.bf16.msra.mxu1 %v7461_v23  ;;  %v3834_v23 = vpack.c.bf16 %v8296_v15, %v8294_v18 }
 0x1b1   : > { %5780 = vmatprep.subr.bf16.mxu1 %v7908_v52 }
 0x1b4   : > { %5781 = vmatpush3.bf16.msra.mxu1 %v7463_v28  ;;  %v7465_v28 = vld [vmem:[%s8867_s1 + $0x220] sm:$0xff]  }
 0x1b5   : > { %6414 = vmatprep.subr.bf16.mxu1 %v7908_v52 }
 0x1b6   : > { %5691 = vmatmul.mubr.bf16.gmra.mrb[16].mxu1 %v1392_v57  ;;  %v8314_v57 = vld [vmem:[#allocation2 + $0x57] sm:$0xff] }
 0x1b7   : > { %6167 = vmatmul.mubr.bf16.gmra.mrb[60].mxu0 %v3359_v58  ;;  %5694 = vmatprep.mubr.msk.bf16.mxu1 %vm7489_vm0, %v7908_v52  ;;  %v7464_v58 = vld [vmem:[%s8867_s1 + $0x218] sm:$0xff]   ;;  %v3835_v62 = vpack.c.bf16 %v8314_v57, %v8312_v27 }
 0x1b8   : > { %6170 = vmatprep.mubr.msk.bf16.mxu0 %vm7489_vm0, %v7908_v52 }
 0x1be   : > { %5695 = vmatmul.mubr.bf16.gmra.mrb[20].mxu1 %v1393_v14  ;;  %v8330_v14 = vld [vmem:[#allocation2 + $0x5f] sm:$0xff] }
 0x1bf   : > { %6171 = vmatmul.mubr.bf16.gmra.mrb[64].mxu0 %v3360_v19  ;;  %5698 = vmatprep.mubr.msk.bf16.mxu1 %vm7489_vm0, %v7908_v52  ;;  %v8332_v19 = vld [vmem:[#allocation2 + $0x67] sm:$0xff] }
 0x1c0   : > { %6174 = vmatprep.mubr.msk.bf16.mxu0 %vm7489_vm0, %v7908_v52  ;;  %v3836_v0 = vpack.c.bf16 %v8332_v19, %v8330_v14 }
 0x1c6   : > { %5699 = vmatmul.mubr.bf16.gmra.mrb[24].mxu1 %v1394_v39  ;;  %v1374_v39 = vld [vmem:[#allocation2 + $0x102] sm:$0xff] }
 0x1c7   : > { %6175 = vmatmul.mubr.bf16.gmra.mrb[68].mxu0 %v3361_v26  ;;  %5702 = vmatprep.mubr.msk.bf16.mxu1 %vm7489_vm0, %v7908_v52  ;;  %v1375_v26 = vld [vmem:[#allocation2 + $0x10a] sm:$0xff] }
 0x1c8   : > { %6178 = vmatprep.mubr.msk.bf16.mxu0 %vm7489_vm0, %v7908_v52  ;;  %v1404_v35 = vpack.c.bf16 %v1375_v26, %v1374_v39  ;;  %v7472_v39 = vld [vmem:[%s8867_s1 + $0x108] sm:$0xff]   ;;  %v8454_v26 = vld [vmem:[#allocation2 + $0xff] sm:$0xff] }
 0x1ce   : > { %5703 = vmatmul.mubr.bf16.gmra.mrb[28].mxu1 %v1395_v47  ;;  %v1376_v47 = vld [vmem:[#allocation2 + $0x112] sm:$0xff] }
 0x1cf   : > { %6179 = vmatmul.mubr.bf16.gmra.mrb[72].mxu0 %v3362_v36  ;;  %5706 = vmatprep.mubr.msk.bf16.mxu1 %vm7489_vm0, %v7908_v52  ;;  %v1377_v36 = vld [vmem:[#allocation2 + $0x11a] sm:$0xff] }
 0x1d0   : > { %6182 = vmatprep.mubr.msk.bf16.mxu0 %vm7489_vm0, %v7908_v52  ;;  %v1405_v38 = vpack.c.bf16 %v1377_v36, %v1376_v47  ;;  %v7474_v36 = vld [vmem:[%s8867_s1 + $0x118] sm:$0xff]  }
 0x1d6   : > { %5707 = vmatmul.mubr.bf16.gmra.mrb[32].mxu1 %v1396_v33  ;;  %v3838_v33 = vpack.c.bf16 %v8364_v50, %v8362_v41 }
 0x1d7   : > { %6183 = vmatmul.mubr.bf16.gmra.mrb[76].mxu0 %v3363_v51  ;;  %5710 = vmatprep.mubr.msk.bf16.mxu1 %vm7489_vm0, %v7908_v52  ;;  %v1378_v51 = vld [vmem:[#allocation2 + $0x122] sm:$0xff] }
 0x1d8   : > { %6186 = vmatprep.mubr.msk.bf16.mxu0 %vm7489_vm0, %v7908_v52  ;;  %v1406_v45 = vpack.c.bf16 %v1379_v54, %v1378_v51  ;;  %v7476_v51 = vld [vmem:[%s8867_s1 + $0x128] sm:$0xff]   ;;  %v8494_v54 = vld [vmem:[#allocation2 + $0x11f] sm:$0xff] }
 0x1de   : > { %5711 = vmatmul.mubr.bf16.gmra.mrb[36].mxu1 %v1397_v48  ;;  %v3839_v48 = vpack.c.bf16 %v8374_v40, %v8372_v42 }
 0x1df   : > { %6187 = vmatmul.mubr.bf16.gmra.mrb[80].mxu0 %v3364_v55  ;;  %5714 = vmatprep.mubr.msk.bf16.mxu1 %vm7489_vm0, %v7908_v52  ;;  %v1380_v55 = vld [vmem:[#allocation2 + $0x132] sm:$0xff] }
 0x1e0   : > { %6190 = vmatprep.mubr.msk.bf16.mxu0 %vm7489_vm0, %v7908_v52  ;;  %v1407_v44 = vpack.c.bf16 %v1381_v61, %v1380_v55  ;;  %v7478_v55 = vld [vmem:[%s8867_s1 + $0x138] sm:$0xff]   ;;  %v8513_v61 = vld [vmem:[#allocation2 + $0x12f] sm:$0xff] }
 0x1e6   : > { %5715 = vmatmul.mubr.bf16.gmra.mrb[40].mxu1 %v1398_v1  ;;  %v3840_v1 = vpack.c.bf16 %v8384_v46, %v8382_v49 }
 0x1e7   : > { %6191 = vmatmul.mubr.bf16.gmra.mrb[84].mxu0 %v3365_v2  ;;  %5718 = vmatprep.mubr.msk.bf16.mxu1 %vm7489_vm0, %v7908_v52  ;;  %v1382_v2 = vld [vmem:[#allocation2 + $0x142] sm:$0xff] }
 0x1e8   : > { %6194 = vmatprep.mubr.msk.bf16.mxu0 %vm7489_vm0, %v7908_v52  ;;  %v1408_v56 = vpack.c.bf16 %v1383_v3, %v1382_v2  ;;  %v8527_v2 = vld [vmem:[#allocation2 + $0x147] sm:$0xff]  ;;  %v1883_v3 = vpack.c.bf16 %v8362_v41, %v8350_v32  ;;  %v8549_v41 = vld [vmem:[#allocation2 + $0x15f] sm:$0xff] }
 0x1ee   : > { %5719 = vmatmul.mubr.bf16.gmra.mrb[44].mxu1 %v1399_v60  ;;  %v3841_v60 = vpack.c.bf16 %v8394_v53, %v8392_v4 }
 0x1ef   : > { %6195 = vmatmul.mubr.bf16.gmra.mrb[88].mxu0 %v3366_v5  ;;  %5722 = vmatprep.mubr.msk.bf16.mxu1 %vm7489_vm0, %v7908_v52  ;;  %v1384_v5 = vld [vmem:[#allocation2 + $0x152] sm:$0xff] }
 0x1f0   : > { %6214 = vmatprep.mubr.msk.bf16.mxu0 %vm7489_vm0, %v7908_v52 }
 0x1f6   : > { %5723 = vmatmul.mubr.bf16.gmra.mrb[48].mxu1 %v1400_v7  ;;  %v8405_v7 = vld [vmem:[#allocation2 + $0xbf] sm:$0xff] }
 0x1f7   : > { %6215 = vmatmul.mubr.bf16.vlgmr.msra.gmra.mrb[0].mxu0 %v3833_v12  ;;  %5726 = vmatprep.mubr.msk.bf16.mxu1 %vm7489_vm0, %v7908_v52  ;;  %v8407_v12 = vld [vmem:[#allocation2 + $0xc7] sm:$0xff] }
 0x1f8   : > { %6307 = vmatpush3.bf16.msra.mxu0 %v7458_v13  ;;  %6218 = vmatprep.mubr.msk.bf16.mxu0 %vm7489_vm0, %v7908_v52  ;;  %v1409_v13 = vpack.c.bf16 %v1385_v8, %v1384_v5  ;;  %v3842_v16 = vpack.c.bf16 %v8407_v12, %v8405_v7  ;;  %v8551_v5 = vld [vmem:[#allocation2 + $0x167] sm:$0xff]  ;;  %v1885_v8 = vpack.c.bf16 %v8382_v49, %v8374_v40  ;;  %v8573_v49 = vld [vmem:[#allocation2 + $0x17f] sm:$0xff] }
 0x1f9   : > { %6308 = vmatprep.subr.bf16.mxu0 %v7908_v52 }
 0x1fc   : > { %6309 = vmatpush3.bf16.msra.mxu0 %v7460_v21  ;;  %v8415_v21 = vld [vmem:[#allocation2 + $0xcf] sm:$0xff] }
 0x1fd   : > { %6310 = vmatprep.subr.bf16.mxu0 %v7908_v52 }
 0x1fe   : > { %5727 = vmatmul.mubr.bf16.gmra.mrb[52].mxu1 %v1401_v22  ;;  %v8417_v22 = vld [vmem:[#allocation2 + $0xd7] sm:$0xff] }
 0x1ff   : > { %6219 = vmatmul.mubr.bf16.gmra.mrb[4].mxu0 %v3834_v23  ;;  %5730 = vmatprep.mubr.msk.bf16.mxu1 %vm7489_vm0, %v7908_v52 }
 0x200   : > { %6222 = vmatprep.mubr.msk.bf16.mxu0 %vm7489_vm0, %v7908_v52  ;;  %6311 = vmatpush3.bf16.msra.mxu0 %v7462_v24  ;;  %v3843_v24 = vpack.c.bf16 %v8417_v22, %v8415_v21 }
 0x201   : > { %6312 = vmatprep.subr.bf16.mxu0 %v7908_v52 }
 0x204   : > { %6313 = vmatpush3.bf16.msra.mxu0 %v7464_v58  ;;  %v8425_v58 = vld [vmem:[#allocation2 + $0xdf] sm:$0xff] }
 0x205   : > { %6314 = vmatprep.subr.bf16.mxu0 %v7908_v52 }
 0x206   : > { %5731 = vmatmul.mubr.bf16.gmra.mrb[56].mxu1 %v1402_v31  ;;  %v8427_v31 = vld [vmem:[#allocation2 + $0xe7] sm:$0xff] }
 0x207   : > { %6223 = vmatmul.mubr.bf16.gmra.mrb[8].mxu0 %v3835_v62  ;;  %5734 = vmatprep.mubr.msk.bf16.mxu1 %vm7489_vm0, %v7908_v52  ;;  %v1877_v62 = vpack.c.bf16 %v1832_v6, %v1831_v29  ;;  %v1889_v6 = vpack.c.bf16 %v8425_v58, %v8417_v22  ;;  %v4280_v22 = vld [vmem:[#allocation2 + $0x50] sm:$0xff] }
 0x208   : > { %6226 = vmatprep.mubr.msk.bf16.mxu0 %vm7489_vm0, %v7908_v52  ;;  %6315 = vmatpush3.bf16.msra.mxu0 %v7465_v28  ;;  %v3844_v28 = vpack.c.bf16 %v8427_v31, %v8425_v58  ;;  %v4281_v58 = vld [vmem:[#allocation2 + $0x58] sm:$0xff] }
 0x209   : > { %6316 = vmatprep.subr.bf16.mxu0 %v7908_v52 }
 0x20c   : > { %6317 = vmatpush3.bf16.msra.mxu0 %v7466_v20  ;;  %v8438_v20 = vld [vmem:[#allocation2 + $0xef] sm:$0xff] }
 0x20d   : > { %6318 = vmatprep.subr.bf16.mxu0 %v7908_v52 }
 0x20e   : > { %5735 = vmatmul.mubr.bf16.gmra.mrb[60].mxu1 %v1403_v30  ;;  %v8440_v30 = vld [vmem:[#allocation2 + $0xf7] sm:$0xff] }
 0x20f   : > { %6227 = vmatmul.mubr.bf16.gmra.mrb[12].mxu0 %v3836_v0  ;;  %5738 = vmatprep.mubr.msk.bf16.mxu1 %vm7489_vm0, %v7908_v52  ;;  %v1878_v0 = vpack.c.bf16 %v8281_v10, %v1833_v63  ;;  %v8456_v10 = vld [vmem:[#allocation2 + $0x107] sm:$0xff]  ;;  %v1891_v63 = vpack.c.bf16 %v8454_v26, %v8440_v30 }
 0x210   : > { %6230 = vmatprep.mubr.msk.bf16.mxu0 %vm7489_vm0, %v7908_v52  ;;  %6319 = vmatpush3.bf16.msra.mxu0 %v7467_v25  ;;  %v3845_v25 = vpack.c.bf16 %v8440_v30, %v8438_v20  ;;  %v3846_v47 = vpack.c.bf16 %v8456_v10, %v8454_v26  ;;  %v4284_v30 = vld [vmem:[#allocation2 + $0x70] sm:$0xff]  ;;  %v4285_v26 = vld [vmem:[#allocation2 + $0x78] sm:$0xff] }
 0x211   : > { %6320 = vmatprep.subr.bf16.mxu0 %v7908_v52 }
 0x214   : > { %6321 = vmatpush3.bf16.msra.mxu0 %v7468_v37  ;;  %v8474_v37 = vld [vmem:[#allocation2 + $0x10f] sm:$0xff] }
 0x216   : > { %5739 = vmatmul.mubr.bf16.gmra.mrb[64].mxu1 %v1404_v35  ;;  %v7473_v35 = vld [vmem:[%s8867_s1 + $0x110] sm:$0xff]  }
 0x217   : > { %6231 = vmatmul.mubr.bf16.gmra.mrb[16].mxu0 %v3837_v34  ;;  %5742 = vmatprep.mubr.msk.bf16.mxu1 %vm7489_vm0, %v7908_v52  ;;  %v1879_v34 = vpack.c.bf16 %v8294_v18, %v8283_v11  ;;  %v8476_v11 = vld [vmem:[#allocation2 + $0x117] sm:$0xff]  ;;  %v7475_v18 = vld [vmem:[%s8867_s1 + $0x120] sm:$0xff]  }
 0x218   : > { %6234 = vmatprep.mubr.msk.bf16.mxu0 %vm7489_vm0, %v7908_v52 }
 0x21e   : > { %5743 = vmatmul.mubr.bf16.gmra.mrb[68].mxu1 %v1405_v38  ;;  %v1880_v38 = vpack.c.bf16 %v8312_v27, %v8296_v15  ;;  %v8496_v15 = vld [vmem:[#allocation2 + $0x127] sm:$0xff]  ;;  %v7477_v27 = vld [vmem:[%s8867_s1 + $0x130] sm:$0xff]  }
 0x21f   : > { %6235 = vmatmul.mubr.bf16.gmra.mrb[20].mxu0 %v3838_v33  ;;  %5746 = vmatprep.mubr.msk.bf16.mxu1 %vm7489_vm0, %v7908_v52  ;;  %v3847_v33 = vpack.c.bf16 %v8476_v11, %v8474_v37 }
 0x220   : > { %6238 = vmatprep.mubr.msk.bf16.mxu0 %vm7489_vm0, %v7908_v52 }
 0x226   : > { %5747 = vmatmul.mubr.bf16.gmra.mrb[72].mxu1 %v1406_v45  ;;  %v1881_v45 = vpack.c.bf16 %v8330_v14, %v8314_v57  ;;  %v1882_v57 = vpack.c.bf16 %v8348_v43, %v8332_v19  ;;  %v8537_v43 = vld [vmem:[#allocation2 + $0x14f] sm:$0xff] }
 0x227   : > { %6239 = vmatmul.mubr.bf16.gmra.mrb[24].mxu0 %v3839_v48  ;;  %5750 = vmatprep.mubr.msk.bf16.mxu1 %vm7489_vm0, %v7908_v52  ;;  %v3848_v48 = vpack.c.bf16 %v8496_v15, %v8494_v54 }
 0x228   : > { %6242 = vmatprep.mubr.msk.bf16.mxu0 %vm7489_vm0, %v7908_v52 }
 0x22e   : > { %5751 = vmatmul.mubr.bf16.gmra.mrb[76].mxu1 %v1407_v44  ;;  %v8515_v44 = vld [vmem:[#allocation2 + $0x137] sm:$0xff] }
 0x22f   : > { %6243 = vmatmul.mubr.bf16.gmra.mrb[28].mxu0 %v3840_v1  ;;  %5754 = vmatprep.mubr.msk.bf16.mxu1 %vm7489_vm0, %v7908_v52  ;;  %v3849_v14 = vpack.c.bf16 %v8515_v44, %v8513_v61  ;;  %v8525_v1 = vld [vmem:[#allocation2 + $0x13f] sm:$0xff] }
 0x230   : > { %6246 = vmatprep.mubr.msk.bf16.mxu0 %vm7489_vm0, %v7908_v52  ;;  %v3850_v19 = vpack.c.bf16 %v8527_v2, %v8525_v1 }
 0x236   : > { %5755 = vmatmul.mubr.bf16.gmra.mrb[80].mxu1 %v1408_v56  ;;  %v8539_v56 = vld [vmem:[#allocation2 + $0x157] sm:$0xff] }
 0x237   : > { %6247 = vmatmul.mubr.bf16.gmra.mrb[32].mxu0 %v3841_v60  ;;  %5758 = vmatprep.mubr.msk.bf16.mxu1 %vm7489_vm0, %v7908_v52  ;;  %v1386_v52 = vld [vmem:[#allocation2 + $0x162] sm:$0xff]  ;;  %v1884_v60 = vpack.c.bf16 %v8372_v42, %v8364_v50  ;;  %v3851_v32 = vpack.c.bf16 %v8539_v56, %v8537_v43  ;;  %v3852_v50 = vpack.c.bf16 %v8551_v5, %v8549_v41  ;;  %v8561_v42 = vld [vmem:[#allocation2 + $0x16f] sm:$0xff] }
 0x238   : > { %6250 = vmatprep.mubr.msk.bf16.mxu0 %vm7489_vm0, %v8401_v9  ;;  %v1410_v23 = vpack.c.bf16 %v1387_v17, %v1386_v52  ;;  %v3830_v52 = vld [vmem:[#allocation2 + $0x187] sm:$0xff]  ;;  %v1887_v17 = vpack.c.bf16 %v8405_v7, %v8394_v53  ;;  %v4276_v53 = vld [vmem:[#allocation2 + $0x30] sm:$0xff]  ;;  %v4277_v7 = vld [vmem:[#allocation2 + $0x38] sm:$0xff] }
 0x23e   : > { %5759 = vmatmul.mubr.bf16.gmra.mrb[84].mxu1 %v1409_v13  ;;  %v8563_v13 = vld [vmem:[#allocation2 + $0x177] sm:$0xff] }
 0x23f   : > { %6251 = vmatmul.mubr.bf16.gmra.mrb[36].mxu0 %v3842_v16  ;;  %5762 = vmatprep.mubr.msk.bf16.mxu1 %vm7489_vm0, %v8401_v9  ;;  %v1886_v16 = vpack.c.bf16 %v8392_v4, %v8384_v46  ;;  %v3853_v40 = vpack.c.bf16 %v8563_v13, %v8561_v42  ;;  %v3831_v46 = vld [vmem:[#allocation2 + $0x18f] sm:$0xff]  ;;  %v3832_v4 = vld [vmem:[#allocation2 + $0x197] sm:$0xff] }
 0x240   : > { %6254 = vmatprep.mubr.msk.bf16.mxu0 %vm7489_vm0, %v8401_v9  ;;  %v3855_v29 = vpack.c.bf16 %v3832_v4, %v3831_v46  ;;  %v2353_v4 = vld [vmem:[#allocation2 + $0x120] sm:$0xff] }
 0x246   : > { %5763 = vmatmul.mubr.bf16.gmra.mrb[88].mxu1 %v1410_v23  ;;  %v3854_v23 = vpack.c.bf16 %v3830_v52, %v8573_v49  ;;  %v2351_v52 = vld [vmem:[#allocation2 + $0x110] sm:$0xff] }
 0x247   : > { %6255 = vmatmul.mubr.bf16.gmra.mrb[40].mxu0 %v3843_v24  ;;  %5782 = vmatprep.mubr.msk.bf16.mxu1 %vm7489_vm0, %v8401_v9  ;;  %v1888_v24 = vpack.c.bf16 %v8415_v21, %v8407_v12  ;;  %v4278_v12 = vld [vmem:[#allocation2 + $0x40] sm:$0xff]  ;;  %v4279_v21 = vld [vmem:[#allocation2 + $0x48] sm:$0xff] }
 0x248   : > { %6258 = vmatprep.mubr.msk.bf16.mxu0 %vm7489_vm0, %v8401_v9 }
 0x24e   : > { %5783 = vmatmul.mubr.bf16.vlgmr.msra.gmra.mrb[0].mxu1 %v1877_v62  ;;  %v4322_v62 = vpack.c.bf16 %v4277_v7, %v4276_v53 }
 0x24f   : > { %6259 = vmatmul.mubr.bf16.gmra.mrb[44].mxu0 %v3844_v28  ;;  %6422 = vmatpush3.bf16.msra.mxu1 %v7471_v59  ;;  %v1890_v28 = vpack.c.bf16 %v8438_v20, %v8427_v31  ;;  %v4323_v59 = vpack.c.bf16 %v4279_v21, %v4278_v12  ;;  %v4282_v31 = vld [vmem:[#allocation2 + $0x60] sm:$0xff]  ;;  %v4283_v20 = vld [vmem:[#allocation2 + $0x68] sm:$0xff]  ;;  %v2355_v21 = vld [vmem:[#allocation2 + $0x130] sm:$0xff] }
 0x250   : > { %5786 = vmatprep.mubr.msk.bf16.mxu1 %vm7489_vm0, %v8401_v9  ;;  %6262 = vmatprep.mubr.msk.bf16.mxu0 %vm7489_vm0, %v8401_v9 }
 0x251   : > { %6415 = vmatprep.subr.bf16.mxu1 %v8401_v9 }
 0x253   : > { %6423 = vmatpush3.bf16.msra.mxu1 %v7472_v39  ;;  %v4325_v39 = vpack.c.bf16 %v4283_v20, %v4282_v31  ;;  %v2357_v20 = vld [vmem:[#allocation2 + $0x140] sm:$0xff] }
 0x254   : > { %6416 = vmatprep.subr.bf16.mxu1 %v8401_v9 }
 0x256   : > { %5787 = vmatmul.mubr.bf16.gmra.mrb[4].mxu1 %v1878_v0  ;;  %v4324_v0 = vpack.c.bf16 %v4281_v58, %v4280_v22 }
 0x257   : > { %6263 = vmatmul.mubr.bf16.gmra.mrb[48].mxu0 %v3845_v25  ;;  %5790 = vmatprep.mubr.msk.bf16.mxu1 %vm7489_vm0, %v8401_v9  ;;  %v1892_v25 = vpack.c.bf16 %v8474_v37, %v8456_v10  ;;  %v4286_v10 = vld [vmem:[#allocation2 + $0x80] sm:$0xff] }
 0x258   : > { %6266 = vmatprep.mubr.msk.bf16.mxu0 %vm7489_vm0, %v8401_v9  ;;  %6424 = vmatpush3.bf16.msra.mxu1 %v7473_v35  ;;  %v1893_v35 = vpack.c.bf16 %v8494_v54, %v8476_v11  ;;  %v4288_v11 = vld [vmem:[#allocation2 + $0x90] sm:$0xff]  ;;  %v4291_v54 = vld [vmem:[#allocation2 + $0xa8] sm:$0xff] }
 0x259   : > { %6417 = vmatprep.subr.bf16.mxu1 %v8401_v9 }
 0x25c   : > { %6425 = vmatpush3.bf16.msra.mxu1 %v7474_v36  ;;  %v1894_v36 = vpack.c.bf16 %v8513_v61, %v8496_v15  ;;  %v1896_v15 = vpack.c.bf16 %v8537_v43, %v8527_v2  ;;  %v4296_v2 = vld [vmem:[#allocation2 + $0xd0] sm:$0xff] }
 0x25d   : > { %6418 = vmatprep.subr.bf16.mxu1 %v8401_v9 }
 0x25e   : > { %5791 = vmatmul.mubr.bf16.gmra.mrb[8].mxu1 %v1879_v34  ;;  %v4326_v34 = vpack.c.bf16 %v4285_v26, %v4284_v30 }
 0x25f   : > { %6267 = vmatmul.mubr.bf16.gmra.mrb[52].mxu0 %v3846_v47  ;;  %5794 = vmatprep.mubr.msk.bf16.mxu1 %vm7489_vm0, %v8401_v9  ;;  %v4287_v47 = vld [vmem:[#allocation2 + $0x88] sm:$0xff] }
 0x260   : > { %6270 = vmatprep.mubr.msk.bf16.mxu0 %vm7489_vm0, %v8401_v9  ;;  %6426 = vmatpush3.bf16.msra.mxu1 %v7475_v18  ;;  %v4327_v37 = vpack.c.bf16 %v4287_v47, %v4286_v10  ;;  %v4289_v18 = vld [vmem:[#allocation2 + $0x98] sm:$0xff]  ;;  %v2359_v47 = vld [vmem:[#allocation2 + $0x150] sm:$0xff] }
 0x261   : > { %6419 = vmatprep.subr.bf16.mxu1 %v8401_v9 }
 0x264   : > { %6427 = vmatpush3.bf16.msra.mxu1 %v7476_v51  ;;  %v4290_v51 = vld [vmem:[#allocation2 + $0xa0] sm:$0xff] }
 0x265   : > { %6420 = vmatprep.subr.bf16.mxu1 %v8401_v9 }
 0x266   : > { %5795 = vmatmul.mubr.bf16.gmra.mrb[12].mxu1 %v1880_v38  ;;  %v1895_v38 = vpack.c.bf16 %v8525_v1, %v8515_v44  ;;  %v4294_v44 = vld [vmem:[#allocation2 + $0xc0] sm:$0xff] }
 0x267   : > { %6271 = vmatmul.mubr.bf16.gmra.mrb[56].mxu0 %v3847_v33  ;;  %5798 = vmatprep.mubr.msk.bf16.mxu1 %vm7489_vm0, %v8401_v9  ;;  %v4328_v33 = vpack.c.bf16 %v4289_v18, %v4288_v11 }
 0x268   : > { %6274 = vmatprep.mubr.msk.bf16.mxu0 %vm7489_vm0, %v8401_v9  ;;  %6428 = vmatpush3.bf16.msra.mxu1 %v7477_v27  ;;  %v4329_v27 = vpack.c.bf16 %v4291_v54, %v4290_v51  ;;  %v2361_v54 = vld [vmem:[#allocation2 + $0x160] sm:$0xff] }
 0x269   : > { %6421 = vmatprep.subr.bf16.mxu1 %v8401_v9 }
 0x26c   : > { %6429 = vmatpush3.bf16.msra.mxu1 %v7478_v55  ;;  %v1897_v55 = vpack.c.bf16 %v8549_v41, %v8539_v56  ;;  %v2345_v56 = vld [vmem:[#allocation2 + $0xe0] sm:$0xff] }
 0x26e   : > { %5799 = vmatmul.mubr.bf16.gmra.mrb[16].mxu1 %v1881_v45  ;;  %v4292_v45 = vld [vmem:[#allocation2 + $0xb0] sm:$0xff] }
 0x26f   : > { %6275 = vmatmul.mubr.bf16.gmra.mrb[60].mxu0 %v3848_v48  ;;  %5802 = vmatprep.mubr.msk.bf16.mxu1 %vm7489_vm0, %v8401_v9  ;;  %v4293_v48 = vld [vmem:[#allocation2 + $0xb8] sm:$0xff] }
 0x270   : > { %6278 = vmatprep.mubr.msk.bf16.mxu0 %vm7489_vm0, %v8401_v9  ;;  %v4330_v61 = vpack.c.bf16 %v4293_v48, %v4292_v45 }
 0x276   : > { %5803 = vmatmul.mubr.bf16.gmra.mrb[20].mxu1 %v1882_v57  ;;  %v4295_v57 = vld [vmem:[#allocation2 + $0xc8] sm:$0xff] }
 0x277   : > { %6279 = vmatmul.mubr.bf16.gmra.mrb[64].mxu0 %v3849_v14  ;;  %5806 = vmatprep.mubr.msk.bf16.mxu1 %vm7489_vm0, %v8401_v9  ;;  %v1898_v14 = vpack.c.bf16 %v8561_v42, %v8551_v5  ;;  %v4331_v1 = vpack.c.bf16 %v4295_v57, %v4294_v44  ;;  %v2347_v5 = vld [vmem:[#allocation2 + $0xf0] sm:$0xff] }
 0x278   : > { %6282 = vmatprep.mubr.msk.bf16.mxu0 %vm7489_vm0, %v8401_v9  ;;  %v2363_v57 = vld [vmem:[#allocation2 + $0x170] sm:$0xff] }
 0x27e   : > { %5807 = vmatmul.mubr.bf16.gmra.mrb[24].mxu1 %v1883_v3  ;;  %v4297_v3 = vld [vmem:[#allocation2 + $0xd8] sm:$0xff] }
 0x27f   : > { %6283 = vmatmul.mubr.bf16.gmra.mrb[68].mxu0 %v3850_v19  ;;  %5810 = vmatprep.mubr.msk.bf16.mxu1 %vm7489_vm0, %v8401_v9  ;;  %v1899_v19 = vpack.c.bf16 %v8573_v49, %v8563_v13  ;;  %v4332_v43 = vpack.c.bf16 %v4297_v3, %v4296_v2  ;;  %v2349_v13 = vld [vmem:[#allocation2 + $0x100] sm:$0xff] }
 0x280   : > { %6286 = vmatprep.mubr.msk.bf16.mxu0 %vm7489_vm0, %v8401_v9 }
 0x286   : > { %5811 = vmatmul.mubr.bf16.gmra.mrb[28].mxu1 %v1884_v60  ;;  %v4299_v60 = vld [vmem:[#allocation2 + $0xe8] sm:$0xff] }
 0x287   : > { %6287 = vmatmul.mubr.bf16.gmra.mrb[72].mxu0 %v3851_v32  ;;  %5814 = vmatprep.mubr.msk.bf16.mxu1 %vm7489_vm0, %v8401_v9  ;;  %v2378_v32 = vpack.c.bf16 %v2345_v56, %v4297_v3  ;;  %v4333_v41 = vpack.c.bf16 %v4299_v60, %v2345_v56 }
 0x288   : > { %6290 = vmatprep.mubr.msk.bf16.mxu0 %vm7489_vm0, %v8401_v9 }
 0x28e   : > { %5815 = vmatmul.mubr.bf16.gmra.mrb[32].mxu1 %v1885_v8  ;;  %v4301_v8 = vld [vmem:[#allocation2 + $0xf8] sm:$0xff] }
 0x28f   : > { %6291 = vmatmul.mubr.bf16.gmra.mrb[76].mxu0 %v3852_v50  ;;  %5818 = vmatprep.mubr.msk.bf16.mxu1 %vm7489_vm0, %v8401_v9  ;;  %v2379_v50 = vpack.c.bf16 %v2347_v5, %v4299_v60  ;;  %v4334_v42 = vpack.c.bf16 %v4301_v8, %v2347_v5  ;;  %v2365_v60 = vld [vmem:[#allocation2 + $0x180] sm:$0xff] }
 0x290   : > { %6294 = vmatprep.mubr.msk.bf16.mxu0 %vm7489_vm0, %v8401_v9 }
 0x296   : > { %5819 = vmatmul.mubr.bf16.gmra.mrb[36].mxu1 %v1886_v16  ;;  %v4303_v16 = vld [vmem:[#allocation2 + $0x108] sm:$0xff] }
 0x297   : > { %6295 = vmatmul.mubr.bf16.gmra.mrb[80].mxu0 %v3853_v40  ;;  %5822 = vmatprep.mubr.msk.bf16.mxu1 %vm7489_vm0, %v8401_v9  ;;  %v2380_v40 = vpack.c.bf16 %v2349_v13, %v4301_v8  ;;  %v4335_v49 = vpack.c.bf16 %v4303_v16, %v2349_v13 }
 0x298   : > { %6298 = vmatprep.mubr.msk.bf16.mxu0 %vm7489_vm0, %v8401_v9 }
 0x29e   : > { %5823 = vmatmul.mubr.bf16.gmra.mrb[40].mxu1 %v1887_v17  ;;  %v4305_v17 = vld [vmem:[#allocation2 + $0x118] sm:$0xff] }
 0x29f   : > { %6299 = vmatmul.mubr.bf16.gmra.mrb[84].mxu0 %v3854_v23  ;;  %5826 = vmatprep.mubr.msk.bf16.mxu1 %vm7489_vm0, %v8401_v9  ;;  %v2381_v23 = vpack.c.bf16 %v2351_v52, %v4303_v16  ;;  %v4336_v46 = vpack.c.bf16 %v4305_v17, %v2351_v52  ;;  %v2382_v7 = vpack.c.bf16 %v2353_v4, %v4305_v17  ;;  %v4320_v16 = vld [vmem:[#allocation2 + $0x190] sm:$0xff] }
 0x2a0   : > { %6302 = vmatprep.mubr.msk.bf16.mxu0 %vm7489_vm0, %v8401_v9 }
 0x2a6   : > { %5827 = vmatmul.mubr.bf16.gmra.mrb[44].mxu1 %v1888_v24  ;;  %v4307_v24 = vld [vmem:[#allocation2 + $0x128] sm:$0xff] }
 0x2a7   : > { %6303 = vmatmul.mubr.bf16.gmra.mrb[88].mxu0 %v3855_v29  ;;  %5830 = vmatprep.mubr.msk.bf16.mxu1 %vm7489_vm0, %v8401_v9  ;;  %v2383_v58 = vpack.c.bf16 %v2355_v21, %v4307_v24 }
 0x2a8   : > { %6322 = vmatprep.mubr.msk.bf16.mxu0 %vm7489_vm0, %v8401_v9 }
 0x2ae   : > { %5831 = vmatmul.mubr.bf16.gmra.mrb[48].mxu1 %v1889_v6 }
 0x2af   : > { %6323 = vmatmul.mubr.bf16.vlgmr.msra.gmra.mrb[0].mxu0 %v4322_v62  ;;  %5834 = vmatprep.mubr.msk.bf16.mxu1 %vm7489_vm0, %v8401_v9  ;;  %v4337_v62 = vpack.c.bf16 %v4307_v24, %v2353_v4 }
 0x2b0   : > { %6326 = vmatprep.mubr.msk.bf16.mxu0 %vm7489_vm0, %v8401_v9 }
 0x2b6   : > { %5835 = vmatmul.mubr.bf16.gmra.mrb[52].mxu1 %v1890_v28  ;;  %v4309_v28 = vld [vmem:[#allocation2 + $0x138] sm:$0xff] }
 0x2b7   : > { %6327 = vmatmul.mubr.bf16.gmra.mrb[4].mxu0 %v4323_v59  ;;  %5838 = vmatprep.mubr.msk.bf16.mxu1 %vm7489_vm0, %v8401_v9  ;;  %v2384_v26 = vpack.c.bf16 %v2357_v20, %v4309_v28 }
 0x2b8   : > { %6330 = vmatprep.mubr.msk.bf16.mxu0 %vm7489_vm0, %v8401_v9 }
 0x2be   : > { %5839 = vmatmul.mubr.bf16.gmra.mrb[56].mxu1 %v1891_v63 }
 0x2bf   : > { %6331 = vmatmul.mubr.bf16.gmra.mrb[8].mxu0 %v4324_v0  ;;  %5842 = vmatprep.mubr.msk.bf16.mxu1 %vm7489_vm0, %v8401_v9  ;;  %v4338_v0 = vpack.c.bf16 %v4309_v28, %v2355_v21 }
 0x2c0   : > { %6334 = vmatprep.mubr.msk.bf16.mxu0 %vm7489_vm0, %v8401_v9 }
 0x2c6   : > { %5843 = vmatmul.mubr.bf16.gmra.mrb[60].mxu1 %v1892_v25  ;;  %v4311_v25 = vld [vmem:[#allocation2 + $0x148] sm:$0xff] }
 0x2c7   : > { %6335 = vmatmul.mubr.bf16.gmra.mrb[12].mxu0 %v4325_v39  ;;  %5846 = vmatprep.mubr.msk.bf16.mxu1 %vm7489_vm0, %v8401_v9  ;;  %v2385_v18 = vpack.c.bf16 %v2359_v47, %v4311_v25 }
 0x2c8   : > { %6338 = vmatprep.mubr.msk.bf16.mxu0 %vm7489_vm0, %v8401_v9 }
 0x2ce   : > { %5847 = vmatmul.mubr.bf16.gmra.mrb[64].mxu1 %v1893_v35 }
 0x2cf   : > { %6339 = vmatmul.mubr.bf16.gmra.mrb[16].mxu0 %v4326_v34  ;;  %5850 = vmatprep.mubr.msk.bf16.mxu1 %vm7489_vm0, %v8401_v9  ;;  %v4339_v34 = vpack.c.bf16 %v4311_v25, %v2357_v20 }
 0x2d0   : > { %6342 = vmatprep.mubr.msk.bf16.mxu0 %vm7489_vm0, %v8401_v9 }
 0x2d6   : > { %5851 = vmatmul.mubr.bf16.gmra.mrb[68].mxu1 %v1894_v36  ;;  %v4313_v36 = vld [vmem:[#allocation2 + $0x158] sm:$0xff] }
 0x2d7   : > { %6343 = vmatmul.mubr.bf16.gmra.mrb[20].mxu0 %v4327_v37  ;;  %5854 = vmatprep.mubr.msk.bf16.mxu1 %vm7489_vm0, %v8401_v9  ;;  %v2386_v48 = vpack.c.bf16 %v2361_v54, %v4313_v36 }
 0x2d8   : > { %6346 = vmatprep.mubr.msk.bf16.mxu0 %vm7489_vm0, %v8401_v9 }
 0x2de   : > { %5855 = vmatmul.mubr.bf16.gmra.mrb[72].mxu1 %v1895_v38 }
 0x2df   : > { %6347 = vmatmul.mubr.bf16.gmra.mrb[24].mxu0 %v4328_v33  ;;  %5858 = vmatprep.mubr.msk.bf16.mxu1 %vm7489_vm0, %v8401_v9  ;;  %v4340_v33 = vpack.c.bf16 %v4313_v36, %v2359_v47 }
 0x2e0   : > { %6350 = vmatprep.mubr.msk.bf16.mxu0 %vm7489_vm0, %v8401_v9 }
 0x2e6   : > { %5859 = vmatmul.mubr.bf16.gmra.mrb[76].mxu1 %v1896_v15  ;;  %v4315_v15 = vld [vmem:[#allocation2 + $0x168] sm:$0xff] }
 0x2e7   : > { %6351 = vmatmul.mubr.bf16.gmra.mrb[28].mxu0 %v4329_v27  ;;  %5862 = vmatprep.mubr.msk.bf16.mxu1 %vm7489_vm0, %v8401_v9  ;;  %v2387_v3 = vpack.c.bf16 %v2363_v57, %v4315_v15 }
 0x2e8   : > { %6354 = vmatprep.mubr.msk.bf16.mxu0 %vm7489_vm0, %v8401_v9 }
 0x2ee   : > { %5863 = vmatmul.mubr.bf16.gmra.mrb[80].mxu1 %v1897_v55 }
 0x2ef   : > { %6355 = vmatmul.mubr.bf16.gmra.mrb[32].mxu0 %v4330_v61  ;;  %5866 = vmatprep.mubr.msk.bf16.mxu1 %vm7489_vm0, %v8401_v9  ;;  %v4341_v61 = vpack.c.bf16 %v4315_v15, %v2361_v54 }
 0x2f0   : > { %6358 = vmatprep.mubr.msk.bf16.mxu0 %vm7489_vm0, %v8401_v9 }
 0x2f6   : > { %5867 = vmatmul.mubr.bf16.gmra.mrb[84].mxu1 %v1898_v14  ;;  %v4317_v14 = vld [vmem:[#allocation2 + $0x178] sm:$0xff] }
 0x2f7   : > { %6359 = vmatmul.mubr.bf16.gmra.mrb[36].mxu0 %v4331_v1  ;;  %5870 = vmatprep.mubr.msk.bf16.mxu1 %vm7489_vm0, %v8401_v9  ;;  %v2388_v8 = vpack.c.bf16 %v2365_v60, %v4317_v14 }
 0x2f8   : > { %6362 = vmatprep.mubr.msk.bf16.mxu0 %vm7489_vm0, %v8401_v9 }
 0x2fe   : > { %5871 = vmatmul.mubr.bf16.gmra.mrb[88].mxu1 %v1899_v19 }
 0x2ff   : > { %6363 = vmatmul.mubr.bf16.gmra.mrb[40].mxu0 %v4332_v43  ;;  %5938 = vmatprep.mubr.msk.bf16.mxu1 %vm7489_vm0, %v8401_v9  ;;  %v4342_v43 = vpack.c.bf16 %v4317_v14, %v2363_v57 }
 0x300   : > { %6366 = vmatprep.mubr.msk.bf16.mxu0 %vm7489_vm0, %v8401_v9 }
 0x306   : > { %5939 = vmatmul.mubr.bf16.vlgmr.msra.gmra.mrb[48].mxu1 %v2378_v32  ;;  %v4319_v32 = vld [vmem:[#allocation2 + $0x188] sm:$0xff] }
 0x307   : > { %6367 = vmatmul.mubr.bf16.gmra.mrb[44].mxu0 %v4333_v41  ;;  %5942 = vmatprep.mubr.msk.bf16.mxu1 %vm7489_vm0, %v8401_v9 }
 0x308   : > { %6370 = vmatprep.mubr.msk.bf16.mxu0 %vm7489_vm0, %v8401_v9 }
 0x30e   : > { %5943 = vmatmul.mubr.bf16.gmra.mrb[52].mxu1 %v2379_v50 }
 0x30f   : > { %6371 = vmatmul.mubr.bf16.gmra.mrb[48].mxu0 %v4334_v42  ;;  %5946 = vmatprep.mubr.msk.bf16.mxu1 %vm7489_vm0, %v8401_v9  ;;  %v4343_v42 = vpack.c.bf16 %v4319_v32, %v2365_v60 }
 0x310   : > { %6374 = vmatprep.mubr.msk.bf16.mxu0 %vm7489_vm0, %v8401_v9 }
 0x316   : > { %5947 = vmatmul.mubr.bf16.gmra.mrb[56].mxu1 %v2380_v40  ;;  %v4321_v40 = vld [vmem:[#allocation2 + $0x198] sm:$0xff] }
 0x317   : > { %6375 = vmatmul.mubr.bf16.gmra.mrb[52].mxu0 %v4335_v49  ;;  %5950 = vmatprep.mubr.msk.bf16.mxu1 %vm7489_vm0, %v8401_v9 }
 0x318   : > { %6378 = vmatprep.mubr.msk.bf16.mxu0 %vm7489_vm0, %v8401_v9 }
 0x31e   : > { %5951 = vmatmul.mubr.bf16.gmra.mrb[60].mxu1 %v2381_v23  ;;  %v4344_v23 = vpack.c.bf16 %v4321_v40, %v4320_v16 }
 0x31f   : > { %6379 = vmatmul.mubr.bf16.gmra.mrb[56].mxu0 %v4336_v46  ;;  %5954 = vmatprep.mubr.msk.bf16.mxu1 %vm7489_vm0, %v8401_v9 }
 0x320   : > { %6382 = vmatprep.mubr.msk.bf16.mxu0 %vm7489_vm0, %v8401_v9 }
 0x321   : > { %v8670_v29 = vpop.f32.mrb[0].mxu1 }
 0x322   : > { %v5784_v53 = vpop.f32.mrb[1].mxu1 }
 0x323   : > { %v8672_v6 = vpop.f32.mrb[2].mxu1 }
 0x324   : > { %v5785_v12 = vpop.f32.mrb[3].mxu1  ;;  %v6438_v47 = vadd.f32 %v8401_v9, %v8672_v6 }
 0x326   : > { %5955 = vmatmul.mubr.bf16.gmra.mrb[64].mxu1 %v2382_v7 }
 0x327   : > { %6383 = vmatmul.mubr.bf16.gmra.mrb[60].mxu0 %v4337_v62  ;;  %5958 = vmatprep.mubr.msk.bf16.mxu1 %vm7489_vm0, %v8401_v9 }
 0x328   : > { %6386 = vmatprep.mubr.msk.bf16.mxu0 %vm7489_vm0, %v8401_v9 }
 0x329   : > { %v8678_v59 = vpop.f32.mrb[4].mxu1 }
 0x32a   : > { %v5788_v22 = vpop.f32.mrb[5].mxu1  ;;  %v6444_v54 = vadd.f32 %v8401_v9, %v8678_v59 }
 0x32b   : > { %v8680_v63 = vpop.f32.mrb[6].mxu1 }
 0x32c   : > { %v5789_v31 = vpop.f32.mrb[7].mxu1 }
 0x32e   : > { %5959 = vmatmul.mubr.bf16.gmra.mrb[68].mxu1 %v2383_v58 }
 0x32f   : > { %6387 = vmatmul.mubr.bf16.gmra.mrb[64].mxu0 %v4338_v0  ;;  %5962 = vmatprep.mubr.msk.bf16.mxu1 %vm7489_vm0, %v8401_v9 }
 0x330   : > { %6390 = vmatprep.mubr.msk.bf16.mxu0 %vm7489_vm0, %v8401_v9 }
 0x331   : > { %v8686_v39 = vpop.f32.mrb[8].mxu1 }
 0x332   : > { %v5792_v30 = vpop.f32.mrb[9].mxu1  ;;  %v6456_v57 = vadd.f32 %v8401_v9, %v8686_v39 }
 0x333   : > { %v8688_v35 = vpop.f32.mrb[10].mxu1 }
 0x334   : > { %v5793_v10 = vpop.f32.mrb[11].mxu1  ;;  %v6462_v59 = vadd.f32 %v8401_v9, %v8688_v35 }
 0x336   : > { %5963 = vmatmul.mubr.bf16.gmra.mrb[72].mxu1 %v2384_v26 }
 0x337   : > { %6391 = vmatmul.mubr.bf16.gmra.mrb[68].mxu0 %v4339_v34  ;;  %5966 = vmatprep.mubr.msk.bf16.mxu1 %vm7489_vm0, %v8401_v9  ;;  %v6432_v34 = vadd.f32 %v8401_v9, %v8670_v29  ;;  %v6450_v29 = vadd.f32 %v8401_v9, %v8680_v63 }
 0x338   : > { %6394 = vmatprep.mubr.msk.bf16.mxu0 %vm7489_vm0, %v8401_v9 }
 0x339   : > { %v8694_v37 = vpop.f32.mrb[12].mxu1 }
 0x33a   : > { %v5796_v11 = vpop.f32.mrb[13].mxu1  ;;  %v6468_v60 = vadd.f32 %v8401_v9, %v8694_v37 }
 0x33b   : > { %v8696_v38 = vpop.f32.mrb[14].mxu1 }
 0x33c   : > { %v5797_v51 = vpop.f32.mrb[15].mxu1  ;;  %v6474_v39 = vadd.f32 %v8401_v9, %v8696_v38 }
 0x33e   : > { %5967 = vmatmul.mubr.bf16.gmra.mrb[76].mxu1 %v2385_v18 }
 0x33f   : > { %6395 = vmatmul.mubr.bf16.gmra.mrb[72].mxu0 %v4340_v33  ;;  %5970 = vmatprep.mubr.msk.bf16.mxu1 %vm7489_vm0, %v8401_v9 }
 0x340   : > { %6398 = vmatprep.mubr.msk.bf16.mxu0 %vm7489_vm0, %v8401_v9 }
 0x341   : > { %v8702_v27 = vpop.f32.mrb[16].mxu1 }
 0x342   : > { %v5800_v45 = vpop.f32.mrb[17].mxu1  ;;  %v6480_v16 = vadd.f32 %v8401_v9, %v8702_v27 }
 0x343   : > { %v8704_v55 = vpop.f32.mrb[18].mxu1 }
 0x344   : > { %v5801_v44 = vpop.f32.mrb[19].mxu1  ;;  %v6486_v37 = vadd.f32 %v8401_v9, %v8704_v55 }
 0x346   : > { %5971 = vmatmul.mubr.bf16.gmra.mrb[80].mxu1 %v2386_v48 }
 0x347   : > { %6399 = vmatmul.mubr.bf16.gmra.mrb[76].mxu0 %v4341_v61  ;;  %5974 = vmatprep.mubr.msk.bf16.mxu1 %vm7489_vm0, %v8401_v9 }
 0x348   : > { %6402 = vmatprep.mubr.msk.bf16.mxu0 %vm7489_vm0, %v8401_v9 }
 0x349   : > { %v8710_v1 = vpop.f32.mrb[20].mxu1 }
 0x34a   : > { %v5804_v2 = vpop.f32.mrb[21].mxu1 }
 0x34b   : > { %v8712_v19 = vpop.f32.mrb[22].mxu1 }
 0x34c   : > { %v5805_v56 = vpop.f32.mrb[23].mxu1  ;;  %v6498_v27 = vadd.f32 %v8401_v9, %v8712_v19 }
 0x34e   : > { %5975 = vmatmul.mubr.bf16.gmra.mrb[84].mxu1 %v2387_v3 }
 0x34f   : > { %6403 = vmatmul.mubr.bf16.gmra.mrb[80].mxu0 %v4342_v43  ;;  %5978 = vmatprep.mubr.msk.bf16.mxu1 %vm7489_vm0, %v8401_v9 }
 0x350   : > { %6406 = vmatprep.mubr.msk.bf16.mxu0 %vm7489_vm0, %v8401_v9 }
 0x351   : > { %v8718_v41 = vpop.f32.mrb[24].mxu1 }
 0x352   : > { %v5808_v5 = vpop.f32.mrb[25].mxu1 }
 0x353   : > { %v8720_v50 = vpop.f32.mrb[26].mxu1 }
 0x354   : > { %v5809_v13 = vpop.f32.mrb[27].mxu1 }
 0x356   : > { %5979 = vmatmul.mubr.bf16.gmra.mrb[88].mxu1 %v2388_v8 }
 0x357   : > { %6407 = vmatmul.mubr.bf16.gmra.mrb[84].mxu0 %v4343_v42 }
 0x358   : > { %6410 = vmatprep.mubr.msk.bf16.mxu0 %vm7489_vm0, %v8401_v9 }
 0x359   : > { %v8724_v49 = vpop.f32.mrb[28].mxu1 }
 0x35a   : > { %v5812_v52 = vpop.f32.mrb[29].mxu1 }
 0x35b   : > { %v8726_v17 = vpop.f32.mrb[30].mxu1 }
 0x35c   : > { %v5813_v46 = vpop.f32.mrb[31].mxu1 }
 0x35f   : > { %6411 = vmatmul.mubr.bf16.gmra.mrb[88].mxu0 %v4344_v23 }
 0x361   : > { %v8728_v4 = vpop.f32.mrb[32].mxu1 }
 0x362   : > { %v5816_v24 = vpop.f32.mrb[33].mxu1 }
 0x363   : > { %v8730_v53 = vpop.f32.mrb[34].mxu1 }
 0x364   : > { %v5817_v7 = vpop.f32.mrb[35].mxu1 }
 0x365   : > { %v6492_v7 = vadd.f32 %v8401_v9, %v8710_v1  ;;  %v6510_v1 = vadd.f32 %v8401_v9, %v8720_v50 }
 0x369   : > { %v8732_v62 = vpop.f32.mrb[36].mxu1 }
 0x36a   : > { %v5820_v12 = vpop.f32.mrb[37].mxu1 }
 0x36b   : > { %v8734_v21 = vpop.f32.mrb[38].mxu1 }
 0x36c   : > { %v5821_v28 = vpop.f32.mrb[39].mxu1 }
 0x371   : > { %v8736_v22 = vpop.f32.mrb[40].mxu1 }
 0x372   : > { %v5824_v58 = vpop.f32.mrb[41].mxu1 }
 0x373   : > { %v8738_v0 = vpop.f32.mrb[42].mxu1 }
 0x374   : > { %v5825_v31 = vpop.f32.mrb[43].mxu1 }
 0x379   : > { %v8740_v20 = vpop.f32.mrb[44].mxu1 }
 0x37a   : > { %v5828_v25 = vpop.f32.mrb[45].mxu1 }
 0x37b   : > { %v8742_v30 = vpop.f32.mrb[46].mxu1 }
 0x37c   : > { %v5829_v26 = vpop.f32.mrb[47].mxu1 }
 0x37d   : > { %v6504_v26 = vadd.f32 %v8401_v9, %v8718_v41  ;;  %v6522_v41 = vadd.f32 %v8401_v9, %v8726_v17 }
 0x382   : > { %v4490_v10 = vpop.f32.mrb[0].mxu0 }
 0x383   : > { %v6435_v36 = vadd.f32 %v6432_v34, %v4490_v10  ;;  %v6324_v11 = vpop.f32.mrb[1].mxu0 }
 0x384   : > { %v4493_v18 = vpop.f32.mrb[2].mxu0 }
 0x385   : > { %4719 = vst [vmem:[%s7547_s26 + $0x18] sm:$0xff] %v6435_v36  ;;  %v6441_v33 = vadd.f32 %v6438_v47, %v4493_v18  ;;  %v6325_v51 = vpop.f32.mrb[3].mxu0  ;;  %v6516_v18 = vadd.f32 %v8401_v9, %v8724_v49  ;;  %v6534_v49 = vadd.f32 %v8401_v9, %v8730_v53 }
 0x387   : > { %4720 = vst [vmem:[%s7547_s26 + $0x20] sm:$0xff] %v6441_v33 }
 0x38a   : > { %v4498_v15 = vpop.f32.mrb[4].mxu0 }
 0x38b   : > { %v6447_v45 = vadd.f32 %v6444_v54, %v4498_v15  ;;  %v6328_v48 = vpop.f32.mrb[5].mxu0 }
 0x38c   : > { %v4501_v6 = vpop.f32.mrb[6].mxu0 }
 0x38d   : > { %4721 = vst [vmem:[%s7547_s26 + $0x28] sm:$0xff] %v6447_v45  ;;  %v6453_v61 = vadd.f32 %v6450_v29, %v4501_v6  ;;  %v6329_v44 = vpop.f32.mrb[7].mxu0  ;;  %v6528_v45 = vadd.f32 %v8401_v9, %v8728_v4  ;;  %v6546_v4 = vadd.f32 %v8401_v9, %v8734_v21 }
 0x38f   : > { %4722 = vst [vmem:[%s7547_s26 + $0x30] sm:$0xff] %v6453_v61 }
 0x392   : > { %v4506_v14 = vpop.f32.mrb[8].mxu0 }
 0x393   : > { %v6459_v2 = vadd.f32 %v6456_v57, %v4506_v14  ;;  %v6332_v3 = vpop.f32.mrb[9].mxu0  ;;  %v6540_v14 = vadd.f32 %v8401_v9, %v8732_v62  ;;  %v6558_v62 = vadd.f32 %v8401_v9, %v8738_v0 }
 0x394   : > { %v4509_v63 = vpop.f32.mrb[10].mxu0 }
 0x395   : > { %4723 = vst [vmem:[%s7547_s26 + $0x38] sm:$0xff] %v6459_v2  ;;  %v6465_v43 = vadd.f32 %v6462_v59, %v4509_v63  ;;  %v6333_v56 = vpop.f32.mrb[11].mxu0 }
 0x396   : > { %v6552_v56 = vadd.f32 %v8401_v9, %v8736_v22  ;;  %v6570_v22 = vadd.f32 %v8401_v9, %v8742_v30 }
 0x397   : > { %4724 = vst [vmem:[%s7547_s26 + $0x40] sm:$0xff] %v6465_v43 }
 0x39a   : > { %v4514_v32 = vpop.f32.mrb[12].mxu0 }
 0x39b   : > { %v6471_v5 = vadd.f32 %v6468_v60, %v4514_v32  ;;  %v6336_v8 = vpop.f32.mrb[13].mxu0 }
 0x39c   : > { %v4517_v35 = vpop.f32.mrb[14].mxu0 }
 0x39d   : > { %4725 = vst [vmem:[%s7547_s26 + $0x48] sm:$0xff] %v6471_v5  ;;  %v6477_v42 = vadd.f32 %v6474_v39, %v4517_v35  ;;  %v6337_v13 = vpop.f32.mrb[15].mxu0  ;;  %v6564_v35 = vadd.f32 %v8401_v9, %v8740_v20 }
 0x39f   : > { %4726 = vst [vmem:[%s7547_s26 + $0x50] sm:$0xff] %v6477_v42 }
 0x3a2   : > { %v4522_v40 = vpop.f32.mrb[16].mxu0 }
 0x3a3   : > { %v6483_v52 = vadd.f32 %v6480_v16, %v4522_v40  ;;  %v6340_v23 = vpop.f32.mrb[17].mxu0 }
 0x3a4   : > { %v4525_v38 = vpop.f32.mrb[18].mxu0 }
 0x3a5   : > { %4727 = vst [vmem:[%s7547_s26 + $0x58] sm:$0xff] %v6483_v52  ;;  %v6489_v46 = vadd.f32 %v6486_v37, %v4525_v38  ;;  %v6341_v24 = vpop.f32.mrb[19].mxu0 }
 0x3a7   : > { %4728 = vst [vmem:[%s7547_s26 + $0x60] sm:$0xff] %v6489_v46 }
 0x3aa   : > { %v4530_v12 = vpop.f32.mrb[20].mxu0 }
 0x3ab   : > { %v6495_v28 = vadd.f32 %v6492_v7, %v4530_v12  ;;  %v6344_v58 = vpop.f32.mrb[21].mxu0 }
 0x3ac   : > { %v4533_v55 = vpop.f32.mrb[22].mxu0 }
 0x3ad   : > { %4729 = vst [vmem:[%s7547_s26 + $0x68] sm:$0xff] %v6495_v28  ;;  %v6501_v31 = vadd.f32 %v6498_v27, %v4533_v55  ;;  %v6345_v25 = vpop.f32.mrb[23].mxu0 }
 0x3af   : > { %4730 = vst [vmem:[%s7547_s26 + $0x70] sm:$0xff] %v6501_v31 }
 0x3b2   : > { %v4538_v34 = vpop.f32.mrb[24].mxu0 }
 0x3b3   : > { %v6507_v10 = vadd.f32 %v6504_v26, %v4538_v34  ;;  %v6348_v47 = vpop.f32.mrb[25].mxu0 }
 0x3b4   : > { %v4541_v19 = vpop.f32.mrb[26].mxu0 }
 0x3b5   : > { %4731 = vst [vmem:[%s7547_s26 + $0x78] sm:$0xff] %v6507_v10  ;;  %v6513_v36 = vadd.f32 %v6510_v1, %v4541_v19  ;;  %v6349_v11 = vpop.f32.mrb[27].mxu0 }
 0x3b7   : > { %4732 = vst [vmem:[%s7547_s26 + $0x80] sm:$0xff] %v6513_v36 }
 0x3ba   : > { %v4546_v33 = vpop.f32.mrb[28].mxu0 }
 0x3bb   : > { %v6519_v51 = vadd.f32 %v6516_v18, %v4546_v33  ;;  %v6352_v54 = vpop.f32.mrb[29].mxu0 }
 0x3bc   : > { %v4549_v50 = vpop.f32.mrb[30].mxu0 }
 0x3bd   : > { %4733 = vst [vmem:[%s7547_s26 + $0x88] sm:$0xff] %v6519_v51  ;;  %v6525_v15 = vadd.f32 %v6522_v41, %v4549_v50  ;;  %v6353_v29 = vpop.f32.mrb[31].mxu0  ;;  %v8825_v50 = vld [vmem:[%s7547_s26] sm:$0xff] }
 0x3bf   : > { %4734 = vst [vmem:[%s7547_s26 + $0x90] sm:$0xff] %v6525_v15 }
 0x3c2   : > { %v4554_v48 = vpop.f32.mrb[32].mxu0 }
 0x3c3   : > { %v6531_v6 = vadd.f32 %v6528_v45, %v4554_v48  ;;  %v6356_v61 = vpop.f32.mrb[33].mxu0 }
 0x3c4   : > { %v4557_v17 = vpop.f32.mrb[34].mxu0 }
 0x3c5   : > { %4735 = vst [vmem:[%s7547_s26 + $0x98] sm:$0xff] %v6531_v6  ;;  %v6537_v44 = vadd.f32 %v6534_v49, %v4557_v17  ;;  %v6357_v57 = vpop.f32.mrb[35].mxu0 }
 0x3c7   : > { %4736 = vst [vmem:[%s7547_s26 + $0xa0] sm:$0xff] %v6537_v44 }
 0x3ca   : > { %v4562_v59 = vpop.f32.mrb[36].mxu0 }
 0x3cb   : > { %v6543_v2 = vadd.f32 %v6540_v14, %v4562_v59  ;;  %v6360_v3 = vpop.f32.mrb[37].mxu0 }
 0x3cc   : > { %v4565_v53 = vpop.f32.mrb[38].mxu0 }
 0x3cd   : > { %4737 = vst [vmem:[%s7547_s26 + $0xa8] sm:$0xff] %v6543_v2  ;;  %v6549_v63 = vadd.f32 %v6546_v4, %v4565_v53  ;;  %v6361_v43 = vpop.f32.mrb[39].mxu0 }
 0x3cf   : > { %4738 = vst [vmem:[%s7547_s26 + $0xb0] sm:$0xff] %v6549_v63 }
 0x3d2   : > { %v4570_v60 = vpop.f32.mrb[40].mxu0 }
 0x3d3   : > { %v6555_v32 = vadd.f32 %v6552_v56, %v4570_v60  ;;  %v6364_v39 = vpop.f32.mrb[41].mxu0 }
 0x3d4   : > { %v4573_v5 = vpop.f32.mrb[42].mxu0 }
 0x3d5   : > { %4739 = vst [vmem:[%s7547_s26 + $0xb8] sm:$0xff] %v6555_v32  ;;  %v6561_v21 = vadd.f32 %v6558_v62, %v4573_v5  ;;  %v6365_v8 = vpop.f32.mrb[43].mxu0 }
 0x3d7   : > { %4740 = vst [vmem:[%s7547_s26 + $0xc0] sm:$0xff] %v6561_v21 }
 0x3d9   : > { %v2630_v42 = vpop.f32.mrb[48].mxu1 }
 0x3da   : > { %v4578_v13 = vpop.f32.mrb[44].mxu0  ;;  %v5940_v16 = vpop.f32.mrb[49].mxu1  ;;  %v6576_v24 = vadd.f32 %v8401_v9, %v2630_v42 }
 0x3db   : > { %v6567_v40 = vadd.f32 %v6564_v35, %v4578_v13  ;;  %v6368_v0 = vpop.f32.mrb[45].mxu0  ;;  %v2633_v37 = vpop.f32.mrb[50].mxu1 }
 0x3dc   : > { %v4581_v52 = vpop.f32.mrb[46].mxu0  ;;  %v5941_v23 = vpop.f32.mrb[51].mxu1  ;;  %v6582_v27 = vadd.f32 %v8401_v9, %v2633_v37 }
 0x3dd   : > { %4741 = vst [vmem:[%s7547_s26 + $0xc8] sm:$0xff] %v6567_v40  ;;  %v6573_v38 = vadd.f32 %v6570_v22, %v4581_v52  ;;  %v6369_v46 = vpop.f32.mrb[47].mxu0 }
 0x3df   : > { %4742 = vst [vmem:[%s7547_s26 + $0xd0] sm:$0xff] %v6573_v38 }
 0x3e1   : > { %v2638_v20 = vpop.f32.mrb[52].mxu1 }
 0x3e2   : > { %v4586_v7 = vpop.f32.mrb[48].mxu0  ;;  %v5944_v12 = vpop.f32.mrb[53].mxu1  ;;  %v6588_v34 = vadd.f32 %v8401_v9, %v2638_v20 }
 0x3e3   : > { %v6579_v28 = vadd.f32 %v6576_v24, %v4586_v7  ;;  %v6372_v30 = vpop.f32.mrb[49].mxu0  ;;  %v2641_v58 = vpop.f32.mrb[54].mxu1 }
 0x3e4   : > { %v4589_v55 = vpop.f32.mrb[50].mxu0  ;;  %v5945_v31 = vpop.f32.mrb[55].mxu1  ;;  %v6594_v19 = vadd.f32 %v8401_v9, %v2641_v58 }
 0x3e5   : > { %4743 = vst [vmem:[%s7547_s26 + $0xd8] sm:$0xff] %v6579_v28  ;;  %v6585_v25 = vadd.f32 %v6582_v27, %v4589_v55  ;;  %v6373_v26 = vpop.f32.mrb[51].mxu0 }
 0x3e7   : > { %4744 = vst [vmem:[%s7547_s26 + $0xe0] sm:$0xff] %v6585_v25 }
 0x3e9   : > { %v2646_v1 = vpop.f32.mrb[56].mxu1 }
 0x3ea   : > { %v4594_v10 = vpop.f32.mrb[52].mxu0  ;;  %v5948_v47 = vpop.f32.mrb[57].mxu1  ;;  %v6600_v15 = vadd.f32 %v8825_v50, %v2646_v1 }
 0x3eb   : > { %v6591_v36 = vadd.f32 %v6588_v34, %v4594_v10  ;;  %v6376_v11 = vpop.f32.mrb[53].mxu0  ;;  %v2649_v18 = vpop.f32.mrb[58].mxu1 }
 0x3ec   : > { %v4597_v33 = vpop.f32.mrb[54].mxu0  ;;  %v5949_v41 = vpop.f32.mrb[59].mxu1  ;;  %v6606_v9 = vadd.f32 %v8825_v50, %v2649_v18 }
 0x3ed   : > { %4745 = vst [vmem:[%s7547_s26 + $0xe8] sm:$0xff] %v6591_v36  ;;  %v6597_v51 = vadd.f32 %v6594_v19, %v4597_v33  ;;  %v6377_v54 = vpop.f32.mrb[55].mxu0 }
 0x3ef   : > { %4746 = vst [vmem:[%s7547_s26 + $0xf0] sm:$0xff] %v6597_v51 }
 0x3f1   : > { %v2654_v29 = vpop.f32.mrb[60].mxu1 }
 0x3f2   : > { %v4602_v45 = vpop.f32.mrb[56].mxu0  ;;  %v5952_v48 = vpop.f32.mrb[61].mxu1  ;;  %v6612_v59 = vadd.f32 %v8825_v50, %v2654_v29 }
 0x3f3   : > { %v6603_v49 = vadd.f32 %v6600_v15, %v4602_v45  ;;  %v6380_v6 = vpop.f32.mrb[57].mxu0  ;;  %v2657_v61 = vpop.f32.mrb[62].mxu1 }
 0x3f4   : > { %v4605_v17 = vpop.f32.mrb[58].mxu0  ;;  %v5953_v44 = vpop.f32.mrb[63].mxu1  ;;  %v6618_v53 = vadd.f32 %v8825_v50, %v2657_v61 }
 0x3f5   : > { %4747 = vst [vmem:[%s7547_s26 + $0xf8] sm:$0xff] %v6603_v49  ;;  %v6609_v57 = vadd.f32 %v6606_v9, %v4605_v17  ;;  %v6381_v14 = vpop.f32.mrb[59].mxu0 }
 0x3f7   : > { %4748 = vst [vmem:[%s7547_s26 + $0x100] sm:$0xff] %v6609_v57 }
 0x3f9   : > { %v2662_v4 = vpop.f32.mrb[64].mxu1 }
 0x3fa   : > { %v4610_v2 = vpop.f32.mrb[60].mxu0  ;;  %v5956_v3 = vpop.f32.mrb[65].mxu1  ;;  %v6624_v5 = vadd.f32 %v8825_v50, %v2662_v4 }
 0x3fb   : > { %v6615_v63 = vadd.f32 %v6612_v59, %v4610_v2  ;;  %v6384_v43 = vpop.f32.mrb[61].mxu0  ;;  %v2665_v56 = vpop.f32.mrb[66].mxu1 }
 0x3fc   : > { %v4613_v60 = vpop.f32.mrb[62].mxu0  ;;  %v5957_v62 = vpop.f32.mrb[67].mxu1  ;;  %v6630_v42 = vadd.f32 %v8825_v50, %v2665_v56 }
 0x3fd   : > { %4749 = vst [vmem:[%s7547_s26 + $0x108] sm:$0xff] %v6615_v63  ;;  %v6621_v32 = vadd.f32 %v6618_v53, %v4613_v60  ;;  %v6385_v39 = vpop.f32.mrb[63].mxu0 }
 0x3ff   : > { %4750 = vst [vmem:[%s7547_s26 + $0x110] sm:$0xff] %v6621_v32 }
 0x401   : > { %v2670_v21 = vpop.f32.mrb[68].mxu1 }
 0x402   : > { %v4618_v8 = vpop.f32.mrb[64].mxu0  ;;  %v5960_v35 = vpop.f32.mrb[69].mxu1  ;;  %v6636_v23 = vadd.f32 %v8825_v50, %v2670_v21 }
 0x403   : > { %v6627_v13 = vadd.f32 %v6624_v5, %v4618_v8  ;;  %v6388_v16 = vpop.f32.mrb[65].mxu0  ;;  %v2673_v22 = vpop.f32.mrb[70].mxu1 }
 0x404   : > { %v4621_v40 = vpop.f32.mrb[66].mxu0  ;;  %v5961_v0 = vpop.f32.mrb[71].mxu1  ;;  %v6642_v20 = vadd.f32 %v8825_v50, %v2673_v22 }
 0x405   : > { %4751 = vst [vmem:[%s7547_s26 + $0x118] sm:$0xff] %v6627_v13  ;;  %v6633_v37 = vadd.f32 %v6630_v42, %v4621_v40  ;;  %v6389_v52 = vpop.f32.mrb[67].mxu0 }
 0x407   : > { %4752 = vst [vmem:[%s7547_s26 + $0x120] sm:$0xff] %v6633_v37 }
 0x409   : > { %v2678_v38 = vpop.f32.mrb[72].mxu1 }
 0x40a   : > { %v4626_v46 = vpop.f32.mrb[68].mxu0  ;;  %v5964_v24 = vpop.f32.mrb[73].mxu1  ;;  %v6648_v31 = vadd.f32 %v8825_v50, %v2678_v38 }
 0x40b   : > { %v6639_v7 = vadd.f32 %v6636_v23, %v4626_v46  ;;  %v6392_v12 = vpop.f32.mrb[69].mxu0  ;;  %v2681_v27 = vpop.f32.mrb[74].mxu1 }
 0x40c   : > { %v4629_v28 = vpop.f32.mrb[70].mxu0  ;;  %v5965_v30 = vpop.f32.mrb[75].mxu1  ;;  %v6654_v1 = vadd.f32 %v8825_v50, %v2681_v27 }
 0x40d   : > { %4753 = vst [vmem:[%s7547_s26 + $0x128] sm:$0xff] %v6639_v7  ;;  %v6645_v58 = vadd.f32 %v6642_v20, %v4629_v28  ;;  %v6393_v55 = vpop.f32.mrb[71].mxu0 }
 0x40f   : > { %4754 = vst [vmem:[%s7547_s26 + $0x130] sm:$0xff] %v6645_v58 }
 0x411   : > { %v2686_v25 = vpop.f32.mrb[76].mxu1 }
 0x412   : > { %v4634_v26 = vpop.f32.mrb[72].mxu0  ;;  %v5968_v34 = vpop.f32.mrb[77].mxu1  ;;  %v6660_v41 = vadd.f32 %v8825_v50, %v2686_v25 }
 0x413   : > { %v6651_v10 = vadd.f32 %v6648_v31, %v4634_v26  ;;  %v6396_v47 = vpop.f32.mrb[73].mxu0  ;;  %v2689_v19 = vpop.f32.mrb[78].mxu1 }
 0x414   : > { %v4637_v36 = vpop.f32.mrb[74].mxu0  ;;  %v5969_v11 = vpop.f32.mrb[79].mxu1  ;;  %v6666_v29 = vadd.f32 %v8825_v50, %v2689_v19 }
 0x415   : > { %4755 = vst [vmem:[%s7547_s26 + $0x138] sm:$0xff] %v6651_v10  ;;  %v6657_v18 = vadd.f32 %v6654_v1, %v4637_v36  ;;  %v6397_v33 = vpop.f32.mrb[75].mxu0 }
 0x417   : > { %4756 = vst [vmem:[%s7547_s26 + $0x140] sm:$0xff] %v6657_v18 }
 0x419   : > { %v2694_v51 = vpop.f32.mrb[80].mxu1 }
 0x41a   : > { %v4642_v54 = vpop.f32.mrb[76].mxu0  ;;  %v5972_v15 = vpop.f32.mrb[81].mxu1  ;;  %v6672_v44 = vadd.f32 %v8825_v50, %v2694_v51 }
 0x41b   : > { %v6663_v45 = vadd.f32 %v6660_v41, %v4642_v54  ;;  %v6400_v48 = vpop.f32.mrb[77].mxu0  ;;  %v2697_v9 = vpop.f32.mrb[82].mxu1 }
 0x41c   : > { %v4645_v49 = vpop.f32.mrb[78].mxu0  ;;  %v5973_v6 = vpop.f32.mrb[83].mxu1  ;;  %v6678_v4 = vadd.f32 %v8825_v50, %v2697_v9 }
 0x41d   : > { %4757 = vst [vmem:[%s7547_s26 + $0x148] sm:$0xff] %v6663_v45  ;;  %v6669_v61 = vadd.f32 %v6666_v29, %v4645_v49  ;;  %v6401_v17 = vpop.f32.mrb[79].mxu0 }
 0x41f   : > { %4758 = vst [vmem:[%s7547_s26 + $0x150] sm:$0xff] %v6669_v61 }
 0x421   : > { %v2702_v57 = vpop.f32.mrb[84].mxu1 }
 0x422   : > { %v4650_v14 = vpop.f32.mrb[80].mxu0  ;;  %v5976_v59 = vpop.f32.mrb[85].mxu1  ;;  %v6684_v62 = vadd.f32 %v8825_v50, %v2702_v57 }
 0x423   : > { %v6675_v2 = vadd.f32 %v6672_v44, %v4650_v14  ;;  %v6404_v3 = vpop.f32.mrb[81].mxu0  ;;  %v2705_v53 = vpop.f32.mrb[86].mxu1 }
 0x424   : > { %v4653_v63 = vpop.f32.mrb[82].mxu0  ;;  %v5977_v43 = vpop.f32.mrb[87].mxu1  ;;  %v6690_v21 = vadd.f32 %v8825_v50, %v2705_v53 }
 0x425   : > { %4759 = vst [vmem:[%s7547_s26 + $0x158] sm:$0xff] %v6675_v2  ;;  %v6681_v56 = vadd.f32 %v6678_v4, %v4653_v63  ;;  %v6405_v60 = vpop.f32.mrb[83].mxu0 }
 0x427   : > { %4760 = vst [vmem:[%s7547_s26 + $0x160] sm:$0xff] %v6681_v56 }
 0x429   : > { %v2710_v32 = vpop.f32.mrb[88].mxu1 }
 0x42a   : > { %v4658_v39 = vpop.f32.mrb[84].mxu0  ;;  %v5980_v5 = vpop.f32.mrb[89].mxu1  ;;  %v6696_v0 = vadd.f32 %v8825_v50, %v2710_v32 }
 0x42b   : > { %v6687_v8 = vadd.f32 %v6684_v62, %v4658_v39  ;;  %v6408_v35 = vpop.f32.mrb[85].mxu0  ;;  %v2713_v42 = vpop.f32.mrb[90].mxu1 }
 0x42c   : > { %v4661_v13 = vpop.f32.mrb[86].mxu0  ;;  %v5981_v16 = vpop.f32.mrb[91].mxu1  ;;  %v6702_v52 = vadd.f32 %v8825_v50, %v2713_v42 }
 0x42d   : > { %4761 = vst [vmem:[%s7547_s26 + $0x168] sm:$0xff] %v6687_v8  ;;  %v6693_v22 = vadd.f32 %v6690_v21, %v4661_v13  ;;  %v6409_v40 = vpop.f32.mrb[87].mxu0 }
 0x42f   : > { %4762 = vst [vmem:[%s7547_s26 + $0x170] sm:$0xff] %v6693_v22 }
 0x432   : > { %v4666_v37 = vpop.f32.mrb[88].mxu0 }
 0x433   : > { %v6699_v23 = vadd.f32 %v6696_v0, %v4666_v37  ;;  %v6412_v38 = vpop.f32.mrb[89].mxu0 }
 0x434   : > { %v4669_v46 = vpop.f32.mrb[90].mxu0 }
 0x435   : > { %4763 = vst [vmem:[%s7547_s26 + $0x178] sm:$0xff] %v6699_v23  ;;  %v6705_v24 = vadd.f32 %v6702_v52, %v4669_v46  ;;  %v6413_v20 = vpop.f32.mrb[91].mxu0 }
 0x437   : > { %4764 = vst [vmem:[%s7547_s26 + $0x180] sm:$0xff] %v6705_v24 }
 0x438 PF: > { %s12_s9 = sadd.s32 1, %s7486_s9  }
 0x439   : > { %p9_p4 = scmp.ge.s32.totalorder %s12_s9, 4  }
 0x43b   :  { %11 = sbr.rel (!%p9_p4) target bundleno = 1 (0x1), region = 66 }

// kernel: fwd.15
= control target key start
LH: loop header
LB: loop body
LE: loop exit
PB: predicated region body
PF: predicated region fallthrough
CT: control target
= control target key end

     0   :  { %s1662_s15 = smov 0   ;;  %s3286_s0 = inlined_call_operand.vmem [shape: f32[2,19,23,128], index: 0, kind: input, shape index: {}]   ;;  %s3287_s1 = inlined_call_operand.vmem [shape: f32[1,128], index: 1, kind: input, shape index: {}]   ;;  %s3288_s2 = inlined_call_operand.vmem [shape: f32[1,128], index: 2, kind: input, shape index: {}]   ;;  %s3289_s3 = inlined_call_operand.vmem [shape: f32[2,19,23,128], index: 3, kind: input, shape index: {}]   ;;  %s3290_s4 = inlined_call_operand.vmem [shape: f32[2,19,23,128], index: 4, kind: output, shape index: {}]  }
   0x1 LB: > { %s1502_s16 = sadd.s32 4294967295, %s1634_s15   ;;  %p1506_p0 = scmp.ge.s32.totalorder %s1634_s15, 1  ;;  %s1634_s15 = sphi %s1662_s15, %s14_s15  }
   0x2   : > { %p172_p1 = scmp.lt.s32.totalorder %s1634_s15, 3 }
   0x4   : > { %p173_p2 = pnand %p1506_p0, %p172_p1 }
   0x6   : > { %176 = sbr.rel (%p173_p2) target bundleno = 827 (0x33b), region = 36 }
   0xd   : > { %p203_p3 = scmp.lt.s32.totalorder %s1502_s16, 1  ;;  %v275_v0 = vlaneseq  ;;  %v3306_v6 = vmov 0  ;;  %v3309_v10 = vmov 0  ;;  %vm390_vm5 = vcmask 1046528  }
   0xf   : > { %s3428_s16 = smov (!%p203_p3, %s1502_s16), 1  ;;  %v276_v1 = vshrl.u32 %v275_v0, 7  ;;  %v1672_v2 = vand.u32 127, %v275_v0 }
  0x10   : > { %s1670_s17 = smul.u32 456, %s3428_s16 }
  0x11   : > { %3305 = vst [vmem:[#allocation2_spill] sm:$0xff] %v1672_v2  ;;  %v278_v3 = vadd.s32 16, %v276_v1  ;;  %vm281_vm0 = vcmp.ge.s32.totalorder %v276_v1, 1  ;;  %vm311_vm1 = vcmp.lt.s32.totalorder %v1672_v2, 8 }
  0x12   : > { %s1678_s20 = scalar_lea.vmem %s3286_s0, %s1670_s17  ;;  %vm1689_vm2 = vmand %vm281_vm0, %vm311_vm1  ;;  %s2403_s28 = scalar_lea.vmem %s3290_s4, %s1670_s17 }
  0x13   : > { %v1682_v4 = vld [vmem:[%s1678_s20 + $0x18] sm:$0xff]  ;;  %v1685_v5 = vld [vmem:[%s1678_s20 + $0x20] sm:$0xff]  ;;  %v3307_v6 = vsel %vm1689_vm2, 4294967295, %v3306_v6  ;;  %vm298_vm3 = vcmp.le.s32.totalorder %v278_v3, 16  ;;  %v1694_v7 = vld [vmem:[%s1678_s20 + $0x28] sm:$0x7f]  ;;  %s2528_s10 = scalar_lea.vmem %s3289_s3, %s1670_s17 }
  0x14   : > { %3308 = vst [vmem:[#allocation3_spill] sm:$0xff] %v3307_v6  ;;  %v335_v8 = vsel %vm1689_vm2, %v1682_v4, 0.0  ;;  %v336_v9 = vsel %vm311_vm1, %v1685_v5, 0.0  ;;  %vm1704_vm4 = vmand %vm298_vm3, %vm311_vm1  ;;  %v1709_v11 = vld [vmem:[%s1678_s20 + $0x30] sm:$0xff]  ;;  %v1715_v14 = vld [vmem:[%s1678_s20 + $0x40] sm:$0x7f] }
  0x15   : > { %v3310_v10 = vsel %vm1704_vm4, 4294967295, %v3309_v10  ;;  %v337_v12 = vsel %vm1704_vm4, %v1694_v7, 0.0  ;;  %v394_v13 = vadd.f32 %v336_v9, %v335_v8  ;;  %v1718_v15 = vld [vmem:[%s1678_s20 + $0x38] sm:$0xff]  ;;  %v338_v16 = vsel %vm1689_vm2, %v1709_v11, 0.0  ;;  %v1731_v21 = vld [vmem:[%s1678_s20 + $0x48] sm:$0xff]  ;;  %v1738_v25 = vld [vmem:[%s1678_s20 + $0x50] sm:$0xff] }
  0x16   : > { %3311 = vst [vmem:[#allocation4_spill] sm:$0xff] %v3310_v10  ;;  %v395_v17 = vsel %vm390_vm5, %v337_v12, 0.0  ;;  %v340_v18 = vsel %vm1704_vm4, %v1715_v14, 0.0  ;;  %v339_v20 = vsel %vm311_vm1, %v1718_v15, 0.0  ;;  %v1734_v23 = vld [vmem:[%s1678_s20 + $0x58] sm:$0x7f] }
  0x17   : > { %v396_v19 = vadd.f32 %v395_v17, %v394_v13  ;;  %v399_v24 = vsel %vm390_vm5, %v340_v18, 0.0  ;;  %v341_v27 = vsel %vm1689_vm2, %v1731_v21, 0.0  ;;  %v343_v28 = vsel %vm1704_vm4, %v1734_v23, 0.0  ;;  %v1750_v31 = vld [vmem:[%s1678_s20 + $0x60] sm:$0xff]  ;;  %v1753_v33 = vld [vmem:[%s1678_s20 + $0x70] sm:$0x7f] }
  0x18   : > { %v342_v30 = vsel %vm311_vm1, %v1738_v25, 0.0  ;;  %v403_v34 = vsel %vm390_vm5, %v343_v28, 0.0  ;;  %v1757_v35 = vld [vmem:[%s1678_s20 + $0x68] sm:$0xff]  ;;  %v344_v37 = vsel %vm1689_vm2, %v1750_v31, 0.0  ;;  %v346_v38 = vsel %vm1704_vm4, %v1753_v33, 0.0  ;;  %v1769_v41 = vld [vmem:[%s1678_s20 + $0x78] sm:$0xff] }
  0x19   : > { %v397_v22 = vadd.f32 %v396_v19, %v338_v16  ;;  %v345_v40 = vsel %vm311_vm1, %v1757_v35, 0.0  ;;  %v1772_v43 = vld [vmem:[%s1678_s20 + $0x88] sm:$0x7f]  ;;  %v407_v44 = vsel %vm390_vm5, %v346_v38, 0.0  ;;  %v1776_v45 = vld [vmem:[%s1678_s20 + $0x80] sm:$0xff]  ;;  %v347_v47 = vsel %vm1689_vm2, %v1769_v41, 0.0 }
  0x1a   : > { %v349_v48 = vsel %vm1704_vm4, %v1772_v43, 0.0  ;;  %v348_v50 = vsel %vm311_vm1, %v1776_v45, 0.0  ;;  %v1788_v51 = vld [vmem:[%s1678_s20 + $0x90] sm:$0xff]  ;;  %v1791_v53 = vld [vmem:[%s1678_s20 + $0xa0] sm:$0x7f]  ;;  %v1795_v55 = vld [vmem:[%s1678_s20 + $0x98] sm:$0xff] }
  0x1b   : > { %v398_v26 = vadd.f32 %v397_v22, %v339_v20  ;;  %v411_v54 = vsel %vm390_vm5, %v349_v48, 0.0  ;;  %v350_v57 = vsel %vm1689_vm2, %v1788_v51, 0.0  ;;  %v352_v58 = vsel %vm1704_vm4, %v1791_v53, 0.0  ;;  %v1807_v61 = vld [vmem:[%s1678_s20 + $0xa8] sm:$0xff]  ;;  %v1810_v63 = vld [vmem:[%s1678_s20 + $0xb8] sm:$0x7f] }
  0x1c   : > { %v351_v60 = vsel %vm311_vm1, %v1795_v55, 0.0  ;;  %v415_v0 = vsel %vm390_vm5, %v352_v58, 0.0  ;;  %v1814_v1 = vld [vmem:[%s1678_s20 + $0xb0] sm:$0xff]  ;;  %v353_v8 = vsel %vm1689_vm2, %v1807_v61, 0.0  ;;  %v355_v9 = vsel %vm1704_vm4, %v1810_v63, 0.0  ;;  %v1826_v16 = vld [vmem:[%s1678_s20 + $0xc0] sm:$0xff] }
  0x1d   : > { %v400_v29 = vadd.f32 %v399_v24, %v398_v26  ;;  %v354_v13 = vsel %vm311_vm1, %v1814_v1, 0.0  ;;  %v1829_v18 = vld [vmem:[%s1678_s20 + $0xd0] sm:$0x7f]  ;;  %v419_v19 = vsel %vm390_vm5, %v355_v9, 0.0  ;;  %v1833_v20 = vld [vmem:[%s1678_s20 + $0xc8] sm:$0xff]  ;;  %v356_v24 = vsel %vm1689_vm2, %v1826_v16, 0.0 }
  0x1e   : > { %v358_v26 = vsel %vm1704_vm4, %v1829_v18, 0.0  ;;  %v357_v28 = vsel %vm311_vm1, %v1833_v20, 0.0  ;;  %v1883_v58 = vld [vmem:[%s1678_s20 + $0x108] sm:$0xff] }
  0x1f   : > { %v401_v32 = vadd.f32 %v400_v29, %v341_v27  ;;  %v1845_v29 = vld [vmem:[%s1678_s20 + $0xd8] sm:$0xff] }
  0x20   : > { %v359_v38 = vsel %vm1689_vm2, %v1845_v29, 0.0 }
  0x21   : > { %v402_v36 = vadd.f32 %v401_v32, %v342_v30  ;;  %v1848_v32 = vld [vmem:[%s1678_s20 + $0xe8] sm:$0x7f] }
  0x23   : > { %v404_v39 = vadd.f32 %v403_v34, %v402_v36  ;;  %v423_v34 = vsel %vm390_vm5, %v358_v26, 0.0  ;;  %v1852_v36 = vld [vmem:[%s1678_s20 + $0xe0] sm:$0xff]  ;;  %v1909_v26 = vld [vmem:[%s1678_s20 + $0x128] sm:$0xff] }
  0x25   : > { %v405_v42 = vadd.f32 %v404_v39, %v344_v37  ;;  %v361_v39 = vsel %vm1704_vm4, %v1848_v32, 0.0 }
  0x26   : > { %v427_v48 = vsel %vm390_vm5, %v361_v39, 0.0 }
  0x27   : > { %v406_v46 = vadd.f32 %v405_v42, %v345_v40  ;;  %v360_v42 = vsel %vm311_vm1, %v1852_v36, 0.0 }
  0x29   : > { %v408_v49 = vadd.f32 %v407_v44, %v406_v46  ;;  %v1864_v44 = vld [vmem:[%s1678_s20 + $0xf0] sm:$0xff] }
  0x2b   : > { %v409_v52 = vadd.f32 %v408_v49, %v347_v47  ;;  %v1867_v47 = vld [vmem:[%s1678_s20 + $0x100] sm:$0x7f]  ;;  %v1871_v49 = vld [vmem:[%s1678_s20 + $0xf8] sm:$0xff] }
  0x2d   : > { %v410_v56 = vadd.f32 %v409_v52, %v348_v50  ;;  %v362_v52 = vsel %vm1689_vm2, %v1864_v44, 0.0 }
  0x2f   : > { %v412_v59 = vadd.f32 %v411_v54, %v410_v56  ;;  %v364_v54 = vsel %vm1704_vm4, %v1867_v47, 0.0 }
  0x31   : > { %v413_v62 = vadd.f32 %v412_v59, %v350_v57  ;;  %v363_v57 = vsel %vm311_vm1, %v1871_v49, 0.0 }
  0x33   : > { %v414_v3 = vadd.f32 %v413_v62, %v351_v60  ;;  %v1886_v60 = vld [vmem:[%s1678_s20 + $0x118] sm:$0x7f]  ;;  %v431_v62 = vsel %vm390_vm5, %v364_v54, 0.0 }
  0x34   : > { %v367_v9 = vsel %vm1704_vm4, %v1886_v60, 0.0 }
  0x35   : > { %v416_v12 = vadd.f32 %v415_v0, %v414_v3  ;;  %v1890_v0 = vld [vmem:[%s1678_s20 + $0x110] sm:$0xff] }
  0x37   : > { %v417_v17 = vadd.f32 %v416_v12, %v353_v8  ;;  %v365_v8 = vsel %vm1689_vm2, %v1883_v58, 0.0 }
  0x39   : > { %v418_v22 = vadd.f32 %v417_v17, %v354_v13  ;;  %v366_v13 = vsel %vm311_vm1, %v1890_v0, 0.0  ;;  %v1902_v17 = vld [vmem:[%s1678_s20 + $0x120] sm:$0xff] }
  0x3b   : > { %v420_v27 = vadd.f32 %v419_v19, %v418_v22  ;;  %v1905_v22 = vld [vmem:[%s1678_s20 + $0x130] sm:$0x7f] }
  0x3d   : > { %v421_v30 = vadd.f32 %v420_v27, %v356_v24  ;;  %v435_v24 = vsel %vm390_vm5, %v367_v9, 0.0 }
  0x3f   : > { %v422_v37 = vadd.f32 %v421_v30, %v357_v28  ;;  %v368_v28 = vsel %vm1689_vm2, %v1902_v17, 0.0  ;;  %v370_v30 = vsel %vm1704_vm4, %v1905_v22, 0.0 }
  0x41   : > { %v424_v40 = vadd.f32 %v423_v34, %v422_v37  ;;  %v369_v37 = vsel %vm311_vm1, %v1909_v26, 0.0 }
  0x43   : > { %v425_v46 = vadd.f32 %v424_v40, %v359_v38  ;;  %v1921_v38 = vld [vmem:[%s1678_s20 + $0x138] sm:$0xff]  ;;  %v1924_v40 = vld [vmem:[%s1678_s20 + $0x148] sm:$0x7f] }
  0x45   : > { %v426_v50 = vadd.f32 %v425_v46, %v360_v42  ;;  %v439_v42 = vsel %vm390_vm5, %v370_v30, 0.0  ;;  %v1928_v46 = vld [vmem:[%s1678_s20 + $0x140] sm:$0xff]  ;;  %v1962_v30 = vld [vmem:[%s1678_s20 + $0x178] sm:$0x7f] }
  0x46   : > { %3313 = vst [vmem:[#allocation6_spill] sm:$0xff] %v1962_v30 }
  0x47   : > { %v428_v56 = vadd.f32 %v427_v48, %v426_v50  ;;  %v371_v50 = vsel %vm1689_vm2, %v1921_v38, 0.0 }
  0x49   : > { %v429_v59 = vadd.f32 %v428_v56, %v362_v52  ;;  %v373_v52 = vsel %vm1704_vm4, %v1924_v40, 0.0  ;;  %v372_v56 = vsel %vm311_vm1, %v1928_v46, 0.0 }
  0x4b   : > { %v430_v3 = vadd.f32 %v429_v59, %v363_v57  ;;  %v1940_v57 = vld [vmem:[%s1678_s20 + $0x150] sm:$0xff] }
  0x4d   : > { %v432_v12 = vadd.f32 %v431_v62, %v430_v3  ;;  %v1943_v62 = vld [vmem:[%s1678_s20 + $0x160] sm:$0x7f]  ;;  %v443_v3 = vsel %vm390_vm5, %v373_v52, 0.0 }
  0x4f   : > { %v433_v19 = vadd.f32 %v432_v12, %v365_v8  ;;  %v1947_v8 = vld [vmem:[%s1678_s20 + $0x158] sm:$0xff]  ;;  %v374_v12 = vsel %vm1689_vm2, %v1940_v57, 0.0 }
  0x51   : > { %v434_v27 = vadd.f32 %v433_v19, %v366_v13  ;;  %v376_v13 = vsel %vm1704_vm4, %v1943_v62, 0.0 }
  0x53   : > { %v436_v34 = vadd.f32 %v435_v24, %v434_v27  ;;  %v375_v24 = vsel %vm311_vm1, %v1947_v8, 0.0  ;;  %v1959_v27 = vld [vmem:[%s1678_s20 + $0x168] sm:$0xff] }
  0x54   : > { %3312 = vst [vmem:[#allocation5_spill] sm:$0xff] %v1959_v27 }
  0x55   : > { %v437_v39 = vadd.f32 %v436_v34, %v368_v28  ;;  %v447_v34 = vsel %vm390_vm5, %v376_v13, 0.0 }
  0x57   : > { %v438_v48 = vadd.f32 %v437_v39, %v369_v37  ;;  %v1966_v37 = vld [vmem:[%s1678_s20 + $0x170] sm:$0xff] }
  0x58   : > { %3314 = vst [vmem:[#allocation7_spill] sm:$0xff] %v1966_v37  ;;  %v378_v52 = vsel %vm311_vm1, %v1966_v37, 0.0 }
  0x59   : > { %v440_v54 = vadd.f32 %v439_v42, %v438_v48  ;;  %v377_v42 = vsel %vm1689_vm2, %v1959_v27, 0.0  ;;  %v379_v48 = vsel %vm1704_vm4, %v1962_v30, 0.0 }
  0x5b   : > { %v441_v59 = vadd.f32 %v440_v54, %v371_v50  ;;  %v1978_v54 = vld [vmem:[%s1678_s20 + $0x180] sm:$0xff] }
  0x5c   : > { %3315 = vst [vmem:[#allocation8_spill] sm:$0xff] %v1978_v54  ;;  %v380_v13 = vsel %vm1689_vm2, %v1978_v54, 0.0 }
  0x5d   : > { %v442_v9 = vadd.f32 %v441_v59, %v372_v56  ;;  %v1981_v59 = vld [vmem:[%s1678_s20 + $0x190] sm:$0x7f] }
  0x5f   : > { %v444_v19 = vadd.f32 %v443_v3, %v442_v9  ;;  %v451_v3 = vsel %vm390_vm5, %v379_v48, 0.0  ;;  %v1985_v9 = vld [vmem:[%s1678_s20 + $0x188] sm:$0xff] }
  0x61   : > { %v445_v28 = vadd.f32 %v444_v19, %v374_v12  ;;  %v382_v19 = vsel %vm1704_vm4, %v1981_v59, 0.0 }
  0x63   : > { %v446_v39 = vadd.f32 %v445_v28, %v375_v24  ;;  %v381_v28 = vsel %vm311_vm1, %v1985_v9, 0.0 }
  0x65   : > { %v448_v50 = vadd.f32 %v447_v34, %v446_v39  ;;  %v455_v39 = vsel %vm390_vm5, %v382_v19, 0.0 }
  0x67   : > { %v449_v56 = vadd.f32 %v448_v50, %v377_v42 }
  0x69   : > { %v450_v12 = vadd.f32 %v449_v56, %v378_v52 }
  0x6b   : > { %v452_v24 = vadd.f32 %v451_v3, %v450_v12 }
  0x6d   : > { %v453_v34 = vadd.f32 %v452_v24, %v380_v13 }
  0x6f   : > { %v454_v42 = vadd.f32 %v453_v34, %v381_v28 }
  0x71   : > { %v456_v48 = vadd.f32 %v455_v39, %v454_v42 }
  0x73   : > { %465 = vadd.xlane.f32.xlu0 %v456_v48 }
 0x100   : > { %v466_v50 = vpop.xlane.xlu0 %465 }
 0x101   : > { %v467_v52 = vrot.slane %v466_v50, 4 }
 0x103   : > { %v468_v56 = vadd.f32 %v467_v52, %v466_v50 }
 0x105   : > { %v469_v37 = vrot.slane %v468_v56, 2 }
 0x107   : > { %v470_v54 = vadd.f32 %v469_v37, %v468_v56 }
 0x109   : > { %v471_v30 = vrot.slane %v470_v54, 1 }
 0x10b   : > { %v472_v27 = vadd.f32 %v471_v30, %v470_v54 }
 0x10d   : > { %1515 = vpush %v472_v27 }
 0x13e   : > { %s1516_s21 = spop %1515 }
 0x13f   : > { %s474_s22 = smul.f32 0.00048828125, %s1516_s21 }
 0x141   : > { %v1997_v3 = vstv %s474_s22 }
 0x142   : > { %v2001_v12 = vsub.f32 %v1682_v4, %v1997_v3  ;;  %v2005_v13 = vsub.f32 %v1685_v5, %v1997_v3  ;;  %v2009_v19 = vsub.f32 %v1694_v7, %v1997_v3  ;;  %v2019_v4 = vsub.f32 %v1709_v11, %v1997_v3 }
 0x143   : > { %v2023_v5 = vsub.f32 %v1715_v14, %v1997_v3  ;;  %v2027_v7 = vsub.f32 %v1718_v15, %v1997_v3  ;;  %v2042_v15 = vsub.f32 %v1731_v21, %v1997_v3  ;;  %v2048_v48 = vsub.f32 %v1734_v23, %v1997_v3 }
 0x144   : > { %v536_v30 = vmul.f32 %v2001_v12, %v2001_v12  ;;  %v537_v27 = vmul.f32 %v2005_v13, %v2005_v13  ;;  %v538_v37 = vmul.f32 %v2009_v19, %v2009_v19  ;;  %v539_v11 = vmul.f32 %v2019_v4, %v2019_v4 }
 0x145   : > { %v541_v14 = vmul.f32 %v2023_v5, %v2023_v5  ;;  %v540_v42 = vmul.f32 %v2027_v7, %v2027_v7  ;;  %v2052_v52 = vsub.f32 %v1738_v25, %v1997_v3  ;;  %v544_v23 = vmul.f32 %v2048_v48, %v2048_v48 }
 0x146   : > { %v593_v54 = vsel %vm1689_vm2, %v536_v30, 0.0  ;;  %v594_v24 = vsel %vm311_vm1, %v537_v27, 0.0  ;;  %v595_v28 = vsel %vm1704_vm4, %v538_v37, 0.0  ;;  %v596_v56 = vsel %vm1689_vm2, %v539_v11, 0.0 }
 0x147   : > { %v651_v34 = vadd.f32 %v594_v24, %v593_v54  ;;  %v652_v39 = vsel %vm390_vm5, %v595_v28, 0.0  ;;  %v598_v30 = vsel %vm1704_vm4, %v541_v14, 0.0  ;;  %v542_v27 = vmul.f32 %v2042_v15, %v2042_v15 }
 0x148   : > { %v597_v37 = vsel %vm311_vm1, %v540_v42, 0.0  ;;  %v2066_v25 = vsub.f32 %v1750_v31, %v1997_v3  ;;  %v543_v24 = vmul.f32 %v2052_v52, %v2052_v52  ;;  %v656_v28 = vsel %vm390_vm5, %v598_v30, 0.0 }
 0x149   : > { %v653_v50 = vadd.f32 %v652_v39, %v651_v34  ;;  %v2073_v11 = vsub.f32 %v1753_v33, %v1997_v3  ;;  %v2077_v34 = vsub.f32 %v1757_v35, %v1997_v3  ;;  %v599_v39 = vsel %vm1689_vm2, %v542_v27, 0.0 }
 0x14a   : > { %v601_v31 = vsel %vm1704_vm4, %v544_v23, 0.0  ;;  %v2091_v35 = vsub.f32 %v1769_v41, %v1997_v3 }
 0x14b   : > { %v654_v21 = vadd.f32 %v653_v50, %v596_v56  ;;  %v545_v50 = vmul.f32 %v2066_v25, %v2066_v25  ;;  %v600_v56 = vsel %vm311_vm1, %v543_v24, 0.0  ;;  %v547_v33 = vmul.f32 %v2073_v11, %v2073_v11 }
 0x14c   : > { %v660_v27 = vsel %vm390_vm5, %v601_v31, 0.0 }
 0x14d   : > { %v655_v54 = vadd.f32 %v654_v21, %v597_v37  ;;  %v546_v21 = vmul.f32 %v2077_v34, %v2077_v34  ;;  %v2098_v37 = vsub.f32 %v1772_v43, %v1997_v3  ;;  %v602_v24 = vsel %vm1689_vm2, %v545_v50, 0.0 }
 0x14e   : > { %v604_v41 = vsel %vm1704_vm4, %v547_v33, 0.0 }
 0x14f   : > { %v657_v14 = vadd.f32 %v656_v28, %v655_v54  ;;  %v2102_v54 = vsub.f32 %v1776_v45, %v1997_v3  ;;  %v550_v43 = vmul.f32 %v2098_v37, %v2098_v37  ;;  %v2116_v45 = vsub.f32 %v1788_v51, %v1997_v3 }
 0x150   : > { %v664_v50 = vsel %vm390_vm5, %v604_v41, 0.0 }
 0x151   : > { %v658_v42 = vadd.f32 %v657_v14, %v599_v39  ;;  %v548_v14 = vmul.f32 %v2091_v35, %v2091_v35  ;;  %v603_v39 = vsel %vm311_vm1, %v546_v21, 0.0  ;;  %v607_v51 = vsel %vm1704_vm4, %v550_v43, 0.0 }
 0x153   : > { %v659_v30 = vadd.f32 %v658_v42, %v600_v56  ;;  %v549_v42 = vmul.f32 %v2102_v54, %v2102_v54  ;;  %v2123_v56 = vsub.f32 %v1791_v53, %v1997_v3  ;;  %v605_v21 = vsel %vm1689_vm2, %v548_v14, 0.0 }
 0x154   : > { %v668_v14 = vsel %vm390_vm5, %v607_v51, 0.0 }
 0x155   : > { %v661_v23 = vadd.f32 %v660_v27, %v659_v30  ;;  %v2127_v30 = vsub.f32 %v1795_v55, %v1997_v3  ;;  %v553_v53 = vmul.f32 %v2123_v56, %v2123_v56  ;;  %v2141_v55 = vsub.f32 %v1807_v61, %v1997_v3 }
 0x157   : > { %v662_v28 = vadd.f32 %v661_v23, %v602_v24  ;;  %v551_v23 = vmul.f32 %v2116_v45, %v2116_v45  ;;  %v606_v24 = vsel %vm311_vm1, %v549_v42, 0.0  ;;  %v610_v61 = vsel %vm1704_vm4, %v553_v53, 0.0 }
 0x159   : > { %v663_v31 = vadd.f32 %v662_v28, %v603_v39  ;;  %v552_v28 = vmul.f32 %v2127_v30, %v2127_v30  ;;  %v2148_v39 = vsub.f32 %v1810_v63, %v1997_v3  ;;  %v608_v42 = vsel %vm1689_vm2, %v551_v23, 0.0 }
 0x15a   : > { %v672_v23 = vsel %vm390_vm5, %v610_v61, 0.0 }
 0x15b   : > { %v665_v33 = vadd.f32 %v664_v50, %v663_v31  ;;  %v2152_v31 = vsub.f32 %v1814_v1, %v1997_v3  ;;  %v556_v63 = vmul.f32 %v2148_v39, %v2148_v39  ;;  %v2166_v1 = vsub.f32 %v1826_v16, %v1997_v3 }
 0x15d   : > { %v666_v27 = vadd.f32 %v665_v33, %v605_v21  ;;  %v554_v33 = vmul.f32 %v2141_v55, %v2141_v55  ;;  %v609_v21 = vsel %vm311_vm1, %v552_v28, 0.0  ;;  %v613_v16 = vsel %vm1704_vm4, %v556_v63, 0.0 }
 0x15f   : > { %v667_v41 = vadd.f32 %v666_v27, %v606_v24  ;;  %v555_v27 = vmul.f32 %v2152_v31, %v2152_v31  ;;  %v2173_v24 = vsub.f32 %v1829_v18, %v1997_v3  ;;  %v611_v28 = vsel %vm1689_vm2, %v554_v33, 0.0 }
 0x160   : > { %v676_v33 = vsel %vm390_vm5, %v613_v16, 0.0 }
 0x161   : > { %v669_v43 = vadd.f32 %v668_v14, %v667_v41  ;;  %v2177_v41 = vsub.f32 %v1833_v20, %v1997_v3  ;;  %v559_v18 = vmul.f32 %v2173_v24, %v2173_v24  ;;  %v2191_v20 = vsub.f32 %v1845_v29, %v1997_v3 }
 0x163   : > { %v670_v50 = vadd.f32 %v669_v43, %v608_v42  ;;  %v557_v43 = vmul.f32 %v2166_v1, %v2166_v1  ;;  %v612_v42 = vsel %vm311_vm1, %v555_v27, 0.0  ;;  %v616_v29 = vsel %vm1704_vm4, %v559_v18, 0.0 }
 0x165   : > { %v671_v51 = vadd.f32 %v670_v50, %v609_v21  ;;  %v558_v50 = vmul.f32 %v2177_v41, %v2177_v41  ;;  %v2198_v21 = vsub.f32 %v1848_v32, %v1997_v3  ;;  %v614_v27 = vsel %vm1689_vm2, %v557_v43, 0.0 }
 0x166   : > { %v680_v43 = vsel %vm390_vm5, %v616_v29, 0.0 }
 0x167   : > { %v673_v53 = vadd.f32 %v672_v23, %v671_v51  ;;  %v2202_v51 = vsub.f32 %v1852_v36, %v1997_v3  ;;  %v562_v32 = vmul.f32 %v2198_v21, %v2198_v21  ;;  %v2216_v36 = vsub.f32 %v1864_v44, %v1997_v3 }
 0x169   : > { %v674_v14 = vadd.f32 %v673_v53, %v611_v28  ;;  %v560_v53 = vmul.f32 %v2191_v20, %v2191_v20  ;;  %v615_v28 = vsel %vm311_vm1, %v558_v50, 0.0  ;;  %v619_v44 = vsel %vm1704_vm4, %v562_v32, 0.0 }
 0x16b   : > { %v675_v61 = vadd.f32 %v674_v14, %v612_v42  ;;  %v561_v14 = vmul.f32 %v2202_v51, %v2202_v51  ;;  %v2223_v42 = vsub.f32 %v1867_v47, %v1997_v3  ;;  %v617_v50 = vsel %vm1689_vm2, %v560_v53, 0.0 }
 0x16c   : > { %v684_v53 = vsel %vm390_vm5, %v619_v44, 0.0 }
 0x16d   : > { %v677_v63 = vadd.f32 %v676_v33, %v675_v61  ;;  %v2227_v61 = vsub.f32 %v1871_v49, %v1997_v3  ;;  %v565_v47 = vmul.f32 %v2223_v42, %v2223_v42  ;;  %v2241_v49 = vsub.f32 %v1883_v58, %v1997_v3 }
 0x16f   : > { %v678_v23 = vadd.f32 %v677_v63, %v614_v27  ;;  %v563_v63 = vmul.f32 %v2216_v36, %v2216_v36  ;;  %v618_v27 = vsel %vm311_vm1, %v561_v14, 0.0  ;;  %v622_v58 = vsel %vm1704_vm4, %v565_v47, 0.0 }
 0x171   : > { %v679_v16 = vadd.f32 %v678_v23, %v615_v28  ;;  %v564_v23 = vmul.f32 %v2227_v61, %v2227_v61  ;;  %v2248_v28 = vsub.f32 %v1886_v60, %v1997_v3  ;;  %v620_v14 = vsel %vm1689_vm2, %v563_v63, 0.0 }
 0x172   : > { %v688_v63 = vsel %vm390_vm5, %v622_v58, 0.0 }
 0x173   : > { %v681_v18 = vadd.f32 %v680_v43, %v679_v16  ;;  %v2252_v16 = vsub.f32 %v1890_v0, %v1997_v3  ;;  %v568_v60 = vmul.f32 %v2248_v28, %v2248_v28  ;;  %v2266_v0 = vsub.f32 %v1902_v17, %v1997_v3 }
 0x175   : > { %v682_v33 = vadd.f32 %v681_v18, %v617_v50  ;;  %v566_v18 = vmul.f32 %v2241_v49, %v2241_v49  ;;  %v621_v50 = vsel %vm311_vm1, %v564_v23, 0.0  ;;  %v625_v17 = vsel %vm1704_vm4, %v568_v60, 0.0 }
 0x177   : > { %v683_v29 = vadd.f32 %v682_v33, %v618_v27  ;;  %v567_v33 = vmul.f32 %v2252_v16, %v2252_v16  ;;  %v2273_v27 = vsub.f32 %v1905_v22, %v1997_v3  ;;  %v623_v23 = vsel %vm1689_vm2, %v566_v18, 0.0 }
 0x178   : > { %v692_v18 = vsel %vm390_vm5, %v625_v17, 0.0 }
 0x179   : > { %v685_v32 = vadd.f32 %v684_v53, %v683_v29  ;;  %v2277_v29 = vsub.f32 %v1909_v26, %v1997_v3  ;;  %v571_v22 = vmul.f32 %v2273_v27, %v2273_v27  ;;  %v2291_v26 = vsub.f32 %v1921_v38, %v1997_v3 }
 0x17b   : > { %v686_v43 = vadd.f32 %v685_v32, %v620_v14  ;;  %v569_v32 = vmul.f32 %v2266_v0, %v2266_v0  ;;  %v624_v14 = vsel %vm311_vm1, %v567_v33, 0.0  ;;  %v628_v38 = vsel %vm1704_vm4, %v571_v22, 0.0 }
 0x17d   : > { %v687_v44 = vadd.f32 %v686_v43, %v621_v50  ;;  %v570_v43 = vmul.f32 %v2277_v29, %v2277_v29  ;;  %v2298_v50 = vsub.f32 %v1924_v40, %v1997_v3  ;;  %v626_v33 = vsel %vm1689_vm2, %v569_v32, 0.0 }
 0x17e   : > { %v696_v32 = vsel %vm390_vm5, %v628_v38, 0.0 }
 0x17f   : > { %v689_v47 = vadd.f32 %v688_v63, %v687_v44  ;;  %v2302_v44 = vsub.f32 %v1928_v46, %v1997_v3  ;;  %v574_v40 = vmul.f32 %v2298_v50, %v2298_v50  ;;  %v2316_v46 = vsub.f32 %v1940_v57, %v1997_v3 }
 0x181   : > { %v690_v53 = vadd.f32 %v689_v47, %v623_v23  ;;  %v572_v47 = vmul.f32 %v2291_v26, %v2291_v26  ;;  %v627_v23 = vsel %vm311_vm1, %v570_v43, 0.0  ;;  %v631_v57 = vsel %vm1704_vm4, %v574_v40, 0.0  ;;  %v3317_v40 = vld [vmem:[#allocation6_spill] sm:$0xff] }
 0x183   : > { %v691_v58 = vadd.f32 %v690_v53, %v624_v14  ;;  %v573_v53 = vmul.f32 %v2302_v44, %v2302_v44  ;;  %v2323_v14 = vsub.f32 %v1943_v62, %v1997_v3  ;;  %v629_v43 = vsel %vm1689_vm2, %v572_v47, 0.0 }
 0x185   : > { %v693_v60 = vadd.f32 %v692_v18, %v691_v58  ;;  %v2327_v58 = vsub.f32 %v1947_v8, %v1997_v3  ;;  %v577_v62 = vmul.f32 %v2323_v14, %v2323_v14  ;;  %v3316_v8 = vld [vmem:[#allocation5_spill] sm:$0xff] }
 0x187   : > { %v694_v63 = vadd.f32 %v693_v60, %v626_v33  ;;  %v575_v60 = vmul.f32 %v2316_v46, %v2316_v46  ;;  %v630_v33 = vsel %vm311_vm1, %v573_v53, 0.0  ;;  %v576_v47 = vmul.f32 %v2327_v58, %v2327_v58  ;;  %v3319_v53 = vld [vmem:[#allocation7_spill] sm:$0xff] }
 0x189   : > { %v695_v17 = vadd.f32 %v694_v63, %v627_v23  ;;  %v2341_v63 = vsub.f32 %v3316_v8, %v1997_v3  ;;  %v700_v23 = vsel %vm390_vm5, %v631_v57, 0.0  ;;  %v633_v57 = vsel %vm311_vm1, %v576_v47, 0.0 }
 0x18a   : > { %v2377_v47 = vsub.f32 %v1985_v9, %v1997_v3 }
 0x18b   : > { %v697_v22 = vadd.f32 %v696_v32, %v695_v17  ;;  %v2348_v17 = vsub.f32 %v3317_v40, %v1997_v3  ;;  %v578_v8 = vmul.f32 %v2341_v63, %v2341_v63  ;;  %v3320_v40 = vld [vmem:[#allocation8_spill] sm:$0xff] }
 0x18c   : > { %3322 = vst [vmem:[#allocation7_spill] sm:$0xff] %v2377_v47  ;;  %v582_v9 = vmul.f32 %v2377_v47, %v2377_v47 }
 0x18d   : > { %v698_v18 = vadd.f32 %v697_v22, %v629_v43  ;;  %3318 = vst [vmem:[#allocation5_spill] sm:$0xff] %v2348_v17  ;;  %v2352_v22 = vsub.f32 %v3319_v53, %v1997_v3  ;;  %v632_v43 = vsel %vm1689_vm2, %v575_v60, 0.0  ;;  %v2366_v53 = vsub.f32 %v3320_v40, %v1997_v3 }
 0x18f   : > { %v699_v38 = vadd.f32 %v698_v18, %v630_v33  ;;  %v634_v18 = vsel %vm1704_vm4, %v577_v62, 0.0  ;;  %v579_v60 = vmul.f32 %v2352_v22, %v2352_v22 }
 0x190   : > { %v704_v62 = vsel %vm390_vm5, %v634_v18, 0.0 }
 0x191   : > { %v701_v32 = vadd.f32 %v700_v23, %v699_v38  ;;  %v580_v38 = vmul.f32 %v2348_v17, %v2348_v17  ;;  %v581_v17 = vmul.f32 %v2366_v53, %v2366_v53  ;;  %v636_v18 = vsel %vm311_vm1, %v579_v60, 0.0 }
 0x192   : > { %v639_v60 = vsel %vm311_vm1, %v582_v9, 0.0 }
 0x193   : > { %v702_v33 = vadd.f32 %v701_v32, %v632_v43  ;;  %v2373_v32 = vsub.f32 %v1981_v59, %v1997_v3 }
 0x195   : > { %v703_v23 = vadd.f32 %v702_v33, %v633_v57  ;;  %3321 = vst [vmem:[#allocation6_spill] sm:$0xff] %v2373_v32  ;;  %v635_v33 = vsel %vm1689_vm2, %v578_v8, 0.0  ;;  %v637_v57 = vsel %vm1704_vm4, %v580_v38, 0.0  ;;  %v583_v59 = vmul.f32 %v2373_v32, %v2373_v32 }
 0x196   : > { %v708_v3 = vsel %vm390_vm5, %v637_v57, 0.0  ;;  %v638_v38 = vsel %vm1689_vm2, %v581_v17, 0.0 }
 0x197   : > { %v705_v43 = vadd.f32 %v704_v62, %v703_v23  ;;  %v640_v62 = vsel %vm1704_vm4, %v583_v59, 0.0 }
 0x198   : > { %v712_v32 = vsel %vm390_vm5, %v640_v62, 0.0 }
 0x199   : > { %v706_v40 = vadd.f32 %v705_v43, %v635_v33 }
 0x19b   : > { %v707_v23 = vadd.f32 %v706_v40, %v636_v18 }
 0x19d   : > { %v709_v8 = vadd.f32 %v708_v3, %v707_v23 }
 0x19f   : > { %v710_v43 = vadd.f32 %v709_v8, %v638_v38 }
 0x1a1   : > { %v711_v33 = vadd.f32 %v710_v43, %v639_v60 }
 0x1a3   : > { %v713_v40 = vadd.f32 %v712_v32, %v711_v33 }
 0x1a5   : > { %722 = vadd.xlane.f32.xlu0 %v713_v40 }
 0x232   : > { %v723_v18 = vpop.xlane.xlu0 %722 }
 0x233   : > { %v724_v47 = vrot.slane %v723_v18, 4 }
 0x235   : > { %v725_v57 = vadd.f32 %v724_v47, %v723_v18 }
 0x237   : > { %v726_v23 = vrot.slane %v725_v57, 2 }
 0x239   : > { %v727_v3 = vadd.f32 %v726_v23, %v725_v57  ;;  %v3324_v23 = vld [vmem:[#allocation7_spill] sm:$0xff] }
 0x23b   : > { %v728_v6 = vrot.slane %v727_v3, 1 }
 0x23d   : > { %v729_v17 = vadd.f32 %v728_v6, %v727_v3  ;;  %v1636_v6 = vmov 0.0  }
 0x23e   : > { %1378 = vst [vmem:[%s2403_s28] sm:$0xff] %v1636_v6  ;;  %1379 = vst [vmem:[%s2403_s28 + $0x8] sm:$0xff] %v1636_v6 }
 0x23f   : > { %1517 = vpush %v729_v17  ;;  %1380 = vst [vmem:[%s2403_s28 + $0x10] sm:$0x7f] %v1636_v6  ;;  %v3325_v17 = vld [vmem:[#allocation6_spill] sm:$0xff] }
 0x240   : > { %1429 = vst [vmem:[%s2403_s28 + $0x198] sm:$0xff] %v1636_v6  ;;  %1430 = vst [vmem:[%s2403_s28 + $0x1a0] sm:$0xff] %v1636_v6 }
 0x241   : > { %1431 = vst [vmem:[%s2403_s28 + $0x1a8] sm:$0x7f] %v1636_v6  ;;  %1432 = vst [vmem:[%s2403_s28 + $0x1b0] sm:$0xff] %v1636_v6 }
 0x242   : > { %1433 = vst [vmem:[%s2403_s28 + $0x1b8] sm:$0xff] %v1636_v6  ;;  %1434 = vst [vmem:[%s2403_s28 + $0x1c0] sm:$0x7f] %v1636_v6 }
 0x270   : > { %s1518_s23 = spop %1517 }
 0x271   : > { %s731_s24 = smul.f32 0.00048828125, %s1518_s23 }
 0x273   : > { %s732_s25 = sadd.f32 1e-05, %s731_s24 }
 0x275   : > { %v733_v59 = vstv %s732_s25 }
 0x276   : > { %1530 = vrsqrt.f32 %v733_v59 }
 0x280   : > { %v1531_v9 = vpop.eup %1530 }
 0x281   : > { %1519 = vpush %v1531_v9 }
 0x2b2   : > { %s1520_s29 = spop %1519 }
 0x2b3   : > { %v736_v32 = vstv %s1520_s29 }
 0x2b4   : > { %v740_v47 = vmul.f32 %v736_v32, %v2001_v12  ;;  %v741_v8 = vmul.f32 %v736_v32, %v2005_v13  ;;  %v742_v38 = vmul.f32 %v736_v32, %v2009_v19  ;;  %v743_v62 = vmul.f32 %v736_v32, %v2019_v4 }
 0x2b5   : > { %v744_v43 = vmul.f32 %v736_v32, %v2027_v7  ;;  %v745_v60 = vmul.f32 %v736_v32, %v2023_v5  ;;  %v746_v33 = vmul.f32 %v736_v32, %v2042_v15  ;;  %v747_v40 = vmul.f32 %v736_v32, %v2052_v52 }
 0x2b6   : > { %v748_v18 = vmul.f32 %v736_v32, %v2048_v48  ;;  %v749_v57 = vmul.f32 %v736_v32, %v2066_v25  ;;  %v750_v12 = vmul.f32 %v736_v32, %v2077_v34  ;;  %v751_v13 = vmul.f32 %v736_v32, %v2073_v11 }
 0x2b7   : > { %v752_v19 = vmul.f32 %v736_v32, %v2091_v35  ;;  %v753_v4 = vmul.f32 %v736_v32, %v2102_v54  ;;  %v754_v7 = vmul.f32 %v736_v32, %v2098_v37  ;;  %v755_v5 = vmul.f32 %v736_v32, %v2116_v45 }
 0x2b8   : > { %v756_v15 = vmul.f32 %v736_v32, %v2127_v30  ;;  %v757_v52 = vmul.f32 %v736_v32, %v2123_v56  ;;  %v758_v48 = vmul.f32 %v736_v32, %v2141_v55  ;;  %v759_v25 = vmul.f32 %v736_v32, %v2152_v31 }
 0x2b9   : > { %v760_v34 = vmul.f32 %v736_v32, %v2148_v39  ;;  %v761_v11 = vmul.f32 %v736_v32, %v2166_v1  ;;  %v762_v35 = vmul.f32 %v736_v32, %v2177_v41  ;;  %v763_v54 = vmul.f32 %v736_v32, %v2173_v24 }
 0x2ba   : > { %v764_v37 = vmul.f32 %v736_v32, %v2191_v20  ;;  %v765_v45 = vmul.f32 %v736_v32, %v2202_v51  ;;  %v766_v30 = vmul.f32 %v736_v32, %v2198_v21  ;;  %v767_v56 = vmul.f32 %v736_v32, %v2216_v36 }
 0x2bb   : > { %v768_v55 = vmul.f32 %v736_v32, %v2227_v61  ;;  %v769_v31 = vmul.f32 %v736_v32, %v2223_v42  ;;  %v770_v39 = vmul.f32 %v736_v32, %v2241_v49  ;;  %v771_v1 = vmul.f32 %v736_v32, %v2252_v16  ;;  %v1510_v42 = vld [vmem:[%s3287_s1] ss:$0 sm:$0xff] }
 0x2bc   : > { %v772_v41 = vmul.f32 %v736_v32, %v2248_v28  ;;  %v773_v24 = vmul.f32 %v736_v32, %v2266_v0  ;;  %v774_v20 = vmul.f32 %v736_v32, %v2277_v29  ;;  %v775_v51 = vmul.f32 %v736_v32, %v2273_v27  ;;  %v3323_v29 = vld [vmem:[#allocation5_spill] sm:$0xff] }
 0x2bd   : > { %v776_v21 = vmul.f32 %v736_v32, %v2291_v26  ;;  %v777_v36 = vmul.f32 %v736_v32, %v2302_v44  ;;  %v778_v61 = vmul.f32 %v736_v32, %v2298_v50  ;;  %v779_v49 = vmul.f32 %v736_v32, %v2316_v46 }
 0x2be   : > { %v780_v28 = vmul.f32 %v736_v32, %v2327_v58  ;;  %v781_v16 = vmul.f32 %v736_v32, %v2323_v14  ;;  %v782_v0 = vmul.f32 %v736_v32, %v2341_v63  ;;  %v783_v27 = vmul.f32 %v736_v32, %v2352_v22 }
 0x2bf   : > { %v784_v26 = vmul.f32 %v736_v32, %v3323_v29  ;;  %v785_v44 = vmul.f32 %v736_v32, %v2366_v53  ;;  %v786_v3 = vmul.f32 %v736_v32, %v3324_v23  ;;  %v787_v59 = vmul.f32 %v736_v32, %v3325_v17 }
 0x2c0   : > { %v804_v9 = vmul.f32 %v1510_v42, %v740_v47  ;;  %v805_v50 = vmul.f32 %v1510_v42, %v741_v8  ;;  %v806_v6 = vmul.f32 %v1510_v42, %v742_v38  ;;  %v807_v46 = vmul.f32 %v1510_v42, %v743_v62 }
 0x2c1   : > { %v808_v10 = vmul.f32 %v1510_v42, %v744_v43  ;;  %v809_v58 = vmul.f32 %v1510_v42, %v745_v60  ;;  %v810_v2 = vmul.f32 %v1510_v42, %v746_v33  ;;  %v811_v14 = vmul.f32 %v1510_v42, %v747_v40 }
 0x2c2   : > { %v812_v63 = vmul.f32 %v1510_v42, %v748_v18  ;;  %v813_v22 = vmul.f32 %v1510_v42, %v749_v57  ;;  %v814_v29 = vmul.f32 %v1510_v42, %v750_v12  ;;  %v815_v53 = vmul.f32 %v1510_v42, %v751_v13 }
 0x2c3   : > { %v816_v23 = vmul.f32 %v1510_v42, %v752_v19  ;;  %v817_v17 = vmul.f32 %v1510_v42, %v753_v4  ;;  %v818_v32 = vmul.f32 %v1510_v42, %v754_v7  ;;  %v819_v47 = vmul.f32 %v1510_v42, %v755_v5 }
 0x2c4   : > { %v820_v8 = vmul.f32 %v1510_v42, %v756_v15  ;;  %v821_v38 = vmul.f32 %v1510_v42, %v757_v52  ;;  %v822_v62 = vmul.f32 %v1510_v42, %v758_v48  ;;  %v823_v43 = vmul.f32 %v1510_v42, %v759_v25 }
 0x2c5   : > { %v824_v60 = vmul.f32 %v1510_v42, %v760_v34  ;;  %v825_v33 = vmul.f32 %v1510_v42, %v761_v11  ;;  %v826_v40 = vmul.f32 %v1510_v42, %v762_v35  ;;  %v827_v18 = vmul.f32 %v1510_v42, %v763_v54  ;;  %v2468_v54 = vld [vmem:[%s3288_s2] ss:$0 sm:$0xff] }
 0x2c6   : > { %v828_v57 = vmul.f32 %v1510_v42, %v764_v37  ;;  %v829_v12 = vmul.f32 %v1510_v42, %v765_v45  ;;  %v830_v13 = vmul.f32 %v1510_v42, %v766_v30  ;;  %v831_v19 = vmul.f32 %v1510_v42, %v767_v56 }
 0x2c7   : > { %v832_v4 = vmul.f32 %v1510_v42, %v768_v55  ;;  %v833_v7 = vmul.f32 %v1510_v42, %v769_v31  ;;  %v834_v5 = vmul.f32 %v1510_v42, %v770_v39  ;;  %v835_v15 = vmul.f32 %v1510_v42, %v771_v1 }
 0x2c8   : > { %v836_v52 = vmul.f32 %v1510_v42, %v772_v41  ;;  %v837_v48 = vmul.f32 %v1510_v42, %v773_v24  ;;  %v838_v25 = vmul.f32 %v1510_v42, %v774_v20  ;;  %v839_v34 = vmul.f32 %v1510_v42, %v775_v51 }
 0x2c9   : > { %v840_v11 = vmul.f32 %v1510_v42, %v776_v21  ;;  %v841_v35 = vmul.f32 %v1510_v42, %v777_v36  ;;  %v842_v37 = vmul.f32 %v1510_v42, %v778_v61  ;;  %v843_v45 = vmul.f32 %v1510_v42, %v779_v49 }
 0x2ca   : > { %v844_v30 = vmul.f32 %v1510_v42, %v780_v28  ;;  %v845_v56 = vmul.f32 %v1510_v42, %v781_v16  ;;  %v2470_v55 = vmul.f32 %v1510_v42, %v782_v0  ;;  %v2472_v31 = vmul.f32 %v1510_v42, %v783_v27 }
 0x2cb   : > { %v2474_v39 = vmul.f32 %v1510_v42, %v784_v26  ;;  %v2476_v1 = vmul.f32 %v1510_v42, %v785_v44  ;;  %v2478_v41 = vmul.f32 %v1510_v42, %v786_v3  ;;  %v2480_v24 = vmul.f32 %v1510_v42, %v787_v59 }
 0x2cc   : > { %v2483_v20 = vadd.f32 %v2468_v54, %v804_v9  ;;  %v2486_v51 = vadd.f32 %v2468_v54, %v805_v50  ;;  %v2489_v21 = vadd.f32 %v2468_v54, %v806_v6  ;;  %v2492_v36 = vadd.f32 %v2468_v54, %v807_v46 }
 0x2cd   : > { %v2495_v61 = vadd.f32 %v2468_v54, %v808_v10  ;;  %v2498_v49 = vadd.f32 %v2468_v54, %v809_v58  ;;  %v2501_v42 = vadd.f32 %v2468_v54, %v810_v2  ;;  %v2504_v28 = vadd.f32 %v2468_v54, %v811_v14 }
 0x2ce   : > { %v2507_v16 = vadd.f32 %v2468_v54, %v812_v63  ;;  %v2510_v0 = vadd.f32 %v2468_v54, %v813_v22  ;;  %v2513_v27 = vadd.f32 %v2468_v54, %v814_v29  ;;  %v2516_v10 = vadd.f32 %v2468_v54, %v815_v53 }
 0x2cf   : > { %v2519_v26 = vadd.f32 %v2468_v54, %v816_v23  ;;  %v2522_v2 = vadd.f32 %v2468_v54, %v817_v17  ;;  %v2531_v44 = vadd.f32 %v2468_v54, %v818_v32  ;;  %v2534_v3 = vadd.f32 %v2468_v54, %v819_v47  ;;  %v925_v47 = vld [vmem:[%s2528_s10 + $0x18] sm:$0xff] }
 0x2d0   : > { %v2537_v59 = vadd.f32 %v2468_v54, %v820_v8  ;;  %v2540_v9 = vadd.f32 %v2468_v54, %v821_v38  ;;  %v2543_v50 = vadd.f32 %v2468_v54, %v822_v62  ;;  %v2546_v6 = vadd.f32 %v2468_v54, %v823_v43  ;;  %v926_v8 = vld [vmem:[%s2528_s10 + $0x20] sm:$0xff] }
 0x2d1   : > { %v2549_v46 = vadd.f32 %v2468_v54, %v824_v60  ;;  %v2552_v58 = vadd.f32 %v2468_v54, %v825_v33  ;;  %v2555_v14 = vadd.f32 %v2468_v54, %v826_v40  ;;  %v2558_v63 = vadd.f32 %v2468_v54, %v827_v18  ;;  %v927_v33 = vld [vmem:[%s2528_s10 + $0x28] sm:$0x7f]  ;;  %v928_v40 = vld [vmem:[%s2528_s10 + $0x30] sm:$0xff]  ;;  %v929_v18 = vld [vmem:[%s2528_s10 + $0x38] sm:$0xff] }
 0x2d2   : > { %v2561_v22 = vadd.f32 %v2468_v54, %v828_v57  ;;  %v2564_v29 = vadd.f32 %v2468_v54, %v829_v12  ;;  %v2567_v53 = vadd.f32 %v2468_v54, %v830_v13  ;;  %v2570_v23 = vadd.f32 %v2468_v54, %v831_v19  ;;  %v930_v57 = vld [vmem:[%s2528_s10 + $0x40] sm:$0x7f] }
 0x2d3   : > { %v2573_v17 = vadd.f32 %v2468_v54, %v832_v4  ;;  %v2576_v32 = vadd.f32 %v2468_v54, %v833_v7  ;;  %v2581_v38 = vadd.f32 %v2468_v54, %v834_v5  ;;  %v2584_v62 = vadd.f32 %v2468_v54, %v835_v15  ;;  %v931_v7 = vld [vmem:[%s2528_s10 + $0x48] sm:$0xff]  ;;  %v932_v5 = vld [vmem:[%s2528_s10 + $0x50] sm:$0xff]  ;;  %v933_v15 = vld [vmem:[%s2528_s10 + $0x58] sm:$0x7f] }
 0x2d4   : > { %v2587_v43 = vadd.f32 %v2468_v54, %v836_v52  ;;  %v2590_v60 = vadd.f32 %v2468_v54, %v837_v48  ;;  %v2597_v12 = vadd.f32 %v2468_v54, %v838_v25  ;;  %v2600_v13 = vadd.f32 %v2468_v54, %v839_v34  ;;  %v934_v52 = vld [vmem:[%s2528_s10 + $0x60] sm:$0xff] }
 0x2d5   : > { %v2603_v19 = vadd.f32 %v2468_v54, %v840_v11  ;;  %v2606_v4 = vadd.f32 %v2468_v54, %v841_v35  ;;  %v2613_v48 = vadd.f32 %v2468_v54, %v842_v37  ;;  %v2616_v25 = vadd.f32 %v2468_v54, %v843_v45  ;;  %v935_v35 = vld [vmem:[%s2528_s10 + $0x68] sm:$0xff] }
 0x2d6   : > { %3326 = vst [vmem:[#allocation8_spill] sm:$0xff] %v2597_v12  ;;  %3327 = vst [vmem:[#allocation5_spill] sm:$0xff] %v2600_v13  ;;  %v2619_v34 = vadd.f32 %v2468_v54, %v844_v30  ;;  %v2622_v11 = vadd.f32 %v2468_v54, %v845_v56  ;;  %v938_v13 = vld [vmem:[%s2528_s10 + $0x80] sm:$0xff]  ;;  %v2630_v37 = vadd.f32 %v2468_v54, %v2470_v55  ;;  %v949_v12 = vld [vmem:[%s2528_s10 + $0xd8] sm:$0xff] }
 0x2d7   : > { %3328 = vst [vmem:[#allocation7_spill] sm:$0xff] %v2603_v19  ;;  %3329 = vst [vmem:[#allocation6_spill] sm:$0xff] %v2606_v4  ;;  %v936_v4 = vld [vmem:[%s2528_s10 + $0x70] sm:$0x7f]  ;;  %v937_v19 = vld [vmem:[%s2528_s10 + $0x78] sm:$0xff]  ;;  %v2634_v45 = vadd.f32 %v2468_v54, %v2472_v31  ;;  %v2638_v30 = vadd.f32 %v2468_v54, %v2474_v39  ;;  %v2642_v56 = vadd.f32 %v2468_v54, %v2476_v1 }
 0x2d8   : > { %3330 = vst [vmem:[#allocation9_spill] sm:$0xff] %v2613_v48  ;;  %3331 = vst [vmem:[#allocation10_spill] sm:$0xff] %v2616_v25  ;;  %v941_v25 = vld [vmem:[%s2528_s10 + $0x98] sm:$0xff]  ;;  %v942_v55 = vld [vmem:[%s2528_s10 + $0xa0] sm:$0x7f]  ;;  %v2654_v31 = vadd.f32 %v2468_v54, %v2480_v24  ;;  %v2664_v48 = vadd.f32 %v926_v8, %v2486_v51  ;;  %v2673_v24 = vadd.f32 %v928_v40, %v2492_v36 }
 0x2d9   : > { %3332 = vst [vmem:[#allocation11_spill] sm:$0xff] %v2619_v34  ;;  %3333 = vst [vmem:[#allocation12_spill] sm:$0xff] %v2622_v11  ;;  %v939_v11 = vld [vmem:[%s2528_s10 + $0x88] sm:$0x7f]  ;;  %v940_v34 = vld [vmem:[%s2528_s10 + $0x90] sm:$0xff]  ;;  %v2691_v36 = vadd.f32 %v933_v15, %v2507_v16  ;;  %v2709_v16 = vadd.f32 %v938_v13, %v2522_v2 }
 0x2da   : > { %3334 = vst [vmem:[#allocation13_spill] sm:$0xff] %v2630_v37  ;;  %3335 = vst [vmem:[#allocation14_spill] sm:$0xff] %v2634_v45  ;;  %v2650_v37 = vadd.f32 %v2468_v54, %v2478_v41  ;;  %v943_v39 = vld [vmem:[%s2528_s10 + $0xa8] sm:$0xff]  ;;  %v945_v45 = vld [vmem:[%s2528_s10 + $0xb8] sm:$0x7f]  ;;  %v2670_v54 = vadd.f32 %v927_v33, %v2489_v21  ;;  %v2688_v21 = vadd.f32 %v932_v5, %v2504_v28 }
 0x2db   : > { %3336 = vst [vmem:[#allocation15_spill] sm:$0xff] %v2638_v30  ;;  %3337 = vst [vmem:[#allocation16_spill] sm:$0xff] %v2642_v56  ;;  %v944_v30 = vld [vmem:[%s2528_s10 + $0xb0] sm:$0xff]  ;;  %v946_v1 = vld [vmem:[%s2528_s10 + $0xc0] sm:$0xff]  ;;  %v2661_v56 = vadd.f32 %v925_v47, %v2483_v20  ;;  %v2679_v20 = vadd.f32 %v930_v57, %v2498_v49  ;;  %v2706_v28 = vadd.f32 %v937_v19, %v2519_v26 }
 0x2dc   : > { %3338 = vst [vmem:[#allocation17_spill] sm:$0xff] %v2650_v37  ;;  %3339 = vst [vmem:[#allocation18_spill] sm:$0xff] %v2654_v31  ;;  %v947_v41 = vld [vmem:[%s2528_s10 + $0xc8] sm:$0xff]  ;;  %v948_v37 = vld [vmem:[%s2528_s10 + $0xd0] sm:$0x7f]  ;;  %v2676_v31 = vadd.f32 %v929_v18, %v2495_v61  ;;  %v2694_v61 = vadd.f32 %v934_v52, %v2510_v0  ;;  %v2700_v18 = vadd.f32 %v935_v35, %v2513_v27 }
 0x2dd   : > { %3340 = vst [vmem:[#allocation19_spill] sm:$0xff] %v2664_v48  ;;  %v950_v51 = vld [vmem:[%s2528_s10 + $0xe0] sm:$0xff]  ;;  %v951_v47 = vld [vmem:[%s2528_s10 + $0xe8] sm:$0x7f]  ;;  %v952_v8 = vld [vmem:[%s2528_s10 + $0xf0] sm:$0xff]  ;;  %v2685_v48 = vadd.f32 %v931_v7, %v2501_v42  ;;  %v2703_v42 = vadd.f32 %v936_v4, %v2516_v10  ;;  %v2715_v5 = vadd.f32 %v939_v11, %v2531_v44  ;;  %v2718_v27 = vadd.f32 %v940_v34, %v2534_v3 }
 0x2de   : > { %v953_v49 = vld [vmem:[%s2528_s10 + $0xf8] sm:$0xff]  ;;  %v954_v33 = vld [vmem:[%s2528_s10 + $0x100] sm:$0x7f]  ;;  %v955_v40 = vld [vmem:[%s2528_s10 + $0x108] sm:$0xff]  ;;  %v2721_v10 = vadd.f32 %v941_v25, %v2537_v59  ;;  %v2724_v26 = vadd.f32 %v942_v55, %v2540_v9  ;;  %v2730_v4 = vadd.f32 %v943_v39, %v2543_v50  ;;  %v2733_v44 = vadd.f32 %v944_v30, %v2546_v6 }
 0x2df   : > { %v956_v0 = vld [vmem:[%s2528_s10 + $0x110] sm:$0xff]  ;;  %v957_v57 = vld [vmem:[%s2528_s10 + $0x118] sm:$0x7f]  ;;  %v958_v7 = vld [vmem:[%s2528_s10 + $0x120] sm:$0xff]  ;;  %v2736_v3 = vadd.f32 %v945_v45, %v2549_v46  ;;  %v2739_v59 = vadd.f32 %v946_v1, %v2552_v58  ;;  %v2745_v25 = vadd.f32 %v947_v41, %v2555_v14  ;;  %v2748_v50 = vadd.f32 %v948_v37, %v2558_v63 }
 0x2e0   : > { %v959_v2 = vld [vmem:[%s2528_s10 + $0x128] sm:$0xff]  ;;  %v960_v13 = vld [vmem:[%s2528_s10 + $0x130] sm:$0x7f]  ;;  %v961_v19 = vld [vmem:[%s2528_s10 + $0x138] sm:$0xff]  ;;  %v2751_v6 = vadd.f32 %v949_v12, %v2561_v22  ;;  %v2754_v46 = vadd.f32 %v950_v51, %v2564_v29  ;;  %v2760_v35 = vadd.f32 %v951_v47, %v2567_v53  ;;  %v2763_v45 = vadd.f32 %v952_v8, %v2570_v23 }
 0x2e1   : > { %v962_v9 = vld [vmem:[%s2528_s10 + $0x140] sm:$0xff]  ;;  %v963_v15 = vld [vmem:[%s2528_s10 + $0x148] sm:$0x7f]  ;;  %v964_v52 = vld [vmem:[%s2528_s10 + $0x150] sm:$0xff]  ;;  %v2766_v14 = vadd.f32 %v953_v49, %v2573_v17  ;;  %v2769_v63 = vadd.f32 %v954_v33, %v2576_v32  ;;  %v2775_v29 = vadd.f32 %v955_v40, %v2581_v38  ;;  %v2778_v30 = vadd.f32 %v956_v0, %v2584_v62 }
 0x2e2   : > { %v965_v58 = vld [vmem:[%s2528_s10 + $0x158] sm:$0xff]  ;;  %v966_v34 = vld [vmem:[%s2528_s10 + $0x160] sm:$0x7f]  ;;  %v967_v11 = vld [vmem:[%s2528_s10 + $0x168] sm:$0xff]  ;;  %v2781_v53 = vadd.f32 %v957_v57, %v2587_v43  ;;  %v2784_v23 = vadd.f32 %v958_v7, %v2590_v60 }
 0x2e3   : > { %v968_v22 = vld [vmem:[%s2528_s10 + $0x170] sm:$0xff]  ;;  %v969_v12 = vld [vmem:[%s2528_s10 + $0x178] sm:$0x7f]  ;;  %v970_v37 = vld [vmem:[%s2528_s10 + $0x180] sm:$0xff] }
 0x2e4   : > { %v971_v17 = vld [vmem:[%s2528_s10 + $0x188] sm:$0xff]  ;;  %v3341_v55 = vld [vmem:[#allocation8_spill] sm:$0xff]  ;;  %v3342_v32 = vld [vmem:[#allocation5_spill] sm:$0xff] }
 0x2e5   : > { %v2788_v39 = vadd.f32 %v959_v2, %v3341_v55  ;;  %v2791_v1 = vadd.f32 %v960_v13, %v3342_v32  ;;  %v3343_v41 = vld [vmem:[#allocation7_spill] sm:$0xff]  ;;  %v3344_v38 = vld [vmem:[#allocation6_spill] sm:$0xff]  ;;  %v3345_v62 = vld [vmem:[#allocation9_spill] sm:$0xff] }
 0x2e6   : > { %v2794_v51 = vadd.f32 %v961_v19, %v3343_v41  ;;  %v2797_v47 = vadd.f32 %v962_v9, %v3344_v38  ;;  %v2800_v8 = vadd.f32 %v963_v15, %v3345_v62  ;;  %v3346_v43 = vld [vmem:[#allocation10_spill] sm:$0xff]  ;;  %v3347_v60 = vld [vmem:[#allocation11_spill] sm:$0xff]  ;;  %v3348_v40 = vld [vmem:[#allocation12_spill] sm:$0xff]  ;;  %v2848_v38 = vmul.f32 0.5, %v2688_v21 }
 0x2e7   : > { %v2803_v49 = vadd.f32 %v964_v52, %v3346_v43  ;;  %v2806_v33 = vadd.f32 %v965_v58, %v3347_v60  ;;  %v2809_v0 = vadd.f32 %v966_v34, %v3348_v40  ;;  %v3349_v57 = vld [vmem:[#allocation13_spill] sm:$0xff]  ;;  %v3350_v2 = vld [vmem:[#allocation14_spill] sm:$0xff]  ;;  %v3351_v19 = vld [vmem:[#allocation15_spill] sm:$0xff]  ;;  %v2827_v58 = vmul.f32 0.5, %v2661_v56 }
 0x2e8   : > { %v2812_v7 = vadd.f32 %v967_v11, %v3349_v57  ;;  %v2815_v13 = vadd.f32 %v968_v22, %v3350_v2  ;;  %v2818_v9 = vadd.f32 %v969_v12, %v3351_v19  ;;  %v3352_v15 = vld [vmem:[#allocation16_spill] sm:$0xff]  ;;  %v3353_v52 = vld [vmem:[#allocation17_spill] sm:$0xff]  ;;  %v3354_v34 = vld [vmem:[#allocation19_spill] sm:$0xff]  ;;  %v2833_v11 = vmul.f32 0.5, %v2670_v54  ;;  %3356 = vst [vmem:[#allocation5_spill] sm:$0xff] %v2848_v38 }
 0x2e9   : > { %v2821_v55 = vadd.f32 %v970_v37, %v3352_v15  ;;  %v2824_v32 = vadd.f32 %v971_v17, %v3353_v52  ;;  %v2830_v41 = vmul.f32 0.5, %v3354_v34  ;;  %v2836_v22 = vmul.f32 0.5, %v2673_v24 }
 0x2ea   : > { %v2839_v12 = vmul.f32 0.5, %v2676_v31  ;;  %v2842_v37 = vmul.f32 0.5, %v2679_v20  ;;  %v2845_v17 = vmul.f32 0.5, %v2685_v48  ;;  %v2851_v62 = vmul.f32 0.5, %v2691_v36 }
 0x2eb   : > { %v2854_v43 = vmul.f32 0.5, %v2694_v61  ;;  %v2857_v60 = vmul.f32 0.5, %v2700_v18  ;;  %v2860_v40 = vmul.f32 0.5, %v2703_v42  ;;  %v2863_v57 = vmul.f32 0.5, %v2706_v28 }
 0x2ec   : > { %3355 = vst [vmem:[#allocation8_spill] sm:$0xff] %v2845_v17  ;;  %3357 = vst [vmem:[#allocation7_spill] sm:$0xff] %v2851_v62  ;;  %v2866_v2 = vmul.f32 0.5, %v2709_v16  ;;  %v2869_v19 = vmul.f32 0.5, %v2715_v5  ;;  %v2872_v15 = vmul.f32 0.5, %v2718_v27  ;;  %v2875_v52 = vmul.f32 0.5, %v2721_v10 }
 0x2ed   : > { %3358 = vst [vmem:[#allocation6_spill] sm:$0xff] %v2854_v43  ;;  %3359 = vst [vmem:[#allocation9_spill] sm:$0xff] %v2857_v60  ;;  %v2878_v60 = vmul.f32 0.5, %v2724_v26  ;;  %v972_v43 = vld [vmem:[%s2528_s10 + $0x190] sm:$0x7f]  ;;  %v3388_v62 = vld [vmem:[#allocation18_spill] sm:$0xff] }
 0x2ee   : > { %3360 = vst [vmem:[#allocation10_spill] sm:$0xff] %v2860_v40  ;;  %3361 = vst [vmem:[#allocation11_spill] sm:$0xff] %v2863_v57  ;;  %v2881_v40 = vmul.f32 0.5, %v2730_v4  ;;  %v2884_v57 = vmul.f32 0.5, %v2733_v44  ;;  %v1097_v38 = vmul.f32 0.70710677, %v3354_v34 }
 0x2ef   : > { %3362 = vst [vmem:[#allocation12_spill] sm:$0xff] %v2866_v2  ;;  %3363 = vst [vmem:[#allocation13_spill] sm:$0xff] %v2869_v19  ;;  %v2887_v2 = vmul.f32 0.5, %v2736_v3  ;;  %v2890_v19 = vmul.f32 0.5, %v2739_v59  ;;  %v1100_v17 = vmul.f32 0.70710677, %v2676_v31 }
 0x2f0   : > { %3364 = vst [vmem:[#allocation14_spill] sm:$0xff] %v2872_v15  ;;  %3365 = vst [vmem:[#allocation15_spill] sm:$0xff] %v2875_v52  ;;  %v2893_v15 = vmul.f32 0.5, %v2745_v25  ;;  %v2896_v52 = vmul.f32 0.5, %v2748_v50  ;;  %v1104_v34 = vmul.f32 0.70710677, %v2691_v36 }
 0x2f1   : > { %3366 = vst [vmem:[#allocation16_spill] sm:$0xff] %v2878_v60  ;;  %3367 = vst [vmem:[#allocation17_spill] sm:$0xff] %v2881_v40  ;;  %v2899_v60 = vmul.f32 0.5, %v2751_v6  ;;  %v2902_v40 = vmul.f32 0.5, %v2754_v46  ;;  %v1109_v31 = vmul.f32 0.70710677, %v2709_v16 }
 0x2f2   : > { %3368 = vst [vmem:[#allocation19_spill] sm:$0xff] %v2884_v57  ;;  %3369 = vst [vmem:[#allocation20_spill] sm:$0xff] %v2887_v2  ;;  %v2905_v57 = vmul.f32 0.5, %v2760_v35  ;;  %v2909_v2 = vmul.f32 0.5, %v2763_v45  ;;  %v1113_v36 = vmul.f32 0.70710677, %v2724_v26 }
 0x2f3   : > { %3370 = vst [vmem:[#allocation21_spill] sm:$0xff] %v2890_v19  ;;  %3371 = vst [vmem:[#allocation22_spill] sm:$0xff] %v2893_v15  ;;  %v2912_v19 = vmul.f32 0.5, %v2766_v14  ;;  %v2915_v15 = vmul.f32 0.5, %v2769_v63  ;;  %v2984_v16 = vmul.f32 0.70710677, %v2745_v25 }
 0x2f4   : > { %3372 = vst [vmem:[#allocation23_spill] sm:$0xff] %v2896_v52  ;;  %3373 = vst [vmem:[#allocation24_spill] sm:$0xff] %v2899_v60  ;;  %v2918_v52 = vmul.f32 0.5, %v2775_v29  ;;  %v2921_v60 = vmul.f32 0.5, %v2778_v30  ;;  %v2996_v26 = vmul.f32 0.70710677, %v2760_v35 }
 0x2f5   : > { %3374 = vst [vmem:[#allocation25_spill] sm:$0xff] %v2902_v40  ;;  %3375 = vst [vmem:[#allocation26_spill] sm:$0xff] %v2905_v57  ;;  %v2924_v40 = vmul.f32 0.5, %v2781_v53  ;;  %v2927_v57 = vmul.f32 0.5, %v2784_v23  ;;  %v3011_v25 = vmul.f32 0.70710677, %v2778_v30 }
 0x2f6   : > { %3376 = vst [vmem:[#allocation27_spill] sm:$0xff] %v2909_v2  ;;  %3377 = vst [vmem:[#allocation28_spill] sm:$0xff] %v2912_v19  ;;  %v2930_v2 = vmul.f32 0.5, %v2788_v39  ;;  %v2933_v19 = vmul.f32 0.5, %v2791_v1  ;;  %v3032_v30 = vmul.f32 0.70710677, %v2800_v8 }
 0x2f7   : > { %3378 = vst [vmem:[#allocation29_spill] sm:$0xff] %v2915_v15  ;;  %3379 = vst [vmem:[#allocation30_spill] sm:$0xff] %v2918_v52  ;;  %v2936_v15 = vmul.f32 0.5, %v2794_v51  ;;  %v2939_v52 = vmul.f32 0.5, %v2797_v47 }
 0x2f8   : > { %3380 = vst [vmem:[#allocation31_spill] sm:$0xff] %v2921_v60  ;;  %3381 = vst [vmem:[#allocation32_spill] sm:$0xff] %v2924_v40  ;;  %v2942_v60 = vmul.f32 0.5, %v2800_v8  ;;  %v2945_v40 = vadd.f32 %v972_v43, %v3388_v62  ;;  %v1102_v62 = vmul.f32 0.70710677, %v2685_v48 }
 0x2f9   : > { %3382 = vst [vmem:[#allocation33_spill] sm:$0xff] %v2927_v57  ;;  %3383 = vst [vmem:[#allocation34_spill] sm:$0xff] %v2930_v2  ;;  %v1096_v57 = vmul.f32 0.70710677, %v2661_v56  ;;  %v1098_v2 = vmul.f32 0.70710677, %v2670_v54 }
 0x2fa   : > { %3384 = vst [vmem:[#allocation35_spill] sm:$0xff] %v2933_v19  ;;  %3385 = vst [vmem:[#allocation36_spill] sm:$0xff] %v2936_v15  ;;  %v2951_v19 = vmul.f32 0.5, %v2803_v49  ;;  %v2954_v15 = vmul.f32 0.5, %v2806_v33  ;;  %v1103_v56 = vmul.f32 0.70710677, %v2688_v21 }
 0x2fb   : > { %3386 = vst [vmem:[#allocation37_spill] sm:$0xff] %v2939_v52  ;;  %3387 = vst [vmem:[#allocation38_spill] sm:$0xff] %v2942_v60  ;;  %v1099_v52 = vmul.f32 0.70710677, %v2673_v24  ;;  %v1101_v60 = vmul.f32 0.70710677, %v2679_v20  ;;  %1532 = verf.f32 %v1096_v57 }
 0x2fc   : > { %3389 = vst [vmem:[#allocation18_spill] sm:$0xff] %v2954_v15  ;;  %v1105_v54 = vmul.f32 0.70710677, %v2694_v61  ;;  %v1106_v43 = vmul.f32 0.70710677, %v2700_v18  ;;  %1534 = verf.f32 %v1097_v38 }
 0x2fd   : > { %v1107_v15 = vmul.f32 0.70710677, %v2703_v42  ;;  %v1108_v24 = vmul.f32 0.70710677, %v2706_v28  ;;  %1536 = verf.f32 %v1098_v2  ;;  %v1110_v20 = vmul.f32 0.70710677, %v2715_v5 }
 0x2fe   : > { %v1111_v48 = vmul.f32 0.70710677, %v2718_v27  ;;  %v1112_v21 = vmul.f32 0.70710677, %v2721_v10  ;;  %1538 = verf.f32 %v1099_v52  ;;  %v2972_v61 = vmul.f32 0.70710677, %v2730_v4 }
 0x2ff   : > { %v2975_v18 = vmul.f32 0.70710677, %v2733_v44  ;;  %1540 = verf.f32 %v1100_v17  ;;  %v2978_v42 = vmul.f32 0.70710677, %v2736_v3  ;;  %v2981_v28 = vmul.f32 0.70710677, %v2739_v59 }
 0x300   : > { %1542 = verf.f32 %v1101_v60  ;;  %v2987_v5 = vmul.f32 0.70710677, %v2748_v50  ;;  %v2990_v27 = vmul.f32 0.70710677, %v2751_v6  ;;  %v2993_v10 = vmul.f32 0.70710677, %v2754_v46 }
 0x301   : > { %1544 = verf.f32 %v1102_v62  ;;  %v2999_v4 = vmul.f32 0.70710677, %v2763_v45  ;;  %v3002_v44 = vmul.f32 0.70710677, %v2766_v14  ;;  %v3005_v3 = vmul.f32 0.70710677, %v2769_v63 }
 0x302   : > { %1546 = verf.f32 %v1103_v56  ;;  %v3008_v59 = vmul.f32 0.70710677, %v2775_v29  ;;  %v3014_v50 = vmul.f32 0.70710677, %v2781_v53  ;;  %v3017_v6 = vmul.f32 0.70710677, %v2784_v23 }
 0x303   : > { %1548 = verf.f32 %v1104_v34  ;;  %v3020_v46 = vmul.f32 0.70710677, %v2788_v39  ;;  %v3023_v45 = vmul.f32 0.70710677, %v2791_v1  ;;  %v3026_v14 = vmul.f32 0.70710677, %v2794_v51 }
 0x304   : > { %1550 = verf.f32 %v1105_v54  ;;  %v3029_v63 = vmul.f32 0.70710677, %v2797_v47  ;;  %v3035_v53 = vmul.f32 0.70710677, %v2803_v49  ;;  %v3038_v23 = vmul.f32 0.70710677, %v2806_v33 }
 0x305   : > { %v1533_v35 = vpop.eup %1532  ;;  %1552 = verf.f32 %v1106_v43  ;;  %v3041_v1 = vmul.f32 0.70710677, %v2809_v0  ;;  %v3044_v51 = vmul.f32 0.70710677, %v2812_v7  ;;  %v3047_v47 = vmul.f32 0.70710677, %v2815_v13 }
 0x306   : > { %v1535_v29 = vpop.eup %1534  ;;  %1554 = verf.f32 %v1107_v15  ;;  %v3050_v17 = vmul.f32 0.70710677, %v2818_v9  ;;  %v3053_v49 = vmul.f32 0.70710677, %v2821_v55  ;;  %v3056_v33 = vmul.f32 0.70710677, %v2824_v32 }
 0x307   : > { %v1537_v39 = vpop.eup %1536  ;;  %1556 = verf.f32 %v1108_v24  ;;  %v1210_v60 = vadd.f32 1.0, %v1533_v35  ;;  %v1211_v57 = vadd.f32 1.0, %v1535_v29  ;;  %v3059_v52 = vmul.f32 0.70710677, %v2945_v40 }
 0x308   : > { %v1539_v8 = vpop.eup %1538  ;;  %1558 = verf.f32 %v1109_v31  ;;  %v1212_v2 = vadd.f32 1.0, %v1537_v39 }
 0x309   : > { %v1541_v38 = vpop.eup %1540  ;;  %1560 = verf.f32 %v1110_v20  ;;  %v1213_v62 = vadd.f32 1.0, %v1539_v8  ;;  %v1267_v43 = vmul.f32 %v1210_v60, %v2827_v58  ;;  %v1268_v24 = vmul.f32 %v1211_v57, %v2830_v41  ;;  %v3390_v41 = vld [vmem:[#allocation8_spill] sm:$0xff]  ;;  %v3392_v57 = vld [vmem:[#allocation5_spill] sm:$0xff] }
 0x30a   : > { %v1543_v15 = vpop.eup %1542  ;;  %1562 = verf.f32 %v1111_v48  ;;  %v1214_v56 = vadd.f32 1.0, %v1541_v38  ;;  %v1269_v35 = vmul.f32 %v1212_v2, %v2833_v11 }
 0x30b   : > { %v1545_v34 = vpop.eup %1544  ;;  %1564 = verf.f32 %v1112_v21  ;;  %v1215_v54 = vadd.f32 1.0, %v1543_v15  ;;  %v1270_v29 = vmul.f32 %v1213_v62, %v2836_v22  ;;  %v1324_v11 = vsel %vm1689_vm2, %v1267_v43, 0.0  ;;  %v3394_v62 = vld [vmem:[#allocation7_spill] sm:$0xff] }
 0x30c   : > { %v1547_v31 = vpop.eup %1546  ;;  %1566 = verf.f32 %v1113_v36  ;;  %v1216_v20 = vadd.f32 1.0, %v1545_v34  ;;  %v1271_v8 = vmul.f32 %v1214_v56, %v2839_v12  ;;  %1381 = vst [vmem:[%s2403_s28 + $0x18] sm:$0xff] %v1324_v11 }
 0x30d   : > { %v1549_v39 = vpop.eup %1548  ;;  %1568 = verf.f32 %v2972_v61  ;;  %v1217_v48 = vadd.f32 1.0, %v1547_v31  ;;  %v1272_v21 = vmul.f32 %v1215_v54, %v2842_v37  ;;  %v1325_v37 = vsel %vm311_vm1, %v1268_v24, 0.0  ;;  %v3396_v31 = vld [vmem:[#allocation6_spill] sm:$0xff] }
 0x30e   : > { %v1551_v38 = vpop.eup %1550  ;;  %1570 = verf.f32 %v2975_v18  ;;  %v1218_v58 = vadd.f32 1.0, %v1549_v39  ;;  %v1273_v36 = vmul.f32 %v1216_v20, %v3390_v41  ;;  %v1326_v54 = vsel %vm1704_vm4, %v1269_v35, 0.0  ;;  %1382 = vst [vmem:[%s2403_s28 + $0x20] sm:$0xff] %v1325_v37  ;;  %v3398_v41 = vld [vmem:[#allocation10_spill] sm:$0xff] }
 0x30f   : > { %v1553_v22 = vpop.eup %1552  ;;  %1572 = verf.f32 %v2978_v42  ;;  %v1219_v61 = vadd.f32 1.0, %v1551_v38  ;;  %v1274_v2 = vmul.f32 %v1217_v48, %v3392_v57  ;;  %v1327_v24 = vsel %vm1689_vm2, %v1270_v29, 0.0  ;;  %1383 = vst [vmem:[%s2403_s28 + $0x28] sm:$0x7f] %v1326_v54  ;;  %v3397_v48 = vld [vmem:[#allocation9_spill] sm:$0xff] }
 0x310   : > { %v1555_v15 = vpop.eup %1554  ;;  %1574 = verf.f32 %v2981_v28  ;;  %v1220_v18 = vadd.f32 1.0, %v1553_v22  ;;  %v1275_v56 = vmul.f32 %v1218_v58, %v3394_v62  ;;  %v1328_v35 = vsel %vm311_vm1, %v1271_v8, 0.0  ;;  %1384 = vst [vmem:[%s2403_s28 + $0x30] sm:$0xff] %v1327_v24  ;;  %v3401_v54 = vld [vmem:[#allocation13_spill] sm:$0xff] }
 0x311   : > { %v1557_v42 = vpop.eup %1556  ;;  %1576 = verf.f32 %v2984_v16  ;;  %v1221_v43 = vadd.f32 1.0, %v1555_v15  ;;  %v1276_v20 = vmul.f32 %v1219_v61, %v3396_v31  ;;  %v1329_v29 = vsel %vm1704_vm4, %v1272_v21, 0.0  ;;  %1385 = vst [vmem:[%s2403_s28 + $0x38] sm:$0xff] %v1328_v35  ;;  %v3399_v61 = vld [vmem:[#allocation11_spill] sm:$0xff]  ;;  %v3400_v15 = vld [vmem:[#allocation12_spill] sm:$0xff]  ;;  %v3402_v31 = vld [vmem:[#allocation14_spill] sm:$0xff] }
 0x312   : > { %v1559_v28 = vpop.eup %1558  ;;  %1578 = verf.f32 %v2987_v5  ;;  %v1222_v39 = vadd.f32 1.0, %v1557_v42  ;;  %v1277_v38 = vmul.f32 %v1220_v18, %v3397_v48  ;;  %v1330_v8 = vsel %vm1689_vm2, %v1273_v36, 0.0  ;;  %1386 = vst [vmem:[%s2403_s28 + $0x40] sm:$0x7f] %v1329_v29  ;;  %v3405_v29 = vld [vmem:[#allocation17_spill] sm:$0xff] }
 0x313   : > { %v1561_v16 = vpop.eup %1560  ;;  %1580 = verf.f32 %v2990_v27  ;;  %v1223_v58 = vadd.f32 1.0, %v1559_v28  ;;  %v1278_v11 = vmul.f32 %v1221_v43, %v3398_v41  ;;  %v1331_v21 = vsel %vm311_vm1, %v1274_v2, 0.0  ;;  %1387 = vst [vmem:[%s2403_s28 + $0x48] sm:$0xff] %v1330_v8 }
 0x314   : > { %v1563_v5 = vpop.eup %1562  ;;  %1582 = verf.f32 %v2993_v10  ;;  %v1224_v22 = vadd.f32 1.0, %v1561_v16  ;;  %v1279_v57 = vmul.f32 %v1222_v39, %v3399_v61  ;;  %v1332_v36 = vsel %vm1704_vm4, %v1275_v56, 0.0  ;;  %1388 = vst [vmem:[%s2403_s28 + $0x50] sm:$0xff] %v1331_v21  ;;  %v3403_v39 = vld [vmem:[#allocation15_spill] sm:$0xff]  ;;  %v3404_v16 = vld [vmem:[#allocation16_spill] sm:$0xff] }
 0x315   : > { %v1565_v27 = vpop.eup %1564  ;;  %1584 = verf.f32 %v2996_v26  ;;  %v1225_v37 = vadd.f32 1.0, %v1563_v5  ;;  %v1280_v18 = vmul.f32 %v1223_v58, %v3400_v15  ;;  %v1333_v2 = vsel %vm1689_vm2, %v1276_v20, 0.0  ;;  %1389 = vst [vmem:[%s2403_s28 + $0x58] sm:$0x7f] %v1332_v36  ;;  %v3406_v61 = vld [vmem:[#allocation19_spill] sm:$0xff]  ;;  %v3409_v36 = vld [vmem:[#allocation22_spill] sm:$0xff] }
 0x316   : > { %v1567_v10 = vpop.eup %1566  ;;  %1586 = verf.f32 %v2999_v4  ;;  %v1226_v62 = vadd.f32 1.0, %v1565_v27  ;;  %v1281_v42 = vmul.f32 %v1224_v22, %v3401_v54  ;;  %v1334_v56 = vsel %vm311_vm1, %v1277_v38, 0.0  ;;  %1390 = vst [vmem:[%s2403_s28 + $0x60] sm:$0xff] %v1333_v2 }
 0x317   : > { %v1569_v26 = vpop.eup %1568  ;;  %1588 = verf.f32 %v3002_v44  ;;  %v1227_v43 = vadd.f32 1.0, %v1567_v10  ;;  %v1282_v24 = vmul.f32 %v1225_v37, %v3402_v31  ;;  %v1335_v20 = vsel %vm1704_vm4, %v1278_v11, 0.0  ;;  %1391 = vst [vmem:[%s2403_s28 + $0x68] sm:$0xff] %v1334_v56  ;;  %v3407_v37 = vld [vmem:[#allocation20_spill] sm:$0xff]  ;;  %v3408_v10 = vld [vmem:[#allocation21_spill] sm:$0xff]  ;;  %v3410_v31 = vld [vmem:[#allocation23_spill] sm:$0xff] }
 0x318   : > { %v1571_v4 = vpop.eup %1570  ;;  %1590 = verf.f32 %v3005_v3  ;;  %v1228_v28 = vadd.f32 1.0, %v1569_v26  ;;  %v1283_v48 = vmul.f32 %v1226_v62, %v3403_v39  ;;  %v1336_v38 = vsel %vm1689_vm2, %v1279_v57, 0.0  ;;  %1392 = vst [vmem:[%s2403_s28 + $0x70] sm:$0x7f] %v1335_v20  ;;  %v3413_v20 = vld [vmem:[#allocation26_spill] sm:$0xff] }
 0x319   : > { %v1573_v44 = vpop.eup %1572  ;;  %1592 = verf.f32 %v3008_v59  ;;  %v1229_v35 = vadd.f32 1.0, %v1571_v4  ;;  %v1284_v58 = vmul.f32 %v1227_v43, %v3404_v16  ;;  %v1337_v11 = vsel %vm311_vm1, %v1280_v18, 0.0  ;;  %1393 = vst [vmem:[%s2403_s28 + $0x78] sm:$0xff] %v1336_v38 }
 0x31a   : > { %v1575_v3 = vpop.eup %1574  ;;  %1594 = verf.f32 %v3011_v25  ;;  %v1230_v41 = vadd.f32 1.0, %v1573_v44  ;;  %v1285_v5 = vmul.f32 %v1228_v28, %v3405_v29  ;;  %v1338_v57 = vsel %vm1704_vm4, %v1281_v42, 0.0  ;;  %1394 = vst [vmem:[%s2403_s28 + $0x80] sm:$0xff] %v1337_v11  ;;  %v3411_v28 = vld [vmem:[#allocation24_spill] sm:$0xff]  ;;  %v3412_v44 = vld [vmem:[#allocation25_spill] sm:$0xff] }
 0x31b   : > { %v1577_v59 = vpop.eup %1576  ;;  %1596 = verf.f32 %v3014_v50  ;;  %v1231_v22 = vadd.f32 1.0, %v1575_v3  ;;  %v1286_v8 = vmul.f32 %v1229_v35, %v3406_v61  ;;  %v1339_v18 = vsel %vm1689_vm2, %v1282_v24, 0.0  ;;  %1395 = vst [vmem:[%s2403_s28 + $0x88] sm:$0x7f] %v1338_v57  ;;  %v3415_v61 = vld [vmem:[#allocation28_spill] sm:$0xff] }
 0x31c   : > { %v1579_v25 = vpop.eup %1578  ;;  %1598 = verf.f32 %v3017_v6  ;;  %v1232_v27 = vadd.f32 1.0, %v1577_v59  ;;  %v1287_v15 = vmul.f32 %v1230_v41, %v3407_v37  ;;  %v1340_v42 = vsel %vm311_vm1, %v1283_v48, 0.0  ;;  %1396 = vst [vmem:[%s2403_s28 + $0x90] sm:$0xff] %v1339_v18  ;;  %v3418_v18 = vld [vmem:[#allocation31_spill] sm:$0xff] }
 0x31d   : > { %v1581_v50 = vpop.eup %1580  ;;  %1600 = verf.f32 %v3020_v46  ;;  %v1233_v21 = vadd.f32 1.0, %v1579_v25  ;;  %v1288_v62 = vmul.f32 %v1231_v22, %v3408_v10  ;;  %v1341_v24 = vsel %vm1704_vm4, %v1284_v58, 0.0  ;;  %1397 = vst [vmem:[%s2403_s28 + $0x98] sm:$0xff] %v1340_v42 }
 0x31e   : > { %v1583_v6 = vpop.eup %1582  ;;  %1602 = verf.f32 %v3023_v45  ;;  %v1234_v54 = vadd.f32 1.0, %v1581_v50  ;;  %v1289_v26 = vmul.f32 %v1232_v27, %v3409_v36  ;;  %v1342_v48 = vsel %vm1689_vm2, %v1285_v5, 0.0  ;;  %1398 = vst [vmem:[%s2403_s28 + $0xa0] sm:$0x7f] %v1341_v24  ;;  %v3414_v5 = vld [vmem:[#allocation27_spill] sm:$0xff]  ;;  %v3416_v27 = vld [vmem:[#allocation29_spill] sm:$0xff] }
 0x31f   : > { %v1585_v46 = vpop.eup %1584  ;;  %1604 = verf.f32 %v3026_v14  ;;  %v1235_v43 = vadd.f32 1.0, %v1583_v6  ;;  %v1290_v2 = vmul.f32 %v1233_v21, %v3410_v31  ;;  %v1343_v16 = vsel %vm311_vm1, %v1286_v8, 0.0  ;;  %1399 = vst [vmem:[%s2403_s28 + $0xa8] sm:$0xff] %v1342_v48  ;;  %v3417_v50 = vld [vmem:[#allocation30_spill] sm:$0xff]  ;;  %v3420_v31 = vld [vmem:[#allocation33_spill] sm:$0xff] }
 0x320   : > { %v1587_v45 = vpop.eup %1586  ;;  %1606 = verf.f32 %v3029_v63  ;;  %v1236_v4 = vadd.f32 1.0, %v1585_v46  ;;  %v1291_v39 = vmul.f32 %v1234_v54, %v3411_v28  ;;  %v1344_v41 = vsel %vm1704_vm4, %v1287_v15, 0.0  ;;  %1400 = vst [vmem:[%s2403_s28 + $0xb0] sm:$0xff] %v1343_v16 }
 0x321   : > { %v1589_v14 = vpop.eup %1588  ;;  %1608 = verf.f32 %v3032_v30  ;;  %v1237_v56 = vadd.f32 1.0, %v1587_v45  ;;  %v1292_v35 = vmul.f32 %v1235_v43, %v3412_v44  ;;  %v1345_v59 = vsel %vm1689_vm2, %v1288_v62, 0.0  ;;  %1401 = vst [vmem:[%s2403_s28 + $0xb8] sm:$0x7f] %v1344_v41 }
 0x322   : > { %v1591_v63 = vpop.eup %1590  ;;  %1610 = verf.f32 %v3035_v53  ;;  %v1238_v58 = vadd.f32 1.0, %v1589_v14  ;;  %v1293_v3 = vmul.f32 %v1236_v4, %v3413_v20  ;;  %v1346_v11 = vsel %vm311_vm1, %v1289_v26, 0.0  ;;  %1402 = vst [vmem:[%s2403_s28 + $0xc0] sm:$0xff] %v1345_v59  ;;  %v3419_v26 = vld [vmem:[#allocation32_spill] sm:$0xff]  ;;  %v3421_v4 = vld [vmem:[#allocation34_spill] sm:$0xff]  ;;  %v3422_v14 = vld [vmem:[#allocation35_spill] sm:$0xff] }
 0x323   : > { %v1593_v30 = vpop.eup %1592  ;;  %1612 = verf.f32 %v3038_v23  ;;  %v1239_v29 = vadd.f32 1.0, %v1591_v63  ;;  %v1294_v38 = vmul.f32 %v1237_v56, %v3414_v5  ;;  %v1347_v15 = vsel %vm1704_vm4, %v1290_v2, 0.0  ;;  %1403 = vst [vmem:[%s2403_s28 + $0xc8] sm:$0xff] %v1346_v11  ;;  %v3423_v63 = vld [vmem:[#allocation36_spill] sm:$0xff] }
 0x324   : > { %v1595_v53 = vpop.eup %1594  ;;  %1614 = verf.f32 %v3041_v1  ;;  %v1240_v22 = vadd.f32 1.0, %v1593_v30  ;;  %v1295_v8 = vmul.f32 %v1238_v58, %v3415_v61  ;;  %v1348_v10 = vsel %vm1689_vm2, %v1291_v39, 0.0  ;;  %1404 = vst [vmem:[%s2403_s28 + $0xd0] sm:$0x7f] %v1347_v15  ;;  %v3425_v61 = vld [vmem:[#allocation38_spill] sm:$0xff] }
 0x325   : > { %v1597_v23 = vpop.eup %1596  ;;  %1616 = verf.f32 %v3044_v51  ;;  %v1241_v25 = vadd.f32 1.0, %v1595_v53  ;;  %v1296_v37 = vmul.f32 %v1239_v29, %v3416_v27  ;;  %v1349_v54 = vsel %vm311_vm1, %v1292_v35, 0.0  ;;  %1405 = vst [vmem:[%s2403_s28 + $0xd8] sm:$0xff] %v1348_v10  ;;  %v3424_v29 = vld [vmem:[#allocation37_spill] sm:$0xff]  ;;  %v3426_v10 = vld [vmem:[#allocation18_spill] sm:$0xff] }
 0x326   : > { %v1599_v1 = vpop.eup %1598  ;;  %1618 = verf.f32 %v3047_v47  ;;  %v1242_v57 = vadd.f32 1.0, %v1597_v23  ;;  %v1297_v21 = vmul.f32 %v1240_v22, %v3417_v50  ;;  %v1350_v46 = vsel %vm1704_vm4, %v1293_v3, 0.0  ;;  %1406 = vst [vmem:[%s2403_s28 + $0xe0] sm:$0xff] %v1349_v54 }
 0x327   : > { %v1601_v51 = vpop.eup %1600  ;;  %1620 = verf.f32 %v3050_v17  ;;  %v1243_v62 = vadd.f32 1.0, %v1599_v1  ;;  %v1298_v6 = vmul.f32 %v1241_v25, %v3418_v18  ;;  %v1351_v24 = vsel %vm1689_vm2, %v1294_v38, 0.0  ;;  %1407 = vst [vmem:[%s2403_s28 + $0xe8] sm:$0x7f] %v1350_v46 }
 0x328   : > { %v1603_v47 = vpop.eup %1602  ;;  %1622 = verf.f32 %v3053_v49  ;;  %v1244_v36 = vadd.f32 1.0, %v1601_v51  ;;  %v1299_v42 = vmul.f32 %v1242_v57, %v3419_v26  ;;  %v1352_v39 = vsel %vm311_vm1, %v1295_v8, 0.0  ;;  %1408 = vst [vmem:[%s2403_s28 + $0xf0] sm:$0xff] %v1351_v24 }
 0x329   : > { %v1605_v17 = vpop.eup %1604  ;;  %1624 = verf.f32 %v3056_v33  ;;  %v1245_v43 = vadd.f32 1.0, %v1603_v47  ;;  %v1300_v2 = vmul.f32 %v1243_v62, %v3420_v31  ;;  %v1353_v44 = vsel %vm1704_vm4, %v1296_v37, 0.0  ;;  %1409 = vst [vmem:[%s2403_s28 + $0xf8] sm:$0xff] %v1352_v39 }
 0x32a   : > { %v1607_v49 = vpop.eup %1606  ;;  %1626 = verf.f32 %v3059_v52  ;;  %v1246_v45 = vadd.f32 1.0, %v1605_v17  ;;  %v1301_v28 = vmul.f32 %v1244_v36, %v3421_v4  ;;  %v1354_v52 = vsel %vm1689_vm2, %v1297_v21, 0.0  ;;  %1410 = vst [vmem:[%s2403_s28 + $0x100] sm:$0x7f] %v1353_v44 }
 0x32b   : > { %v1609_v33 = vpop.eup %1608  ;;  %v1247_v48 = vadd.f32 1.0, %v1607_v49  ;;  %v1302_v56 = vmul.f32 %v1245_v43, %v3422_v14  ;;  %v1355_v20 = vsel %vm311_vm1, %v1298_v6, 0.0  ;;  %v1356_v3 = vsel %vm1704_vm4, %v1299_v42, 0.0  ;;  %1411 = vst [vmem:[%s2403_s28 + $0x108] sm:$0xff] %v1354_v52 }
 0x32c   : > { %v1611_v35 = vpop.eup %1610  ;;  %v1248_v16 = vadd.f32 1.0, %v1609_v33  ;;  %v1303_v58 = vmul.f32 %v1246_v45, %v3423_v63  ;;  %v1357_v38 = vsel %vm1689_vm2, %v1300_v2, 0.0  ;;  %v1358_v59 = vsel %vm311_vm1, %v1301_v28, 0.0  ;;  %1412 = vst [vmem:[%s2403_s28 + $0x110] sm:$0xff] %v1355_v20  ;;  %1413 = vst [vmem:[%s2403_s28 + $0x118] sm:$0x7f] %v1356_v3 }
 0x32d   : > { %v1613_v41 = vpop.eup %1612  ;;  %v1249_v30 = vadd.f32 1.0, %v1611_v35  ;;  %v1304_v5 = vmul.f32 %v1247_v48, %v3424_v29  ;;  %v1359_v11 = vsel %vm1704_vm4, %v1302_v56, 0.0  ;;  %1414 = vst [vmem:[%s2403_s28 + $0x120] sm:$0xff] %v1357_v38  ;;  %1415 = vst [vmem:[%s2403_s28 + $0x128] sm:$0xff] %v1358_v59  ;;  %v1080_v27 = vmul.f32 0.5, %v2809_v0 }
 0x32e   : > { %v1615_v53 = vpop.eup %1614  ;;  %v1250_v22 = vadd.f32 1.0, %v1613_v41  ;;  %v1305_v8 = vmul.f32 %v1248_v16, %v3425_v61  ;;  %v1360_v23 = vsel %vm1689_vm2, %v1303_v58, 0.0  ;;  %1416 = vst [vmem:[%s2403_s28 + $0x130] sm:$0x7f] %v1359_v11  ;;  %v1081_v50 = vmul.f32 0.5, %v2812_v7 }
 0x32f   : > { %v1617_v25 = vpop.eup %1616  ;;  %v1251_v37 = vadd.f32 1.0, %v1615_v53  ;;  %v1306_v15 = vmul.f32 %v1249_v30, %v2951_v19  ;;  %v1361_v1 = vsel %vm311_vm1, %v1304_v5, 0.0  ;;  %1417 = vst [vmem:[%s2403_s28 + $0x138] sm:$0xff] %v1360_v23  ;;  %v1082_v18 = vmul.f32 0.5, %v2815_v13 }
 0x330   : > { %v1619_v57 = vpop.eup %1618  ;;  %v1252_v21 = vadd.f32 1.0, %v1617_v25  ;;  %v1307_v51 = vmul.f32 %v1250_v22, %v3426_v10  ;;  %v1362_v62 = vsel %vm1704_vm4, %v1305_v8, 0.0  ;;  %1418 = vst [vmem:[%s2403_s28 + $0x140] sm:$0xff] %v1361_v1  ;;  %v1083_v7 = vmul.f32 0.5, %v2818_v9 }
 0x331   : > { %v1621_v0 = vpop.eup %1620  ;;  %v1253_v19 = vadd.f32 1.0, %v1619_v57  ;;  %v1308_v6 = vmul.f32 %v1251_v37, %v1080_v27  ;;  %v1363_v54 = vsel %vm1689_vm2, %v1306_v15, 0.0  ;;  %1419 = vst [vmem:[%s2403_s28 + $0x148] sm:$0x7f] %v1362_v62  ;;  %v1084_v13 = vmul.f32 0.5, %v2821_v55 }
 0x332   : > { %v1623_v47 = vpop.eup %1622  ;;  %v1254_v36 = vadd.f32 1.0, %v1621_v0  ;;  %v1309_v26 = vmul.f32 %v1252_v21, %v1081_v50  ;;  %v1364_v42 = vsel %vm311_vm1, %v1307_v51, 0.0  ;;  %1420 = vst [vmem:[%s2403_s28 + $0x150] sm:$0xff] %v1363_v54  ;;  %v1085_v9 = vmul.f32 0.5, %v2824_v32 }
 0x333   : > { %v1625_v46 = vpop.eup %1624  ;;  %v1255_v17 = vadd.f32 1.0, %v1623_v47  ;;  %v1310_v43 = vmul.f32 %v1253_v19, %v1082_v18  ;;  %v1365_v31 = vsel %vm1704_vm4, %v1308_v6, 0.0  ;;  %1421 = vst [vmem:[%s2403_s28 + $0x158] sm:$0xff] %v1364_v42  ;;  %v1086_v55 = vmul.f32 0.5, %v2945_v40 }
 0x334   : > { %v1627_v2 = vpop.eup %1626  ;;  %v1256_v24 = vadd.f32 1.0, %v1625_v46  ;;  %v1311_v49 = vmul.f32 %v1254_v36, %v1083_v7  ;;  %v1366_v45 = vsel %vm1689_vm2, %v1309_v26, 0.0  ;;  %1422 = vst [vmem:[%s2403_s28 + $0x160] sm:$0x7f] %v1365_v31 }
 0x335   : > { %v1257_v4 = vadd.f32 1.0, %v1627_v2  ;;  %v1312_v28 = vmul.f32 %v1255_v17, %v1084_v13  ;;  %v1367_v39 = vsel %vm311_vm1, %v1310_v43, 0.0  ;;  %1423 = vst [vmem:[%s2403_s28 + $0x168] sm:$0xff] %v1366_v45 }
 0x336   : > { %v1313_v33 = vmul.f32 %v1256_v24, %v1085_v9  ;;  %v1368_v32 = vsel %vm1704_vm4, %v1311_v49, 0.0  ;;  %1424 = vst [vmem:[%s2403_s28 + $0x170] sm:$0xff] %v1367_v39 }
 0x337   : > { %v1314_v48 = vmul.f32 %v1257_v4, %v1086_v55  ;;  %v1369_v14 = vsel %vm1689_vm2, %v1312_v28, 0.0  ;;  %1425 = vst [vmem:[%s2403_s28 + $0x178] sm:$0x7f] %v1368_v32 }
 0x338   : > { %v1370_v56 = vsel %vm311_vm1, %v1313_v33, 0.0  ;;  %1426 = vst [vmem:[%s2403_s28 + $0x180] sm:$0xff] %v1369_v14 }
 0x339   : > { %v1371_v40 = vsel %vm1704_vm4, %v1314_v48, 0.0  ;;  %1427 = vst [vmem:[%s2403_s28 + $0x188] sm:$0xff] %v1370_v56 }
 0x33a   : > { %1428 = vst [vmem:[%s2403_s28 + $0x190] sm:$0x7f] %v1371_v40 }
 0x33b PF: > { %s14_s15 = sadd.s32 1, %s1634_s15  }
 0x33c   : > { %p11_p4 = scmp.ge.s32.totalorder %s14_s15, 4  }
 0x33e   :  { %13 = sbr.rel (!%p11_p4) target bundleno = 1 (0x1), region = 69 }

</bundles_post_ra>
